<compile_context>
chip_gen: v7x
topology: tpu7x:2x2x1
jax: 0.10.0
libtpu: 0.0.40
codegen_flags: <defaults>
</compile_context>

<pallas_src>
import functools

import jax
import jax.numpy as jnp
from jax.experimental import pallas as pl
from jax.experimental.pallas import tpu as pltpu

# bitsandbytes 4-bit dequantization tables (code index 0..15 -> value in [-1, 1]).
NF4_TABLE = (
    -1.0, -0.6961928009986877, -0.5250730514526367, -0.39491748809814453,
    -0.28444138169288635, -0.18477343022823334, -0.09105003625154495, 0.0,
    0.07958029955625534, 0.16093020141124725, 0.2461123913526535, 0.33791524171829224,
    0.44070982933044434, 0.5626170039176941, 0.7229568362236023, 1.0,
)
FP4_TABLE = (
    0.0, 0.0052083333, 0.6666667, 1.0, 0.3333333, 0.5, 0.1666667, 0.25,
    -0.0, -0.0052083333, -0.6666667, -1.0, -0.3333333, -0.5, -0.1666667, -0.25,
)

QUANT_BLOCKSIZE = 64  # bnb default 4-bit blocksize


def _round_up(a, b):
    return (a + b - 1) // b * b


def quantize_4bit(w, quant_type="nf4", blocksize=QUANT_BLOCKSIZE):
    """Params4bit-style blockwise 4-bit quantization (init-time glue, plain JAX).

    Returns:
      packed:   (K//8, N) int32 -- codes of W.T, 8 codes per word; nibble j holds
                row j*(K//8)+k8 of W.T (in-kernel slab-wise unpack restores K order).
      absmax_t: (K//blocksize, N) fp32 -- per-block absmax, lane-dense layout.
    """
    table = jnp.asarray(NF4_TABLE if quant_type == "nf4" else FP4_TABLE, jnp.float32)
    n_out, n_in = w.shape
    assert n_in % blocksize == 0 and n_in % 8 == 0

    flat = w.astype(jnp.float32).reshape(-1, blocksize)
    absmax = jnp.max(jnp.abs(flat), axis=1)
    absmax = jnp.where(absmax == 0.0, 1.0, absmax)
    scaled = flat / absmax[:, None]
    codes = jnp.argmin(jnp.abs(scaled[..., None] - table[None, None, :]), axis=-1)
    codes = codes.reshape(n_out, n_in).astype(jnp.uint32)
    absmax = absmax.reshape(n_out, n_in // blocksize).astype(jnp.float32)

    # Pack W.T codes: (K, N) -> (8, K//8, N) -> one int32 word per (k8, n).
    k8 = n_in // 8
    codes_t = codes.T.reshape(8, k8, n_out)
    packed = jnp.zeros((k8, n_out), jnp.uint32)
    for j in range(8):
        packed = packed | (codes_t[j] << jnp.uint32(4 * j))
    packed = jax.lax.bitcast_convert_type(packed, jnp.int32)

    absmax_t = absmax.T  # (K//blocksize, N), lane-dense
    return packed, absmax_t


def dequantize_4bit_ref(packed, absmax_t, quant_type="nf4", blocksize=QUANT_BLOCKSIZE):
    """Pure-JAX reference dequantization of the packed layout -> W of shape (N, K)."""
    table = jnp.asarray(NF4_TABLE if quant_type == "nf4" else FP4_TABLE, jnp.float32)
    k8, n_out = packed.shape
    pu = jax.lax.bitcast_convert_type(packed, jnp.uint32)
    slabs = [((pu >> jnp.uint32(4 * j)) & jnp.uint32(0xF)).astype(jnp.int32)
             for j in range(8)]
    codes_t = jnp.concatenate(slabs, axis=0)                  # (K, N)
    w_t_norm = table[codes_t]                                 # (K, N)
    scale_t = jnp.repeat(absmax_t, blocksize, axis=0)         # (K, N)
    return (w_t_norm * scale_t).T                             # (N, K)


def _decode_nibbles(nib_u32, table):
    """4-level binary-tree decode: 4-bit code -> fp32 table value (VPU selects only)."""
    b0 = (nib_u32 & jnp.uint32(1)) != 0
    b1 = (nib_u32 & jnp.uint32(2)) != 0
    b2 = (nib_u32 & jnp.uint32(4)) != 0
    b3 = (nib_u32 & jnp.uint32(8)) != 0
    v = [jnp.where(b0, jnp.float32(table[2 * i + 1]), jnp.float32(table[2 * i]))
         for i in range(8)]
    v = [jnp.where(b1, v[2 * i + 1], v[2 * i]) for i in range(4)]
    v = [jnp.where(b2, v[2 * i + 1], v[2 * i]) for i in range(2)]
    return jnp.where(b3, v[1], v[0])


def _linear4bit_kernel(x_ref, packed_ref, absmax_ref, bias_ref, o_ref, w_scratch,
                       *, table, blocksize):
    # grid = (n_tiles, m_tiles); axis 0 = N tile ("parallel"), axis 1 = M tile
    # ("arbitrary", innermost sequential).
    # x_ref:      (tm, K) bf16        activations
    # packed_ref: (K//8, tn) int32    packed 4-bit codes of this W.T column tile
    # absmax_ref: (K//bs, tn) fp32    per-block absmax (lane-dense)
    # bias_ref:   (1, tn) fp32
    # o_ref:      (tm, tn)            output in the original activation dtype
    # w_scratch:  (K, tn) bf16        dequantized W.T tile, persists across M tiles
    #
    # NOTE: the dequant hoist relies on M being the innermost sequential grid axis; if
    # the grid order / dimension semantics change, later M tiles would read stale data.
    k8, tn = packed_ref.shape
    k = 8 * k8

    @pl.when(pl.program_id(1) == 0)
    def _dequantize_weight_tile():
        packed = pltpu.bitcast(packed_ref[...], jnp.uint32)       # (K//8, tn)
        slab_aligned = (k8 % blocksize == 0)      # each slab spans whole absmax blocks
        block_per_slab = (blocksize % k8 == 0)    # each slab falls inside one block
        for j in range(8):                        # slab j = W.T rows [j*k8, (j+1)*k8)
            nib = (packed >> jnp.uint32(4 * j)) & jnp.uint32(0xF)
            w_norm = _decode_nibbles(nib, table)                  # (K//8, tn) fp32
            if slab_aligned:
                nbs = k8 // blocksize
                scale = absmax_ref[pl.ds(j * nbs, nbs), :]        # (nbs, tn)
                w = (w_norm.reshape(nbs, blocksize, tn)
                     * scale[:, None, :]).reshape(k8, tn)
            elif block_per_slab:
                scale = absmax_ref[(j * k8) // blocksize, :]      # (tn,)
                w = w_norm * scale[None, :]
            else:
                w = w_norm                                        # scaled below
            w_scratch[pl.ds(j * k8, k8), :] = w.astype(w_scratch.dtype)
        if not (slab_aligned or block_per_slab):
            # Rare unaligned K: apply the blockwise scale to the whole tile post hoc.
            nb = k // blocksize
            scale = absmax_ref[...]                               # (nb, tn)
            w_all = (w_scratch[...].astype(jnp.float32).reshape(nb, blocksize, tn)
                     * scale[:, None, :]).reshape(k, tn)
            w_scratch[...] = w_all.astype(w_scratch.dtype)

    # One full-K bf16 matmul per tile; fp32 MXU accumulation, bias added in fp32.
    acc = jnp.dot(x_ref[...], w_scratch[...], preferred_element_type=jnp.float32)
    acc = acc + bias_ref[...]
    o_ref[...] = acc.astype(o_ref.dtype)


def _tpu_kind():
    try:
        return jax.devices()[0].device_kind.lower()
    except Exception:
        return ""


def _vmem_budget_bytes(kind):
    if "v7" in kind:
        return 40 * (1 << 20)     # 64 MiB/TC physical -> leave headroom
    if "v4" in kind or "v5" in kind or "v6" in kind:
        return 100 * (1 << 20)    # 128 MiB physical
    return 16 * (1 << 20)         # unknown / older generations: conservative


def linear4bit_forward(x, packed_codes, absmax_t, bias, *, quant_type="nf4",
                       blocksize=QUANT_BLOCKSIZE, tm=None, tn=None):
    """Forward pass of Linear4bitOnline: out = x @ dequant(W).T + bias, cast to x.dtype.

    Compute runs in bf16 (MXU-native) with fp32 accumulation; the output is cast back
    to the original activation dtype (matches bnb compute-dtype semantics).
    """
    inp_dtype = x.dtype
    *lead, k = x.shape
    k8, n_out = packed_codes.shape
    assert k == 8 * k8 and k % blocksize == 0

    kind = _tpu_kind()
    budget = _vmem_budget_bytes(kind)
    if tm is None:
        tm = 256 if ("v6" in kind or "v7" in kind) else 128
    if tn is None:
        tn = 256 if "v7" in kind else 512

    x2 = x.reshape(-1, k)
    m = x2.shape[0]
    out_isz = jnp.dtype(inp_dtype).itemsize

    # Row tile: multiple of 16 (bf16 sublane packing); shrunk for tiny inputs.
    tm_eff = min(tm, _round_up(max(m, 1), 16))

    # N tile: largest multiple-of-128 divisor of N (<= tn) that fits the VMEM budget.
    tn_cands = sorted(
        [d for d in range(128, min(n_out, max(tn, 128)) + 1, 128) if n_out % d == 0],
        reverse=True,
    ) or [n_out]

    def vmem_estimate(tm_, tn_):
        return (2 * tm_ * k * 2                     # bf16 x (double-buffered)
                + 2 * k8 * tn_ * 4                  # packed int32 codes
                + 2 * (k // blocksize) * tn_ * 4    # absmax
                + 2 * 8 * tn_ * 4                   # bias (sublane-padded)
                + 2 * tm_ * tn_ * out_isz           # output (double-buffered)
                + k * tn_ * 2)                      # bf16 dequantized W.T scratch

    tn_eff = tn_cands[-1]
    for cand in tn_cands:
        if vmem_estimate(tm_eff, cand) <= 0.75 * budget:
            tn_eff = cand
            break
    while vmem_estimate(tm_eff, tn_eff) > 0.75 * budget and tm_eff > 16:
        tm_eff = max(16, (tm_eff // 2) // 16 * 16)
    # TODO(synk): if still over budget (huge K on v7x), add a K-split grid axis.

    m_pad = _round_up(m, tm_eff)
    x2 = x2.astype(jnp.bfloat16)
    if m_pad != m:
        x2 = jnp.pad(x2, ((0, m_pad - m), (0, 0)))

    bias_arr = jnp.zeros((n_out,), jnp.float32) if bias is None else bias
    bias2 = bias_arr.reshape(1, n_out).astype(jnp.float32)

    table = NF4_TABLE if quant_type == "nf4" else FP4_TABLE
    kernel = functools.partial(_linear4bit_kernel, table=table, blocksize=blocksize)

    grid = (n_out // tn_eff, m_pad // tm_eff)

    out = pl.pallas_call(
        kernel,
        out_shape=jax.ShapeDtypeStruct((m_pad, n_out), inp_dtype),
        grid_spec=pltpu.PrefetchScalarGridSpec(
            num_scalar_prefetch=0,
            grid=grid,
            in_specs=[
                pl.BlockSpec((tm_eff, k), lambda j, i: (i, 0)),                 # x rows
                pl.BlockSpec((k8, tn_eff), lambda j, i: (0, j)),                # packed codes
                pl.BlockSpec((k // blocksize, tn_eff), lambda j, i: (0, j)),    # absmax
                pl.BlockSpec((1, tn_eff), lambda j, i: (0, j)),                 # bias
            ],
            out_specs=pl.BlockSpec((tm_eff, tn_eff), lambda j, i: (i, j)),
            scratch_shapes=[pltpu.VMEM((k, tn_eff), jnp.bfloat16)],             # dequant W.T
        ),
        compiler_params=pltpu.CompilerParams(
            dimension_semantics=("parallel", "arbitrary"),
            vmem_limit_bytes=budget,
        ),
    )(x2, packed_codes, absmax_t, bias2)

    out = out[:m]
    return out.reshape(*lead, n_out)


if __name__ == "__main__":
    key = jax.random.PRNGKey(0)
    k_w, k_b, k_x = jax.random.split(key, 3)

    in_features = 256
    out_features = 512
    batch, seq = 2, 13          # m = 26 -> exercises M padding / remainder handling
    quant_type = "nf4"

    # Deterministic synthetic parameters (mirrors Linear4bitOnline.__init__ shapes).
    weight = jax.random.normal(k_w, (out_features, in_features), jnp.float32) * 0.1
    bias = jax.random.normal(k_b, (out_features,), jnp.float32) * 0.05
    x = jax.random.normal(k_x, (batch, seq, in_features), jnp.float32)

    # Params4bit-equivalent quantization (setup glue): packed codes + lane-dense absmax.
    packed, absmax_t = quantize_4bit(weight, quant_type=quant_type)

    # Pure-JAX reference of matmul_4bit semantics (dequantize then x @ W.T + bias).
    w_deq = dequantize_4bit_ref(packed, absmax_t, quant_type=quant_type)
    ref = (x.reshape(-1, in_features) @ w_deq.T + bias[None, :]).reshape(
        batch, seq, out_features)

    # fp32 activation path (compute runs in bf16 on the MXU, fp32 accumulation).
    out = linear4bit_forward(x, packed, absmax_t, bias, quant_type=quant_type)
    out = jax.block_until_ready(out)
    assert out.shape == (batch, seq, out_features)
    assert out.dtype == x.dtype
    assert jnp.allclose(out, ref, atol=6e-2, rtol=6e-2), "fp32 mismatch vs reference"

    # bf16 activation path. tm=16 / tn=256 exercise multiple M tiles reusing the hoisted
    # dequantized-weight scratch and multiple N tiles at these tiny test shapes.
    x_bf16 = x.astype(jnp.bfloat16)
    out_bf = linear4bit_forward(x_bf16, packed, absmax_t, bias,
                                quant_type=quant_type, tm=16, tn=256)
    out_bf = jax.block_until_ready(out_bf)
    assert out_bf.shape == (batch, seq, out_features)
    assert out_bf.dtype == jnp.bfloat16
    assert jnp.allclose(out_bf.astype(jnp.float32), ref, atol=0.15, rtol=0.15), \
        "bf16 mismatch vs reference"

    print("KERNEL_OK")
</pallas_src>

<mosaic_0001>
module attributes {stable_mosaic.version = 11 : i64} {
  func.func @_linear4bit_kernel(%arg0: i32, %arg1: i32, %arg2: memref<32x256xbf16, #tpu.memory_space<vmem>>, %arg3: memref<32x512xi32, #tpu.memory_space<vmem>>, %arg4: memref<4x512xf32, #tpu.memory_space<vmem>>, %arg5: memref<1x512xf32, #tpu.memory_space<vmem>>, %arg6: memref<32x512xf32, #tpu.memory_space<vmem>>, %arg7: memref<256x512xbf16, #tpu.memory_space<vmem>>) attributes {dimension_semantics = [#tpu.dimension_semantics<parallel>, #tpu.dimension_semantics<arbitrary>], iteration_bounds = array<i64: 1, 1>, scalar_prefetch = 0 : i64, scratch_operands = 1 : i64, tpu.core_type = #tpu.core_type<tc>, window_params = [{transform_indices = @transform_0, window_bounds = array<i64: 32, 256>}, {transform_indices = @transform_1, window_bounds = array<i64: 32, 512>}, {transform_indices = @transform_2, window_bounds = array<i64: 4, 512>}, {transform_indices = @transform_3, window_bounds = array<i64: 1, 512>}, {transform_indices = @transform_4, window_bounds = array<i64: 32, 512>}]} {
    %c0_i32 = arith.constant 0 : i32
    %0 = arith.cmpi eq, %arg1, %c0_i32 : i32
    %1 = arith.extui %0 : i1 to i32
    %c0_i32_0 = arith.constant 0 : i32
    %2 = arith.cmpi ne, %1, %c0_i32_0 : i32
    scf.if %2 {
      %c0_8 = arith.constant 0 : index
      %c0_9 = arith.constant 0 : index
      %10 = vector.load %arg3[%c0_8, %c0_9] : memref<32x512xi32, #tpu.memory_space<vmem>>, vector<32x512xi32>
      %11 = tpu.bitcast %10 : vector<32x512xi32> -> vector<32x512xi32>
      %c0_i32_10 = arith.constant 0 : i32
      %12 = vector.broadcast %c0_i32_10 : i32 to vector<32x512xi32>
      %13 = arith.shrui %11, %12 : vector<32x512xi32>
      %c15_i32 = arith.constant 15 : i32
      %14 = vector.broadcast %c15_i32 : i32 to vector<32x512xi32>
      %15 = arith.andi %13, %14 : vector<32x512xi32>
      %c1_i32 = arith.constant 1 : i32
      %16 = vector.broadcast %c1_i32 : i32 to vector<32x512xi32>
      %17 = arith.andi %15, %16 : vector<32x512xi32>
      %c0_i32_11 = arith.constant 0 : i32
      %18 = vector.broadcast %c0_i32_11 : i32 to vector<32x512xi32>
      %19 = arith.cmpi ne, %17, %18 : vector<32x512xi32>
      %c2_i32 = arith.constant 2 : i32
      %20 = vector.broadcast %c2_i32 : i32 to vector<32x512xi32>
      %21 = arith.andi %15, %20 : vector<32x512xi32>
      %c0_i32_12 = arith.constant 0 : i32
      %22 = vector.broadcast %c0_i32_12 : i32 to vector<32x512xi32>
      %23 = arith.cmpi ne, %21, %22 : vector<32x512xi32>
      %c4_i32 = arith.constant 4 : i32
      %24 = vector.broadcast %c4_i32 : i32 to vector<32x512xi32>
      %25 = arith.andi %15, %24 : vector<32x512xi32>
      %c0_i32_13 = arith.constant 0 : i32
      %26 = vector.broadcast %c0_i32_13 : i32 to vector<32x512xi32>
      %27 = arith.cmpi ne, %25, %26 : vector<32x512xi32>
      %c8_i32 = arith.constant 8 : i32
      %28 = vector.broadcast %c8_i32 : i32 to vector<32x512xi32>
      %29 = arith.andi %15, %28 : vector<32x512xi32>
      %c0_i32_14 = arith.constant 0 : i32
      %30 = vector.broadcast %c0_i32_14 : i32 to vector<32x512xi32>
      %31 = arith.cmpi ne, %29, %30 : vector<32x512xi32>
      %cst_15 = arith.constant -0.6961928 : f32
      %cst_16 = arith.constant -1.000000e+00 : f32
      %32 = vector.broadcast %cst_15 : f32 to vector<32x512xf32>
      %33 = vector.broadcast %cst_16 : f32 to vector<32x512xf32>
      %34 = arith.select %19, %32, %33 : vector<32x512xi1>, vector<32x512xf32>
      %cst_17 = arith.constant -0.394917488 : f32
      %cst_18 = arith.constant -0.525073051 : f32
      %35 = vector.broadcast %cst_17 : f32 to vector<32x512xf32>
      %36 = vector.broadcast %cst_18 : f32 to vector<32x512xf32>
      %37 = arith.select %19, %35, %36 : vector<32x512xi1>, vector<32x512xf32>
      %cst_19 = arith.constant -0.18477343 : f32
      %cst_20 = arith.constant -0.284441382 : f32
      %38 = vector.broadcast %cst_19 : f32 to vector<32x512xf32>
      %39 = vector.broadcast %cst_20 : f32 to vector<32x512xf32>
      %40 = arith.select %19, %38, %39 : vector<32x512xi1>, vector<32x512xf32>
      %cst_21 = arith.constant 0.000000e+00 : f32
      %cst_22 = arith.constant -0.0910500362 : f32
      %41 = vector.broadcast %cst_21 : f32 to vector<32x512xf32>
      %42 = vector.broadcast %cst_22 : f32 to vector<32x512xf32>
      %43 = arith.select %19, %41, %42 : vector<32x512xi1>, vector<32x512xf32>
      %cst_23 = arith.constant 0.160930201 : f32
      %cst_24 = arith.constant 0.0795802995 : f32
      %44 = vector.broadcast %cst_23 : f32 to vector<32x512xf32>
      %45 = vector.broadcast %cst_24 : f32 to vector<32x512xf32>
      %46 = arith.select %19, %44, %45 : vector<32x512xi1>, vector<32x512xf32>
      %cst_25 = arith.constant 0.337915242 : f32
      %cst_26 = arith.constant 0.246112391 : f32
      %47 = vector.broadcast %cst_25 : f32 to vector<32x512xf32>
      %48 = vector.broadcast %cst_26 : f32 to vector<32x512xf32>
      %49 = arith.select %19, %47, %48 : vector<32x512xi1>, vector<32x512xf32>
      %cst_27 = arith.constant 5.626170e-01 : f32
      %cst_28 = arith.constant 0.440709829 : f32
      %50 = vector.broadcast %cst_27 : f32 to vector<32x512xf32>
      %51 = vector.broadcast %cst_28 : f32 to vector<32x512xf32>
      %52 = arith.select %19, %50, %51 : vector<32x512xi1>, vector<32x512xf32>
      %cst_29 = arith.constant 1.000000e+00 : f32
      %cst_30 = arith.constant 0.722956836 : f32
      %53 = vector.broadcast %cst_29 : f32 to vector<32x512xf32>
      %54 = vector.broadcast %cst_30 : f32 to vector<32x512xf32>
      %55 = arith.select %19, %53, %54 : vector<32x512xi1>, vector<32x512xf32>
      %56 = arith.select %23, %37, %34 : vector<32x512xi1>, vector<32x512xf32>
      %57 = arith.select %23, %43, %40 : vector<32x512xi1>, vector<32x512xf32>
      %58 = arith.select %23, %49, %46 : vector<32x512xi1>, vector<32x512xf32>
      %59 = arith.select %23, %55, %52 : vector<32x512xi1>, vector<32x512xf32>
      %60 = arith.select %27, %57, %56 : vector<32x512xi1>, vector<32x512xf32>
      %61 = arith.select %27, %59, %58 : vector<32x512xi1>, vector<32x512xf32>
      %62 = arith.select %31, %61, %60 : vector<32x512xi1>, vector<32x512xf32>
      %c0_31 = arith.constant 0 : index
      %c0_32 = arith.constant 0 : index
      %63 = vector.load %arg4[%c0_31, %c0_32] : memref<4x512xf32, #tpu.memory_space<vmem>>, vector<1x512xf32>
      %64 = vector.shape_cast %63 : vector<1x512xf32> to vector<512xf32>
      %65 = vector.shape_cast %64 : vector<512xf32> to vector<1x512xf32>
      %66 = vector.broadcast %65 : vector<1x512xf32> to vector<32x512xf32>
      %67 = arith.mulf %62, %66 : vector<32x512xf32>
      %68 = arith.truncf %67 : vector<32x512xf32> to vector<32x512xbf16>
      %c0_33 = arith.constant 0 : index
      %c0_34 = arith.constant 0 : index
      %69 = vector.load %arg7[%c0_33, %c0_34] : memref<256x512xbf16, #tpu.memory_space<vmem>>, vector<32x512xbf16>
      tpu.vector_store %arg7[%c0_33, %c0_34], %68 {strides = array<i32>} : memref<256x512xbf16, #tpu.memory_space<vmem>>, vector<32x512xbf16>,
      %c4_i32_35 = arith.constant 4 : i32
      %70 = vector.broadcast %c4_i32_35 : i32 to vector<32x512xi32>
      %71 = arith.shrui %11, %70 : vector<32x512xi32>
      %c15_i32_36 = arith.constant 15 : i32
      %72 = vector.broadcast %c15_i32_36 : i32 to vector<32x512xi32>
      %73 = arith.andi %71, %72 : vector<32x512xi32>
      %c1_i32_37 = arith.constant 1 : i32
      %74 = vector.broadcast %c1_i32_37 : i32 to vector<32x512xi32>
      %75 = arith.andi %73, %74 : vector<32x512xi32>
      %c0_i32_38 = arith.constant 0 : i32
      %76 = vector.broadcast %c0_i32_38 : i32 to vector<32x512xi32>
      %77 = arith.cmpi ne, %75, %76 : vector<32x512xi32>
      %c2_i32_39 = arith.constant 2 : i32
      %78 = vector.broadcast %c2_i32_39 : i32 to vector<32x512xi32>
      %79 = arith.andi %73, %78 : vector<32x512xi32>
      %c0_i32_40 = arith.constant 0 : i32
      %80 = vector.broadcast %c0_i32_40 : i32 to vector<32x512xi32>
      %81 = arith.cmpi ne, %79, %80 : vector<32x512xi32>
      %c4_i32_41 = arith.constant 4 : i32
      %82 = vector.broadcast %c4_i32_41 : i32 to vector<32x512xi32>
      %83 = arith.andi %73, %82 : vector<32x512xi32>
      %c0_i32_42 = arith.constant 0 : i32
      %84 = vector.broadcast %c0_i32_42 : i32 to vector<32x512xi32>
      %85 = arith.cmpi ne, %83, %84 : vector<32x512xi32>
      %c8_i32_43 = arith.constant 8 : i32
      %86 = vector.broadcast %c8_i32_43 : i32 to vector<32x512xi32>
      %87 = arith.andi %73, %86 : vector<32x512xi32>
      %c0_i32_44 = arith.constant 0 : i32
      %88 = vector.broadcast %c0_i32_44 : i32 to vector<32x512xi32>
      %89 = arith.cmpi ne, %87, %88 : vector<32x512xi32>
      %cst_45 = arith.constant -0.6961928 : f32
      %cst_46 = arith.constant -1.000000e+00 : f32
      %90 = vector.broadcast %cst_45 : f32 to vector<32x512xf32>
      %91 = vector.broadcast %cst_46 : f32 to vector<32x512xf32>
      %92 = arith.select %77, %90, %91 : vector<32x512xi1>, vector<32x512xf32>
      %cst_47 = arith.constant -0.394917488 : f32
      %cst_48 = arith.constant -0.525073051 : f32
      %93 = vector.broadcast %cst_47 : f32 to vector<32x512xf32>
      %94 = vector.broadcast %cst_48 : f32 to vector<32x512xf32>
      %95 = arith.select %77, %93, %94 : vector<32x512xi1>, vector<32x512xf32>
      %cst_49 = arith.constant -0.18477343 : f32
      %cst_50 = arith.constant -0.284441382 : f32
      %96 = vector.broadcast %cst_49 : f32 to vector<32x512xf32>
      %97 = vector.broadcast %cst_50 : f32 to vector<32x512xf32>
      %98 = arith.select %77, %96, %97 : vector<32x512xi1>, vector<32x512xf32>
      %cst_51 = arith.constant 0.000000e+00 : f32
      %cst_52 = arith.constant -0.0910500362 : f32
      %99 = vector.broadcast %cst_51 : f32 to vector<32x512xf32>
      %100 = vector.broadcast %cst_52 : f32 to vector<32x512xf32>
      %101 = arith.select %77, %99, %100 : vector<32x512xi1>, vector<32x512xf32>
      %cst_53 = arith.constant 0.160930201 : f32
      %cst_54 = arith.constant 0.0795802995 : f32
      %102 = vector.broadcast %cst_53 : f32 to vector<32x512xf32>
      %103 = vector.broadcast %cst_54 : f32 to vector<32x512xf32>
      %104 = arith.select %77, %102, %103 : vector<32x512xi1>, vector<32x512xf32>
      %cst_55 = arith.constant 0.337915242 : f32
      %cst_56 = arith.constant 0.246112391 : f32
      %105 = vector.broadcast %cst_55 : f32 to vector<32x512xf32>
      %106 = vector.broadcast %cst_56 : f32 to vector<32x512xf32>
      %107 = arith.select %77, %105, %106 : vector<32x512xi1>, vector<32x512xf32>
      %cst_57 = arith.constant 5.626170e-01 : f32
      %cst_58 = arith.constant 0.440709829 : f32
      %108 = vector.broadcast %cst_57 : f32 to vector<32x512xf32>
      %109 = vector.broadcast %cst_58 : f32 to vector<32x512xf32>
      %110 = arith.select %77, %108, %109 : vector<32x512xi1>, vector<32x512xf32>
      %cst_59 = arith.constant 1.000000e+00 : f32
      %cst_60 = arith.constant 0.722956836 : f32
      %111 = vector.broadcast %cst_59 : f32 to vector<32x512xf32>
      %112 = vector.broadcast %cst_60 : f32 to vector<32x512xf32>
      %113 = arith.select %77, %111, %112 : vector<32x512xi1>, vector<32x512xf32>
      %114 = arith.select %81, %95, %92 : vector<32x512xi1>, vector<32x512xf32>
      %115 = arith.select %81, %101, %98 : vector<32x512xi1>, vector<32x512xf32>
      %116 = arith.select %81, %107, %104 : vector<32x512xi1>, vector<32x512xf32>
      %117 = arith.select %81, %113, %110 : vector<32x512xi1>, vector<32x512xf32>
      %118 = arith.select %85, %115, %114 : vector<32x512xi1>, vector<32x512xf32>
      %119 = arith.select %85, %117, %116 : vector<32x512xi1>, vector<32x512xf32>
      %120 = arith.select %89, %119, %118 : vector<32x512xi1>, vector<32x512xf32>
      %c0_61 = arith.constant 0 : index
      %c0_62 = arith.constant 0 : index
      %121 = vector.load %arg4[%c0_61, %c0_62] : memref<4x512xf32, #tpu.memory_space<vmem>>, vector<1x512xf32>
      %122 = vector.shape_cast %121 : vector<1x512xf32> to vector<512xf32>
      %123 = vector.shape_cast %122 : vector<512xf32> to vector<1x512xf32>
      %124 = vector.broadcast %123 : vector<1x512xf32> to vector<32x512xf32>
      %125 = arith.mulf %120, %124 : vector<32x512xf32>
      %126 = arith.truncf %125 : vector<32x512xf32> to vector<32x512xbf16>
      %c32 = arith.constant 32 : index
      %c0_63 = arith.constant 0 : index
      %127 = vector.load %arg7[%c32, %c0_63] : memref<256x512xbf16, #tpu.memory_space<vmem>>, vector<32x512xbf16>
      tpu.vector_store %arg7[%c32, %c0_63], %126 {strides = array<i32>} : memref<256x512xbf16, #tpu.memory_space<vmem>>, vector<32x512xbf16>,
      %c8_i32_64 = arith.constant 8 : i32
      %128 = vector.broadcast %c8_i32_64 : i32 to vector<32x512xi32>
      %129 = arith.shrui %11, %128 : vector<32x512xi32>
      %c15_i32_65 = arith.constant 15 : i32
      %130 = vector.broadcast %c15_i32_65 : i32 to vector<32x512xi32>
      %131 = arith.andi %129, %130 : vector<32x512xi32>
      %c1_i32_66 = arith.constant 1 : i32
      %132 = vector.broadcast %c1_i32_66 : i32 to vector<32x512xi32>
      %133 = arith.andi %131, %132 : vector<32x512xi32>
      %c0_i32_67 = arith.constant 0 : i32
      %134 = vector.broadcast %c0_i32_67 : i32 to vector<32x512xi32>
      %135 = arith.cmpi ne, %133, %134 : vector<32x512xi32>
      %c2_i32_68 = arith.constant 2 : i32
      %136 = vector.broadcast %c2_i32_68 : i32 to vector<32x512xi32>
      %137 = arith.andi %131, %136 : vector<32x512xi32>
      %c0_i32_69 = arith.constant 0 : i32
      %138 = vector.broadcast %c0_i32_69 : i32 to vector<32x512xi32>
      %139 = arith.cmpi ne, %137, %138 : vector<32x512xi32>
      %c4_i32_70 = arith.constant 4 : i32
      %140 = vector.broadcast %c4_i32_70 : i32 to vector<32x512xi32>
      %141 = arith.andi %131, %140 : vector<32x512xi32>
      %c0_i32_71 = arith.constant 0 : i32
      %142 = vector.broadcast %c0_i32_71 : i32 to vector<32x512xi32>
      %143 = arith.cmpi ne, %141, %142 : vector<32x512xi32>
      %c8_i32_72 = arith.constant 8 : i32
      %144 = vector.broadcast %c8_i32_72 : i32 to vector<32x512xi32>
      %145 = arith.andi %131, %144 : vector<32x512xi32>
      %c0_i32_73 = arith.constant 0 : i32
      %146 = vector.broadcast %c0_i32_73 : i32 to vector<32x512xi32>
      %147 = arith.cmpi ne, %145, %146 : vector<32x512xi32>
      %cst_74 = arith.constant -0.6961928 : f32
      %cst_75 = arith.constant -1.000000e+00 : f32
      %148 = vector.broadcast %cst_74 : f32 to vector<32x512xf32>
      %149 = vector.broadcast %cst_75 : f32 to vector<32x512xf32>
      %150 = arith.select %135, %148, %149 : vector<32x512xi1>, vector<32x512xf32>
      %cst_76 = arith.constant -0.394917488 : f32
      %cst_77 = arith.constant -0.525073051 : f32
      %151 = vector.broadcast %cst_76 : f32 to vector<32x512xf32>
      %152 = vector.broadcast %cst_77 : f32 to vector<32x512xf32>
      %153 = arith.select %135, %151, %152 : vector<32x512xi1>, vector<32x512xf32>
      %cst_78 = arith.constant -0.18477343 : f32
      %cst_79 = arith.constant -0.284441382 : f32
      %154 = vector.broadcast %cst_78 : f32 to vector<32x512xf32>
      %155 = vector.broadcast %cst_79 : f32 to vector<32x512xf32>
      %156 = arith.select %135, %154, %155 : vector<32x512xi1>, vector<32x512xf32>
      %cst_80 = arith.constant 0.000000e+00 : f32
      %cst_81 = arith.constant -0.0910500362 : f32
      %157 = vector.broadcast %cst_80 : f32 to vector<32x512xf32>
      %158 = vector.broadcast %cst_81 : f32 to vector<32x512xf32>
      %159 = arith.select %135, %157, %158 : vector<32x512xi1>, vector<32x512xf32>
      %cst_82 = arith.constant 0.160930201 : f32
      %cst_83 = arith.constant 0.0795802995 : f32
      %160 = vector.broadcast %cst_82 : f32 to vector<32x512xf32>
      %161 = vector.broadcast %cst_83 : f32 to vector<32x512xf32>
      %162 = arith.select %135, %160, %161 : vector<32x512xi1>, vector<32x512xf32>
      %cst_84 = arith.constant 0.337915242 : f32
      %cst_85 = arith.constant 0.246112391 : f32
      %163 = vector.broadcast %cst_84 : f32 to vector<32x512xf32>
      %164 = vector.broadcast %cst_85 : f32 to vector<32x512xf32>
      %165 = arith.select %135, %163, %164 : vector<32x512xi1>, vector<32x512xf32>
      %cst_86 = arith.constant 5.626170e-01 : f32
      %cst_87 = arith.constant 0.440709829 : f32
      %166 = vector.broadcast %cst_86 : f32 to vector<32x512xf32>
      %167 = vector.broadcast %cst_87 : f32 to vector<32x512xf32>
      %168 = arith.select %135, %166, %167 : vector<32x512xi1>, vector<32x512xf32>
      %cst_88 = arith.constant 1.000000e+00 : f32
      %cst_89 = arith.constant 0.722956836 : f32
      %169 = vector.broadcast %cst_88 : f32 to vector<32x512xf32>
      %170 = vector.broadcast %cst_89 : f32 to vector<32x512xf32>
      %171 = arith.select %135, %169, %170 : vector<32x512xi1>, vector<32x512xf32>
      %172 = arith.select %139, %153, %150 : vector<32x512xi1>, vector<32x512xf32>
      %173 = arith.select %139, %159, %156 : vector<32x512xi1>, vector<32x512xf32>
      %174 = arith.select %139, %165, %162 : vector<32x512xi1>, vector<32x512xf32>
      %175 = arith.select %139, %171, %168 : vector<32x512xi1>, vector<32x512xf32>
      %176 = arith.select %143, %173, %172 : vector<32x512xi1>, vector<32x512xf32>
      %177 = arith.select %143, %175, %174 : vector<32x512xi1>, vector<32x512xf32>
      %178 = arith.select %147, %177, %176 : vector<32x512xi1>, vector<32x512xf32>
      %c1 = arith.constant 1 : index
      %c0_90 = arith.constant 0 : index
      %179 = vector.load %arg4[%c1, %c0_90] : memref<4x512xf32, #tpu.memory_space<vmem>>, vector<1x512xf32>
      %180 = vector.shape_cast %179 : vector<1x512xf32> to vector<512xf32>
      %181 = vector.shape_cast %180 : vector<512xf32> to vector<1x512xf32>
      %182 = vector.broadcast %181 : vector<1x512xf32> to vector<32x512xf32>
      %183 = arith.mulf %178, %182 : vector<32x512xf32>
      %184 = arith.truncf %183 : vector<32x512xf32> to vector<32x512xbf16>
      %c64 = arith.constant 64 : index
      %c0_91 = arith.constant 0 : index
      %185 = vector.load %arg7[%c64, %c0_91] : memref<256x512xbf16, #tpu.memory_space<vmem>>, vector<32x512xbf16>
      tpu.vector_store %arg7[%c64, %c0_91], %184 {strides = array<i32>} : memref<256x512xbf16, #tpu.memory_space<vmem>>, vector<32x512xbf16>,
      %c12_i32 = arith.constant 12 : i32
      %186 = vector.broadcast %c12_i32 : i32 to vector<32x512xi32>
      %187 = arith.shrui %11, %186 : vector<32x512xi32>
      %c15_i32_92 = arith.constant 15 : i32
      %188 = vector.broadcast %c15_i32_92 : i32 to vector<32x512xi32>
      %189 = arith.andi %187, %188 : vector<32x512xi32>
      %c1_i32_93 = arith.constant 1 : i32
      %190 = vector.broadcast %c1_i32_93 : i32 to vector<32x512xi32>
      %191 = arith.andi %189, %190 : vector<32x512xi32>
      %c0_i32_94 = arith.constant 0 : i32
      %192 = vector.broadcast %c0_i32_94 : i32 to vector<32x512xi32>
      %193 = arith.cmpi ne, %191, %192 : vector<32x512xi32>
      %c2_i32_95 = arith.constant 2 : i32
      %194 = vector.broadcast %c2_i32_95 : i32 to vector<32x512xi32>
      %195 = arith.andi %189, %194 : vector<32x512xi32>
      %c0_i32_96 = arith.constant 0 : i32
      %196 = vector.broadcast %c0_i32_96 : i32 to vector<32x512xi32>
      %197 = arith.cmpi ne, %195, %196 : vector<32x512xi32>
      %c4_i32_97 = arith.constant 4 : i32
      %198 = vector.broadcast %c4_i32_97 : i32 to vector<32x512xi32>
      %199 = arith.andi %189, %198 : vector<32x512xi32>
      %c0_i32_98 = arith.constant 0 : i32
      %200 = vector.broadcast %c0_i32_98 : i32 to vector<32x512xi32>
      %201 = arith.cmpi ne, %199, %200 : vector<32x512xi32>
      %c8_i32_99 = arith.constant 8 : i32
      %202 = vector.broadcast %c8_i32_99 : i32 to vector<32x512xi32>
      %203 = arith.andi %189, %202 : vector<32x512xi32>
      %c0_i32_100 = arith.constant 0 : i32
      %204 = vector.broadcast %c0_i32_100 : i32 to vector<32x512xi32>
      %205 = arith.cmpi ne, %203, %204 : vector<32x512xi32>
      %cst_101 = arith.constant -0.6961928 : f32
      %cst_102 = arith.constant -1.000000e+00 : f32
      %206 = vector.broadcast %cst_101 : f32 to vector<32x512xf32>
      %207 = vector.broadcast %cst_102 : f32 to vector<32x512xf32>
      %208 = arith.select %193, %206, %207 : vector<32x512xi1>, vector<32x512xf32>
      %cst_103 = arith.constant -0.394917488 : f32
      %cst_104 = arith.constant -0.525073051 : f32
      %209 = vector.broadcast %cst_103 : f32 to vector<32x512xf32>
      %210 = vector.broadcast %cst_104 : f32 to vector<32x512xf32>
      %211 = arith.select %193, %209, %210 : vector<32x512xi1>, vector<32x512xf32>
      %cst_105 = arith.constant -0.18477343 : f32
      %cst_106 = arith.constant -0.284441382 : f32
      %212 = vector.broadcast %cst_105 : f32 to vector<32x512xf32>
      %213 = vector.broadcast %cst_106 : f32 to vector<32x512xf32>
      %214 = arith.select %193, %212, %213 : vector<32x512xi1>, vector<32x512xf32>
      %cst_107 = arith.constant 0.000000e+00 : f32
      %cst_108 = arith.constant -0.0910500362 : f32
      %215 = vector.broadcast %cst_107 : f32 to vector<32x512xf32>
      %216 = vector.broadcast %cst_108 : f32 to vector<32x512xf32>
      %217 = arith.select %193, %215, %216 : vector<32x512xi1>, vector<32x512xf32>
      %cst_109 = arith.constant 0.160930201 : f32
      %cst_110 = arith.constant 0.0795802995 : f32
      %218 = vector.broadcast %cst_109 : f32 to vector<32x512xf32>
      %219 = vector.broadcast %cst_110 : f32 to vector<32x512xf32>
      %220 = arith.select %193, %218, %219 : vector<32x512xi1>, vector<32x512xf32>
      %cst_111 = arith.constant 0.337915242 : f32
      %cst_112 = arith.constant 0.246112391 : f32
      %221 = vector.broadcast %cst_111 : f32 to vector<32x512xf32>
      %222 = vector.broadcast %cst_112 : f32 to vector<32x512xf32>
      %223 = arith.select %193, %221, %222 : vector<32x512xi1>, vector<32x512xf32>
      %cst_113 = arith.constant 5.626170e-01 : f32
      %cst_114 = arith.constant 0.440709829 : f32
      %224 = vector.broadcast %cst_113 : f32 to vector<32x512xf32>
      %225 = vector.broadcast %cst_114 : f32 to vector<32x512xf32>
      %226 = arith.select %193, %224, %225 : vector<32x512xi1>, vector<32x512xf32>
      %cst_115 = arith.constant 1.000000e+00 : f32
      %cst_116 = arith.constant 0.722956836 : f32
      %227 = vector.broadcast %cst_115 : f32 to vector<32x512xf32>
      %228 = vector.broadcast %cst_116 : f32 to vector<32x512xf32>
      %229 = arith.select %193, %227, %228 : vector<32x512xi1>, vector<32x512xf32>
      %230 = arith.select %197, %211, %208 : vector<32x512xi1>, vector<32x512xf32>
      %231 = arith.select %197, %217, %214 : vector<32x512xi1>, vector<32x512xf32>
      %232 = arith.select %197, %223, %220 : vector<32x512xi1>, vector<32x512xf32>
      %233 = arith.select %197, %229, %226 : vector<32x512xi1>, vector<32x512xf32>
      %234 = arith.select %201, %231, %230 : vector<32x512xi1>, vector<32x512xf32>
      %235 = arith.select %201, %233, %232 : vector<32x512xi1>, vector<32x512xf32>
      %236 = arith.select %205, %235, %234 : vector<32x512xi1>, vector<32x512xf32>
      %c1_117 = arith.constant 1 : index
      %c0_118 = arith.constant 0 : index
      %237 = vector.load %arg4[%c1_117, %c0_118] : memref<4x512xf32, #tpu.memory_space<vmem>>, vector<1x512xf32>
      %238 = vector.shape_cast %237 : vector<1x512xf32> to vector<512xf32>
      %239 = vector.shape_cast %238 : vector<512xf32> to vector<1x512xf32>
      %240 = vector.broadcast %239 : vector<1x512xf32> to vector<32x512xf32>
      %241 = arith.mulf %236, %240 : vector<32x512xf32>
      %242 = arith.truncf %241 : vector<32x512xf32> to vector<32x512xbf16>
      %c96 = arith.constant 96 : index
      %c0_119 = arith.constant 0 : index
      %243 = vector.load %arg7[%c96, %c0_119] : memref<256x512xbf16, #tpu.memory_space<vmem>>, vector<32x512xbf16>
      tpu.vector_store %arg7[%c96, %c0_119], %242 {strides = array<i32>} : memref<256x512xbf16, #tpu.memory_space<vmem>>, vector<32x512xbf16>,
      %c16_i32 = arith.constant 16 : i32
      %244 = vector.broadcast %c16_i32 : i32 to vector<32x512xi32>
      %245 = arith.shrui %11, %244 : vector<32x512xi32>
      %c15_i32_120 = arith.constant 15 : i32
      %246 = vector.broadcast %c15_i32_120 : i32 to vector<32x512xi32>
      %247 = arith.andi %245, %246 : vector<32x512xi32>
      %c1_i32_121 = arith.constant 1 : i32
      %248 = vector.broadcast %c1_i32_121 : i32 to vector<32x512xi32>
      %249 = arith.andi %247, %248 : vector<32x512xi32>
      %c0_i32_122 = arith.constant 0 : i32
      %250 = vector.broadcast %c0_i32_122 : i32 to vector<32x512xi32>
      %251 = arith.cmpi ne, %249, %250 : vector<32x512xi32>
      %c2_i32_123 = arith.constant 2 : i32
      %252 = vector.broadcast %c2_i32_123 : i32 to vector<32x512xi32>
      %253 = arith.andi %247, %252 : vector<32x512xi32>
      %c0_i32_124 = arith.constant 0 : i32
      %254 = vector.broadcast %c0_i32_124 : i32 to vector<32x512xi32>
      %255 = arith.cmpi ne, %253, %254 : vector<32x512xi32>
      %c4_i32_125 = arith.constant 4 : i32
      %256 = vector.broadcast %c4_i32_125 : i32 to vector<32x512xi32>
      %257 = arith.andi %247, %256 : vector<32x512xi32>
      %c0_i32_126 = arith.constant 0 : i32
      %258 = vector.broadcast %c0_i32_126 : i32 to vector<32x512xi32>
      %259 = arith.cmpi ne, %257, %258 : vector<32x512xi32>
      %c8_i32_127 = arith.constant 8 : i32
      %260 = vector.broadcast %c8_i32_127 : i32 to vector<32x512xi32>
      %261 = arith.andi %247, %260 : vector<32x512xi32>
      %c0_i32_128 = arith.constant 0 : i32
      %262 = vector.broadcast %c0_i32_128 : i32 to vector<32x512xi32>
      %263 = arith.cmpi ne, %261, %262 : vector<32x512xi32>
      %cst_129 = arith.constant -0.6961928 : f32
      %cst_130 = arith.constant -1.000000e+00 : f32
      %264 = vector.broadcast %cst_129 : f32 to vector<32x512xf32>
      %265 = vector.broadcast %cst_130 : f32 to vector<32x512xf32>
      %266 = arith.select %251, %264, %265 : vector<32x512xi1>, vector<32x512xf32>
      %cst_131 = arith.constant -0.394917488 : f32
      %cst_132 = arith.constant -0.525073051 : f32
      %267 = vector.broadcast %cst_131 : f32 to vector<32x512xf32>
      %268 = vector.broadcast %cst_132 : f32 to vector<32x512xf32>
      %269 = arith.select %251, %267, %268 : vector<32x512xi1>, vector<32x512xf32>
      %cst_133 = arith.constant -0.18477343 : f32
      %cst_134 = arith.constant -0.284441382 : f32
      %270 = vector.broadcast %cst_133 : f32 to vector<32x512xf32>
      %271 = vector.broadcast %cst_134 : f32 to vector<32x512xf32>
      %272 = arith.select %251, %270, %271 : vector<32x512xi1>, vector<32x512xf32>
      %cst_135 = arith.constant 0.000000e+00 : f32
      %cst_136 = arith.constant -0.0910500362 : f32
      %273 = vector.broadcast %cst_135 : f32 to vector<32x512xf32>
      %274 = vector.broadcast %cst_136 : f32 to vector<32x512xf32>
      %275 = arith.select %251, %273, %274 : vector<32x512xi1>, vector<32x512xf32>
      %cst_137 = arith.constant 0.160930201 : f32
      %cst_138 = arith.constant 0.0795802995 : f32
      %276 = vector.broadcast %cst_137 : f32 to vector<32x512xf32>
      %277 = vector.broadcast %cst_138 : f32 to vector<32x512xf32>
      %278 = arith.select %251, %276, %277 : vector<32x512xi1>, vector<32x512xf32>
      %cst_139 = arith.constant 0.337915242 : f32
      %cst_140 = arith.constant 0.246112391 : f32
      %279 = vector.broadcast %cst_139 : f32 to vector<32x512xf32>
      %280 = vector.broadcast %cst_140 : f32 to vector<32x512xf32>
      %281 = arith.select %251, %279, %280 : vector<32x512xi1>, vector<32x512xf32>
      %cst_141 = arith.constant 5.626170e-01 : f32
      %cst_142 = arith.constant 0.440709829 : f32
      %282 = vector.broadcast %cst_141 : f32 to vector<32x512xf32>
      %283 = vector.broadcast %cst_142 : f32 to vector<32x512xf32>
      %284 = arith.select %251, %282, %283 : vector<32x512xi1>, vector<32x512xf32>
      %cst_143 = arith.constant 1.000000e+00 : f32
      %cst_144 = arith.constant 0.722956836 : f32
      %285 = vector.broadcast %cst_143 : f32 to vector<32x512xf32>
      %286 = vector.broadcast %cst_144 : f32 to vector<32x512xf32>
      %287 = arith.select %251, %285, %286 : vector<32x512xi1>, vector<32x512xf32>
      %288 = arith.select %255, %269, %266 : vector<32x512xi1>, vector<32x512xf32>
      %289 = arith.select %255, %275, %272 : vector<32x512xi1>, vector<32x512xf32>
      %290 = arith.select %255, %281, %278 : vector<32x512xi1>, vector<32x512xf32>
      %291 = arith.select %255, %287, %284 : vector<32x512xi1>, vector<32x512xf32>
      %292 = arith.select %259, %289, %288 : vector<32x512xi1>, vector<32x512xf32>
      %293 = arith.select %259, %291, %290 : vector<32x512xi1>, vector<32x512xf32>
      %294 = arith.select %263, %293, %292 : vector<32x512xi1>, vector<32x512xf32>
      %c2 = arith.constant 2 : index
      %c0_145 = arith.constant 0 : index
      %295 = vector.load %arg4[%c2, %c0_145] : memref<4x512xf32, #tpu.memory_space<vmem>>, vector<1x512xf32>
      %296 = vector.shape_cast %295 : vector<1x512xf32> to vector<512xf32>
      %297 = vector.shape_cast %296 : vector<512xf32> to vector<1x512xf32>
      %298 = vector.broadcast %297 : vector<1x512xf32> to vector<32x512xf32>
      %299 = arith.mulf %294, %298 : vector<32x512xf32>
      %300 = arith.truncf %299 : vector<32x512xf32> to vector<32x512xbf16>
      %c128 = arith.constant 128 : index
      %c0_146 = arith.constant 0 : index
      %301 = vector.load %arg7[%c128, %c0_146] : memref<256x512xbf16, #tpu.memory_space<vmem>>, vector<32x512xbf16>
      tpu.vector_store %arg7[%c128, %c0_146], %300 {strides = array<i32>} : memref<256x512xbf16, #tpu.memory_space<vmem>>, vector<32x512xbf16>,
      %c20_i32 = arith.constant 20 : i32
      %302 = vector.broadcast %c20_i32 : i32 to vector<32x512xi32>
      %303 = arith.shrui %11, %302 : vector<32x512xi32>
      %c15_i32_147 = arith.constant 15 : i32
      %304 = vector.broadcast %c15_i32_147 : i32 to vector<32x512xi32>
      %305 = arith.andi %303, %304 : vector<32x512xi32>
      %c1_i32_148 = arith.constant 1 : i32
      %306 = vector.broadcast %c1_i32_148 : i32 to vector<32x512xi32>
      %307 = arith.andi %305, %306 : vector<32x512xi32>
      %c0_i32_149 = arith.constant 0 : i32
      %308 = vector.broadcast %c0_i32_149 : i32 to vector<32x512xi32>
      %309 = arith.cmpi ne, %307, %308 : vector<32x512xi32>
      %c2_i32_150 = arith.constant 2 : i32
      %310 = vector.broadcast %c2_i32_150 : i32 to vector<32x512xi32>
      %311 = arith.andi %305, %310 : vector<32x512xi32>
      %c0_i32_151 = arith.constant 0 : i32
      %312 = vector.broadcast %c0_i32_151 : i32 to vector<32x512xi32>
      %313 = arith.cmpi ne, %311, %312 : vector<32x512xi32>
      %c4_i32_152 = arith.constant 4 : i32
      %314 = vector.broadcast %c4_i32_152 : i32 to vector<32x512xi32>
      %315 = arith.andi %305, %314 : vector<32x512xi32>
      %c0_i32_153 = arith.constant 0 : i32
      %316 = vector.broadcast %c0_i32_153 : i32 to vector<32x512xi32>
      %317 = arith.cmpi ne, %315, %316 : vector<32x512xi32>
      %c8_i32_154 = arith.constant 8 : i32
      %318 = vector.broadcast %c8_i32_154 : i32 to vector<32x512xi32>
      %319 = arith.andi %305, %318 : vector<32x512xi32>
      %c0_i32_155 = arith.constant 0 : i32
      %320 = vector.broadcast %c0_i32_155 : i32 to vector<32x512xi32>
      %321 = arith.cmpi ne, %319, %320 : vector<32x512xi32>
      %cst_156 = arith.constant -0.6961928 : f32
      %cst_157 = arith.constant -1.000000e+00 : f32
      %322 = vector.broadcast %cst_156 : f32 to vector<32x512xf32>
      %323 = vector.broadcast %cst_157 : f32 to vector<32x512xf32>
      %324 = arith.select %309, %322, %323 : vector<32x512xi1>, vector<32x512xf32>
      %cst_158 = arith.constant -0.394917488 : f32
      %cst_159 = arith.constant -0.525073051 : f32
      %325 = vector.broadcast %cst_158 : f32 to vector<32x512xf32>
      %326 = vector.broadcast %cst_159 : f32 to vector<32x512xf32>
      %327 = arith.select %309, %325, %326 : vector<32x512xi1>, vector<32x512xf32>
      %cst_160 = arith.constant -0.18477343 : f32
      %cst_161 = arith.constant -0.284441382 : f32
      %328 = vector.broadcast %cst_160 : f32 to vector<32x512xf32>
      %329 = vector.broadcast %cst_161 : f32 to vector<32x512xf32>
      %330 = arith.select %309, %328, %329 : vector<32x512xi1>, vector<32x512xf32>
      %cst_162 = arith.constant 0.000000e+00 : f32
      %cst_163 = arith.constant -0.0910500362 : f32
      %331 = vector.broadcast %cst_162 : f32 to vector<32x512xf32>
      %332 = vector.broadcast %cst_163 : f32 to vector<32x512xf32>
      %333 = arith.select %309, %331, %332 : vector<32x512xi1>, vector<32x512xf32>
      %cst_164 = arith.constant 0.160930201 : f32
      %cst_165 = arith.constant 0.0795802995 : f32
      %334 = vector.broadcast %cst_164 : f32 to vector<32x512xf32>
      %335 = vector.broadcast %cst_165 : f32 to vector<32x512xf32>
      %336 = arith.select %309, %334, %335 : vector<32x512xi1>, vector<32x512xf32>
      %cst_166 = arith.constant 0.337915242 : f32
      %cst_167 = arith.constant 0.246112391 : f32
      %337 = vector.broadcast %cst_166 : f32 to vector<32x512xf32>
      %338 = vector.broadcast %cst_167 : f32 to vector<32x512xf32>
      %339 = arith.select %309, %337, %338 : vector<32x512xi1>, vector<32x512xf32>
      %cst_168 = arith.constant 5.626170e-01 : f32
      %cst_169 = arith.constant 0.440709829 : f32
      %340 = vector.broadcast %cst_168 : f32 to vector<32x512xf32>
      %341 = vector.broadcast %cst_169 : f32 to vector<32x512xf32>
      %342 = arith.select %309, %340, %341 : vector<32x512xi1>, vector<32x512xf32>
      %cst_170 = arith.constant 1.000000e+00 : f32
      %cst_171 = arith.constant 0.722956836 : f32
      %343 = vector.broadcast %cst_170 : f32 to vector<32x512xf32>
      %344 = vector.broadcast %cst_171 : f32 to vector<32x512xf32>
      %345 = arith.select %309, %343, %344 : vector<32x512xi1>, vector<32x512xf32>
      %346 = arith.select %313, %327, %324 : vector<32x512xi1>, vector<32x512xf32>
      %347 = arith.select %313, %333, %330 : vector<32x512xi1>, vector<32x512xf32>
      %348 = arith.select %313, %339, %336 : vector<32x512xi1>, vector<32x512xf32>
      %349 = arith.select %313, %345, %342 : vector<32x512xi1>, vector<32x512xf32>
      %350 = arith.select %317, %347, %346 : vector<32x512xi1>, vector<32x512xf32>
      %351 = arith.select %317, %349, %348 : vector<32x512xi1>, vector<32x512xf32>
      %352 = arith.select %321, %351, %350 : vector<32x512xi1>, vector<32x512xf32>
      %c2_172 = arith.constant 2 : index
      %c0_173 = arith.constant 0 : index
      %353 = vector.load %arg4[%c2_172, %c0_173] : memref<4x512xf32, #tpu.memory_space<vmem>>, vector<1x512xf32>
      %354 = vector.shape_cast %353 : vector<1x512xf32> to vector<512xf32>
      %355 = vector.shape_cast %354 : vector<512xf32> to vector<1x512xf32>
      %356 = vector.broadcast %355 : vector<1x512xf32> to vector<32x512xf32>
      %357 = arith.mulf %352, %356 : vector<32x512xf32>
      %358 = arith.truncf %357 : vector<32x512xf32> to vector<32x512xbf16>
      %c160 = arith.constant 160 : index
      %c0_174 = arith.constant 0 : index
      %359 = vector.load %arg7[%c160, %c0_174] : memref<256x512xbf16, #tpu.memory_space<vmem>>, vector<32x512xbf16>
      tpu.vector_store %arg7[%c160, %c0_174], %358 {strides = array<i32>} : memref<256x512xbf16, #tpu.memory_space<vmem>>, vector<32x512xbf16>,
      %c24_i32 = arith.constant 24 : i32
      %360 = vector.broadcast %c24_i32 : i32 to vector<32x512xi32>
      %361 = arith.shrui %11, %360 : vector<32x512xi32>
      %c15_i32_175 = arith.constant 15 : i32
      %362 = vector.broadcast %c15_i32_175 : i32 to vector<32x512xi32>
      %363 = arith.andi %361, %362 : vector<32x512xi32>
      %c1_i32_176 = arith.constant 1 : i32
      %364 = vector.broadcast %c1_i32_176 : i32 to vector<32x512xi32>
      %365 = arith.andi %363, %364 : vector<32x512xi32>
      %c0_i32_177 = arith.constant 0 : i32
      %366 = vector.broadcast %c0_i32_177 : i32 to vector<32x512xi32>
      %367 = arith.cmpi ne, %365, %366 : vector<32x512xi32>
      %c2_i32_178 = arith.constant 2 : i32
      %368 = vector.broadcast %c2_i32_178 : i32 to vector<32x512xi32>
      %369 = arith.andi %363, %368 : vector<32x512xi32>
      %c0_i32_179 = arith.constant 0 : i32
      %370 = vector.broadcast %c0_i32_179 : i32 to vector<32x512xi32>
      %371 = arith.cmpi ne, %369, %370 : vector<32x512xi32>
      %c4_i32_180 = arith.constant 4 : i32
      %372 = vector.broadcast %c4_i32_180 : i32 to vector<32x512xi32>
      %373 = arith.andi %363, %372 : vector<32x512xi32>
      %c0_i32_181 = arith.constant 0 : i32
      %374 = vector.broadcast %c0_i32_181 : i32 to vector<32x512xi32>
      %375 = arith.cmpi ne, %373, %374 : vector<32x512xi32>
      %c8_i32_182 = arith.constant 8 : i32
      %376 = vector.broadcast %c8_i32_182 : i32 to vector<32x512xi32>
      %377 = arith.andi %363, %376 : vector<32x512xi32>
      %c0_i32_183 = arith.constant 0 : i32
      %378 = vector.broadcast %c0_i32_183 : i32 to vector<32x512xi32>
      %379 = arith.cmpi ne, %377, %378 : vector<32x512xi32>
      %cst_184 = arith.constant -0.6961928 : f32
      %cst_185 = arith.constant -1.000000e+00 : f32
      %380 = vector.broadcast %cst_184 : f32 to vector<32x512xf32>
      %381 = vector.broadcast %cst_185 : f32 to vector<32x512xf32>
      %382 = arith.select %367, %380, %381 : vector<32x512xi1>, vector<32x512xf32>
      %cst_186 = arith.constant -0.394917488 : f32
      %cst_187 = arith.constant -0.525073051 : f32
      %383 = vector.broadcast %cst_186 : f32 to vector<32x512xf32>
      %384 = vector.broadcast %cst_187 : f32 to vector<32x512xf32>
      %385 = arith.select %367, %383, %384 : vector<32x512xi1>, vector<32x512xf32>
      %cst_188 = arith.constant -0.18477343 : f32
      %cst_189 = arith.constant -0.284441382 : f32
      %386 = vector.broadcast %cst_188 : f32 to vector<32x512xf32>
      %387 = vector.broadcast %cst_189 : f32 to vector<32x512xf32>
      %388 = arith.select %367, %386, %387 : vector<32x512xi1>, vector<32x512xf32>
      %cst_190 = arith.constant 0.000000e+00 : f32
      %cst_191 = arith.constant -0.0910500362 : f32
      %389 = vector.broadcast %cst_190 : f32 to vector<32x512xf32>
      %390 = vector.broadcast %cst_191 : f32 to vector<32x512xf32>
      %391 = arith.select %367, %389, %390 : vector<32x512xi1>, vector<32x512xf32>
      %cst_192 = arith.constant 0.160930201 : f32
      %cst_193 = arith.constant 0.0795802995 : f32
      %392 = vector.broadcast %cst_192 : f32 to vector<32x512xf32>
      %393 = vector.broadcast %cst_193 : f32 to vector<32x512xf32>
      %394 = arith.select %367, %392, %393 : vector<32x512xi1>, vector<32x512xf32>
      %cst_194 = arith.constant 0.337915242 : f32
      %cst_195 = arith.constant 0.246112391 : f32
      %395 = vector.broadcast %cst_194 : f32 to vector<32x512xf32>
      %396 = vector.broadcast %cst_195 : f32 to vector<32x512xf32>
      %397 = arith.select %367, %395, %396 : vector<32x512xi1>, vector<32x512xf32>
      %cst_196 = arith.constant 5.626170e-01 : f32
      %cst_197 = arith.constant 0.440709829 : f32
      %398 = vector.broadcast %cst_196 : f32 to vector<32x512xf32>
      %399 = vector.broadcast %cst_197 : f32 to vector<32x512xf32>
      %400 = arith.select %367, %398, %399 : vector<32x512xi1>, vector<32x512xf32>
      %cst_198 = arith.constant 1.000000e+00 : f32
      %cst_199 = arith.constant 0.722956836 : f32
      %401 = vector.broadcast %cst_198 : f32 to vector<32x512xf32>
      %402 = vector.broadcast %cst_199 : f32 to vector<32x512xf32>
      %403 = arith.select %367, %401, %402 : vector<32x512xi1>, vector<32x512xf32>
      %404 = arith.select %371, %385, %382 : vector<32x512xi1>, vector<32x512xf32>
      %405 = arith.select %371, %391, %388 : vector<32x512xi1>, vector<32x512xf32>
      %406 = arith.select %371, %397, %394 : vector<32x512xi1>, vector<32x512xf32>
      %407 = arith.select %371, %403, %400 : vector<32x512xi1>, vector<32x512xf32>
      %408 = arith.select %375, %405, %404 : vector<32x512xi1>, vector<32x512xf32>
      %409 = arith.select %375, %407, %406 : vector<32x512xi1>, vector<32x512xf32>
      %410 = arith.select %379, %409, %408 : vector<32x512xi1>, vector<32x512xf32>
      %c3 = arith.constant 3 : index
      %c0_200 = arith.constant 0 : index
      %411 = vector.load %arg4[%c3, %c0_200] : memref<4x512xf32, #tpu.memory_space<vmem>>, vector<1x512xf32>
      %412 = vector.shape_cast %411 : vector<1x512xf32> to vector<512xf32>
      %413 = vector.shape_cast %412 : vector<512xf32> to vector<1x512xf32>
      %414 = vector.broadcast %413 : vector<1x512xf32> to vector<32x512xf32>
      %415 = arith.mulf %410, %414 : vector<32x512xf32>
      %416 = arith.truncf %415 : vector<32x512xf32> to vector<32x512xbf16>
      %c192 = arith.constant 192 : index
      %c0_201 = arith.constant 0 : index
      %417 = vector.load %arg7[%c192, %c0_201] : memref<256x512xbf16, #tpu.memory_space<vmem>>, vector<32x512xbf16>
      tpu.vector_store %arg7[%c192, %c0_201], %416 {strides = array<i32>} : memref<256x512xbf16, #tpu.memory_space<vmem>>, vector<32x512xbf16>,
      %c28_i32 = arith.constant 28 : i32
      %418 = vector.broadcast %c28_i32 : i32 to vector<32x512xi32>
      %419 = arith.shrui %11, %418 : vector<32x512xi32>
      %c15_i32_202 = arith.constant 15 : i32
      %420 = vector.broadcast %c15_i32_202 : i32 to vector<32x512xi32>
      %421 = arith.andi %419, %420 : vector<32x512xi32>
      %c1_i32_203 = arith.constant 1 : i32
      %422 = vector.broadcast %c1_i32_203 : i32 to vector<32x512xi32>
      %423 = arith.andi %421, %422 : vector<32x512xi32>
      %c0_i32_204 = arith.constant 0 : i32
      %424 = vector.broadcast %c0_i32_204 : i32 to vector<32x512xi32>
      %425 = arith.cmpi ne, %423, %424 : vector<32x512xi32>
      %c2_i32_205 = arith.constant 2 : i32
      %426 = vector.broadcast %c2_i32_205 : i32 to vector<32x512xi32>
      %427 = arith.andi %421, %426 : vector<32x512xi32>
      %c0_i32_206 = arith.constant 0 : i32
      %428 = vector.broadcast %c0_i32_206 : i32 to vector<32x512xi32>
      %429 = arith.cmpi ne, %427, %428 : vector<32x512xi32>
      %c4_i32_207 = arith.constant 4 : i32
      %430 = vector.broadcast %c4_i32_207 : i32 to vector<32x512xi32>
      %431 = arith.andi %421, %430 : vector<32x512xi32>
      %c0_i32_208 = arith.constant 0 : i32
      %432 = vector.broadcast %c0_i32_208 : i32 to vector<32x512xi32>
      %433 = arith.cmpi ne, %431, %432 : vector<32x512xi32>
      %c8_i32_209 = arith.constant 8 : i32
      %434 = vector.broadcast %c8_i32_209 : i32 to vector<32x512xi32>
      %435 = arith.andi %421, %434 : vector<32x512xi32>
      %c0_i32_210 = arith.constant 0 : i32
      %436 = vector.broadcast %c0_i32_210 : i32 to vector<32x512xi32>
      %437 = arith.cmpi ne, %435, %436 : vector<32x512xi32>
      %cst_211 = arith.constant -0.6961928 : f32
      %cst_212 = arith.constant -1.000000e+00 : f32
      %438 = vector.broadcast %cst_211 : f32 to vector<32x512xf32>
      %439 = vector.broadcast %cst_212 : f32 to vector<32x512xf32>
      %440 = arith.select %425, %438, %439 : vector<32x512xi1>, vector<32x512xf32>
      %cst_213 = arith.constant -0.394917488 : f32
      %cst_214 = arith.constant -0.525073051 : f32
      %441 = vector.broadcast %cst_213 : f32 to vector<32x512xf32>
      %442 = vector.broadcast %cst_214 : f32 to vector<32x512xf32>
      %443 = arith.select %425, %441, %442 : vector<32x512xi1>, vector<32x512xf32>
      %cst_215 = arith.constant -0.18477343 : f32
      %cst_216 = arith.constant -0.284441382 : f32
      %444 = vector.broadcast %cst_215 : f32 to vector<32x512xf32>
      %445 = vector.broadcast %cst_216 : f32 to vector<32x512xf32>
      %446 = arith.select %425, %444, %445 : vector<32x512xi1>, vector<32x512xf32>
      %cst_217 = arith.constant 0.000000e+00 : f32
      %cst_218 = arith.constant -0.0910500362 : f32
      %447 = vector.broadcast %cst_217 : f32 to vector<32x512xf32>
      %448 = vector.broadcast %cst_218 : f32 to vector<32x512xf32>
      %449 = arith.select %425, %447, %448 : vector<32x512xi1>, vector<32x512xf32>
      %cst_219 = arith.constant 0.160930201 : f32
      %cst_220 = arith.constant 0.0795802995 : f32
      %450 = vector.broadcast %cst_219 : f32 to vector<32x512xf32>
      %451 = vector.broadcast %cst_220 : f32 to vector<32x512xf32>
      %452 = arith.select %425, %450, %451 : vector<32x512xi1>, vector<32x512xf32>
      %cst_221 = arith.constant 0.337915242 : f32
      %cst_222 = arith.constant 0.246112391 : f32
      %453 = vector.broadcast %cst_221 : f32 to vector<32x512xf32>
      %454 = vector.broadcast %cst_222 : f32 to vector<32x512xf32>
      %455 = arith.select %425, %453, %454 : vector<32x512xi1>, vector<32x512xf32>
      %cst_223 = arith.constant 5.626170e-01 : f32
      %cst_224 = arith.constant 0.440709829 : f32
      %456 = vector.broadcast %cst_223 : f32 to vector<32x512xf32>
      %457 = vector.broadcast %cst_224 : f32 to vector<32x512xf32>
      %458 = arith.select %425, %456, %457 : vector<32x512xi1>, vector<32x512xf32>
      %cst_225 = arith.constant 1.000000e+00 : f32
      %cst_226 = arith.constant 0.722956836 : f32
      %459 = vector.broadcast %cst_225 : f32 to vector<32x512xf32>
      %460 = vector.broadcast %cst_226 : f32 to vector<32x512xf32>
      %461 = arith.select %425, %459, %460 : vector<32x512xi1>, vector<32x512xf32>
      %462 = arith.select %429, %443, %440 : vector<32x512xi1>, vector<32x512xf32>
      %463 = arith.select %429, %449, %446 : vector<32x512xi1>, vector<32x512xf32>
      %464 = arith.select %429, %455, %452 : vector<32x512xi1>, vector<32x512xf32>
      %465 = arith.select %429, %461, %458 : vector<32x512xi1>, vector<32x512xf32>
      %466 = arith.select %433, %463, %462 : vector<32x512xi1>, vector<32x512xf32>
      %467 = arith.select %433, %465, %464 : vector<32x512xi1>, vector<32x512xf32>
      %468 = arith.select %437, %467, %466 : vector<32x512xi1>, vector<32x512xf32>
      %c3_227 = arith.constant 3 : index
      %c0_228 = arith.constant 0 : index
      %469 = vector.load %arg4[%c3_227, %c0_228] : memref<4x512xf32, #tpu.memory_space<vmem>>, vector<1x512xf32>
      %470 = vector.shape_cast %469 : vector<1x512xf32> to vector<512xf32>
      %471 = vector.shape_cast %470 : vector<512xf32> to vector<1x512xf32>
      %472 = vector.broadcast %471 : vector<1x512xf32> to vector<32x512xf32>
      %473 = arith.mulf %468, %472 : vector<32x512xf32>
      %474 = arith.truncf %473 : vector<32x512xf32> to vector<32x512xbf16>
      %c224 = arith.constant 224 : index
      %c0_229 = arith.constant 0 : index
      %475 = vector.load %arg7[%c224, %c0_229] : memref<256x512xbf16, #tpu.memory_space<vmem>>, vector<32x512xbf16>
      tpu.vector_store %arg7[%c224, %c0_229], %474 {strides = array<i32>} : memref<256x512xbf16, #tpu.memory_space<vmem>>, vector<32x512xbf16>,
    } else {
    }
    %c0 = arith.constant 0 : index
    %c0_1 = arith.constant 0 : index
    %3 = vector.load %arg2[%c0, %c0_1] : memref<32x256xbf16, #tpu.memory_space<vmem>>, vector<32x256xbf16>
    %c0_2 = arith.constant 0 : index
    %c0_3 = arith.constant 0 : index
    %4 = vector.load %arg7[%c0_2, %c0_3] : memref<256x512xbf16, #tpu.memory_space<vmem>>, vector<256x512xbf16>
    %cst = arith.constant dense<0.000000e+00> : vector<32x512xf32>
    %5 = tpu.matmul %3, %4, %cst {dimension_numbers = #tpu.dot_dimension_numbers<[1], [0], [0], [1], [0, 0, 1, 1], [], []>} : vector<32x256xbf16>, vector<256x512xbf16>, vector<32x512xf32> -> vector<32x512xf32>
    %c0_4 = arith.constant 0 : index
    %c0_5 = arith.constant 0 : index
    %6 = vector.load %arg5[%c0_4, %c0_5] : memref<1x512xf32, #tpu.memory_space<vmem>>, vector<1x512xf32>
    %7 = vector.broadcast %6 : vector<1x512xf32> to vector<32x512xf32>
    %8 = arith.addf %5, %7 : vector<32x512xf32>
    %c0_6 = arith.constant 0 : index
    %c0_7 = arith.constant 0 : index
    %9 = vector.load %arg6[%c0_6, %c0_7] : memref<32x512xf32, #tpu.memory_space<vmem>>, vector<32x512xf32>
    tpu.vector_store %arg6[%c0_6, %c0_7], %8 {strides = array<i32>} : memref<32x512xf32, #tpu.memory_space<vmem>>, vector<32x512xf32>,
    return
  }
  func.func @transform_0(%arg0: i32, %arg1: i32) -> (i32, i32) {
    %c0_i32 = arith.constant 0 : i32
    %c0_i32_0 = arith.constant 0 : i32
    return %arg1, %c0_i32 : i32, i32
  }
  func.func @transform_1(%arg0: i32, %arg1: i32) -> (i32, i32) {
    %c0_i32 = arith.constant 0 : i32
    %c0_i32_0 = arith.constant 0 : i32
    return %c0_i32, %arg0 : i32, i32
  }
  func.func @transform_2(%arg0: i32, %arg1: i32) -> (i32, i32) {
    %c0_i32 = arith.constant 0 : i32
    %c0_i32_0 = arith.constant 0 : i32
    return %c0_i32, %arg0 : i32, i32
  }
  func.func @transform_3(%arg0: i32, %arg1: i32) -> (i32, i32) {
    %c0_i32 = arith.constant 0 : i32
    %c0_i32_0 = arith.constant 0 : i32
    return %c0_i32, %arg0 : i32, i32
  }
  func.func @transform_4(%arg0: i32, %arg1: i32) -> (i32, i32) {
    %c0_i32 = arith.constant 0 : i32
    return %arg1, %arg0 : i32, i32
  }
}

</mosaic_0001>

<bundles_post_ra>
// kernel: tpu_custom_call.1
= control target key start
LH: loop header
LB: loop body
LE: loop exit
PB: predicated region body
PF: predicated region fallthrough
CT: control target
= control target key end

     0   :  { %9 = vsyncpa [#allocation4], 0  ;;  %s11758_s0 = inlined_call_operand.hbm [shape: bf16[32,256], index: 0, kind: input, shape index: {}]   ;;  %s11759_s1 = inlined_call_operand.hbm [shape: s32[32,512], index: 1, kind: input, shape index: {}]   ;;  %s11760_s2 = inlined_call_operand.hbm [shape: f32[4,512], index: 2, kind: input, shape index: {}]   ;;  %s11761_s3 = inlined_call_operand.vmem [shape: f32[1,512], index: 3, kind: input, shape index: {}]   ;;  %s11762_s4 = inlined_call_operand.hbm [shape: f32[32,512], index: 4, kind: output, shape index: {}]  }
   0x1   :  { %10 = vsyncpa [#allocation7], 0 }
   0x2   :  { %11 = vsyncpa [#allocation5], 0  ;;  %s4130_s15 = smov [#allocation6]   ;;  %s4036_s19 = scalar_lea.hbm %s11759_s1, 2048 }
   0x3   :  { %s29_s16 = sshll.u32 %s4130_s15, 4  ;;  %p4037_p0 = scmp.ne.s32.totalorder %s11759_s1, %s4036_s19  ;;  %s30_s16 = int_to_ptr.vmem [resolvable:$true] %s29_s16 }
   0x4   :  { %p4040_p1 = scmp.lt.u32.totalorder %s4036_s19, %s11759_s1 }
   0x6   :  { %p4042_p2 = pnand %p4040_p1, %p4037_p0 }
   0x8   :  { %4045 = shalt.err (!%p4042_p2)
}
   0x9   :  { %s4046_s24 = scalar_lea.vmem %s30_s16, 2048  ;;  %p4051_p4 = scmp.lt.s32.totalorder %s30_s16, %s30_s16 }
   0xa   :  { %p4047_p3 = scmp.ne.s32.totalorder %s30_s16, %s4046_s24  ;;  %p4052_p5 = scmp.lt.s32.totalorder %s4046_s24, %s4046_s24 }
   0xc   :  { %p4053_p6 = por %p4052_p5, %p4051_p4 }
   0xe   :  { %p4054_p7 = pnand %p4053_p6, %p4047_p3 }
  0x10   :  { %4057 = shalt.err (!%p4054_p7)
}
  0x11   :  { %s4131_s25 = smov 512   ;;  %s4132_s26 = smov 32  }
  0x12   :  { %35 = dma.hbm_to_vmem [thread:$0]  %s11759_s1, 2048, %s30_s16, [#allocation7], %s4131_s25, %s4131_s25, %s4132_s26  }
  0x13   :  { %s4133_s29 = smov [#allocation3]   ;;  %s4058_s7 = scalar_lea.hbm %s11758_s0, 512 }
  0x14   :  { %s17_s30 = sshll.u32 %s4133_s29, 4  ;;  %p4059_p8 = scmp.ne.s32.totalorder %s11758_s0, %s4058_s7  ;;  %s18_s30 = int_to_ptr.vmem [resolvable:$true] %s17_s30 }
  0x15   :  { %p4062_p9 = scmp.lt.u32.totalorder %s4058_s7, %s11758_s0 }
  0x17   :  { %p4064_p10 = pnand %p4062_p9, %p4059_p8 }
  0x19   :  { %4067 = shalt.err (!%p4064_p10)
}
  0x1a   :  { %s4068_s12 = scalar_lea.vmem %s18_s30, 512  ;;  %p4073_p12 = scmp.lt.s32.totalorder %s18_s30, %s18_s30 }
  0x1b   :  { %p4069_p11 = scmp.ne.s32.totalorder %s18_s30, %s4068_s12  ;;  %p4074_p13 = scmp.lt.s32.totalorder %s4068_s12, %s4068_s12 }
  0x1d   :  { %p4075_p0 = por %p4074_p13, %p4073_p12 }
  0x1f   :  { %p4076_p1 = pnand %p4075_p0, %p4069_p11 }
  0x21   :  { %4079 = shalt.err (!%p4076_p1)
}
  0x22   :  { %s4134_s1 = smov 128   ;;  %s4135_s13 = smov 8  }
  0x23   :  { %23 = dma.hbm_to_vmem [thread:$0]  %s11758_s0, 512, %s18_s30, [#allocation4], %s4134_s1, %s4134_s1, %s4135_s13  }
  0x24   :  { %s4136_s16 = smov [#allocation8]   ;;  %s4080_s20 = scalar_lea.hbm %s11760_s2, 256 }
  0x25   :  { %s42_s17 = sshll.u32 %s4136_s16, 4  ;;  %p4081_p2 = scmp.ne.s32.totalorder %s11760_s2, %s4080_s20  ;;  %s43_s17 = int_to_ptr.vmem [resolvable:$true] %s42_s17 }
  0x26   :  { %p4084_p3 = scmp.lt.u32.totalorder %s4080_s20, %s11760_s2 }
  0x28   :  { %p4086_p4 = pnand %p4084_p3, %p4081_p2 }
  0x2a   :  { %4089 = shalt.err (!%p4086_p4)
}
  0x2b   :  { %s4090_s27 = scalar_lea.vmem %s43_s17, 256  ;;  %p4095_p6 = scmp.lt.s32.totalorder %s43_s17, %s43_s17 }
  0x2c   :  { %p4091_p5 = scmp.ne.s32.totalorder %s43_s17, %s4090_s27  ;;  %p4096_p7 = scmp.lt.s32.totalorder %s4090_s27, %s4090_s27 }
  0x2e   :  { %p4097_p8 = por %p4096_p7, %p4095_p6 }
  0x30   :  { %p4098_p9 = pnand %p4097_p8, %p4091_p5 }
  0x32   :  { %4101 = shalt.err (!%p4098_p9)
}
  0x33   :  { %45 = dma.hbm_to_vmem [thread:$0]  %s11760_s2, 256, %s43_s17, [#allocation7]  }
  0x34   :  { %4124 = dma.done.wait [#allocation4], 512  }
  0x35   :  { %4125 = vsyncadd [#allocation4], 4294966784 }
  0x36   :  { %4126 = dma.done.wait [#allocation7], 2304  }
  0x37   :  { %4127 = vsyncadd [#allocation7], 4294964992  ;;  %v463_v0 = vlaneseq  ;;  %v4214_v4 = vld [vmem:[#allocation6 + $0x8] sm:$0xff]  ;;  %v4228_v11 = vld [vmem:[#allocation6 + $0x18] sm:$0xff]  ;;  %v4137_v35 = vmov -1.0  }
  0x38   :  { %v4216_v5 = vld [vmem:[#allocation6 + $0x28] sm:$0xff]  ;;  %v78_v8 = vand.u32 15, %v4214_v4  ;;  %v4230_v12 = vld [vmem:[#allocation6 + $0x38] sm:$0xff]  ;;  %v4232_v13 = vld [vmem:[#allocation6] sm:$0xff]  ;;  %v4237_v15 = vand.u32 15, %v4228_v11 }
  0x39   :  { %v464_v1 = vshrl.u32 %v463_v0, 7  ;;  %v4218_v6 = vld [vmem:[#allocation8] ss:$4 sm:$0xf]  ;;  %v82_v9 = vand.u32 15, %v4216_v5  ;;  %v4240_v16 = vand.u32 15, %v4230_v12 }
  0x3a   :  { %v4247_v18 = vand.u32 15, %v4232_v13  ;;  %v94_v19 = vand.u32 1, %v78_v8  ;;  %v126_v21 = vand.u32 2, %v78_v8  ;;  %v158_v23 = vand.u32 4, %v78_v8 }
  0x3b   :  { %v4210_v2 = vsub.s32 1, %v464_v1  ;;  %v4212_v3 = vsub.s32 3, %v464_v1  ;;  %v4220_v7 = vsub.s32 0, %v464_v1  ;;  %v4234_v14 = vsub.s32 2, %v464_v1 }
  0x3c   :  { %v98_v20 = vand.u32 1, %v82_v9  ;;  %v130_v22 = vand.u32 2, %v82_v9  ;;  %v162_v24 = vand.u32 4, %v82_v9  ;;  %v190_v25 = vand.u32 8, %v78_v8 }
  0x3d   :  { %v4226_v10 = vrot.slane %v4218_v6, %v4210_v2  ;;  %v4244_v17 = vrot.slane %v4218_v6, %v4212_v3  ;;  %v194_v26 = vand.u32 8, %v82_v9  ;;  %vm4249_vm0 = vcmp.ne.s32.totalorder %v94_v19, 0 }
  0x3e   :  { %vm4253_vm1 = vcmp.ne.s32.totalorder %v98_v20, 0  ;;  %vm4257_vm2 = vcmp.ne.s32.totalorder %v126_v21, 0  ;;  %vm4261_vm3 = vcmp.ne.s32.totalorder %v130_v22, 0  ;;  %vm4265_vm4 = vcmp.ne.s32.totalorder %v158_v23, 0 }
  0x3f   :  { %vm4269_vm5 = vcmp.ne.s32.totalorder %v162_v24, 0  ;;  %vm4273_vm6 = vcmp.ne.s32.totalorder %v190_v25, 0  ;;  %vm4277_vm7 = vcmp.ne.s32.totalorder %v194_v26, 0  ;;  %v222_v36 = vsel %vm4249_vm0, -0.6961928, %v4137_v35 }
  0x40   :  { %v226_v37 = vsel %vm4253_vm1, -0.6961928, %v4137_v35  ;;  %v4138_v38 = vmov -0.52507305   ;;  %v4292_v40 = vrot.slane %v4218_v6, %v4220_v7  ;;  %v4139_v42 = vmov -0.28444138  }
  0x41   :  { %v238_v39 = vsel %vm4249_vm0, -0.3949175, %v4138_v38  ;;  %v242_v41 = vsel %vm4253_vm1, -0.3949175, %v4138_v38  ;;  %v254_v43 = vsel %vm4249_vm0, -0.18477343, %v4139_v42 }
  0x42   :  { %v258_v44 = vsel %vm4253_vm1, -0.18477343, %v4139_v42  ;;  %v350_v45 = vsel %vm4257_vm2, %v238_v39, %v222_v36  ;;  %v4140_v46 = vmov -0.091050036   ;;  %v4141_v49 = vmov 0.0795803  }
  0x43   :  { %v270_v47 = vsel %vm4249_vm0, 0.0, %v4140_v46  ;;  %v274_v48 = vsel %vm4253_vm1, 0.0, %v4140_v46  ;;  %v286_v50 = vsel %vm4249_vm0, 0.1609302, %v4141_v49  ;;  %v290_v51 = vsel %vm4253_vm1, 0.1609302, %v4141_v49 }
  0x44   :  { %v4142_v52 = vmov 0.24611239   ;;  %v4143_v55 = vmov 0.44070983   ;;  %v354_v57 = vsel %vm4261_vm3, %v242_v41, %v226_v37  ;;  %v4144_v59 = vmov 0.72295684  }
  0x45   :  { %v302_v53 = vsel %vm4249_vm0, 0.33791524, %v4142_v52  ;;  %v306_v54 = vsel %vm4253_vm1, 0.33791524, %v4142_v52  ;;  %v318_v56 = vsel %vm4249_vm0, 0.562617, %v4143_v55  ;;  %v366_v62 = vsel %vm4257_vm2, %v270_v47, %v254_v43 }
  0x46   :  { %v322_v58 = vsel %vm4253_vm1, 0.562617, %v4143_v55  ;;  %v334_v60 = vsel %vm4249_vm0, 1.0, %v4144_v59  ;;  %v338_v61 = vsel %vm4253_vm1, 1.0, %v4144_v59  ;;  %v370_v63 = vsel %vm4261_vm3, %v274_v48, %v258_v44 }
  0x47   :  { %v382_v0 = vsel %vm4257_vm2, %v302_v53, %v286_v50  ;;  %v386_v1 = vsel %vm4261_vm3, %v306_v54, %v290_v51  ;;  %v398_v8 = vsel %vm4257_vm2, %v334_v60, %v318_v56  ;;  %v402_v9 = vsel %vm4261_vm3, %v338_v61, %v322_v58 }
  0x48   :  { %v414_v19 = vsel %vm4265_vm4, %v366_v62, %v350_v45  ;;  %v418_v20 = vsel %vm4269_vm5, %v370_v63, %v354_v57  ;;  %v430_v21 = vsel %vm4265_vm4, %v398_v8, %v382_v0  ;;  %v434_v22 = vsel %vm4269_vm5, %v402_v9, %v386_v1 }
  0x49   :  { %v446_v23 = vsel %vm4273_vm6, %v430_v21, %v414_v19  ;;  %v96_v24 = vand.u32 1, %v4237_v15  ;;  %v100_v25 = vand.u32 1, %v4240_v16  ;;  %v450_v26 = vsel %vm4277_vm7, %v434_v22, %v418_v20  ;;  %v4455_v20 = vld [vmem:[#allocation6 + $0x20] sm:$0xff] }
  0x4a   :  { %v484_v27 = vmul.f32 %v4226_v10, %v446_v23  ;;  %v128_v28 = vand.u32 2, %v4237_v15  ;;  %v132_v29 = vand.u32 2, %v4240_v16  ;;  %v488_v30 = vmul.f32 %v4226_v10, %v450_v26 }
  0x4b   :  { %vm4367_vm8 = vcmp.ne.s32.totalorder %v96_v24, 0  ;;  %vm4371_vm9 = vcmp.ne.s32.totalorder %v100_v25, 0  ;;  %v160_v33 = vand.u32 4, %v4237_v15  ;;  %v164_v37 = vand.u32 4, %v4240_v16 }
  0x4c   :  { %vm4376_vm10 = vcmp.ne.s32.totalorder %v128_v28, 0  ;;  %vm4380_vm11 = vcmp.ne.s32.totalorder %v132_v29, 0  ;;  %v192_v39 = vand.u32 8, %v4237_v15  ;;  %v500_v41 = vpack.c.bf16 %v488_v30, %v484_v27 }
  0x4d   :  { %vm4386_vm12 = vcmp.ne.s32.totalorder %v160_v33, 0  ;;  %v196_v44 = vand.u32 8, %v4240_v16  ;;  %v224_v45 = vsel %vm4367_vm8, -0.6961928, %v4137_v35  ;;  %vm4394_vm13 = vcmp.ne.s32.totalorder %v164_v37, 0 }
  0x4e   :  { %vm4398_vm14 = vcmp.ne.s32.totalorder %v192_v39, 0  ;;  %v228_v15 = vsel %vm4371_vm9, -0.6961928, %v4137_v35  ;;  %v240_v16 = vsel %vm4367_vm8, -0.3949175, %v4138_v38  ;;  %3806 = vmatprep.subr.bf16.mxu0 %v500_v41  ;;  %v272_v54 = vsel %vm4367_vm8, 0.0, %v4140_v46 }
  0x4f   :  { %vm4408_vm15 = vcmp.ne.s32.totalorder %v196_v44, 0  ;;  %v244_v51 = vsel %vm4371_vm9, -0.3949175, %v4138_v38  ;;  %v256_v53 = vsel %vm4367_vm8, -0.18477343, %v4139_v42  ;;  %v276_v57 = vsel %vm4371_vm9, 0.0, %v4140_v46 }
  0x50   :  { %v260_v56 = vsel %vm4371_vm9, -0.18477343, %v4139_v42  ;;  %v288_v58 = vsel %vm4367_vm8, 0.1609302, %v4141_v49  ;;  %v336_v60 = vsel %vm4367_vm8, 1.0, %v4144_v59  ;;  %v352_v0 = vsel %vm4376_vm10, %v240_v16, %v224_v45 }
  0x51   :  { %v292_v61 = vsel %vm4371_vm9, 0.1609302, %v4141_v49  ;;  %v304_v62 = vsel %vm4367_vm8, 0.33791524, %v4142_v52  ;;  %v308_v63 = vsel %vm4371_vm9, 0.33791524, %v4142_v52  ;;  %v356_v19 = vsel %vm4380_vm11, %v244_v51, %v228_v15 }
  0x52   :  { %v320_v1 = vsel %vm4367_vm8, 0.562617, %v4143_v55  ;;  %v324_v8 = vsel %vm4371_vm9, 0.562617, %v4143_v55  ;;  %v340_v9 = vsel %vm4371_vm9, 1.0, %v4144_v59  ;;  %v368_v21 = vsel %vm4376_vm10, %v272_v54, %v256_v53 }
  0x53   :  { %v372_v22 = vsel %vm4380_vm11, %v276_v57, %v260_v56  ;;  %v384_v23 = vsel %vm4376_vm10, %v304_v62, %v288_v58  ;;  %v388_v24 = vsel %vm4380_vm11, %v308_v63, %v292_v61  ;;  %v400_v25 = vsel %vm4376_vm10, %v336_v60, %v320_v1 }
  0x54   :  { %v404_v26 = vsel %vm4380_vm11, %v340_v9, %v324_v8  ;;  %v416_v27 = vsel %vm4386_vm12, %v368_v21, %v352_v0  ;;  %v420_v28 = vsel %vm4394_vm13, %v372_v22, %v356_v19  ;;  %v432_v29 = vsel %vm4386_vm12, %v400_v25, %v384_v23 }
  0x55   :  { %v436_v30 = vsel %vm4394_vm13, %v404_v26, %v388_v24  ;;  %v81_v31 = vand.u32 15, %v4455_v20  ;;  %v93_v32 = vand.u32 1, %v4247_v18  ;;  %v448_v33 = vsel %vm4398_vm14, %v432_v29, %v416_v27 }
  0x56   :  { %v452_v34 = vsel %vm4408_vm15, %v436_v30, %v420_v28  ;;  %v125_v36 = vand.u32 2, %v4247_v18  ;;  %v157_v37 = vand.u32 4, %v4247_v18  ;;  %v486_v39 = vmul.f32 %v4244_v17, %v448_v33 }
  0x57   :  { %v490_v41 = vmul.f32 %v4244_v17, %v452_v34  ;;  %v97_v43 = vand.u32 1, %v81_v31  ;;  %vm4487_vm0 = vcmp.ne.s32.totalorder %v93_v32, 0  ;;  %v129_v45 = vand.u32 2, %v81_v31  ;;  %v4578_v32 = vld [vmem:[#allocation6 + $0x30] sm:$0xff] }
  0x58   :  { %vm4491_vm1 = vcmp.ne.s32.totalorder %v125_v36, 0  ;;  %v161_v48 = vand.u32 4, %v81_v31  ;;  %vm4495_vm2 = vcmp.ne.s32.totalorder %v157_v37, 0  ;;  %v189_v51 = vand.u32 8, %v4247_v18 }
  0x59   :  { %v502_v16 = vpack.c.bf16 %v490_v41, %v486_v39  ;;  %vm4499_vm3 = vcmp.ne.s32.totalorder %v97_v43, 0  ;;  %v193_v53 = vand.u32 8, %v81_v31  ;;  %vm4504_vm4 = vcmp.ne.s32.totalorder %v129_v45, 0  ;;  %v4576_v31 = vld [vmem:[#allocation6 + $0x10] sm:$0xff]  ;;  %v4588_v39 = vld [vmem:[#allocation6 + $0x48] sm:$0xff] }
  0x5a   :  { %vm4508_vm5 = vcmp.ne.s32.totalorder %v161_v48, 0  ;;  %v221_v57 = vsel %vm4487_vm0, -0.6961928, %v4137_v35  ;;  %v225_v58 = vsel %vm4499_vm3, -0.6961928, %v4137_v35  ;;  %vm4518_vm6 = vcmp.ne.s32.totalorder %v189_v51, 0 }
  0x5b   :  { %3859 = vmatprep.subr.bf16.mxu1 %v502_v16  ;;  %vm4522_vm7 = vcmp.ne.s32.totalorder %v193_v53, 0  ;;  %v237_v61 = vsel %vm4487_vm0, -0.3949175, %v4138_v38  ;;  %v241_v62 = vsel %vm4499_vm3, -0.3949175, %v4138_v38  ;;  %v269_v1 = vsel %vm4487_vm0, 0.0, %v4140_v46 }
  0x5c   :  { %v253_v63 = vsel %vm4487_vm0, -0.18477343, %v4139_v42  ;;  %v257_v0 = vsel %vm4499_vm3, -0.18477343, %v4139_v42  ;;  %v273_v8 = vsel %vm4499_vm3, 0.0, %v4140_v46  ;;  %v349_v22 = vsel %vm4491_vm1, %v237_v61, %v221_v57  ;;  %v4590_v41 = vld [vmem:[#allocation6 + $0x68] sm:$0xff] }
  0x5d   :  { %v285_v9 = vsel %vm4487_vm0, 0.1609302, %v4141_v49  ;;  %v289_v19 = vsel %vm4499_vm3, 0.1609302, %v4141_v49  ;;  %v301_v21 = vsel %vm4487_vm0, 0.33791524, %v4142_v52  ;;  %v353_v26 = vsel %vm4504_vm4, %v241_v62, %v225_v58 }
  0x5e   :  { %v305_v23 = vsel %vm4499_vm3, 0.33791524, %v4142_v52  ;;  %v317_v24 = vsel %vm4487_vm0, 0.562617, %v4143_v55  ;;  %v321_v25 = vsel %vm4499_vm3, 0.562617, %v4143_v55  ;;  %v365_v29 = vsel %vm4491_vm1, %v269_v1, %v253_v63 }
  0x5f   :  { %v333_v27 = vsel %vm4487_vm0, 1.0, %v4144_v59  ;;  %v337_v28 = vsel %vm4499_vm3, 1.0, %v4144_v59  ;;  %v369_v30 = vsel %vm4504_vm4, %v273_v8, %v257_v0  ;;  %v381_v33 = vsel %vm4491_vm1, %v301_v21, %v285_v9 }
  0x60   :  { %v385_v34 = vsel %vm4504_vm4, %v305_v23, %v289_v19  ;;  %v397_v36 = vsel %vm4491_vm1, %v333_v27, %v317_v24  ;;  %v401_v37 = vsel %vm4504_vm4, %v337_v28, %v321_v25  ;;  %v413_v43 = vsel %vm4495_vm2, %v365_v29, %v349_v22 }
  0x61   :  { %v417_v44 = vsel %vm4508_vm5, %v369_v30, %v353_v26  ;;  %v429_v45 = vsel %vm4495_vm2, %v397_v36, %v381_v33  ;;  %v433_v47 = vsel %vm4508_vm5, %v401_v37, %v385_v34  ;;  %v79_v50 = vand.u32 15, %v4576_v31 }
  0x62   :  { %v445_v48 = vsel %vm4518_vm6, %v429_v45, %v413_v43  ;;  %v449_v16 = vsel %vm4522_vm7, %v433_v47, %v417_v44  ;;  %v83_v51 = vand.u32 15, %v4578_v32  ;;  %v4609_v15 = vand.u32 15, %v4588_v39 }
  0x63   :  { %v483_v53 = vmul.f32 %v4292_v40, %v445_v48  ;;  %v487_v54 = vmul.f32 %v4292_v40, %v449_v16  ;;  %v4612_v56 = vand.u32 15, %v4590_v41  ;;  %v95_v57 = vand.u32 1, %v79_v50 }
  0x64   :  { %v99_v58 = vand.u32 1, %v83_v51  ;;  %v127_v18 = vand.u32 2, %v79_v50  ;;  %v131_v61 = vand.u32 2, %v83_v51  ;;  %v159_v62 = vand.u32 4, %v79_v50 }
  0x65   :  { %v499_v60 = vpack.c.bf16 %v487_v54, %v483_v53  ;;  %v163_v63 = vand.u32 4, %v83_v51  ;;  %v191_v0 = vand.u32 8, %v79_v50  ;;  %vm4614_vm8 = vcmp.ne.s32.totalorder %v95_v57, 0 }
  0x66   :  { %vm4618_vm9 = vcmp.ne.s32.totalorder %v99_v58, 0  ;;  %vm4622_vm10 = vcmp.ne.s32.totalorder %v127_v18, 0  ;;  %vm4626_vm11 = vcmp.ne.s32.totalorder %v131_v61, 0  ;;  %vm4630_vm12 = vcmp.ne.s32.totalorder %v159_v62, 0 }
  0x67   :  { %3807 = vmatpush1.bf16.msra.mxu0 %v499_v60  ;;  %vm4634_vm13 = vcmp.ne.s32.totalorder %v163_v63, 0  ;;  %v195_v23 = vand.u32 8, %v83_v51  ;;  %vm4638_vm14 = vcmp.ne.s32.totalorder %v191_v0, 0  ;;  %v223_v25 = vsel %vm4614_vm8, -0.6961928, %v4137_v35 }
  0x68   :  { %v227_v26 = vsel %vm4618_vm9, -0.6961928, %v4137_v35  ;;  %v239_v27 = vsel %vm4614_vm8, -0.3949175, %v4138_v38  ;;  %v4653_v28 = vrot.slane %v4218_v6, %v4234_v14  ;;  %v243_v30 = vsel %vm4618_vm9, -0.3949175, %v4138_v38 }
  0x69   :  { %vm4655_vm15 = vcmp.ne.s32.totalorder %v195_v23, 0  ;;  %v255_v33 = vsel %vm4614_vm8, -0.18477343, %v4139_v42  ;;  %v271_v34 = vsel %vm4614_vm8, 0.0, %v4140_v46  ;;  %v259_v6 = vsel %vm4618_vm9, -0.18477343, %v4139_v42 }
  0x6a   :  { %v275_v36 = vsel %vm4618_vm9, 0.0, %v4140_v46  ;;  %v287_v37 = vsel %vm4614_vm8, 0.1609302, %v4141_v49  ;;  %v335_v43 = vsel %vm4614_vm8, 1.0, %v4144_v59  ;;  %v291_v44 = vsel %vm4618_vm9, 0.1609302, %v4141_v49 }
  0x6b   :  { %v303_v45 = vsel %vm4614_vm8, 0.33791524, %v4142_v52  ;;  %v307_v47 = vsel %vm4618_vm9, 0.33791524, %v4142_v52  ;;  %v351_v48 = vsel %vm4622_vm10, %v239_v27, %v223_v25  ;;  %v319_v16 = vsel %vm4614_vm8, 0.562617, %v4143_v55 }
  0x6c   :  { %v323_v50 = vsel %vm4618_vm9, 0.562617, %v4143_v55  ;;  %v339_v51 = vsel %vm4618_vm9, 1.0, %v4144_v59  ;;  %v355_v53 = vsel %vm4626_vm11, %v243_v30, %v227_v26  ;;  %v367_v54 = vsel %vm4622_vm10, %v271_v34, %v255_v33 }
  0x6d   :  { %v371_v57 = vsel %vm4626_vm11, %v275_v36, %v259_v6  ;;  %v383_v58 = vsel %vm4622_vm10, %v303_v45, %v287_v37  ;;  %v387_v18 = vsel %vm4626_vm11, %v307_v47, %v291_v44  ;;  %v399_v61 = vsel %vm4622_vm10, %v335_v43, %v319_v16 }
  0x6e   :  { %v403_v60 = vsel %vm4626_vm11, %v339_v51, %v323_v50  ;;  %v415_v62 = vsel %vm4630_vm12, %v367_v54, %v351_v48  ;;  %v419_v63 = vsel %vm4634_vm13, %v371_v57, %v355_v53  ;;  %v431_v0 = vsel %vm4630_vm12, %v399_v61, %v383_v58  ;;  %v4795_v58 = vld [vmem:[#allocation6 + $0x58] sm:$0xff] }
  0x6f   :  { %v435_v1 = vsel %vm4634_vm13, %v403_v60, %v387_v18  ;;  %v102_v8 = vand.u32 1, %v4609_v15  ;;  %v106_v9 = vand.u32 1, %v4612_v56  ;;  %v447_v19 = vsel %vm4638_vm14, %v431_v0, %v415_v62 }
  0x70   :  { %v451_v23 = vsel %vm4655_vm15, %v435_v1, %v419_v63  ;;  %v134_v25 = vand.u32 2, %v4609_v15  ;;  %v138_v26 = vand.u32 2, %v4612_v56  ;;  %v485_v21 = vmul.f32 %v4653_v28, %v447_v19 }
  0x71   :  { %v489_v27 = vmul.f32 %v4653_v28, %v451_v23  ;;  %vm4732_vm0 = vcmp.ne.s32.totalorder %v102_v8, 0  ;;  %vm4736_vm1 = vcmp.ne.s32.totalorder %v106_v9, 0  ;;  %v166_v33 = vand.u32 4, %v4609_v15 }
  0x72   :  { %vm4740_vm2 = vcmp.ne.s32.totalorder %v134_v25, 0  ;;  %vm4744_vm3 = vcmp.ne.s32.totalorder %v138_v26, 0  ;;  %v170_v34 = vand.u32 4, %v4612_v56  ;;  %v198_v36 = vand.u32 8, %v4609_v15  ;;  %v4828_v26 = vld [vmem:[#allocation6 + $0x78] sm:$0xff] }
  0x73   :  { %v501_v6 = vpack.c.bf16 %v489_v27, %v485_v21  ;;  %v202_v37 = vand.u32 8, %v4612_v56  ;;  %v230_v43 = vsel %vm4732_vm0, -0.6961928, %v4137_v35  ;;  %vm4755_vm4 = vcmp.ne.s32.totalorder %v166_v33, 0  ;;  %v4830_v21 = vld [vmem:[#allocation6 + $0x40] sm:$0xff] }
  0x74   :  { %vm4759_vm5 = vcmp.ne.s32.totalorder %v170_v34, 0  ;;  %v234_v47 = vsel %vm4736_vm1, -0.6961928, %v4137_v35  ;;  %v246_v15 = vsel %vm4732_vm0, -0.3949175, %v4138_v38  ;;  %vm4769_vm6 = vcmp.ne.s32.totalorder %v198_v36, 0 }
  0x75   :  { %3860 = vmatpush1.bf16.msra.mxu1 %v501_v6  ;;  %vm4773_vm7 = vcmp.ne.s32.totalorder %v202_v37, 0  ;;  %v250_v16 = vsel %vm4736_vm1, -0.3949175, %v4138_v38  ;;  %v262_v50 = vsel %vm4732_vm0, -0.18477343, %v4139_v42  ;;  %v278_v53 = vsel %vm4732_vm0, 0.0, %v4140_v46 }
  0x76   :  { %v266_v51 = vsel %vm4736_vm1, -0.18477343, %v4139_v42  ;;  %v282_v54 = vsel %vm4736_vm1, 0.0, %v4140_v46  ;;  %v294_v57 = vsel %vm4732_vm0, 0.1609302, %v4141_v49  ;;  %v358_v62 = vsel %vm4740_vm2, %v246_v15, %v230_v43 }
  0x77   :  { %v298_v18 = vsel %vm4736_vm1, 0.1609302, %v4141_v49  ;;  %v310_v61 = vsel %vm4732_vm0, 0.33791524, %v4142_v52  ;;  %v314_v60 = vsel %vm4736_vm1, 0.33791524, %v4142_v52  ;;  %v362_v9 = vsel %vm4744_vm3, %v250_v16, %v234_v47 }
  0x78   :  { %v326_v63 = vsel %vm4732_vm0, 0.562617, %v4143_v55  ;;  %v330_v0 = vsel %vm4736_vm1, 0.562617, %v4143_v55  ;;  %v342_v1 = vsel %vm4732_vm0, 1.0, %v4144_v59  ;;  %v346_v8 = vsel %vm4736_vm1, 1.0, %v4144_v59 }
  0x79   :  { %v374_v19 = vsel %vm4740_vm2, %v278_v53, %v262_v50  ;;  %v378_v23 = vsel %vm4744_vm3, %v282_v54, %v266_v51  ;;  %v390_v25 = vsel %vm4740_vm2, %v310_v61, %v294_v57  ;;  %v394_v27 = vsel %vm4744_vm3, %v314_v60, %v298_v18 }
  0x7a   :  { %v406_v22 = vsel %vm4740_vm2, %v342_v1, %v326_v63  ;;  %v410_v30 = vsel %vm4744_vm3, %v346_v8, %v330_v0  ;;  %v422_v33 = vsel %vm4755_vm4, %v374_v19, %v358_v62  ;;  %v426_v34 = vsel %vm4759_vm5, %v378_v23, %v362_v9 }
  0x7b   :  { %v438_v6 = vsel %vm4755_vm4, %v406_v22, %v390_v25  ;;  %v442_v36 = vsel %vm4759_vm5, %v410_v30, %v394_v27  ;;  %v88_v37 = vand.u32 15, %v4795_v58  ;;  %v92_v43 = vand.u32 15, %v4828_v26 }
  0x7c   :  { %v454_v24 = vsel %vm4769_vm6, %v438_v6, %v422_v33  ;;  %v458_v29 = vsel %vm4773_vm7, %v442_v36, %v426_v34  ;;  %v4853_v47 = vand.u32 15, %v4830_v21 }
  0x7d   :  { %v492_v15 = vmul.f32 %v4226_v10, %v454_v24  ;;  %v496_v44 = vmul.f32 %v4226_v10, %v458_v29  ;;  %v104_v16 = vand.u32 1, %v88_v37  ;;  %v136_v45 = vand.u32 2, %v88_v37 }
  0x7e   :  { %v108_v50 = vand.u32 1, %v92_v43  ;;  %v140_v51 = vand.u32 2, %v92_v43  ;;  %v168_v53 = vand.u32 4, %v88_v37  ;;  %v172_v54 = vand.u32 4, %v92_v43 }
  0x7f   :  { %v504_v56 = vpack.c.bf16 %v496_v44, %v492_v15  ;;  %vm4857_vm8 = vcmp.ne.s32.totalorder %v104_v16, 0  ;;  %vm4861_vm9 = vcmp.ne.s32.totalorder %v136_v45, 0  ;;  %v200_v18 = vand.u32 8, %v88_v37 }
  0x80   :  { %vm4865_vm10 = vcmp.ne.s32.totalorder %v108_v50, 0  ;;  %vm4869_vm11 = vcmp.ne.s32.totalorder %v140_v51, 0  ;;  %vm4873_vm12 = vcmp.ne.s32.totalorder %v168_v53, 0  ;;  %vm4877_vm13 = vcmp.ne.s32.totalorder %v172_v54, 0  ;;  %v4945_v50 = vld [vmem:[#allocation6 + $0x60] sm:$0xff] }
  0x81   :  { %3808 = vmatprep.subr.bf16.mxu0 %v504_v56  ;;  %v204_v63 = vand.u32 8, %v92_v43  ;;  %vm4881_vm14 = vcmp.ne.s32.totalorder %v200_v18, 0  ;;  %v232_v1 = vsel %vm4857_vm8, -0.6961928, %v4137_v35  ;;  %v236_v8 = vsel %vm4865_vm10, -0.6961928, %v4137_v35 }
  0x82   :  { %v248_v9 = vsel %vm4857_vm8, -0.3949175, %v4138_v38  ;;  %v252_v19 = vsel %vm4865_vm10, -0.3949175, %v4138_v38  ;;  %v264_v23 = vsel %vm4857_vm8, -0.18477343, %v4139_v42 }
  0x83   :  { %vm4900_vm15 = vcmp.ne.s32.totalorder %v204_v63, 0  ;;  %v268_v27 = vsel %vm4865_vm10, -0.18477343, %v4139_v42  ;;  %v280_v22 = vsel %vm4857_vm8, 0.0, %v4140_v46  ;;  %v284_v30 = vsel %vm4865_vm10, 0.0, %v4140_v46 }
  0x84   :  { %v296_v33 = vsel %vm4857_vm8, 0.1609302, %v4141_v49  ;;  %v300_v34 = vsel %vm4865_vm10, 0.1609302, %v4141_v49  ;;  %v312_v6 = vsel %vm4857_vm8, 0.33791524, %v4142_v52  ;;  %v360_v36 = vsel %vm4861_vm9, %v248_v9, %v232_v1 }
  0x85   :  { %v316_v37 = vsel %vm4865_vm10, 0.33791524, %v4142_v52  ;;  %v328_v24 = vsel %vm4857_vm8, 0.562617, %v4143_v55  ;;  %v332_v29 = vsel %vm4865_vm10, 0.562617, %v4143_v55  ;;  %v364_v43 = vsel %vm4869_vm11, %v252_v19, %v236_v8 }
  0x86   :  { %v344_v15 = vsel %vm4857_vm8, 1.0, %v4144_v59  ;;  %v348_v44 = vsel %vm4865_vm10, 1.0, %v4144_v59  ;;  %v376_v16 = vsel %vm4861_vm9, %v280_v22, %v264_v23  ;;  %v380_v45 = vsel %vm4869_vm11, %v284_v30, %v268_v27 }
  0x87   :  { %v392_v51 = vsel %vm4861_vm9, %v312_v6, %v296_v33  ;;  %v396_v53 = vsel %vm4869_vm11, %v316_v37, %v300_v34  ;;  %v408_v54 = vsel %vm4861_vm9, %v344_v15, %v328_v24  ;;  %v412_v56 = vsel %vm4869_vm11, %v348_v44, %v332_v29 }
  0x88   :  { %v424_v57 = vsel %vm4873_vm12, %v376_v16, %v360_v36  ;;  %v428_v18 = vsel %vm4877_vm13, %v380_v45, %v364_v43  ;;  %v440_v61 = vsel %vm4873_vm12, %v408_v54, %v392_v51  ;;  %v444_v63 = vsel %vm4877_vm13, %v412_v56, %v396_v53 }
  0x89   :  { %v456_v1 = vsel %vm4881_vm14, %v440_v61, %v424_v57  ;;  %v460_v48 = vsel %vm4900_vm15, %v444_v63, %v428_v18  ;;  %v89_v10 = vand.u32 15, %v4945_v50  ;;  %v101_v8 = vand.u32 1, %v4853_v47  ;;  %v5035_v57 = vld [vmem:[#allocation6 + $0x50] sm:$0xff] }
  0x8a   :  { %v494_v9 = vmul.f32 %v4244_v17, %v456_v1  ;;  %v498_v19 = vmul.f32 %v4244_v17, %v460_v48  ;;  %v133_v60 = vand.u32 2, %v4853_v47  ;;  %v165_v23 = vand.u32 4, %v4853_v47  ;;  %v5037_v18 = vld [vmem:[#allocation6 + $0x70] sm:$0xff] }
  0x8b   :  { %v105_v62 = vand.u32 1, %v89_v10  ;;  %vm4973_vm0 = vcmp.ne.s32.totalorder %v101_v8, 0  ;;  %v137_v0 = vand.u32 2, %v89_v10  ;;  %v169_v25 = vand.u32 4, %v89_v10 }
  0x8c   :  { %v506_v22 = vpack.c.bf16 %v498_v19, %v494_v9  ;;  %vm4977_vm1 = vcmp.ne.s32.totalorder %v133_v60, 0  ;;  %vm4981_vm2 = vcmp.ne.s32.totalorder %v165_v23, 0  ;;  %v197_v17 = vand.u32 8, %v4853_v47 }
  0x8d   :  { %vm4986_vm3 = vcmp.ne.s32.totalorder %v105_v62, 0  ;;  %vm4990_vm4 = vcmp.ne.s32.totalorder %v137_v0, 0  ;;  %vm4994_vm5 = vcmp.ne.s32.totalorder %v169_v25, 0  ;;  %v201_v37 = vand.u32 8, %v89_v10 }
  0x8e   :  { %3861 = vmatprep.subr.bf16.mxu1 %v506_v22  ;;  %vm4998_vm6 = vcmp.ne.s32.totalorder %v197_v17, 0  ;;  %v229_v47 = vsel %vm4973_vm0, -0.6961928, %v4137_v35  ;;  %v233_v29 = vsel %vm4986_vm3, -0.6961928, %v4137_v35  ;;  %v277_v43 = vsel %vm4973_vm0, 0.0, %v4140_v46 }
  0x8f   :  { %vm5011_vm7 = vcmp.ne.s32.totalorder %v201_v37, 0  ;;  %v245_v44 = vsel %vm4973_vm0, -0.3949175, %v4138_v38  ;;  %v249_v16 = vsel %vm4986_vm3, -0.3949175, %v4138_v38  ;;  %v281_v45 = vsel %vm4986_vm3, 0.0, %v4140_v46 }
  0x90   :  { %v261_v51 = vsel %vm4973_vm0, -0.18477343, %v4139_v42  ;;  %v265_v53 = vsel %vm4986_vm3, -0.18477343, %v4139_v42  ;;  %v293_v54 = vsel %vm4973_vm0, 0.1609302, %v4141_v49  ;;  %v357_v56 = vsel %vm4977_vm1, %v245_v44, %v229_v47 }
  0x91   :  { %v297_v61 = vsel %vm4986_vm3, 0.1609302, %v4141_v49  ;;  %v309_v63 = vsel %vm4973_vm0, 0.33791524, %v4142_v52  ;;  %v313_v1 = vsel %vm4986_vm3, 0.33791524, %v4142_v52  ;;  %v361_v48 = vsel %vm4990_vm4, %v249_v16, %v233_v29 }
  0x92   :  { %v325_v10 = vsel %vm4973_vm0, 0.562617, %v4143_v55  ;;  %v329_v8 = vsel %vm4986_vm3, 0.562617, %v4143_v55  ;;  %v341_v9 = vsel %vm4973_vm0, 1.0, %v4144_v59  ;;  %v345_v19 = vsel %vm4986_vm3, 1.0, %v4144_v59 }
  0x93   :  { %v373_v60 = vsel %vm4977_vm1, %v277_v43, %v261_v51  ;;  %v377_v23 = vsel %vm4990_vm4, %v281_v45, %v265_v53  ;;  %v389_v62 = vsel %vm4977_vm1, %v309_v63, %v293_v54  ;;  %v393_v0 = vsel %vm4990_vm4, %v313_v1, %v297_v61 }
  0x94   :  { %v405_v27 = vsel %vm4977_vm1, %v341_v9, %v325_v10  ;;  %v409_v25 = vsel %vm4990_vm4, %v345_v19, %v329_v8  ;;  %v421_v22 = vsel %vm4981_vm2, %v373_v60, %v357_v56  ;;  %v425_v17 = vsel %vm4994_vm5, %v377_v23, %v361_v48 }
  0x95   :  { %v437_v34 = vsel %vm4981_vm2, %v405_v27, %v389_v62  ;;  %v441_v37 = vsel %vm4994_vm5, %v409_v25, %v393_v0  ;;  %v87_v47 = vand.u32 15, %v5035_v57  ;;  %v91_v30 = vand.u32 15, %v5037_v18  ;;  %v5204_v62 = vld [vmem:[#allocation8] ss:$4 sm:$0xf] }
  0x96   :  { %v453_v6 = vsel %vm4998_vm6, %v437_v34, %v421_v22  ;;  %v457_v29 = vsel %vm5011_vm7, %v441_v37, %v425_v17  ;;  %v516_v43 = vshrl.u32 %v4214_v4, 4  ;;  %v520_v44 = vshrl.u32 %v4216_v5, 4 }
  0x97   :  { %v491_v33 = vmul.f32 %v4292_v40, %v453_v6  ;;  %v495_v16 = vmul.f32 %v4292_v40, %v457_v29  ;;  %v103_v36 = vand.u32 1, %v87_v47  ;;  %v107_v45 = vand.u32 1, %v91_v30 }
  0x98   :  { %v135_v51 = vand.u32 2, %v87_v47  ;;  %v139_v53 = vand.u32 2, %v91_v30  ;;  %v167_v54 = vand.u32 4, %v87_v47  ;;  %v171_v56 = vand.u32 4, %v91_v30 }
  0x99   :  { %v503_v61 = vpack.c.bf16 %v495_v16, %v491_v33  ;;  %vm5092_vm8 = vcmp.ne.s32.totalorder %v103_v36, 0  ;;  %vm5096_vm9 = vcmp.ne.s32.totalorder %v107_v45, 0  ;;  %v199_v4 = vand.u32 8, %v87_v47 }
  0x9a   :  { %vm5100_vm10 = vcmp.ne.s32.totalorder %v135_v51, 0  ;;  %vm5104_vm11 = vcmp.ne.s32.totalorder %v139_v53, 0  ;;  %vm5108_vm12 = vcmp.ne.s32.totalorder %v167_v54, 0  ;;  %vm5112_vm13 = vcmp.ne.s32.totalorder %v171_v56, 0 }
  0x9b   :  { %3809 = vmatpush1.bf16.msra.mxu0 %v503_v61  ;;  %v203_v48 = vand.u32 8, %v91_v30  ;;  %vm5116_vm14 = vcmp.ne.s32.totalorder %v199_v4, 0  ;;  %v231_v8 = vsel %vm5092_vm8, -0.6961928, %v4137_v35  ;;  %v235_v9 = vsel %vm5096_vm9, -0.6961928, %v4137_v35 }
  0x9c   :  { %v247_v19 = vsel %vm5092_vm8, -0.3949175, %v4138_v38  ;;  %v251_v60 = vsel %vm5096_vm9, -0.3949175, %v4138_v38  ;;  %v263_v23 = vsel %vm5092_vm8, -0.18477343, %v4139_v42 }
  0x9d   :  { %vm5135_vm15 = vcmp.ne.s32.totalorder %v203_v48, 0  ;;  %v267_v0 = vsel %vm5096_vm9, -0.18477343, %v4139_v42  ;;  %v279_v27 = vsel %vm5092_vm8, 0.0, %v4140_v46  ;;  %v283_v25 = vsel %vm5096_vm9, 0.0, %v4140_v46 }
  0x9e   :  { %v295_v22 = vsel %vm5092_vm8, 0.1609302, %v4141_v49  ;;  %v299_v17 = vsel %vm5096_vm9, 0.1609302, %v4141_v49  ;;  %v311_v34 = vsel %vm5092_vm8, 0.33791524, %v4142_v52  ;;  %v359_v37 = vsel %vm5100_vm10, %v247_v19, %v231_v8 }
  0x9f   :  { %v315_v47 = vsel %vm5096_vm9, 0.33791524, %v4142_v52  ;;  %v327_v30 = vsel %vm5092_vm8, 0.562617, %v4143_v55  ;;  %v331_v6 = vsel %vm5096_vm9, 0.562617, %v4143_v55  ;;  %v363_v29 = vsel %vm5104_vm11, %v251_v60, %v235_v9 }
  0xa0   :  { %v343_v33 = vsel %vm5092_vm8, 1.0, %v4144_v59  ;;  %v347_v16 = vsel %vm5096_vm9, 1.0, %v4144_v59  ;;  %v375_v36 = vsel %vm5100_vm10, %v279_v27, %v263_v23  ;;  %v379_v45 = vsel %vm5104_vm11, %v283_v25, %v267_v0 }
  0xa1   :  { %v391_v51 = vsel %vm5100_vm10, %v311_v34, %v295_v22  ;;  %v395_v53 = vsel %vm5104_vm11, %v315_v47, %v299_v17  ;;  %v407_v54 = vsel %vm5100_vm10, %v343_v33, %v327_v30  ;;  %v411_v56 = vsel %vm5104_vm11, %v347_v16, %v331_v6 }
  0xa2   :  { %v423_v61 = vsel %vm5108_vm12, %v375_v36, %v359_v37  ;;  %v427_v24 = vsel %vm5112_vm13, %v379_v45, %v363_v29  ;;  %v439_v15 = vsel %vm5108_vm12, %v407_v54, %v391_v51  ;;  %v443_v4 = vsel %vm5112_vm13, %v411_v56, %v395_v53 }
  0xa3   :  { %v455_v48 = vsel %vm5116_vm14, %v439_v15, %v423_v61  ;;  %v459_v5 = vsel %vm5135_vm15, %v443_v4, %v427_v24  ;;  %v532_v40 = vand.u32 15, %v516_v43  ;;  %v536_v8 = vand.u32 15, %v520_v44 }
  0xa4   :  { %v493_v9 = vmul.f32 %v4653_v28, %v455_v48  ;;  %v497_v19 = vmul.f32 %v4653_v28, %v459_v5  ;;  %v518_v60 = vshrl.u32 %v4228_v11, 4  ;;  %v522_v63 = vshrl.u32 %v4230_v12, 4 }
  0xa5   :  { %v548_v23 = vand.u32 1, %v532_v40  ;;  %v552_v0 = vand.u32 1, %v536_v8  ;;  %v580_v1 = vand.u32 2, %v532_v40  ;;  %v584_v27 = vand.u32 2, %v536_v8 }
  0xa6   :  { %v505_v25 = vpack.c.bf16 %v497_v19, %v493_v9  ;;  %v612_v10 = vand.u32 4, %v532_v40  ;;  %v616_v22 = vand.u32 4, %v536_v8  ;;  %v644_v17 = vand.u32 8, %v532_v40 }
  0xa7   :  { %vm5206_vm0 = vcmp.ne.s32.totalorder %v548_v23, 0  ;;  %vm5210_vm1 = vcmp.ne.s32.totalorder %v552_v0, 0  ;;  %vm5214_vm2 = vcmp.ne.s32.totalorder %v580_v1, 0  ;;  %vm5218_vm3 = vcmp.ne.s32.totalorder %v584_v27, 0 }
  0xa8   :  { %3862 = vmatpush1.bf16.msra.mxu1 %v505_v25  ;;  %vm5222_vm4 = vcmp.ne.s32.totalorder %v612_v10, 0  ;;  %vm5226_vm5 = vcmp.ne.s32.totalorder %v616_v22, 0  ;;  %v648_v37 = vand.u32 8, %v536_v8  ;;  %vm5230_vm6 = vcmp.ne.s32.totalorder %v644_v17, 0 }
  0xa9   :  { %v676_v30 = vsel %vm5206_vm0, -0.6961928, %v4137_v35  ;;  %v680_v6 = vsel %vm5210_vm1, -0.6961928, %v4137_v35  ;;  %v692_v29 = vsel %vm5206_vm0, -0.3949175, %v4138_v38  ;;  %v5245_v33 = vrot.slane %v5204_v62, %v4210_v2 }
  0xaa   :  { %vm5247_vm7 = vcmp.ne.s32.totalorder %v648_v37, 0  ;;  %v696_v36 = vsel %vm5210_vm1, -0.3949175, %v4138_v38  ;;  %v708_v45 = vsel %vm5206_vm0, -0.18477343, %v4139_v42  ;;  %v724_v51 = vsel %vm5206_vm0, 0.0, %v4140_v46 }
  0xab   :  { %v712_v53 = vsel %vm5210_vm1, -0.18477343, %v4139_v42  ;;  %v728_v54 = vsel %vm5210_vm1, 0.0, %v4140_v46  ;;  %v740_v56 = vsel %vm5206_vm0, 0.1609302, %v4141_v49  ;;  %v788_v61 = vsel %vm5206_vm0, 1.0, %v4144_v59 }
  0xac   :  { %v744_v24 = vsel %vm5210_vm1, 0.1609302, %v4141_v49  ;;  %v756_v15 = vsel %vm5206_vm0, 0.33791524, %v4142_v52  ;;  %v760_v4 = vsel %vm5210_vm1, 0.33791524, %v4142_v52  ;;  %v804_v48 = vsel %vm5214_vm2, %v692_v29, %v676_v30 }
  0xad   :  { %v772_v5 = vsel %vm5206_vm0, 0.562617, %v4143_v55  ;;  %v776_v40 = vsel %vm5210_vm1, 0.562617, %v4143_v55  ;;  %v792_v8 = vsel %vm5210_vm1, 1.0, %v4144_v59  ;;  %v808_v9 = vsel %vm5218_vm3, %v696_v36, %v680_v6 }
  0xae   :  { %v820_v19 = vsel %vm5214_vm2, %v724_v51, %v708_v45  ;;  %v824_v23 = vsel %vm5218_vm3, %v728_v54, %v712_v53  ;;  %v836_v0 = vsel %vm5214_vm2, %v756_v15, %v740_v56  ;;  %v840_v1 = vsel %vm5218_vm3, %v760_v4, %v744_v24 }
  0xaf   :  { %v852_v27 = vsel %vm5214_vm2, %v788_v61, %v772_v5  ;;  %v856_v25 = vsel %vm5218_vm3, %v792_v8, %v776_v40  ;;  %v868_v10 = vsel %vm5222_vm4, %v820_v19, %v804_v48  ;;  %v872_v22 = vsel %vm5226_vm5, %v824_v23, %v808_v9 }
  0xb0   :  { %v884_v17 = vsel %vm5222_vm4, %v852_v27, %v836_v0  ;;  %v888_v43 = vsel %vm5226_vm5, %v856_v25, %v840_v1  ;;  %v534_v28 = vand.u32 15, %v518_v60  ;;  %v538_v37 = vand.u32 15, %v522_v63 }
  0xb1   :  { %v900_v11 = vsel %vm5230_vm6, %v884_v17, %v868_v10  ;;  %v904_v12 = vsel %vm5247_vm7, %v888_v43, %v872_v22  ;;  %v515_v30 = vshrl.u32 %v4232_v13, 4  ;;  %v519_v6 = vshrl.u32 %v4455_v20, 4 }
  0xb2   :  { %v938_v29 = vmul.f32 %v5245_v33, %v900_v11  ;;  %v942_v44 = vmul.f32 %v5245_v33, %v904_v12  ;;  %v550_v36 = vand.u32 1, %v534_v28  ;;  %v554_v45 = vand.u32 1, %v538_v37 }
  0xb3   :  { %v582_v34 = vand.u32 2, %v534_v28  ;;  %v586_v51 = vand.u32 2, %v538_v37  ;;  %v614_v60 = vand.u32 4, %v534_v28  ;;  %v618_v63 = vand.u32 4, %v538_v37 }
  0xb4   :  { %v954_v53 = vpack.c.bf16 %v942_v44, %v938_v29  ;;  %vm5322_vm8 = vcmp.ne.s32.totalorder %v550_v36, 0  ;;  %vm5326_vm9 = vcmp.ne.s32.totalorder %v554_v45, 0  ;;  %v646_v13 = vand.u32 8, %v534_v28 }
  0xb5   :  { %vm5330_vm10 = vcmp.ne.s32.totalorder %v582_v34, 0  ;;  %vm5334_vm11 = vcmp.ne.s32.totalorder %v586_v51, 0  ;;  %vm5338_vm12 = vcmp.ne.s32.totalorder %v614_v60, 0  ;;  %vm5342_vm13 = vcmp.ne.s32.totalorder %v618_v63, 0 }
  0xb6   :  { %3810 = vmatprep.subr.bf16.mxu0 %v954_v53  ;;  %v650_v24 = vand.u32 8, %v538_v37  ;;  %vm5346_vm14 = vcmp.ne.s32.totalorder %v646_v13, 0  ;;  %v678_v4 = vsel %vm5322_vm8, -0.6961928, %v4137_v35  ;;  %v682_v48 = vsel %vm5326_vm9, -0.6961928, %v4137_v35 }
  0xb7   :  { %v694_v5 = vsel %vm5322_vm8, -0.3949175, %v4138_v38  ;;  %v698_v40 = vsel %vm5326_vm9, -0.3949175, %v4138_v38  ;;  %v710_v8 = vsel %vm5322_vm8, -0.18477343, %v4139_v42  ;;  %v5367_v9 = vrot.slane %v5204_v62, %v4212_v3 }
  0xb8   :  { %vm5369_vm15 = vcmp.ne.s32.totalorder %v650_v24, 0  ;;  %v714_v23 = vsel %vm5326_vm9, -0.18477343, %v4139_v42  ;;  %v726_v0 = vsel %vm5322_vm8, 0.0, %v4140_v46  ;;  %v730_v1 = vsel %vm5326_vm9, 0.0, %v4140_v46 }
  0xb9   :  { %v742_v27 = vsel %vm5322_vm8, 0.1609302, %v4141_v49  ;;  %v746_v25 = vsel %vm5326_vm9, 0.1609302, %v4141_v49  ;;  %v758_v10 = vsel %vm5322_vm8, 0.33791524, %v4142_v52  ;;  %v806_v22 = vsel %vm5330_vm10, %v694_v5, %v678_v4 }
  0xba   :  { %v762_v17 = vsel %vm5326_vm9, 0.33791524, %v4142_v52  ;;  %v774_v43 = vsel %vm5322_vm8, 0.562617, %v4143_v55  ;;  %v778_v28 = vsel %vm5326_vm9, 0.562617, %v4143_v55  ;;  %v810_v37 = vsel %vm5334_vm11, %v698_v40, %v682_v48 }
  0xbb   :  { %v790_v11 = vsel %vm5322_vm8, 1.0, %v4144_v59  ;;  %v794_v12 = vsel %vm5326_vm9, 1.0, %v4144_v59  ;;  %v822_v29 = vsel %vm5330_vm10, %v726_v0, %v710_v8  ;;  %v826_v44 = vsel %vm5334_vm11, %v730_v1, %v714_v23 }
  0xbc   :  { %v838_v36 = vsel %vm5330_vm10, %v758_v10, %v742_v27  ;;  %v842_v45 = vsel %vm5334_vm11, %v762_v17, %v746_v25  ;;  %v854_v34 = vsel %vm5330_vm10, %v790_v11, %v774_v43  ;;  %v858_v51 = vsel %vm5334_vm11, %v794_v12, %v778_v28 }
  0xbd   :  { %v870_v60 = vsel %vm5338_vm12, %v822_v29, %v806_v22  ;;  %v874_v63 = vsel %vm5342_vm13, %v826_v44, %v810_v37  ;;  %v886_v53 = vsel %vm5338_vm12, %v854_v34, %v838_v36  ;;  %v890_v47 = vsel %vm5342_vm13, %v858_v51, %v842_v45 }
  0xbe   :  { %v902_v16 = vsel %vm5346_vm14, %v886_v53, %v870_v60  ;;  %v906_v13 = vsel %vm5369_vm15, %v890_v47, %v874_v63  ;;  %v531_v20 = vand.u32 15, %v515_v30  ;;  %v535_v54 = vand.u32 15, %v519_v6 }
  0xbf   :  { %v940_v24 = vmul.f32 %v5367_v9, %v902_v16  ;;  %v944_v4 = vmul.f32 %v5367_v9, %v906_v13  ;;  %v517_v48 = vshrl.u32 %v4576_v31, 4  ;;  %v521_v56 = vshrl.u32 %v4578_v32, 4 }
  0xc0   :  { %v547_v5 = vand.u32 1, %v531_v20  ;;  %v551_v40 = vand.u32 1, %v535_v54  ;;  %v579_v61 = vand.u32 2, %v531_v20  ;;  %v583_v8 = vand.u32 2, %v535_v54 }
  0xc1   :  { %v956_v23 = vpack.c.bf16 %v944_v4, %v940_v24  ;;  %v611_v15 = vand.u32 4, %v531_v20  ;;  %v615_v0 = vand.u32 4, %v535_v54  ;;  %v643_v1 = vand.u32 8, %v531_v20 }
  0xc2   :  { %vm5438_vm0 = vcmp.ne.s32.totalorder %v547_v5, 0  ;;  %vm5442_vm1 = vcmp.ne.s32.totalorder %v551_v40, 0  ;;  %vm5446_vm2 = vcmp.ne.s32.totalorder %v579_v61, 0  ;;  %vm5450_vm3 = vcmp.ne.s32.totalorder %v583_v8, 0 }
  0xc3   :  { %3863 = vmatprep.subr.bf16.mxu1 %v956_v23  ;;  %vm5454_vm4 = vcmp.ne.s32.totalorder %v611_v15, 0  ;;  %vm5458_vm5 = vcmp.ne.s32.totalorder %v615_v0, 0  ;;  %v647_v25 = vand.u32 8, %v535_v54  ;;  %vm5462_vm6 = vcmp.ne.s32.totalorder %v643_v1, 0 }
  0xc4   :  { %v675_v22 = vsel %vm5438_vm0, -0.6961928, %v4137_v35  ;;  %v679_v17 = vsel %vm5442_vm1, -0.6961928, %v4137_v35  ;;  %v691_v43 = vsel %vm5438_vm0, -0.3949175, %v4138_v38  ;;  %v5477_v28 = vrot.slane %v5204_v62, %v4220_v7 }
  0xc5   :  { %vm5479_vm7 = vcmp.ne.s32.totalorder %v647_v25, 0  ;;  %v695_v11 = vsel %vm5442_vm1, -0.3949175, %v4138_v38  ;;  %v707_v12 = vsel %vm5438_vm0, -0.18477343, %v4139_v42  ;;  %v723_v29 = vsel %vm5438_vm0, 0.0, %v4140_v46 }
  0xc6   :  { %v711_v44 = vsel %vm5442_vm1, -0.18477343, %v4139_v42  ;;  %v727_v36 = vsel %vm5442_vm1, 0.0, %v4140_v46  ;;  %v739_v45 = vsel %vm5438_vm0, 0.1609302, %v4141_v49  ;;  %v787_v34 = vsel %vm5438_vm0, 1.0, %v4144_v59 }
  0xc7   :  { %v743_v51 = vsel %vm5442_vm1, 0.1609302, %v4141_v49  ;;  %v755_v60 = vsel %vm5438_vm0, 0.33791524, %v4142_v52  ;;  %v759_v63 = vsel %vm5442_vm1, 0.33791524, %v4142_v52  ;;  %v803_v53 = vsel %vm5446_vm2, %v691_v43, %v675_v22 }
  0xc8   :  { %v771_v47 = vsel %vm5438_vm0, 0.562617, %v4143_v55  ;;  %v775_v16 = vsel %vm5442_vm1, 0.562617, %v4143_v55  ;;  %v791_v13 = vsel %vm5442_vm1, 1.0, %v4144_v59  ;;  %v807_v20 = vsel %vm5450_vm3, %v695_v11, %v679_v17 }
  0xc9   :  { %v819_v54 = vsel %vm5446_vm2, %v723_v29, %v707_v12  ;;  %v823_v24 = vsel %vm5450_vm3, %v727_v36, %v711_v44  ;;  %v835_v4 = vsel %vm5446_vm2, %v755_v60, %v739_v45  ;;  %v839_v5 = vsel %vm5450_vm3, %v759_v63, %v743_v51 }
  0xca   :  { %v851_v40 = vsel %vm5446_vm2, %v787_v34, %v771_v47  ;;  %v855_v61 = vsel %vm5450_vm3, %v791_v13, %v775_v16  ;;  %v867_v8 = vsel %vm5454_vm4, %v819_v54, %v803_v53  ;;  %v871_v23 = vsel %vm5458_vm5, %v823_v24, %v807_v20 }
  0xcb   :  { %v883_v15 = vsel %vm5454_vm4, %v851_v40, %v835_v4  ;;  %v887_v0 = vsel %vm5458_vm5, %v855_v61, %v839_v5  ;;  %v533_v1 = vand.u32 15, %v517_v48  ;;  %v537_v19 = vand.u32 15, %v521_v56 }
  0xcc   :  { %v899_v30 = vsel %vm5462_vm6, %v883_v15, %v867_v8  ;;  %v903_v31 = vsel %vm5479_vm7, %v887_v0, %v871_v23  ;;  %v524_v32 = vshrl.u32 %v4588_v39, 4  ;;  %v528_v25 = vshrl.u32 %v4590_v41, 4 }
  0xcd   :  { %v937_v22 = vmul.f32 %v5477_v28, %v899_v30  ;;  %v941_v6 = vmul.f32 %v5477_v28, %v903_v31  ;;  %v549_v17 = vand.u32 1, %v533_v1  ;;  %v553_v43 = vand.u32 1, %v537_v19 }
  0xce   :  { %v581_v27 = vand.u32 2, %v533_v1  ;;  %v585_v11 = vand.u32 2, %v537_v19  ;;  %v613_v48 = vand.u32 4, %v533_v1  ;;  %v617_v56 = vand.u32 4, %v537_v19 }
  0xcf   :  { %v953_v12 = vpack.c.bf16 %v941_v6, %v937_v22  ;;  %vm5554_vm8 = vcmp.ne.s32.totalorder %v549_v17, 0  ;;  %vm5558_vm9 = vcmp.ne.s32.totalorder %v553_v43, 0  ;;  %v645_v39 = vand.u32 8, %v533_v1 }
  0xd0   :  { %vm5562_vm10 = vcmp.ne.s32.totalorder %v581_v27, 0  ;;  %vm5566_vm11 = vcmp.ne.s32.totalorder %v585_v11, 0  ;;  %vm5570_vm12 = vcmp.ne.s32.totalorder %v613_v48, 0  ;;  %vm5574_vm13 = vcmp.ne.s32.totalorder %v617_v56, 0 }
  0xd1   :  { %3811 = vmatpush1.bf16.msra.mxu0 %v953_v12  ;;  %v649_v45 = vand.u32 8, %v537_v19  ;;  %vm5578_vm14 = vcmp.ne.s32.totalorder %v645_v39, 0  ;;  %v677_v51 = vsel %vm5554_vm8, -0.6961928, %v4137_v35  ;;  %v681_v60 = vsel %vm5558_vm9, -0.6961928, %v4137_v35 }
  0xd2   :  { %v693_v63 = vsel %vm5554_vm8, -0.3949175, %v4138_v38  ;;  %v697_v53 = vsel %vm5558_vm9, -0.3949175, %v4138_v38  ;;  %v709_v47 = vsel %vm5554_vm8, -0.18477343, %v4139_v42  ;;  %v5599_v16 = vrot.slane %v5204_v62, %v4234_v14 }
  0xd3   :  { %vm5601_vm15 = vcmp.ne.s32.totalorder %v649_v45, 0  ;;  %v713_v20 = vsel %vm5558_vm9, -0.18477343, %v4139_v42  ;;  %v725_v54 = vsel %vm5554_vm8, 0.0, %v4140_v46  ;;  %v729_v24 = vsel %vm5558_vm9, 0.0, %v4140_v46 }
  0xd4   :  { %v741_v62 = vsel %vm5554_vm8, 0.1609302, %v4141_v49  ;;  %v745_v4 = vsel %vm5558_vm9, 0.1609302, %v4141_v49  ;;  %v757_v5 = vsel %vm5554_vm8, 0.33791524, %v4142_v52  ;;  %v805_v40 = vsel %vm5562_vm10, %v693_v63, %v677_v51 }
  0xd5   :  { %v761_v61 = vsel %vm5558_vm9, 0.33791524, %v4142_v52  ;;  %v773_v8 = vsel %vm5554_vm8, 0.562617, %v4143_v55  ;;  %v777_v23 = vsel %vm5558_vm9, 0.562617, %v4143_v55  ;;  %v809_v15 = vsel %vm5566_vm11, %v697_v53, %v681_v60 }
  0xd6   :  { %v789_v0 = vsel %vm5554_vm8, 1.0, %v4144_v59  ;;  %v793_v1 = vsel %vm5558_vm9, 1.0, %v4144_v59  ;;  %v821_v19 = vsel %vm5562_vm10, %v725_v54, %v709_v47  ;;  %v825_v30 = vsel %vm5566_vm11, %v729_v24, %v713_v20 }
  0xd7   :  { %v837_v31 = vsel %vm5562_vm10, %v757_v5, %v741_v62  ;;  %v841_v22 = vsel %vm5566_vm11, %v761_v61, %v745_v4  ;;  %v853_v6 = vsel %vm5562_vm10, %v789_v0, %v773_v8  ;;  %v857_v17 = vsel %vm5566_vm11, %v793_v1, %v777_v23 }
  0xd8   :  { %v869_v43 = vsel %vm5570_vm12, %v821_v19, %v805_v40  ;;  %v873_v27 = vsel %vm5574_vm13, %v825_v30, %v809_v15  ;;  %v885_v11 = vsel %vm5570_vm12, %v853_v6, %v837_v31  ;;  %v889_v48 = vsel %vm5574_vm13, %v857_v17, %v841_v22 }
  0xd9   :  { %v901_v56 = vsel %vm5578_vm14, %v885_v11, %v869_v43  ;;  %v905_v12 = vsel %vm5601_vm15, %v889_v48, %v873_v27  ;;  %v540_v10 = vand.u32 15, %v524_v32  ;;  %v544_v37 = vand.u32 15, %v528_v25 }
  0xda   :  { %v939_v39 = vmul.f32 %v5599_v16, %v901_v56  ;;  %v943_v41 = vmul.f32 %v5599_v16, %v905_v12  ;;  %v526_v29 = vshrl.u32 %v4795_v58, 4  ;;  %v530_v44 = vshrl.u32 %v4828_v26, 4 }
  0xdb   :  { %v556_v45 = vand.u32 1, %v540_v10  ;;  %v560_v51 = vand.u32 1, %v544_v37  ;;  %v588_v36 = vand.u32 2, %v540_v10  ;;  %v592_v60 = vand.u32 2, %v544_v37 }
  0xdc   :  { %v955_v63 = vpack.c.bf16 %v943_v41, %v939_v39  ;;  %v620_v34 = vand.u32 4, %v540_v10  ;;  %v624_v53 = vand.u32 4, %v544_v37  ;;  %v652_v47 = vand.u32 8, %v540_v10 }
  0xdd   :  { %vm5670_vm0 = vcmp.ne.s32.totalorder %v556_v45, 0  ;;  %vm5674_vm1 = vcmp.ne.s32.totalorder %v560_v51, 0  ;;  %vm5678_vm2 = vcmp.ne.s32.totalorder %v588_v36, 0  ;;  %vm5682_vm3 = vcmp.ne.s32.totalorder %v592_v60, 0 }
  0xde   :  { %3864 = vmatpush1.bf16.msra.mxu1 %v955_v63  ;;  %vm5686_vm4 = vcmp.ne.s32.totalorder %v620_v34, 0  ;;  %vm5690_vm5 = vcmp.ne.s32.totalorder %v624_v53, 0  ;;  %v656_v54 = vand.u32 8, %v544_v37  ;;  %vm5694_vm6 = vcmp.ne.s32.totalorder %v652_v47, 0 }
  0xdf   :  { %v684_v62 = vsel %vm5670_vm0, -0.6961928, %v4137_v35  ;;  %v688_v4 = vsel %vm5674_vm1, -0.6961928, %v4137_v35  ;;  %v700_v5 = vsel %vm5670_vm0, -0.3949175, %v4138_v38 }
  0xe0   :  { %vm5707_vm7 = vcmp.ne.s32.totalorder %v656_v54, 0  ;;  %v704_v61 = vsel %vm5674_vm1, -0.3949175, %v4138_v38  ;;  %v716_v8 = vsel %vm5670_vm0, -0.18477343, %v4139_v42  ;;  %v732_v23 = vsel %vm5670_vm0, 0.0, %v4140_v46 }
  0xe1   :  { %v720_v15 = vsel %vm5674_vm1, -0.18477343, %v4139_v42  ;;  %v736_v0 = vsel %vm5674_vm1, 0.0, %v4140_v46  ;;  %v748_v1 = vsel %vm5670_vm0, 0.1609302, %v4141_v49  ;;  %v796_v19 = vsel %vm5670_vm0, 1.0, %v4144_v59 }
  0xe2   :  { %v752_v30 = vsel %vm5674_vm1, 0.1609302, %v4141_v49  ;;  %v764_v31 = vsel %vm5670_vm0, 0.33791524, %v4142_v52  ;;  %v768_v22 = vsel %vm5674_vm1, 0.33791524, %v4142_v52  ;;  %v812_v6 = vsel %vm5678_vm2, %v700_v5, %v684_v62 }
  0xe3   :  { %v780_v17 = vsel %vm5670_vm0, 0.562617, %v4143_v55  ;;  %v784_v43 = vsel %vm5674_vm1, 0.562617, %v4143_v55  ;;  %v800_v27 = vsel %vm5674_vm1, 1.0, %v4144_v59  ;;  %v816_v11 = vsel %vm5682_vm3, %v704_v61, %v688_v4 }
  0xe4   :  { %v828_v48 = vsel %vm5678_vm2, %v732_v23, %v716_v8  ;;  %v832_v56 = vsel %vm5682_vm3, %v736_v0, %v720_v15  ;;  %v844_v12 = vsel %vm5678_vm2, %v764_v31, %v748_v1  ;;  %v848_v10 = vsel %vm5682_vm3, %v768_v22, %v752_v30 }
  0xe5   :  { %v860_v37 = vsel %vm5678_vm2, %v796_v19, %v780_v17  ;;  %v864_v39 = vsel %vm5682_vm3, %v800_v27, %v784_v43  ;;  %v876_v41 = vsel %vm5686_vm4, %v828_v48, %v812_v6  ;;  %v880_v45 = vsel %vm5690_vm5, %v832_v56, %v816_v11 }
  0xe6   :  { %v892_v51 = vsel %vm5686_vm4, %v860_v37, %v844_v12  ;;  %v896_v36 = vsel %vm5690_vm5, %v864_v39, %v848_v10  ;;  %v542_v60 = vand.u32 15, %v526_v29  ;;  %v546_v63 = vand.u32 15, %v530_v44 }
  0xe7   :  { %v908_v34 = vsel %vm5694_vm6, %v892_v51, %v876_v41  ;;  %v912_v53 = vsel %vm5707_vm7, %v896_v36, %v880_v45  ;;  %v523_v47 = vshrl.u32 %v4830_v21, 4  ;;  %v527_v13 = vshrl.u32 %v4945_v50, 4 }
  0xe8   :  { %v946_v32 = vmul.f32 %v5245_v33, %v908_v34  ;;  %v950_v58 = vmul.f32 %v5245_v33, %v912_v53  ;;  %v558_v26 = vand.u32 1, %v542_v60  ;;  %v562_v25 = vand.u32 1, %v546_v63 }
  0xe9   :  { %v590_v20 = vand.u32 2, %v542_v60  ;;  %v594_v54 = vand.u32 2, %v546_v63  ;;  %v622_v29 = vand.u32 4, %v542_v60  ;;  %v626_v44 = vand.u32 4, %v546_v63 }
  0xea   :  { %v958_v62 = vpack.c.bf16 %v950_v58, %v946_v32  ;;  %vm5782_vm8 = vcmp.ne.s32.totalorder %v558_v26, 0  ;;  %vm5786_vm9 = vcmp.ne.s32.totalorder %v562_v25, 0  ;;  %v654_v21 = vand.u32 8, %v542_v60 }
  0xeb   :  { %vm5790_vm10 = vcmp.ne.s32.totalorder %v590_v20, 0  ;;  %vm5794_vm11 = vcmp.ne.s32.totalorder %v594_v54, 0  ;;  %vm5798_vm12 = vcmp.ne.s32.totalorder %v622_v29, 0  ;;  %vm5802_vm13 = vcmp.ne.s32.totalorder %v626_v44, 0 }
  0xec   :  { %3812 = vmatprep.subr.bf16.mxu0 %v958_v62  ;;  %v658_v61 = vand.u32 8, %v546_v63  ;;  %vm5806_vm14 = vcmp.ne.s32.totalorder %v654_v21, 0  ;;  %v686_v23 = vsel %vm5782_vm8, -0.6961928, %v4137_v35  ;;  %v690_v15 = vsel %vm5786_vm9, -0.6961928, %v4137_v35 }
  0xed   :  { %v702_v0 = vsel %vm5782_vm8, -0.3949175, %v4138_v38  ;;  %v706_v1 = vsel %vm5786_vm9, -0.3949175, %v4138_v38  ;;  %v718_v19 = vsel %vm5782_vm8, -0.18477343, %v4139_v42 }
  0xee   :  { %vm5825_vm15 = vcmp.ne.s32.totalorder %v658_v61, 0  ;;  %v722_v31 = vsel %vm5786_vm9, -0.18477343, %v4139_v42  ;;  %v734_v22 = vsel %vm5782_vm8, 0.0, %v4140_v46  ;;  %v738_v6 = vsel %vm5786_vm9, 0.0, %v4140_v46 }
  0xef   :  { %v750_v17 = vsel %vm5782_vm8, 0.1609302, %v4141_v49  ;;  %v754_v43 = vsel %vm5786_vm9, 0.1609302, %v4141_v49  ;;  %v766_v27 = vsel %vm5782_vm8, 0.33791524, %v4142_v52  ;;  %v814_v11 = vsel %vm5790_vm10, %v702_v0, %v686_v23 }
  0xf0   :  { %v770_v48 = vsel %vm5786_vm9, 0.33791524, %v4142_v52  ;;  %v782_v56 = vsel %vm5782_vm8, 0.562617, %v4143_v55  ;;  %v786_v12 = vsel %vm5786_vm9, 0.562617, %v4143_v55  ;;  %v818_v10 = vsel %vm5794_vm11, %v706_v1, %v690_v15 }
  0xf1   :  { %v798_v37 = vsel %vm5782_vm8, 1.0, %v4144_v59  ;;  %v802_v39 = vsel %vm5786_vm9, 1.0, %v4144_v59  ;;  %v830_v41 = vsel %vm5790_vm10, %v734_v22, %v718_v19  ;;  %v834_v45 = vsel %vm5794_vm11, %v738_v6, %v722_v31 }
  0xf2   :  { %v846_v51 = vsel %vm5790_vm10, %v766_v27, %v750_v17  ;;  %v850_v36 = vsel %vm5794_vm11, %v770_v48, %v754_v43  ;;  %v862_v60 = vsel %vm5790_vm10, %v798_v37, %v782_v56  ;;  %v866_v63 = vsel %vm5794_vm11, %v802_v39, %v786_v12 }
  0xf3   :  { %v878_v34 = vsel %vm5798_vm12, %v830_v41, %v814_v11  ;;  %v882_v53 = vsel %vm5802_vm13, %v834_v45, %v818_v10  ;;  %v894_v32 = vsel %vm5798_vm12, %v862_v60, %v846_v51  ;;  %v898_v58 = vsel %vm5802_vm13, %v866_v63, %v850_v36 }
  0xf4   :  { %v910_v26 = vsel %vm5806_vm14, %v894_v32, %v878_v34  ;;  %v914_v25 = vsel %vm5825_vm15, %v898_v58, %v882_v53  ;;  %v539_v20 = vand.u32 15, %v523_v47  ;;  %v543_v54 = vand.u32 15, %v527_v13 }
  0xf5   :  { %v948_v29 = vmul.f32 %v5367_v9, %v910_v26  ;;  %v952_v44 = vmul.f32 %v5367_v9, %v914_v25  ;;  %v525_v62 = vshrl.u32 %v5035_v57, 4  ;;  %v529_v24 = vshrl.u32 %v5037_v18, 4 }
  0xf6   :  { %v555_v4 = vand.u32 1, %v539_v20  ;;  %v559_v21 = vand.u32 1, %v543_v54  ;;  %v587_v50 = vand.u32 2, %v539_v20  ;;  %v591_v33 = vand.u32 2, %v543_v54 }
  0xf7   :  { %v960_v5 = vpack.c.bf16 %v952_v44, %v948_v29  ;;  %v619_v40 = vand.u32 4, %v539_v20  ;;  %v623_v61 = vand.u32 4, %v543_v54  ;;  %v651_v8 = vand.u32 8, %v539_v20 }
  0xf8   :  { %vm5894_vm0 = vcmp.ne.s32.totalorder %v555_v4, 0  ;;  %vm5898_vm1 = vcmp.ne.s32.totalorder %v559_v21, 0  ;;  %vm5902_vm2 = vcmp.ne.s32.totalorder %v587_v50, 0  ;;  %vm5906_vm3 = vcmp.ne.s32.totalorder %v591_v33, 0  ;;  %v6002_v21 = vld [vmem:[#allocation6 + $0x8] sm:$0xff] }
  0xf9   :  { %3865 = vmatprep.subr.bf16.mxu1 %v960_v5  ;;  %vm5910_vm4 = vcmp.ne.s32.totalorder %v619_v40, 0  ;;  %vm5914_vm5 = vcmp.ne.s32.totalorder %v623_v61, 0  ;;  %v655_v15 = vand.u32 8, %v543_v54  ;;  %vm5918_vm6 = vcmp.ne.s32.totalorder %v651_v8, 0  ;;  %v6005_v33 = vld [vmem:[#allocation6 + $0x28] sm:$0xff] }
  0xfa   :  { %v683_v1 = vsel %vm5894_vm0, -0.6961928, %v4137_v35  ;;  %v687_v19 = vsel %vm5898_vm1, -0.6961928, %v4137_v35  ;;  %v699_v30 = vsel %vm5894_vm0, -0.3949175, %v4138_v38 }
  0xfb   :  { %vm5931_vm7 = vcmp.ne.s32.totalorder %v655_v15, 0  ;;  %v703_v22 = vsel %vm5898_vm1, -0.3949175, %v4138_v38  ;;  %v715_v6 = vsel %vm5894_vm0, -0.18477343, %v4139_v42  ;;  %v731_v17 = vsel %vm5894_vm0, 0.0, %v4140_v46 }
  0xfc   :  { %v719_v43 = vsel %vm5898_vm1, -0.18477343, %v4139_v42  ;;  %v735_v27 = vsel %vm5898_vm1, 0.0, %v4140_v46  ;;  %v747_v11 = vsel %vm5894_vm0, 0.1609302, %v4141_v49  ;;  %v795_v48 = vsel %vm5894_vm0, 1.0, %v4144_v59 }
  0xfd   :  { %v751_v56 = vsel %vm5898_vm1, 0.1609302, %v4141_v49  ;;  %v763_v12 = vsel %vm5894_vm0, 0.33791524, %v4142_v52  ;;  %v767_v10 = vsel %vm5898_vm1, 0.33791524, %v4142_v52  ;;  %v811_v37 = vsel %vm5902_vm2, %v699_v30, %v683_v1 }
  0xfe   :  { %v779_v39 = vsel %vm5894_vm0, 0.562617, %v4143_v55  ;;  %v783_v41 = vsel %vm5898_vm1, 0.562617, %v4143_v55  ;;  %v799_v45 = vsel %vm5898_vm1, 1.0, %v4144_v59  ;;  %v815_v51 = vsel %vm5906_vm3, %v703_v22, %v687_v19 }
  0xff   :  { %v827_v36 = vsel %vm5902_vm2, %v731_v17, %v715_v6  ;;  %v831_v60 = vsel %vm5906_vm3, %v735_v27, %v719_v43  ;;  %v843_v63 = vsel %vm5902_vm2, %v763_v12, %v747_v11  ;;  %v847_v34 = vsel %vm5906_vm3, %v767_v10, %v751_v56 }
 0x100   :  { %v859_v53 = vsel %vm5902_vm2, %v795_v48, %v779_v39  ;;  %v863_v32 = vsel %vm5906_vm3, %v799_v45, %v783_v41  ;;  %v875_v58 = vsel %vm5910_vm4, %v827_v36, %v811_v37  ;;  %v879_v26 = vsel %vm5914_vm5, %v831_v60, %v815_v51 }
 0x101   :  { %v891_v25 = vsel %vm5910_vm4, %v859_v53, %v843_v63  ;;  %v895_v20 = vsel %vm5914_vm5, %v863_v32, %v847_v34  ;;  %v541_v54 = vand.u32 15, %v525_v62  ;;  %v545_v29 = vand.u32 15, %v529_v24 }
 0x102   :  { %v907_v44 = vsel %vm5918_vm6, %v891_v25, %v875_v58  ;;  %v911_v4 = vsel %vm5931_vm7, %v895_v20, %v879_v26  ;;  %v970_v50 = vshrl.u32 %v6002_v21, 8  ;;  %v974_v5 = vshrl.u32 %v6005_v33, 8 }
 0x103   :  { %v945_v40 = vmul.f32 %v5477_v28, %v907_v44  ;;  %v949_v61 = vmul.f32 %v5477_v28, %v911_v4  ;;  %v557_v62 = vand.u32 1, %v541_v54  ;;  %v561_v24 = vand.u32 1, %v545_v29 }
 0x104   :  { %v589_v8 = vand.u32 2, %v541_v54  ;;  %v593_v23 = vand.u32 2, %v545_v29  ;;  %v621_v47 = vand.u32 4, %v541_v54  ;;  %v625_v57 = vand.u32 4, %v545_v29 }
 0x105   :  { %v957_v18 = vpack.c.bf16 %v949_v61, %v945_v40  ;;  %vm6010_vm8 = vcmp.ne.s32.totalorder %v557_v62, 0  ;;  %vm6014_vm9 = vcmp.ne.s32.totalorder %v561_v24, 0  ;;  %v653_v15 = vand.u32 8, %v541_v54 }
 0x106   :  { %vm6018_vm10 = vcmp.ne.s32.totalorder %v589_v8, 0  ;;  %vm6022_vm11 = vcmp.ne.s32.totalorder %v593_v23, 0  ;;  %vm6026_vm12 = vcmp.ne.s32.totalorder %v621_v47, 0  ;;  %vm6030_vm13 = vcmp.ne.s32.totalorder %v625_v57, 0  ;;  %v6120_v47 = vld [vmem:[#allocation6 + $0x18] sm:$0xff] }
 0x107   :  { %3813 = vmatpush1.bf16.msra.mxu0 %v957_v18  ;;  %v657_v30 = vand.u32 8, %v545_v29  ;;  %vm6034_vm14 = vcmp.ne.s32.totalorder %v653_v15, 0  ;;  %v685_v22 = vsel %vm6010_vm8, -0.6961928, %v4137_v35  ;;  %v689_v6 = vsel %vm6014_vm9, -0.6961928, %v4137_v35 }
 0x108   :  { %v701_v17 = vsel %vm6010_vm8, -0.3949175, %v4138_v38  ;;  %v705_v43 = vsel %vm6014_vm9, -0.3949175, %v4138_v38  ;;  %v717_v27 = vsel %vm6010_vm8, -0.18477343, %v4139_v42 }
 0x109   :  { %vm6053_vm15 = vcmp.ne.s32.totalorder %v657_v30, 0  ;;  %v721_v48 = vsel %vm6014_vm9, -0.18477343, %v4139_v42  ;;  %v733_v56 = vsel %vm6010_vm8, 0.0, %v4140_v46  ;;  %v737_v12 = vsel %vm6014_vm9, 0.0, %v4140_v46  ;;  %v6123_v18 = vld [vmem:[#allocation6 + $0x38] sm:$0xff] }
 0x10a   :  { %v749_v10 = vsel %vm6010_vm8, 0.1609302, %v4141_v49  ;;  %v753_v37 = vsel %vm6014_vm9, 0.1609302, %v4141_v49  ;;  %v765_v39 = vsel %vm6010_vm8, 0.33791524, %v4142_v52  ;;  %v813_v41 = vsel %vm6018_vm10, %v701_v17, %v685_v22 }
 0x10b   :  { %v769_v45 = vsel %vm6014_vm9, 0.33791524, %v4142_v52  ;;  %v781_v51 = vsel %vm6010_vm8, 0.562617, %v4143_v55  ;;  %v785_v36 = vsel %vm6014_vm9, 0.562617, %v4143_v55  ;;  %v817_v60 = vsel %vm6022_vm11, %v705_v43, %v689_v6 }
 0x10c   :  { %v797_v63 = vsel %vm6010_vm8, 1.0, %v4144_v59  ;;  %v801_v34 = vsel %vm6014_vm9, 1.0, %v4144_v59  ;;  %v829_v53 = vsel %vm6018_vm10, %v733_v56, %v717_v27  ;;  %v833_v32 = vsel %vm6022_vm11, %v737_v12, %v721_v48  ;;  %v6126_v30 = vld [vmem:[#allocation8 + $0x1] ss:$4 sm:$0xf] }
 0x10d   :  { %v845_v58 = vsel %vm6018_vm10, %v765_v39, %v749_v10  ;;  %v849_v26 = vsel %vm6022_vm11, %v769_v45, %v753_v37  ;;  %v861_v25 = vsel %vm6018_vm10, %v797_v63, %v781_v51  ;;  %v865_v20 = vsel %vm6022_vm11, %v801_v34, %v785_v36  ;;  %v6362_v37 = vld [vmem:[#allocation6 + $0x10] sm:$0xff] }
 0x10e   :  { %v877_v54 = vsel %vm6026_vm12, %v829_v53, %v813_v41  ;;  %v881_v29 = vsel %vm6030_vm13, %v833_v32, %v817_v60  ;;  %v893_v44 = vsel %vm6026_vm12, %v861_v25, %v845_v58  ;;  %v897_v4 = vsel %vm6030_vm13, %v865_v20, %v849_v26 }
 0x10f   :  { %v909_v40 = vsel %vm6034_vm14, %v893_v44, %v877_v54  ;;  %v913_v61 = vsel %vm6053_vm15, %v897_v4, %v881_v29  ;;  %v986_v62 = vand.u32 15, %v970_v50  ;;  %v990_v24 = vand.u32 15, %v974_v5 }
 0x110   :  { %v947_v8 = vmul.f32 %v5599_v16, %v909_v40  ;;  %v951_v23 = vmul.f32 %v5599_v16, %v913_v61  ;;  %v972_v57 = vshrl.u32 %v6120_v47, 8  ;;  %v976_v9 = vshrl.u32 %v6123_v18, 8 }
 0x111   :  { %v1002_v13 = vand.u32 1, %v986_v62  ;;  %v1006_v15 = vand.u32 1, %v990_v24  ;;  %v1034_v0 = vand.u32 2, %v986_v62  ;;  %v1038_v28 = vand.u32 2, %v990_v24 }
 0x112   :  { %v959_v1 = vpack.c.bf16 %v951_v23, %v947_v8  ;;  %v1066_v19 = vand.u32 4, %v986_v62  ;;  %v1070_v50 = vand.u32 4, %v990_v24  ;;  %v1098_v5 = vand.u32 8, %v986_v62 }
 0x113   :  { %vm6128_vm0 = vcmp.ne.s32.totalorder %v1002_v13, 0  ;;  %vm6132_vm1 = vcmp.ne.s32.totalorder %v1006_v15, 0  ;;  %vm6136_vm2 = vcmp.ne.s32.totalorder %v1034_v0, 0  ;;  %vm6140_vm3 = vcmp.ne.s32.totalorder %v1038_v28, 0 }
 0x114   :  { %3866 = vmatpush1.bf16.msra.mxu1 %v959_v1  ;;  %vm6144_vm4 = vcmp.ne.s32.totalorder %v1066_v19, 0  ;;  %vm6148_vm5 = vcmp.ne.s32.totalorder %v1070_v50, 0  ;;  %v1102_v27 = vand.u32 8, %v990_v24  ;;  %vm6152_vm6 = vcmp.ne.s32.totalorder %v1098_v5, 0  ;;  %v6240_v19 = vld [vmem:[#allocation6] sm:$0xff] }
 0x115   :  { %v1130_v48 = vsel %vm6128_vm0, -0.6961928, %v4137_v35  ;;  %v1134_v56 = vsel %vm6132_vm1, -0.6961928, %v4137_v35  ;;  %v1146_v12 = vsel %vm6128_vm0, -0.3949175, %v4138_v38  ;;  %v6167_v10 = vrot.slane %v6126_v30, %v4210_v2 }
 0x116   :  { %vm6169_vm7 = vcmp.ne.s32.totalorder %v1102_v27, 0  ;;  %v1150_v39 = vsel %vm6132_vm1, -0.3949175, %v4138_v38  ;;  %v1162_v41 = vsel %vm6128_vm0, -0.18477343, %v4139_v42  ;;  %v1178_v45 = vsel %vm6128_vm0, 0.0, %v4140_v46 }
 0x117   :  { %v1166_v51 = vsel %vm6132_vm1, -0.18477343, %v4139_v42  ;;  %v1182_v36 = vsel %vm6132_vm1, 0.0, %v4140_v46  ;;  %v1194_v60 = vsel %vm6128_vm0, 0.1609302, %v4141_v49  ;;  %v1242_v63 = vsel %vm6128_vm0, 1.0, %v4144_v59 }
 0x118   :  { %v1198_v34 = vsel %vm6132_vm1, 0.1609302, %v4141_v49  ;;  %v1210_v53 = vsel %vm6128_vm0, 0.33791524, %v4142_v52  ;;  %v1214_v32 = vsel %vm6132_vm1, 0.33791524, %v4142_v52  ;;  %v1258_v58 = vsel %vm6136_vm2, %v1146_v12, %v1130_v48 }
 0x119   :  { %v1226_v26 = vsel %vm6128_vm0, 0.562617, %v4143_v55  ;;  %v1230_v25 = vsel %vm6132_vm1, 0.562617, %v4143_v55  ;;  %v1246_v20 = vsel %vm6132_vm1, 1.0, %v4144_v59  ;;  %v1262_v54 = vsel %vm6140_vm3, %v1150_v39, %v1134_v56  ;;  %v6243_v5 = vld [vmem:[#allocation6 + $0x20] sm:$0xff] }
 0x11a   :  { %v1274_v29 = vsel %vm6136_vm2, %v1178_v45, %v1162_v41  ;;  %v1278_v44 = vsel %vm6140_vm3, %v1182_v36, %v1166_v51  ;;  %v1290_v4 = vsel %vm6136_vm2, %v1210_v53, %v1194_v60  ;;  %v1294_v40 = vsel %vm6140_vm3, %v1214_v32, %v1198_v34  ;;  %v6365_v41 = vld [vmem:[#allocation6 + $0x30] sm:$0xff] }
 0x11b   :  { %v1306_v61 = vsel %vm6136_vm2, %v1242_v63, %v1226_v26  ;;  %v1310_v62 = vsel %vm6140_vm3, %v1246_v20, %v1230_v25  ;;  %v1322_v24 = vsel %vm6144_vm4, %v1274_v29, %v1258_v58  ;;  %v1326_v8 = vsel %vm6148_vm5, %v1278_v44, %v1262_v54 }
 0x11c   :  { %v1338_v23 = vsel %vm6144_vm4, %v1306_v61, %v1290_v4  ;;  %v1342_v13 = vsel %vm6148_vm5, %v1310_v62, %v1294_v40  ;;  %v988_v15 = vand.u32 15, %v972_v57  ;;  %v992_v0 = vand.u32 15, %v976_v9 }
 0x11d   :  { %v1354_v28 = vsel %vm6152_vm6, %v1338_v23, %v1322_v24  ;;  %v1358_v1 = vsel %vm6169_vm7, %v1342_v13, %v1326_v8  ;;  %v969_v50 = vshrl.u32 %v6240_v19, 8  ;;  %v973_v16 = vshrl.u32 %v6243_v5, 8 }
 0x11e   :  { %v1393_v31 = vmul.f32 %v6167_v10, %v1354_v28  ;;  %v1397_v22 = vmul.f32 %v6167_v10, %v1358_v1  ;;  %v1004_v57 = vand.u32 1, %v988_v15  ;;  %v1008_v9 = vand.u32 1, %v992_v0 }
 0x11f   :  { %v1036_v6 = vand.u32 2, %v988_v15  ;;  %v1040_v17 = vand.u32 2, %v992_v0  ;;  %v1068_v43 = vand.u32 4, %v988_v15  ;;  %v1072_v27 = vand.u32 4, %v992_v0 }
 0x120   :  { %v1409_v11 = vpack.c.bf16 %v1397_v22, %v1393_v31  ;;  %vm6248_vm8 = vcmp.ne.s32.totalorder %v1004_v57, 0  ;;  %vm6252_vm9 = vcmp.ne.s32.totalorder %v1008_v9, 0  ;;  %v1100_v12 = vand.u32 8, %v988_v15 }
 0x121   :  { %vm6256_vm10 = vcmp.ne.s32.totalorder %v1036_v6, 0  ;;  %vm6260_vm11 = vcmp.ne.s32.totalorder %v1040_v17, 0  ;;  %vm6264_vm12 = vcmp.ne.s32.totalorder %v1068_v43, 0  ;;  %vm6268_vm13 = vcmp.ne.s32.totalorder %v1072_v27, 0 }
 0x122   :  { %3814 = vmatprep.subr.bf16.mxu0 %v1409_v11  ;;  %v1104_v51 = vand.u32 8, %v992_v0  ;;  %vm6272_vm14 = vcmp.ne.s32.totalorder %v1100_v12, 0  ;;  %v1132_v60 = vsel %vm6248_vm8, -0.6961928, %v4137_v35  ;;  %v1136_v63 = vsel %vm6252_vm9, -0.6961928, %v4137_v35 }
 0x123   :  { %v1148_v34 = vsel %vm6248_vm8, -0.3949175, %v4138_v38  ;;  %v1152_v53 = vsel %vm6252_vm9, -0.3949175, %v4138_v38  ;;  %v1164_v32 = vsel %vm6248_vm8, -0.18477343, %v4139_v42  ;;  %v6293_v58 = vrot.slane %v6126_v30, %v4212_v3 }
 0x124   :  { %vm6295_vm15 = vcmp.ne.s32.totalorder %v1104_v51, 0  ;;  %v1168_v25 = vsel %vm6252_vm9, -0.18477343, %v4139_v42  ;;  %v1180_v20 = vsel %vm6248_vm8, 0.0, %v4140_v46  ;;  %v1184_v54 = vsel %vm6252_vm9, 0.0, %v4140_v46 }
 0x125   :  { %v1196_v29 = vsel %vm6248_vm8, 0.1609302, %v4141_v49  ;;  %v1200_v44 = vsel %vm6252_vm9, 0.1609302, %v4141_v49  ;;  %v1212_v4 = vsel %vm6248_vm8, 0.33791524, %v4142_v52  ;;  %v1260_v40 = vsel %vm6256_vm10, %v1148_v34, %v1132_v60 }
 0x126   :  { %v1216_v61 = vsel %vm6252_vm9, 0.33791524, %v4142_v52  ;;  %v1228_v62 = vsel %vm6248_vm8, 0.562617, %v4143_v55  ;;  %v1232_v24 = vsel %vm6252_vm9, 0.562617, %v4143_v55  ;;  %v1264_v8 = vsel %vm6260_vm11, %v1152_v53, %v1136_v63 }
 0x127   :  { %v1244_v23 = vsel %vm6248_vm8, 1.0, %v4144_v59  ;;  %v1248_v13 = vsel %vm6252_vm9, 1.0, %v4144_v59  ;;  %v1276_v15 = vsel %vm6256_vm10, %v1180_v20, %v1164_v32  ;;  %v1280_v0 = vsel %vm6260_vm11, %v1184_v54, %v1168_v25  ;;  %v6480_v20 = vld [vmem:[#allocation6 + $0x48] sm:$0xff] }
 0x128   :  { %v1292_v28 = vsel %vm6256_vm10, %v1212_v4, %v1196_v29  ;;  %v1296_v1 = vsel %vm6260_vm11, %v1216_v61, %v1200_v44  ;;  %v1308_v31 = vsel %vm6256_vm10, %v1244_v23, %v1228_v62  ;;  %v1312_v22 = vsel %vm6260_vm11, %v1248_v13, %v1232_v24 }
 0x129   :  { %v1324_v57 = vsel %vm6264_vm12, %v1276_v15, %v1260_v40  ;;  %v1328_v9 = vsel %vm6268_vm13, %v1280_v0, %v1264_v8  ;;  %v1340_v6 = vsel %vm6264_vm12, %v1308_v31, %v1292_v28  ;;  %v1344_v17 = vsel %vm6268_vm13, %v1312_v22, %v1296_v1 }
 0x12a   :  { %v1356_v43 = vsel %vm6272_vm14, %v1340_v6, %v1324_v57  ;;  %v1360_v27 = vsel %vm6295_vm15, %v1344_v17, %v1328_v9  ;;  %v985_v11 = vand.u32 15, %v969_v50  ;;  %v989_v48 = vand.u32 15, %v973_v16 }
 0x12b   :  { %v1395_v56 = vmul.f32 %v6293_v58, %v1356_v43  ;;  %v1399_v12 = vmul.f32 %v6293_v58, %v1360_v27  ;;  %v971_v39 = vshrl.u32 %v6362_v37, 8  ;;  %v975_v45 = vshrl.u32 %v6365_v41, 8 }
 0x12c   :  { %v1001_v51 = vand.u32 1, %v985_v11  ;;  %v1005_v36 = vand.u32 1, %v989_v48  ;;  %v1033_v60 = vand.u32 2, %v985_v11  ;;  %v1037_v63 = vand.u32 2, %v989_v48 }
 0x12d   :  { %v1411_v34 = vpack.c.bf16 %v1399_v12, %v1395_v56  ;;  %v1065_v53 = vand.u32 4, %v985_v11  ;;  %v1069_v50 = vand.u32 4, %v989_v48  ;;  %v1097_v16 = vand.u32 8, %v985_v11 }
 0x12e   :  { %vm6368_vm0 = vcmp.ne.s32.totalorder %v1001_v51, 0  ;;  %vm6372_vm1 = vcmp.ne.s32.totalorder %v1005_v36, 0  ;;  %vm6376_vm2 = vcmp.ne.s32.totalorder %v1033_v60, 0  ;;  %vm6380_vm3 = vcmp.ne.s32.totalorder %v1037_v63, 0 }
 0x12f   :  { %3867 = vmatprep.subr.bf16.mxu1 %v1411_v34  ;;  %vm6384_vm4 = vcmp.ne.s32.totalorder %v1065_v53, 0  ;;  %vm6388_vm5 = vcmp.ne.s32.totalorder %v1069_v50, 0  ;;  %v1101_v44 = vand.u32 8, %v989_v48  ;;  %vm6392_vm6 = vcmp.ne.s32.totalorder %v1097_v16, 0 }
 0x130   :  { %v1129_v40 = vsel %vm6368_vm0, -0.6961928, %v4137_v35  ;;  %v1133_v61 = vsel %vm6372_vm1, -0.6961928, %v4137_v35  ;;  %v1145_v62 = vsel %vm6368_vm0, -0.3949175, %v4138_v38  ;;  %v6407_v24 = vrot.slane %v6126_v30, %v4220_v7 }
 0x131   :  { %vm6409_vm7 = vcmp.ne.s32.totalorder %v1101_v44, 0  ;;  %v1149_v23 = vsel %vm6372_vm1, -0.3949175, %v4138_v38  ;;  %v1161_v13 = vsel %vm6368_vm0, -0.18477343, %v4139_v42  ;;  %v1177_v15 = vsel %vm6368_vm0, 0.0, %v4140_v46 }
 0x132   :  { %v1165_v0 = vsel %vm6372_vm1, -0.18477343, %v4139_v42  ;;  %v1181_v28 = vsel %vm6372_vm1, 0.0, %v4140_v46  ;;  %v1193_v1 = vsel %vm6368_vm0, 0.1609302, %v4141_v49  ;;  %v1241_v31 = vsel %vm6368_vm0, 1.0, %v4144_v59 }
 0x133   :  { %v1197_v22 = vsel %vm6372_vm1, 0.1609302, %v4141_v49  ;;  %v1209_v57 = vsel %vm6368_vm0, 0.33791524, %v4142_v52  ;;  %v1213_v9 = vsel %vm6372_vm1, 0.33791524, %v4142_v52  ;;  %v1257_v6 = vsel %vm6376_vm2, %v1145_v62, %v1129_v40 }
 0x134   :  { %v1225_v17 = vsel %vm6368_vm0, 0.562617, %v4143_v55  ;;  %v1229_v43 = vsel %vm6372_vm1, 0.562617, %v4143_v55  ;;  %v1245_v27 = vsel %vm6372_vm1, 1.0, %v4144_v59  ;;  %v1261_v11 = vsel %vm6380_vm3, %v1149_v23, %v1133_v61  ;;  %v6483_v40 = vld [vmem:[#allocation6 + $0x68] sm:$0xff] }
 0x135   :  { %v1273_v48 = vsel %vm6376_vm2, %v1177_v15, %v1161_v13  ;;  %v1277_v56 = vsel %vm6380_vm3, %v1181_v28, %v1165_v0  ;;  %v1289_v12 = vsel %vm6376_vm2, %v1209_v57, %v1193_v1  ;;  %v1293_v51 = vsel %vm6380_vm3, %v1213_v9, %v1197_v22 }
 0x136   :  { %v1305_v36 = vsel %vm6376_vm2, %v1241_v31, %v1225_v17  ;;  %v1309_v60 = vsel %vm6380_vm3, %v1245_v27, %v1229_v43  ;;  %v1321_v63 = vsel %vm6384_vm4, %v1273_v48, %v1257_v6  ;;  %v1325_v34 = vsel %vm6388_vm5, %v1277_v56, %v1261_v11 }
 0x137   :  { %v1337_v53 = vsel %vm6384_vm4, %v1305_v36, %v1289_v12  ;;  %v1341_v50 = vsel %vm6388_vm5, %v1309_v60, %v1293_v51  ;;  %v987_v16 = vand.u32 15, %v971_v39  ;;  %v991_v32 = vand.u32 15, %v975_v45 }
 0x138   :  { %v1353_v26 = vsel %vm6392_vm6, %v1337_v53, %v1321_v63  ;;  %v1357_v25 = vsel %vm6409_vm7, %v1341_v50, %v1325_v34  ;;  %v978_v44 = vshrl.u32 %v6480_v20, 8  ;;  %v982_v54 = vshrl.u32 %v6483_v40, 8 }
 0x139   :  { %v1392_v61 = vmul.f32 %v6407_v24, %v1353_v26  ;;  %v1396_v29 = vmul.f32 %v6407_v24, %v1357_v25  ;;  %v1003_v39 = vand.u32 1, %v987_v16  ;;  %v1007_v45 = vand.u32 1, %v991_v32 }
 0x13a   :  { %v1035_v62 = vand.u32 2, %v987_v16  ;;  %v1039_v4 = vand.u32 2, %v991_v32  ;;  %v1067_v23 = vand.u32 4, %v987_v16  ;;  %v1071_v13 = vand.u32 4, %v991_v32 }
 0x13b   :  { %v1408_v8 = vpack.c.bf16 %v1396_v29, %v1392_v61  ;;  %vm6488_vm8 = vcmp.ne.s32.totalorder %v1003_v39, 0  ;;  %vm6492_vm9 = vcmp.ne.s32.totalorder %v1007_v45, 0  ;;  %v1099_v28 = vand.u32 8, %v987_v16 }
 0x13c   :  { %vm6496_vm10 = vcmp.ne.s32.totalorder %v1035_v62, 0  ;;  %vm6500_vm11 = vcmp.ne.s32.totalorder %v1039_v4, 0  ;;  %vm6504_vm12 = vcmp.ne.s32.totalorder %v1067_v23, 0  ;;  %vm6508_vm13 = vcmp.ne.s32.totalorder %v1071_v13, 0 }
 0x13d   :  { %3815 = vmatpush1.bf16.msra.mxu0 %v1408_v8  ;;  %v1103_v9 = vand.u32 8, %v991_v32  ;;  %vm6512_vm14 = vcmp.ne.s32.totalorder %v1099_v28, 0  ;;  %v1131_v17 = vsel %vm6488_vm8, -0.6961928, %v4137_v35  ;;  %v1135_v43 = vsel %vm6492_vm9, -0.6961928, %v4137_v35 }
 0x13e   :  { %v1147_v27 = vsel %vm6488_vm8, -0.3949175, %v4138_v38  ;;  %v1151_v11 = vsel %vm6492_vm9, -0.3949175, %v4138_v38  ;;  %v1163_v48 = vsel %vm6488_vm8, -0.18477343, %v4139_v42  ;;  %v6533_v56 = vrot.slane %v6126_v30, %v4234_v14 }
 0x13f   :  { %vm6535_vm15 = vcmp.ne.s32.totalorder %v1103_v9, 0  ;;  %v1167_v51 = vsel %vm6492_vm9, -0.18477343, %v4139_v42  ;;  %v1179_v36 = vsel %vm6488_vm8, 0.0, %v4140_v46  ;;  %v1183_v60 = vsel %vm6492_vm9, 0.0, %v4140_v46 }
 0x140   :  { %v1195_v30 = vsel %vm6488_vm8, 0.1609302, %v4141_v49  ;;  %v1199_v63 = vsel %vm6492_vm9, 0.1609302, %v4141_v49  ;;  %v1211_v34 = vsel %vm6488_vm8, 0.33791524, %v4142_v52  ;;  %v1259_v53 = vsel %vm6496_vm10, %v1147_v27, %v1131_v17 }
 0x141   :  { %v1215_v50 = vsel %vm6492_vm9, 0.33791524, %v4142_v52  ;;  %v1227_v16 = vsel %vm6488_vm8, 0.562617, %v4143_v55  ;;  %v1231_v32 = vsel %vm6492_vm9, 0.562617, %v4143_v55  ;;  %v1263_v26 = vsel %vm6500_vm11, %v1151_v11, %v1135_v43 }
 0x142   :  { %v1243_v25 = vsel %vm6488_vm8, 1.0, %v4144_v59  ;;  %v1247_v61 = vsel %vm6492_vm9, 1.0, %v4144_v59  ;;  %v1275_v29 = vsel %vm6496_vm10, %v1179_v36, %v1163_v48  ;;  %v1279_v39 = vsel %vm6500_vm11, %v1183_v60, %v1167_v51  ;;  %v6602_v27 = vld [vmem:[#allocation6 + $0x58] sm:$0xff] }
 0x143   :  { %v1291_v45 = vsel %vm6496_vm10, %v1211_v34, %v1195_v30  ;;  %v1295_v62 = vsel %vm6500_vm11, %v1215_v50, %v1199_v63  ;;  %v1307_v4 = vsel %vm6496_vm10, %v1243_v25, %v1227_v16  ;;  %v1311_v23 = vsel %vm6500_vm11, %v1247_v61, %v1231_v32  ;;  %v6605_v11 = vld [vmem:[#allocation6 + $0x78] sm:$0xff] }
 0x144   :  { %v1323_v13 = vsel %vm6504_vm12, %v1275_v29, %v1259_v53  ;;  %v1327_v8 = vsel %vm6508_vm13, %v1279_v39, %v1263_v26  ;;  %v1339_v15 = vsel %vm6504_vm12, %v1307_v4, %v1291_v45  ;;  %v1343_v0 = vsel %vm6508_vm13, %v1311_v23, %v1295_v62 }
 0x145   :  { %v1355_v28 = vsel %vm6512_vm14, %v1339_v15, %v1323_v13  ;;  %v1359_v1 = vsel %vm6535_vm15, %v1343_v0, %v1327_v8  ;;  %v994_v31 = vand.u32 15, %v978_v44  ;;  %v998_v9 = vand.u32 15, %v982_v54 }
 0x146   :  { %v1394_v17 = vmul.f32 %v6533_v56, %v1355_v28  ;;  %v1398_v43 = vmul.f32 %v6533_v56, %v1359_v1  ;;  %v980_v22 = vshrl.u32 %v6602_v27, 8  ;;  %v984_v57 = vshrl.u32 %v6605_v11, 8 }
 0x147   :  { %v1010_v48 = vand.u32 1, %v994_v31  ;;  %v1014_v6 = vand.u32 1, %v998_v9  ;;  %v1042_v51 = vand.u32 2, %v994_v31  ;;  %v1046_v36 = vand.u32 2, %v998_v9 }
 0x148   :  { %v1410_v12 = vpack.c.bf16 %v1398_v43, %v1394_v17  ;;  %v1074_v60 = vand.u32 4, %v994_v31  ;;  %v1078_v44 = vand.u32 4, %v998_v9  ;;  %v1106_v54 = vand.u32 8, %v994_v31 }
 0x149   :  { %vm6608_vm0 = vcmp.ne.s32.totalorder %v1010_v48, 0  ;;  %vm6612_vm1 = vcmp.ne.s32.totalorder %v1014_v6, 0  ;;  %vm6616_vm2 = vcmp.ne.s32.totalorder %v1042_v51, 0  ;;  %vm6620_vm3 = vcmp.ne.s32.totalorder %v1046_v36, 0 }
 0x14a   :  { %3868 = vmatpush1.bf16.msra.mxu1 %v1410_v12  ;;  %vm6624_vm4 = vcmp.ne.s32.totalorder %v1074_v60, 0  ;;  %vm6628_vm5 = vcmp.ne.s32.totalorder %v1078_v44, 0  ;;  %v1110_v32 = vand.u32 8, %v998_v9  ;;  %vm6632_vm6 = vcmp.ne.s32.totalorder %v1106_v54, 0 }
 0x14b   :  { %v1138_v25 = vsel %vm6608_vm0, -0.6961928, %v4137_v35  ;;  %v1142_v61 = vsel %vm6612_vm1, -0.6961928, %v4137_v35  ;;  %v1154_v29 = vsel %vm6608_vm0, -0.3949175, %v4138_v38 }
 0x14c   :  { %vm6645_vm7 = vcmp.ne.s32.totalorder %v1110_v32, 0  ;;  %v1158_v45 = vsel %vm6612_vm1, -0.3949175, %v4138_v38  ;;  %v1170_v62 = vsel %vm6608_vm0, -0.18477343, %v4139_v42  ;;  %v1186_v4 = vsel %vm6608_vm0, 0.0, %v4140_v46 }
 0x14d   :  { %v1174_v23 = vsel %vm6612_vm1, -0.18477343, %v4139_v42  ;;  %v1190_v13 = vsel %vm6612_vm1, 0.0, %v4140_v46  ;;  %v1202_v8 = vsel %vm6608_vm0, 0.1609302, %v4141_v49  ;;  %v1250_v15 = vsel %vm6608_vm0, 1.0, %v4144_v59 }
 0x14e   :  { %v1206_v0 = vsel %vm6612_vm1, 0.1609302, %v4141_v49  ;;  %v1218_v28 = vsel %vm6608_vm0, 0.33791524, %v4142_v52  ;;  %v1222_v1 = vsel %vm6612_vm1, 0.33791524, %v4142_v52  ;;  %v1266_v31 = vsel %vm6616_vm2, %v1154_v29, %v1138_v25 }
 0x14f   :  { %v1234_v9 = vsel %vm6608_vm0, 0.562617, %v4143_v55  ;;  %v1238_v17 = vsel %vm6612_vm1, 0.562617, %v4143_v55  ;;  %v1254_v43 = vsel %vm6612_vm1, 1.0, %v4144_v59  ;;  %v1270_v48 = vsel %vm6620_vm3, %v1158_v45, %v1142_v61  ;;  %v6716_v29 = vld [vmem:[#allocation6 + $0x40] sm:$0xff] }
 0x150   :  { %v1282_v6 = vsel %vm6616_vm2, %v1186_v4, %v1170_v62  ;;  %v1286_v51 = vsel %vm6620_vm3, %v1190_v13, %v1174_v23  ;;  %v1298_v36 = vsel %vm6616_vm2, %v1218_v28, %v1202_v8  ;;  %v1302_v12 = vsel %vm6620_vm3, %v1222_v1, %v1206_v0  ;;  %v6719_v62 = vld [vmem:[#allocation6 + $0x60] sm:$0xff] }
 0x151   :  { %v1314_v60 = vsel %vm6616_vm2, %v1250_v15, %v1234_v9  ;;  %v1318_v44 = vsel %vm6620_vm3, %v1254_v43, %v1238_v17  ;;  %v1330_v54 = vsel %vm6624_vm4, %v1282_v6, %v1266_v31  ;;  %v1334_v30 = vsel %vm6628_vm5, %v1286_v51, %v1270_v48 }
 0x152   :  { %v1346_v63 = vsel %vm6624_vm4, %v1314_v60, %v1298_v36  ;;  %v1350_v32 = vsel %vm6628_vm5, %v1318_v44, %v1302_v12  ;;  %v996_v25 = vand.u32 15, %v980_v22  ;;  %v1000_v61 = vand.u32 15, %v984_v57 }
 0x153   :  { %v1362_v34 = vsel %vm6632_vm6, %v1346_v63, %v1330_v54  ;;  %v1366_v53 = vsel %vm6645_vm7, %v1350_v32, %v1334_v30  ;;  %v977_v45 = vshrl.u32 %v6716_v29, 8  ;;  %v981_v50 = vshrl.u32 %v6719_v62, 8 }
 0x154   :  { %v1401_v4 = vmul.f32 %v6167_v10, %v1362_v34  ;;  %v1405_v16 = vmul.f32 %v6167_v10, %v1366_v53  ;;  %v1012_v22 = vand.u32 1, %v996_v25  ;;  %v1016_v57 = vand.u32 1, %v1000_v61 }
 0x155   :  { %v1044_v23 = vand.u32 2, %v996_v25  ;;  %v1048_v26 = vand.u32 2, %v1000_v61  ;;  %v1076_v13 = vand.u32 4, %v996_v25  ;;  %v1080_v8 = vand.u32 4, %v1000_v61 }
 0x156   :  { %v1413_v39 = vpack.c.bf16 %v1405_v16, %v1401_v4  ;;  %vm6724_vm8 = vcmp.ne.s32.totalorder %v1012_v22, 0  ;;  %vm6728_vm9 = vcmp.ne.s32.totalorder %v1016_v57, 0  ;;  %v1108_v28 = vand.u32 8, %v996_v25 }
 0x157   :  { %vm6732_vm10 = vcmp.ne.s32.totalorder %v1044_v23, 0  ;;  %vm6736_vm11 = vcmp.ne.s32.totalorder %v1048_v26, 0  ;;  %vm6740_vm12 = vcmp.ne.s32.totalorder %v1076_v13, 0  ;;  %vm6744_vm13 = vcmp.ne.s32.totalorder %v1080_v8, 0 }
 0x158   :  { %3816 = vmatprep.subr.bf16.mxu0 %v1413_v39  ;;  %v1112_v17 = vand.u32 8, %v1000_v61  ;;  %vm6748_vm14 = vcmp.ne.s32.totalorder %v1108_v28, 0  ;;  %v1140_v48 = vsel %vm6724_vm8, -0.6961928, %v4137_v35  ;;  %v1144_v6 = vsel %vm6728_vm9, -0.6961928, %v4137_v35 }
 0x159   :  { %v1156_v51 = vsel %vm6724_vm8, -0.3949175, %v4138_v38  ;;  %v1160_v36 = vsel %vm6728_vm9, -0.3949175, %v4138_v38  ;;  %v1172_v12 = vsel %vm6724_vm8, -0.18477343, %v4139_v42 }
 0x15a   :  { %vm6767_vm15 = vcmp.ne.s32.totalorder %v1112_v17, 0  ;;  %v1176_v44 = vsel %vm6728_vm9, -0.18477343, %v4139_v42  ;;  %v1188_v54 = vsel %vm6724_vm8, 0.0, %v4140_v46  ;;  %v1192_v30 = vsel %vm6728_vm9, 0.0, %v4140_v46 }
 0x15b   :  { %v1204_v63 = vsel %vm6724_vm8, 0.1609302, %v4141_v49  ;;  %v1208_v32 = vsel %vm6728_vm9, 0.1609302, %v4141_v49  ;;  %v1220_v25 = vsel %vm6724_vm8, 0.33791524, %v4142_v52  ;;  %v1268_v61 = vsel %vm6732_vm10, %v1156_v51, %v1140_v48 }
 0x15c   :  { %v1224_v34 = vsel %vm6728_vm9, 0.33791524, %v4142_v52  ;;  %v1236_v53 = vsel %vm6724_vm8, 0.562617, %v4143_v55  ;;  %v1240_v4 = vsel %vm6728_vm9, 0.562617, %v4143_v55  ;;  %v1272_v16 = vsel %vm6736_vm11, %v1160_v36, %v1144_v6 }
 0x15d   :  { %v1252_v22 = vsel %vm6724_vm8, 1.0, %v4144_v59  ;;  %v1256_v57 = vsel %vm6728_vm9, 1.0, %v4144_v59  ;;  %v1284_v23 = vsel %vm6732_vm10, %v1188_v54, %v1172_v12  ;;  %v1288_v26 = vsel %vm6736_vm11, %v1192_v30, %v1176_v44  ;;  %v6834_v44 = vld [vmem:[#allocation6 + $0x50] sm:$0xff] }
 0x15e   :  { %v1300_v13 = vsel %vm6732_vm10, %v1220_v25, %v1204_v63  ;;  %v1304_v8 = vsel %vm6736_vm11, %v1224_v34, %v1208_v32  ;;  %v1316_v39 = vsel %vm6732_vm10, %v1252_v22, %v1236_v53  ;;  %v1320_v15 = vsel %vm6736_vm11, %v1256_v57, %v1240_v4  ;;  %v6837_v54 = vld [vmem:[#allocation6 + $0x70] sm:$0xff] }
 0x15f   :  { %v1332_v0 = vsel %vm6740_vm12, %v1284_v23, %v1268_v61  ;;  %v1336_v28 = vsel %vm6744_vm13, %v1288_v26, %v1272_v16  ;;  %v1348_v17 = vsel %vm6740_vm12, %v1316_v39, %v1300_v13  ;;  %v1352_v48 = vsel %vm6744_vm13, %v1320_v15, %v1304_v8 }
 0x160   :  { %v1364_v6 = vsel %vm6748_vm14, %v1348_v17, %v1332_v0  ;;  %v1368_v1 = vsel %vm6767_vm15, %v1352_v48, %v1336_v28  ;;  %v993_v10 = vand.u32 15, %v977_v45  ;;  %v997_v51 = vand.u32 15, %v981_v50 }
 0x161   :  { %v1403_v36 = vmul.f32 %v6293_v58, %v1364_v6  ;;  %v1407_v12 = vmul.f32 %v6293_v58, %v1368_v1  ;;  %v979_v31 = vshrl.u32 %v6834_v44, 8  ;;  %v983_v9 = vshrl.u32 %v6837_v54, 8 }
 0x162   :  { %v1009_v30 = vand.u32 1, %v993_v10  ;;  %v1013_v43 = vand.u32 1, %v997_v51  ;;  %v1041_v63 = vand.u32 2, %v993_v10  ;;  %v1045_v32 = vand.u32 2, %v997_v51 }
 0x163   :  { %v1415_v60 = vpack.c.bf16 %v1407_v12, %v1403_v36  ;;  %v1073_v25 = vand.u32 4, %v993_v10  ;;  %v1077_v45 = vand.u32 4, %v997_v51  ;;  %v1105_v50 = vand.u32 8, %v993_v10 }
 0x164   :  { %vm6840_vm0 = vcmp.ne.s32.totalorder %v1009_v30, 0  ;;  %vm6844_vm1 = vcmp.ne.s32.totalorder %v1013_v43, 0  ;;  %vm6848_vm2 = vcmp.ne.s32.totalorder %v1041_v63, 0  ;;  %vm6852_vm3 = vcmp.ne.s32.totalorder %v1045_v32, 0 }
 0x165   :  { %3869 = vmatprep.subr.bf16.mxu1 %v1415_v60  ;;  %vm6856_vm4 = vcmp.ne.s32.totalorder %v1073_v25, 0  ;;  %vm6860_vm5 = vcmp.ne.s32.totalorder %v1077_v45, 0  ;;  %v1109_v22 = vand.u32 8, %v997_v51  ;;  %vm6864_vm6 = vcmp.ne.s32.totalorder %v1105_v50, 0 }
 0x166   :  { %v1137_v23 = vsel %vm6840_vm0, -0.6961928, %v4137_v35  ;;  %v1141_v26 = vsel %vm6844_vm1, -0.6961928, %v4137_v35  ;;  %v1153_v13 = vsel %vm6840_vm0, -0.3949175, %v4138_v38 }
 0x167   :  { %vm6877_vm7 = vcmp.ne.s32.totalorder %v1109_v22, 0  ;;  %v1157_v39 = vsel %vm6844_vm1, -0.3949175, %v4138_v38  ;;  %v1169_v15 = vsel %vm6840_vm0, -0.18477343, %v4139_v42  ;;  %v1185_v0 = vsel %vm6840_vm0, 0.0, %v4140_v46 }
 0x168   :  { %v1173_v28 = vsel %vm6844_vm1, -0.18477343, %v4139_v42  ;;  %v1189_v17 = vsel %vm6844_vm1, 0.0, %v4140_v46  ;;  %v1201_v48 = vsel %vm6840_vm0, 0.1609302, %v4141_v49  ;;  %v1249_v6 = vsel %vm6840_vm0, 1.0, %v4144_v59 }
 0x169   :  { %v1205_v1 = vsel %vm6844_vm1, 0.1609302, %v4141_v49  ;;  %v1217_v10 = vsel %vm6840_vm0, 0.33791524, %v4142_v52  ;;  %v1221_v51 = vsel %vm6844_vm1, 0.33791524, %v4142_v52  ;;  %v1265_v36 = vsel %vm6848_vm2, %v1153_v13, %v1137_v23 }
 0x16a   :  { %v1233_v12 = vsel %vm6840_vm0, 0.562617, %v4143_v55  ;;  %v1237_v30 = vsel %vm6844_vm1, 0.562617, %v4143_v55  ;;  %v1253_v43 = vsel %vm6844_vm1, 1.0, %v4144_v59  ;;  %v1269_v63 = vsel %vm6852_vm3, %v1157_v39, %v1141_v26 }
 0x16b   :  { %v1281_v32 = vsel %vm6848_vm2, %v1185_v0, %v1169_v15  ;;  %v1285_v60 = vsel %vm6852_vm3, %v1189_v17, %v1173_v28  ;;  %v1297_v25 = vsel %vm6848_vm2, %v1217_v10, %v1201_v48  ;;  %v1301_v45 = vsel %vm6852_vm3, %v1221_v51, %v1205_v1 }
 0x16c   :  { %v1313_v50 = vsel %vm6848_vm2, %v1249_v6, %v1233_v12  ;;  %v1317_v61 = vsel %vm6852_vm3, %v1253_v43, %v1237_v30  ;;  %v1329_v58 = vsel %vm6856_vm4, %v1281_v32, %v1265_v36  ;;  %v1333_v22 = vsel %vm6860_vm5, %v1285_v60, %v1269_v63 }
 0x16d   :  { %v1345_v23 = vsel %vm6856_vm4, %v1313_v50, %v1297_v25  ;;  %v1349_v26 = vsel %vm6860_vm5, %v1317_v61, %v1301_v45  ;;  %v995_v13 = vand.u32 15, %v979_v31  ;;  %v999_v39 = vand.u32 15, %v983_v9  ;;  %v7064_v25 = vld [vmem:[#allocation8 + $0x1] ss:$4 sm:$0xf] }
 0x16e   :  { %v1361_v34 = vsel %vm6864_vm6, %v1345_v23, %v1329_v58  ;;  %v1365_v53 = vsel %vm6877_vm7, %v1349_v26, %v1333_v22  ;;  %v1425_v15 = vshrl.u32 %v6002_v21, 12  ;;  %v1429_v0 = vshrl.u32 %v6005_v33, 12 }
 0x16f   :  { %v1400_v28 = vmul.f32 %v6407_v24, %v1361_v34  ;;  %v1404_v4 = vmul.f32 %v6407_v24, %v1365_v53  ;;  %v1011_v17 = vand.u32 1, %v995_v13  ;;  %v1015_v48 = vand.u32 1, %v999_v39 }
 0x170   :  { %v1043_v16 = vand.u32 2, %v995_v13  ;;  %v1047_v6 = vand.u32 2, %v999_v39  ;;  %v1075_v31 = vand.u32 4, %v995_v13  ;;  %v1079_v9 = vand.u32 4, %v999_v39 }
 0x171   :  { %v1412_v1 = vpack.c.bf16 %v1404_v4, %v1400_v28  ;;  %vm6952_vm8 = vcmp.ne.s32.totalorder %v1011_v17, 0  ;;  %vm6956_vm9 = vcmp.ne.s32.totalorder %v1015_v48, 0  ;;  %v1107_v21 = vand.u32 8, %v995_v13 }
 0x172   :  { %vm6960_vm10 = vcmp.ne.s32.totalorder %v1043_v16, 0  ;;  %vm6964_vm11 = vcmp.ne.s32.totalorder %v1047_v6, 0  ;;  %vm6968_vm12 = vcmp.ne.s32.totalorder %v1075_v31, 0  ;;  %vm6972_vm13 = vcmp.ne.s32.totalorder %v1079_v9, 0 }
 0x173   :  { %3817 = vmatpush1.bf16.msra.mxu0 %v1412_v1  ;;  %v1111_v36 = vand.u32 8, %v999_v39  ;;  %vm6976_vm14 = vcmp.ne.s32.totalorder %v1107_v21, 0  ;;  %v1139_v30 = vsel %vm6952_vm8, -0.6961928, %v4137_v35  ;;  %v1143_v43 = vsel %vm6956_vm9, -0.6961928, %v4137_v35 }
 0x174   :  { %v1155_v63 = vsel %vm6952_vm8, -0.3949175, %v4138_v38  ;;  %v1159_v32 = vsel %vm6956_vm9, -0.3949175, %v4138_v38  ;;  %v1171_v60 = vsel %vm6952_vm8, -0.18477343, %v4139_v42 }
 0x175   :  { %vm6995_vm15 = vcmp.ne.s32.totalorder %v1111_v36, 0  ;;  %v1175_v45 = vsel %vm6956_vm9, -0.18477343, %v4139_v42  ;;  %v1187_v50 = vsel %vm6952_vm8, 0.0, %v4140_v46  ;;  %v1191_v61 = vsel %vm6956_vm9, 0.0, %v4140_v46 }
 0x176   :  { %v1203_v58 = vsel %vm6952_vm8, 0.1609302, %v4141_v49  ;;  %v1207_v22 = vsel %vm6956_vm9, 0.1609302, %v4141_v49  ;;  %v1219_v23 = vsel %vm6952_vm8, 0.33791524, %v4142_v52  ;;  %v1267_v26 = vsel %vm6960_vm10, %v1155_v63, %v1139_v30 }
 0x177   :  { %v1223_v13 = vsel %vm6956_vm9, 0.33791524, %v4142_v52  ;;  %v1235_v39 = vsel %vm6952_vm8, 0.562617, %v4143_v55  ;;  %v1239_v34 = vsel %vm6956_vm9, 0.562617, %v4143_v55  ;;  %v1271_v53 = vsel %vm6964_vm11, %v1159_v32, %v1143_v43 }
 0x178   :  { %v1251_v28 = vsel %vm6952_vm8, 1.0, %v4144_v59  ;;  %v1255_v4 = vsel %vm6956_vm9, 1.0, %v4144_v59  ;;  %v1283_v17 = vsel %vm6960_vm10, %v1187_v50, %v1171_v60  ;;  %v1287_v48 = vsel %vm6964_vm11, %v1191_v61, %v1175_v45 }
 0x179   :  { %v1299_v16 = vsel %vm6960_vm10, %v1219_v23, %v1203_v58  ;;  %v1303_v6 = vsel %vm6964_vm11, %v1223_v13, %v1207_v22  ;;  %v1315_v31 = vsel %vm6960_vm10, %v1251_v28, %v1235_v39  ;;  %v1319_v9 = vsel %vm6964_vm11, %v1255_v4, %v1239_v34 }
 0x17a   :  { %v1331_v1 = vsel %vm6968_vm12, %v1283_v17, %v1267_v26  ;;  %v1335_v57 = vsel %vm6972_vm13, %v1287_v48, %v1271_v53  ;;  %v1347_v8 = vsel %vm6968_vm12, %v1315_v31, %v1299_v16  ;;  %v1351_v21 = vsel %vm6972_vm13, %v1319_v9, %v1303_v6 }
 0x17b   :  { %v1363_v36 = vsel %vm6976_vm14, %v1347_v8, %v1331_v1  ;;  %v1367_v33 = vsel %vm6995_vm15, %v1351_v21, %v1335_v57  ;;  %v1441_v24 = vand.u32 15, %v1425_v15  ;;  %v1445_v30 = vand.u32 15, %v1429_v0 }
 0x17c   :  { %v1402_v43 = vmul.f32 %v6533_v56, %v1363_v36  ;;  %v1406_v63 = vmul.f32 %v6533_v56, %v1367_v33  ;;  %v1427_v32 = vshrl.u32 %v6120_v47, 12  ;;  %v1431_v10 = vshrl.u32 %v6123_v18, 12 }
 0x17d   :  { %v1457_v60 = vand.u32 1, %v1441_v24  ;;  %v1461_v45 = vand.u32 1, %v1445_v30  ;;  %v1489_v51 = vand.u32 2, %v1441_v24  ;;  %v1493_v50 = vand.u32 2, %v1445_v30 }
 0x17e   :  { %v1414_v61 = vpack.c.bf16 %v1406_v63, %v1402_v43  ;;  %v1521_v12 = vand.u32 4, %v1441_v24  ;;  %v1525_v58 = vand.u32 4, %v1445_v30  ;;  %v1553_v22 = vand.u32 8, %v1441_v24 }
 0x17f   :  { %vm7066_vm0 = vcmp.ne.s32.totalorder %v1457_v60, 0  ;;  %vm7070_vm1 = vcmp.ne.s32.totalorder %v1461_v45, 0  ;;  %vm7074_vm2 = vcmp.ne.s32.totalorder %v1489_v51, 0  ;;  %vm7078_vm3 = vcmp.ne.s32.totalorder %v1493_v50, 0 }
 0x180   :  { %3870 = vmatpush1.bf16.msra.mxu1 %v1414_v61  ;;  %vm7082_vm4 = vcmp.ne.s32.totalorder %v1521_v12, 0  ;;  %vm7086_vm5 = vcmp.ne.s32.totalorder %v1525_v58, 0  ;;  %v1557_v26 = vand.u32 8, %v1445_v30  ;;  %vm7090_vm6 = vcmp.ne.s32.totalorder %v1553_v22, 0 }
 0x181   :  { %v1585_v39 = vsel %vm7066_vm0, -0.6961928, %v4137_v35  ;;  %v1589_v34 = vsel %vm7070_vm1, -0.6961928, %v4137_v35  ;;  %v1601_v53 = vsel %vm7066_vm0, -0.3949175, %v4138_v38  ;;  %v7105_v28 = vrot.slane %v7064_v25, %v4210_v2 }
 0x182   :  { %vm7107_vm7 = vcmp.ne.s32.totalorder %v1557_v26, 0  ;;  %v1605_v17 = vsel %vm7070_vm1, -0.3949175, %v4138_v38  ;;  %v1617_v48 = vsel %vm7066_vm0, -0.18477343, %v4139_v42  ;;  %v1633_v16 = vsel %vm7066_vm0, 0.0, %v4140_v46 }
 0x183   :  { %v1621_v6 = vsel %vm7070_vm1, -0.18477343, %v4139_v42  ;;  %v1637_v31 = vsel %vm7070_vm1, 0.0, %v4140_v46  ;;  %v1649_v9 = vsel %vm7066_vm0, 0.1609302, %v4141_v49  ;;  %v1697_v1 = vsel %vm7066_vm0, 1.0, %v4144_v59 }
 0x184   :  { %v1653_v57 = vsel %vm7070_vm1, 0.1609302, %v4141_v49  ;;  %v1665_v8 = vsel %vm7066_vm0, 0.33791524, %v4142_v52  ;;  %v1669_v21 = vsel %vm7070_vm1, 0.33791524, %v4142_v52  ;;  %v1713_v36 = vsel %vm7074_vm2, %v1601_v53, %v1585_v39 }
 0x185   :  { %v1681_v33 = vsel %vm7066_vm0, 0.562617, %v4143_v55  ;;  %v1685_v24 = vsel %vm7070_vm1, 0.562617, %v4143_v55  ;;  %v1701_v30 = vsel %vm7070_vm1, 1.0, %v4144_v59  ;;  %v1717_v43 = vsel %vm7078_vm3, %v1605_v17, %v1589_v34 }
 0x186   :  { %v1729_v63 = vsel %vm7074_vm2, %v1633_v16, %v1617_v48  ;;  %v1733_v60 = vsel %vm7078_vm3, %v1637_v31, %v1621_v6  ;;  %v1745_v45 = vsel %vm7074_vm2, %v1665_v8, %v1649_v9  ;;  %v1749_v51 = vsel %vm7078_vm3, %v1669_v21, %v1653_v57 }
 0x187   :  { %v1761_v50 = vsel %vm7074_vm2, %v1697_v1, %v1681_v33  ;;  %v1765_v61 = vsel %vm7078_vm3, %v1701_v30, %v1685_v24  ;;  %v1777_v12 = vsel %vm7082_vm4, %v1729_v63, %v1713_v36  ;;  %v1781_v58 = vsel %vm7086_vm5, %v1733_v60, %v1717_v43 }
 0x188   :  { %v1793_v22 = vsel %vm7082_vm4, %v1761_v50, %v1745_v45  ;;  %v1797_v15 = vsel %vm7086_vm5, %v1765_v61, %v1749_v51  ;;  %v1443_v56 = vand.u32 15, %v1427_v32  ;;  %v1447_v26 = vand.u32 15, %v1431_v10 }
 0x189   :  { %v1809_v47 = vsel %vm7090_vm6, %v1793_v22, %v1777_v12  ;;  %v1813_v18 = vsel %vm7107_vm7, %v1797_v15, %v1781_v58  ;;  %v1424_v39 = vshrl.u32 %v6240_v19, 12  ;;  %v1428_v34 = vshrl.u32 %v6243_v5, 12 }
 0x18a   :  { %v1847_v53 = vmul.f32 %v7105_v28, %v1809_v47  ;;  %v1851_v0 = vmul.f32 %v7105_v28, %v1813_v18  ;;  %v1459_v17 = vand.u32 1, %v1443_v56  ;;  %v1463_v48 = vand.u32 1, %v1447_v26 }
 0x18b   :  { %v1491_v23 = vand.u32 2, %v1443_v56  ;;  %v1495_v16 = vand.u32 2, %v1447_v26  ;;  %v1523_v32 = vand.u32 4, %v1443_v56  ;;  %v1527_v10 = vand.u32 4, %v1447_v26 }
 0x18c   :  { %v1863_v6 = vpack.c.bf16 %v1851_v0, %v1847_v53  ;;  %vm7182_vm8 = vcmp.ne.s32.totalorder %v1459_v17, 0  ;;  %vm7186_vm9 = vcmp.ne.s32.totalorder %v1463_v48, 0  ;;  %v1555_v19 = vand.u32 8, %v1443_v56 }
 0x18d   :  { %vm7190_vm10 = vcmp.ne.s32.totalorder %v1491_v23, 0  ;;  %vm7194_vm11 = vcmp.ne.s32.totalorder %v1495_v16, 0  ;;  %vm7198_vm12 = vcmp.ne.s32.totalorder %v1523_v32, 0  ;;  %vm7202_vm13 = vcmp.ne.s32.totalorder %v1527_v10, 0 }
 0x18e   :  { %3818 = vmatprep.subr.bf16.mxu0 %v1863_v6  ;;  %v1559_v57 = vand.u32 8, %v1447_v26  ;;  %vm7206_vm14 = vcmp.ne.s32.totalorder %v1555_v19, 0  ;;  %v1587_v21 = vsel %vm7182_vm8, -0.6961928, %v4137_v35  ;;  %v1591_v36 = vsel %vm7186_vm9, -0.6961928, %v4137_v35 }
 0x18f   :  { %v1603_v33 = vsel %vm7182_vm8, -0.3949175, %v4138_v38  ;;  %v1607_v24 = vsel %vm7186_vm9, -0.3949175, %v4138_v38  ;;  %v1619_v30 = vsel %vm7182_vm8, -0.18477343, %v4139_v42  ;;  %v7227_v43 = vrot.slane %v7064_v25, %v4212_v3 }
 0x190   :  { %vm7229_vm15 = vcmp.ne.s32.totalorder %v1559_v57, 0  ;;  %v1623_v60 = vsel %vm7186_vm9, -0.18477343, %v4139_v42  ;;  %v1635_v45 = vsel %vm7182_vm8, 0.0, %v4140_v46  ;;  %v1639_v51 = vsel %vm7186_vm9, 0.0, %v4140_v46 }
 0x191   :  { %v1651_v50 = vsel %vm7182_vm8, 0.1609302, %v4141_v49  ;;  %v1655_v61 = vsel %vm7186_vm9, 0.1609302, %v4141_v49  ;;  %v1667_v12 = vsel %vm7182_vm8, 0.33791524, %v4142_v52  ;;  %v1715_v58 = vsel %vm7190_vm10, %v1603_v33, %v1587_v21 }
 0x192   :  { %v1671_v22 = vsel %vm7186_vm9, 0.33791524, %v4142_v52  ;;  %v1683_v15 = vsel %vm7182_vm8, 0.562617, %v4143_v55  ;;  %v1687_v56 = vsel %vm7186_vm9, 0.562617, %v4143_v55  ;;  %v1719_v26 = vsel %vm7194_vm11, %v1607_v24, %v1591_v36 }
 0x193   :  { %v1699_v47 = vsel %vm7182_vm8, 1.0, %v4144_v59  ;;  %v1703_v18 = vsel %vm7186_vm9, 1.0, %v4144_v59  ;;  %v1731_v53 = vsel %vm7190_vm10, %v1635_v45, %v1619_v30  ;;  %v1735_v0 = vsel %vm7194_vm11, %v1639_v51, %v1623_v60 }
 0x194   :  { %v1747_v17 = vsel %vm7190_vm10, %v1667_v12, %v1651_v50  ;;  %v1751_v48 = vsel %vm7194_vm11, %v1671_v22, %v1655_v61  ;;  %v1763_v23 = vsel %vm7190_vm10, %v1699_v47, %v1683_v15  ;;  %v1767_v16 = vsel %vm7194_vm11, %v1703_v18, %v1687_v56 }
 0x195   :  { %v1779_v32 = vsel %vm7198_vm12, %v1731_v53, %v1715_v58  ;;  %v1783_v10 = vsel %vm7202_vm13, %v1735_v0, %v1719_v26  ;;  %v1795_v6 = vsel %vm7198_vm12, %v1763_v23, %v1747_v17  ;;  %v1799_v13 = vsel %vm7202_vm13, %v1767_v16, %v1751_v48 }
 0x196   :  { %v1811_v4 = vsel %vm7206_vm14, %v1795_v6, %v1779_v32  ;;  %v1815_v19 = vsel %vm7229_vm15, %v1799_v13, %v1783_v10  ;;  %v1440_v5 = vand.u32 15, %v1424_v39  ;;  %v1444_v31 = vand.u32 15, %v1428_v34 }
 0x197   :  { %v1849_v57 = vmul.f32 %v7227_v43, %v1811_v4  ;;  %v1853_v21 = vmul.f32 %v7227_v43, %v1815_v19  ;;  %v1426_v36 = vshrl.u32 %v6362_v37, 12  ;;  %v1430_v9 = vshrl.u32 %v6365_v41, 12 }
 0x198   :  { %v1456_v33 = vand.u32 1, %v1440_v5  ;;  %v1460_v24 = vand.u32 1, %v1444_v31  ;;  %v1488_v1 = vand.u32 2, %v1440_v5  ;;  %v1492_v30 = vand.u32 2, %v1444_v31 }
 0x199   :  { %v1865_v60 = vpack.c.bf16 %v1853_v21, %v1849_v57  ;;  %v1520_v8 = vand.u32 4, %v1440_v5  ;;  %v1524_v45 = vand.u32 4, %v1444_v31  ;;  %v1552_v51 = vand.u32 8, %v1440_v5 }
 0x19a   :  { %vm7298_vm0 = vcmp.ne.s32.totalorder %v1456_v33, 0  ;;  %vm7302_vm1 = vcmp.ne.s32.totalorder %v1460_v24, 0  ;;  %vm7306_vm2 = vcmp.ne.s32.totalorder %v1488_v1, 0  ;;  %vm7310_vm3 = vcmp.ne.s32.totalorder %v1492_v30, 0 }
 0x19b   :  { %3871 = vmatprep.subr.bf16.mxu1 %v1865_v60  ;;  %vm7314_vm4 = vcmp.ne.s32.totalorder %v1520_v8, 0  ;;  %vm7318_vm5 = vcmp.ne.s32.totalorder %v1524_v45, 0  ;;  %v1556_v61 = vand.u32 8, %v1444_v31  ;;  %vm7322_vm6 = vcmp.ne.s32.totalorder %v1552_v51, 0 }
 0x19c   :  { %v1584_v58 = vsel %vm7298_vm0, -0.6961928, %v4137_v35  ;;  %v1588_v22 = vsel %vm7302_vm1, -0.6961928, %v4137_v35  ;;  %v1600_v15 = vsel %vm7298_vm0, -0.3949175, %v4138_v38  ;;  %v7337_v56 = vrot.slane %v7064_v25, %v4220_v7 }
 0x19d   :  { %vm7339_vm7 = vcmp.ne.s32.totalorder %v1556_v61, 0  ;;  %v1604_v47 = vsel %vm7302_vm1, -0.3949175, %v4138_v38  ;;  %v1616_v18 = vsel %vm7298_vm0, -0.18477343, %v4139_v42  ;;  %v1632_v53 = vsel %vm7298_vm0, 0.0, %v4140_v46 }
 0x19e   :  { %v1620_v0 = vsel %vm7302_vm1, -0.18477343, %v4139_v42  ;;  %v1636_v17 = vsel %vm7302_vm1, 0.0, %v4140_v46  ;;  %v1648_v48 = vsel %vm7298_vm0, 0.1609302, %v4141_v49  ;;  %v1696_v23 = vsel %vm7298_vm0, 1.0, %v4144_v59 }
 0x19f   :  { %v1652_v16 = vsel %vm7302_vm1, 0.1609302, %v4141_v49  ;;  %v1664_v32 = vsel %vm7298_vm0, 0.33791524, %v4142_v52  ;;  %v1668_v10 = vsel %vm7302_vm1, 0.33791524, %v4142_v52  ;;  %v1712_v6 = vsel %vm7306_vm2, %v1600_v15, %v1584_v58 }
 0x1a0   :  { %v1680_v13 = vsel %vm7298_vm0, 0.562617, %v4143_v55  ;;  %v1684_v4 = vsel %vm7302_vm1, 0.562617, %v4143_v55  ;;  %v1700_v19 = vsel %vm7302_vm1, 1.0, %v4144_v59  ;;  %v1716_v5 = vsel %vm7310_vm3, %v1604_v47, %v1588_v22 }
 0x1a1   :  { %v1728_v31 = vsel %vm7306_vm2, %v1632_v53, %v1616_v18  ;;  %v1732_v57 = vsel %vm7310_vm3, %v1636_v17, %v1620_v0  ;;  %v1744_v21 = vsel %vm7306_vm2, %v1664_v32, %v1648_v48  ;;  %v1748_v33 = vsel %vm7310_vm3, %v1668_v10, %v1652_v16 }
 0x1a2   :  { %v1760_v24 = vsel %vm7306_vm2, %v1696_v23, %v1680_v13  ;;  %v1764_v1 = vsel %vm7310_vm3, %v1700_v19, %v1684_v4  ;;  %v1776_v30 = vsel %vm7314_vm4, %v1728_v31, %v1712_v6  ;;  %v1780_v60 = vsel %vm7318_vm5, %v1732_v57, %v1716_v5 }
 0x1a3   :  { %v1792_v8 = vsel %vm7314_vm4, %v1760_v24, %v1744_v21  ;;  %v1796_v45 = vsel %vm7318_vm5, %v1764_v1, %v1748_v33  ;;  %v1442_v51 = vand.u32 15, %v1426_v36  ;;  %v1446_v63 = vand.u32 15, %v1430_v9 }
 0x1a4   :  { %v1808_v39 = vsel %vm7322_vm6, %v1792_v8, %v1776_v30  ;;  %v1812_v37 = vsel %vm7339_vm7, %v1796_v45, %v1780_v60  ;;  %v1433_v41 = vshrl.u32 %v6480_v20, 12  ;;  %v1437_v61 = vshrl.u32 %v6483_v40, 12 }
 0x1a5   :  { %v1846_v58 = vmul.f32 %v7337_v56, %v1808_v39  ;;  %v1850_v34 = vmul.f32 %v7337_v56, %v1812_v37  ;;  %v1458_v22 = vand.u32 1, %v1442_v51  ;;  %v1462_v15 = vand.u32 1, %v1446_v63 }
 0x1a6   :  { %v1490_v50 = vand.u32 2, %v1442_v51  ;;  %v1494_v47 = vand.u32 2, %v1446_v63  ;;  %v1522_v36 = vand.u32 4, %v1442_v51  ;;  %v1526_v9 = vand.u32 4, %v1446_v63 }
 0x1a7   :  { %v1862_v18 = vpack.c.bf16 %v1850_v34, %v1846_v58  ;;  %vm7414_vm8 = vcmp.ne.s32.totalorder %v1458_v22, 0  ;;  %vm7418_vm9 = vcmp.ne.s32.totalorder %v1462_v15, 0  ;;  %v1554_v20 = vand.u32 8, %v1442_v51 }
 0x1a8   :  { %vm7422_vm10 = vcmp.ne.s32.totalorder %v1490_v50, 0  ;;  %vm7426_vm11 = vcmp.ne.s32.totalorder %v1494_v47, 0  ;;  %vm7430_vm12 = vcmp.ne.s32.totalorder %v1522_v36, 0  ;;  %vm7434_vm13 = vcmp.ne.s32.totalorder %v1526_v9, 0 }
 0x1a9   :  { %3819 = vmatpush1.bf16.msra.mxu0 %v1862_v18  ;;  %v1558_v48 = vand.u32 8, %v1446_v63  ;;  %vm7438_vm14 = vcmp.ne.s32.totalorder %v1554_v20, 0  ;;  %v1586_v16 = vsel %vm7414_vm8, -0.6961928, %v4137_v35  ;;  %v1590_v32 = vsel %vm7418_vm9, -0.6961928, %v4137_v35 }
 0x1aa   :  { %v1602_v10 = vsel %vm7414_vm8, -0.3949175, %v4138_v38  ;;  %v1606_v6 = vsel %vm7418_vm9, -0.3949175, %v4138_v38  ;;  %v1618_v13 = vsel %vm7414_vm8, -0.18477343, %v4139_v42  ;;  %v7459_v4 = vrot.slane %v7064_v25, %v4234_v14 }
 0x1ab   :  { %vm7461_vm15 = vcmp.ne.s32.totalorder %v1558_v48, 0  ;;  %v1622_v5 = vsel %vm7418_vm9, -0.18477343, %v4139_v42  ;;  %v1634_v31 = vsel %vm7414_vm8, 0.0, %v4140_v46  ;;  %v1638_v57 = vsel %vm7418_vm9, 0.0, %v4140_v46 }
 0x1ac   :  { %v1650_v25 = vsel %vm7414_vm8, 0.1609302, %v4141_v49  ;;  %v1654_v21 = vsel %vm7418_vm9, 0.1609302, %v4141_v49  ;;  %v1666_v33 = vsel %vm7414_vm8, 0.33791524, %v4142_v52  ;;  %v1714_v24 = vsel %vm7422_vm10, %v1602_v10, %v1586_v16 }
 0x1ad   :  { %v1670_v1 = vsel %vm7418_vm9, 0.33791524, %v4142_v52  ;;  %v1682_v30 = vsel %vm7414_vm8, 0.562617, %v4143_v55  ;;  %v1686_v60 = vsel %vm7418_vm9, 0.562617, %v4143_v55  ;;  %v1718_v8 = vsel %vm7426_vm11, %v1606_v6, %v1590_v32 }
 0x1ae   :  { %v1698_v45 = vsel %vm7414_vm8, 1.0, %v4144_v59  ;;  %v1702_v51 = vsel %vm7418_vm9, 1.0, %v4144_v59  ;;  %v1730_v63 = vsel %vm7422_vm10, %v1634_v31, %v1618_v13  ;;  %v1734_v39 = vsel %vm7426_vm11, %v1638_v57, %v1622_v5 }
 0x1af   :  { %v1746_v37 = vsel %vm7422_vm10, %v1666_v33, %v1650_v25  ;;  %v1750_v58 = vsel %vm7426_vm11, %v1670_v1, %v1654_v21  ;;  %v1762_v34 = vsel %vm7422_vm10, %v1698_v45, %v1682_v30  ;;  %v1766_v22 = vsel %vm7426_vm11, %v1702_v51, %v1686_v60 }
 0x1b0   :  { %v1778_v15 = vsel %vm7430_vm12, %v1730_v63, %v1714_v24  ;;  %v1782_v50 = vsel %vm7434_vm13, %v1734_v39, %v1718_v8  ;;  %v1794_v47 = vsel %vm7430_vm12, %v1762_v34, %v1746_v37  ;;  %v1798_v36 = vsel %vm7434_vm13, %v1766_v22, %v1750_v58 }
 0x1b1   :  { %v1810_v9 = vsel %vm7438_vm14, %v1794_v47, %v1778_v15  ;;  %v1814_v18 = vsel %vm7461_vm15, %v1798_v36, %v1782_v50  ;;  %v1449_v12 = vand.u32 15, %v1433_v41  ;;  %v1453_v26 = vand.u32 15, %v1437_v61 }
 0x1b2   :  { %v1848_v20 = vmul.f32 %v7459_v4, %v1810_v9  ;;  %v1852_v40 = vmul.f32 %v7459_v4, %v1814_v18  ;;  %v1435_v53 = vshrl.u32 %v6602_v27, 12  ;;  %v1439_v0 = vshrl.u32 %v6605_v11, 12 }
 0x1b3   :  { %v1465_v48 = vand.u32 1, %v1449_v12  ;;  %v1469_v16 = vand.u32 1, %v1453_v26  ;;  %v1497_v17 = vand.u32 2, %v1449_v12  ;;  %v1501_v32 = vand.u32 2, %v1453_v26 }
 0x1b4   :  { %v1864_v10 = vpack.c.bf16 %v1852_v40, %v1848_v20  ;;  %v1529_v23 = vand.u32 4, %v1449_v12  ;;  %v1533_v6 = vand.u32 4, %v1453_v26  ;;  %v1561_v13 = vand.u32 8, %v1449_v12 }
 0x1b5   :  { %vm7530_vm0 = vcmp.ne.s32.totalorder %v1465_v48, 0  ;;  %vm7534_vm1 = vcmp.ne.s32.totalorder %v1469_v16, 0  ;;  %vm7538_vm2 = vcmp.ne.s32.totalorder %v1497_v17, 0  ;;  %vm7542_vm3 = vcmp.ne.s32.totalorder %v1501_v32, 0 }
 0x1b6   :  { %3872 = vmatpush1.bf16.msra.mxu1 %v1864_v10  ;;  %vm7546_vm4 = vcmp.ne.s32.totalorder %v1529_v23, 0  ;;  %vm7550_vm5 = vcmp.ne.s32.totalorder %v1533_v6, 0  ;;  %v1565_v31 = vand.u32 8, %v1453_v26  ;;  %vm7554_vm6 = vcmp.ne.s32.totalorder %v1561_v13, 0 }
 0x1b7   :  { %v1593_v25 = vsel %vm7530_vm0, -0.6961928, %v4137_v35  ;;  %v1597_v21 = vsel %vm7534_vm1, -0.6961928, %v4137_v35  ;;  %v1609_v33 = vsel %vm7530_vm0, -0.3949175, %v4138_v38 }
 0x1b8   :  { %vm7567_vm7 = vcmp.ne.s32.totalorder %v1565_v31, 0  ;;  %v1613_v1 = vsel %vm7534_vm1, -0.3949175, %v4138_v38  ;;  %v1625_v30 = vsel %vm7530_vm0, -0.18477343, %v4139_v42  ;;  %v1641_v60 = vsel %vm7530_vm0, 0.0, %v4140_v46 }
 0x1b9   :  { %v1629_v8 = vsel %vm7534_vm1, -0.18477343, %v4139_v42  ;;  %v1645_v45 = vsel %vm7534_vm1, 0.0, %v4140_v46  ;;  %v1657_v51 = vsel %vm7530_vm0, 0.1609302, %v4141_v49  ;;  %v1705_v63 = vsel %vm7530_vm0, 1.0, %v4144_v59 }
 0x1ba   :  { %v1661_v39 = vsel %vm7534_vm1, 0.1609302, %v4141_v49  ;;  %v1673_v37 = vsel %vm7530_vm0, 0.33791524, %v4142_v52  ;;  %v1677_v58 = vsel %vm7534_vm1, 0.33791524, %v4142_v52  ;;  %v1721_v34 = vsel %vm7538_vm2, %v1609_v33, %v1593_v25 }
 0x1bb   :  { %v1689_v22 = vsel %vm7530_vm0, 0.562617, %v4143_v55  ;;  %v1693_v15 = vsel %vm7534_vm1, 0.562617, %v4143_v55  ;;  %v1709_v50 = vsel %vm7534_vm1, 1.0, %v4144_v59  ;;  %v1725_v47 = vsel %vm7542_vm3, %v1613_v1, %v1597_v21 }
 0x1bc   :  { %v1737_v36 = vsel %vm7538_vm2, %v1641_v60, %v1625_v30  ;;  %v1741_v9 = vsel %vm7542_vm3, %v1645_v45, %v1629_v8  ;;  %v1753_v18 = vsel %vm7538_vm2, %v1673_v37, %v1657_v51  ;;  %v1757_v12 = vsel %vm7542_vm3, %v1677_v58, %v1661_v39 }
 0x1bd   :  { %v1769_v26 = vsel %vm7538_vm2, %v1705_v63, %v1689_v22  ;;  %v1773_v20 = vsel %vm7542_vm3, %v1709_v50, %v1693_v15  ;;  %v1785_v40 = vsel %vm7546_vm4, %v1737_v36, %v1721_v34  ;;  %v1789_v48 = vsel %vm7550_vm5, %v1741_v9, %v1725_v47 }
 0x1be   :  { %v1801_v16 = vsel %vm7546_vm4, %v1769_v26, %v1753_v18  ;;  %v1805_v17 = vsel %vm7550_vm5, %v1773_v20, %v1757_v12  ;;  %v1451_v32 = vand.u32 15, %v1435_v53  ;;  %v1455_v10 = vand.u32 15, %v1439_v0 }
 0x1bf   :  { %v1817_v23 = vsel %vm7554_vm6, %v1801_v16, %v1785_v40  ;;  %v1821_v6 = vsel %vm7567_vm7, %v1805_v17, %v1789_v48  ;;  %v1432_v13 = vshrl.u32 %v6716_v29, 12  ;;  %v1436_v19 = vshrl.u32 %v6719_v62, 12 }
 0x1c0   :  { %v1855_v41 = vmul.f32 %v7105_v28, %v1817_v23  ;;  %v1859_v27 = vmul.f32 %v7105_v28, %v1821_v6  ;;  %v1467_v11 = vand.u32 1, %v1451_v32  ;;  %v1471_v61 = vand.u32 1, %v1455_v10 }
 0x1c1   :  { %v1499_v5 = vand.u32 2, %v1451_v32  ;;  %v1503_v31 = vand.u32 2, %v1455_v10  ;;  %v1531_v53 = vand.u32 4, %v1451_v32  ;;  %v1535_v0 = vand.u32 4, %v1455_v10 }
 0x1c2   :  { %v1867_v25 = vpack.c.bf16 %v1859_v27, %v1855_v41  ;;  %vm7642_vm8 = vcmp.ne.s32.totalorder %v1467_v11, 0  ;;  %vm7646_vm9 = vcmp.ne.s32.totalorder %v1471_v61, 0  ;;  %v1563_v29 = vand.u32 8, %v1451_v32 }
 0x1c3   :  { %vm7650_vm10 = vcmp.ne.s32.totalorder %v1499_v5, 0  ;;  %vm7654_vm11 = vcmp.ne.s32.totalorder %v1503_v31, 0  ;;  %vm7658_vm12 = vcmp.ne.s32.totalorder %v1531_v53, 0  ;;  %vm7662_vm13 = vcmp.ne.s32.totalorder %v1535_v0, 0 }
 0x1c4   :  { %3820 = vmatprep.subr.bf16.mxu0 %v1867_v25  ;;  %v1567_v1 = vand.u32 8, %v1455_v10  ;;  %vm7666_vm14 = vcmp.ne.s32.totalorder %v1563_v29, 0  ;;  %v1595_v60 = vsel %vm7642_vm8, -0.6961928, %v4137_v35  ;;  %v1599_v8 = vsel %vm7646_vm9, -0.6961928, %v4137_v35 }
 0x1c5   :  { %v1611_v45 = vsel %vm7642_vm8, -0.3949175, %v4138_v38  ;;  %v1615_v51 = vsel %vm7646_vm9, -0.3949175, %v4138_v38  ;;  %v1627_v63 = vsel %vm7642_vm8, -0.18477343, %v4139_v42 }
 0x1c6   :  { %vm7685_vm15 = vcmp.ne.s32.totalorder %v1567_v1, 0  ;;  %v1631_v37 = vsel %vm7646_vm9, -0.18477343, %v4139_v42  ;;  %v1643_v58 = vsel %vm7642_vm8, 0.0, %v4140_v46  ;;  %v1647_v34 = vsel %vm7646_vm9, 0.0, %v4140_v46 }
 0x1c7   :  { %v1659_v22 = vsel %vm7642_vm8, 0.1609302, %v4141_v49  ;;  %v1663_v15 = vsel %vm7646_vm9, 0.1609302, %v4141_v49  ;;  %v1675_v50 = vsel %vm7642_vm8, 0.33791524, %v4142_v52  ;;  %v1723_v47 = vsel %vm7650_vm10, %v1611_v45, %v1595_v60 }
 0x1c8   :  { %v1679_v36 = vsel %vm7646_vm9, 0.33791524, %v4142_v52  ;;  %v1691_v9 = vsel %vm7642_vm8, 0.562617, %v4143_v55  ;;  %v1695_v18 = vsel %vm7646_vm9, 0.562617, %v4143_v55  ;;  %v1727_v12 = vsel %vm7654_vm11, %v1615_v51, %v1599_v8 }
 0x1c9   :  { %v1707_v26 = vsel %vm7642_vm8, 1.0, %v4144_v59  ;;  %v1711_v20 = vsel %vm7646_vm9, 1.0, %v4144_v59  ;;  %v1739_v40 = vsel %vm7650_vm10, %v1643_v58, %v1627_v63  ;;  %v1743_v48 = vsel %vm7654_vm11, %v1647_v34, %v1631_v37 }
 0x1ca   :  { %v1755_v16 = vsel %vm7650_vm10, %v1675_v50, %v1659_v22  ;;  %v1759_v17 = vsel %vm7654_vm11, %v1679_v36, %v1663_v15  ;;  %v1771_v32 = vsel %vm7650_vm10, %v1707_v26, %v1691_v9  ;;  %v1775_v10 = vsel %vm7654_vm11, %v1711_v20, %v1695_v18 }
 0x1cb   :  { %v1787_v23 = vsel %vm7658_vm12, %v1739_v40, %v1723_v47  ;;  %v1791_v6 = vsel %vm7662_vm13, %v1743_v48, %v1727_v12  ;;  %v1803_v41 = vsel %vm7658_vm12, %v1771_v32, %v1755_v16  ;;  %v1807_v27 = vsel %vm7662_vm13, %v1775_v10, %v1759_v17 }
 0x1cc   :  { %v1819_v11 = vsel %vm7666_vm14, %v1803_v41, %v1787_v23  ;;  %v1823_v61 = vsel %vm7685_vm15, %v1807_v27, %v1791_v6  ;;  %v1448_v5 = vand.u32 15, %v1432_v13  ;;  %v1452_v31 = vand.u32 15, %v1436_v19 }
 0x1cd   :  { %v1857_v53 = vmul.f32 %v7227_v43, %v1819_v11  ;;  %v1861_v0 = vmul.f32 %v7227_v43, %v1823_v61  ;;  %v1434_v25 = vshrl.u32 %v6834_v44, 12  ;;  %v1438_v57 = vshrl.u32 %v6837_v54, 12 }
 0x1ce   :  { %v1464_v21 = vand.u32 1, %v1448_v5  ;;  %v1468_v29 = vand.u32 1, %v1452_v31  ;;  %v1496_v62 = vand.u32 2, %v1448_v5  ;;  %v1500_v28 = vand.u32 2, %v1452_v31 }
 0x1cf   :  { %v1869_v33 = vpack.c.bf16 %v1861_v0, %v1857_v53  ;;  %v1528_v24 = vand.u32 4, %v1448_v5  ;;  %v1532_v1 = vand.u32 4, %v1452_v31  ;;  %v1560_v30 = vand.u32 8, %v1448_v5 }
 0x1d0   :  { %vm7754_vm0 = vcmp.ne.s32.totalorder %v1464_v21, 0  ;;  %vm7758_vm1 = vcmp.ne.s32.totalorder %v1468_v29, 0  ;;  %vm7762_vm2 = vcmp.ne.s32.totalorder %v1496_v62, 0  ;;  %vm7766_vm3 = vcmp.ne.s32.totalorder %v1500_v28, 0  ;;  %v7862_v29 = vld [vmem:[#allocation6 + $0x8] sm:$0xff] }
 0x1d1   :  { %3873 = vmatprep.subr.bf16.mxu1 %v1869_v33  ;;  %vm7770_vm4 = vcmp.ne.s32.totalorder %v1528_v24, 0  ;;  %vm7774_vm5 = vcmp.ne.s32.totalorder %v1532_v1, 0  ;;  %v1564_v8 = vand.u32 8, %v1452_v31  ;;  %vm7778_vm6 = vcmp.ne.s32.totalorder %v1560_v30, 0  ;;  %v7865_v28 = vld [vmem:[#allocation6 + $0x28] sm:$0xff] }
 0x1d2   :  { %v1592_v51 = vsel %vm7754_vm0, -0.6961928, %v4137_v35  ;;  %v1596_v63 = vsel %vm7758_vm1, -0.6961928, %v4137_v35  ;;  %v1608_v39 = vsel %vm7754_vm0, -0.3949175, %v4138_v38 }
 0x1d3   :  { %vm7791_vm7 = vcmp.ne.s32.totalorder %v1564_v8, 0  ;;  %v1612_v58 = vsel %vm7758_vm1, -0.3949175, %v4138_v38  ;;  %v1624_v34 = vsel %vm7754_vm0, -0.18477343, %v4139_v42  ;;  %v1640_v22 = vsel %vm7754_vm0, 0.0, %v4140_v46 }
 0x1d4   :  { %v1628_v15 = vsel %vm7758_vm1, -0.18477343, %v4139_v42  ;;  %v1644_v50 = vsel %vm7758_vm1, 0.0, %v4140_v46  ;;  %v1656_v47 = vsel %vm7754_vm0, 0.1609302, %v4141_v49  ;;  %v1704_v36 = vsel %vm7754_vm0, 1.0, %v4144_v59 }
 0x1d5   :  { %v1660_v9 = vsel %vm7758_vm1, 0.1609302, %v4141_v49  ;;  %v1672_v18 = vsel %vm7754_vm0, 0.33791524, %v4142_v52  ;;  %v1676_v12 = vsel %vm7758_vm1, 0.33791524, %v4142_v52  ;;  %v1720_v26 = vsel %vm7762_vm2, %v1608_v39, %v1592_v51 }
 0x1d6   :  { %v1688_v20 = vsel %vm7754_vm0, 0.562617, %v4143_v55  ;;  %v1692_v40 = vsel %vm7758_vm1, 0.562617, %v4143_v55  ;;  %v1708_v48 = vsel %vm7758_vm1, 1.0, %v4144_v59  ;;  %v1724_v16 = vsel %vm7766_vm3, %v1612_v58, %v1596_v63 }
 0x1d7   :  { %v1736_v17 = vsel %vm7762_vm2, %v1640_v22, %v1624_v34  ;;  %v1740_v32 = vsel %vm7766_vm3, %v1644_v50, %v1628_v15  ;;  %v1752_v10 = vsel %vm7762_vm2, %v1672_v18, %v1656_v47  ;;  %v1756_v23 = vsel %vm7766_vm3, %v1676_v12, %v1660_v9 }
 0x1d8   :  { %v1768_v6 = vsel %vm7762_vm2, %v1704_v36, %v1688_v20  ;;  %v1772_v41 = vsel %vm7766_vm3, %v1708_v48, %v1692_v40  ;;  %v1784_v27 = vsel %vm7770_vm4, %v1736_v17, %v1720_v26  ;;  %v1788_v11 = vsel %vm7774_vm5, %v1740_v32, %v1724_v16 }
 0x1d9   :  { %v1800_v61 = vsel %vm7770_vm4, %v1768_v6, %v1752_v10  ;;  %v1804_v5 = vsel %vm7774_vm5, %v1772_v41, %v1756_v23  ;;  %v1450_v31 = vand.u32 15, %v1434_v25  ;;  %v1454_v53 = vand.u32 15, %v1438_v57 }
 0x1da   :  { %v1816_v0 = vsel %vm7778_vm6, %v1800_v61, %v1784_v27  ;;  %v1820_v21 = vsel %vm7791_vm7, %v1804_v5, %v1788_v11  ;;  %v1879_v62 = vshrl.u32 %v7862_v29, 16  ;;  %v1883_v33 = vshrl.u32 %v7865_v28, 16 }
 0x1db   :  { %v1854_v24 = vmul.f32 %v7337_v56, %v1816_v0  ;;  %v1858_v1 = vmul.f32 %v7337_v56, %v1820_v21  ;;  %v1466_v25 = vand.u32 1, %v1450_v31  ;;  %v1470_v57 = vand.u32 1, %v1454_v53 }
 0x1dc   :  { %v1498_v30 = vand.u32 2, %v1450_v31  ;;  %v1502_v60 = vand.u32 2, %v1454_v53  ;;  %v1530_v13 = vand.u32 4, %v1450_v31  ;;  %v1534_v44 = vand.u32 4, %v1454_v53 }
 0x1dd   :  { %v1866_v54 = vpack.c.bf16 %v1858_v1, %v1854_v24  ;;  %vm7870_vm8 = vcmp.ne.s32.totalorder %v1466_v25, 0  ;;  %vm7874_vm9 = vcmp.ne.s32.totalorder %v1470_v57, 0  ;;  %v1562_v8 = vand.u32 8, %v1450_v31 }
 0x1de   :  { %vm7878_vm10 = vcmp.ne.s32.totalorder %v1498_v30, 0  ;;  %vm7882_vm11 = vcmp.ne.s32.totalorder %v1502_v60, 0  ;;  %vm7886_vm12 = vcmp.ne.s32.totalorder %v1530_v13, 0  ;;  %vm7890_vm13 = vcmp.ne.s32.totalorder %v1534_v44, 0  ;;  %v7980_v13 = vld [vmem:[#allocation6 + $0x18] sm:$0xff] }
 0x1df   :  { %3821 = vmatpush1.bf16.msra.mxu0 %v1866_v54  ;;  %v1566_v39 = vand.u32 8, %v1454_v53  ;;  %vm7894_vm14 = vcmp.ne.s32.totalorder %v1562_v8, 0  ;;  %v1594_v58 = vsel %vm7870_vm8, -0.6961928, %v4137_v35  ;;  %v1598_v34 = vsel %vm7874_vm9, -0.6961928, %v4137_v35 }
 0x1e0   :  { %v1610_v22 = vsel %vm7870_vm8, -0.3949175, %v4138_v38  ;;  %v1614_v15 = vsel %vm7874_vm9, -0.3949175, %v4138_v38  ;;  %v1626_v50 = vsel %vm7870_vm8, -0.18477343, %v4139_v42 }
 0x1e1   :  { %vm7913_vm15 = vcmp.ne.s32.totalorder %v1566_v39, 0  ;;  %v1630_v36 = vsel %vm7874_vm9, -0.18477343, %v4139_v42  ;;  %v1642_v9 = vsel %vm7870_vm8, 0.0, %v4140_v46  ;;  %v1646_v18 = vsel %vm7874_vm9, 0.0, %v4140_v46  ;;  %v7983_v54 = vld [vmem:[#allocation6 + $0x38] sm:$0xff] }
 0x1e2   :  { %v1658_v12 = vsel %vm7870_vm8, 0.1609302, %v4141_v49  ;;  %v1662_v26 = vsel %vm7874_vm9, 0.1609302, %v4141_v49  ;;  %v1674_v20 = vsel %vm7870_vm8, 0.33791524, %v4142_v52  ;;  %v1722_v40 = vsel %vm7878_vm10, %v1610_v22, %v1594_v58 }
 0x1e3   :  { %v1678_v48 = vsel %vm7874_vm9, 0.33791524, %v4142_v52  ;;  %v1690_v16 = vsel %vm7870_vm8, 0.562617, %v4143_v55  ;;  %v1694_v17 = vsel %vm7874_vm9, 0.562617, %v4143_v55  ;;  %v1726_v32 = vsel %vm7882_vm11, %v1614_v15, %v1598_v34 }
 0x1e4   :  { %v1706_v10 = vsel %vm7870_vm8, 1.0, %v4144_v59  ;;  %v1710_v23 = vsel %vm7874_vm9, 1.0, %v4144_v59  ;;  %v1738_v6 = vsel %vm7878_vm10, %v1642_v9, %v1626_v50  ;;  %v1742_v41 = vsel %vm7882_vm11, %v1646_v18, %v1630_v36  ;;  %v7986_v39 = vld [vmem:[#allocation8 + $0x2] ss:$4 sm:$0xf] }
 0x1e5   :  { %v1754_v27 = vsel %vm7878_vm10, %v1674_v20, %v1658_v12  ;;  %v1758_v11 = vsel %vm7882_vm11, %v1678_v48, %v1662_v26  ;;  %v1770_v61 = vsel %vm7878_vm10, %v1706_v10, %v1690_v16  ;;  %v1774_v5 = vsel %vm7882_vm11, %v1710_v23, %v1694_v17  ;;  %v8222_v26 = vld [vmem:[#allocation6 + $0x10] sm:$0xff] }
 0x1e6   :  { %v1786_v31 = vsel %vm7886_vm12, %v1738_v6, %v1722_v40  ;;  %v1790_v53 = vsel %vm7890_vm13, %v1742_v41, %v1726_v32  ;;  %v1802_v0 = vsel %vm7886_vm12, %v1770_v61, %v1754_v27  ;;  %v1806_v21 = vsel %vm7890_vm13, %v1774_v5, %v1758_v11 }
 0x1e7   :  { %v1818_v24 = vsel %vm7894_vm14, %v1802_v0, %v1786_v31  ;;  %v1822_v1 = vsel %vm7913_vm15, %v1806_v21, %v1790_v53  ;;  %v1895_v25 = vand.u32 15, %v1879_v62  ;;  %v1899_v57 = vand.u32 15, %v1883_v33 }
 0x1e8   :  { %v1856_v30 = vmul.f32 %v7459_v4, %v1818_v24  ;;  %v1860_v60 = vmul.f32 %v7459_v4, %v1822_v1  ;;  %v1881_v44 = vshrl.u32 %v7980_v13, 16  ;;  %v1885_v43 = vshrl.u32 %v7983_v54, 16 }
 0x1e9   :  { %v1911_v19 = vand.u32 1, %v1895_v25  ;;  %v1915_v8 = vand.u32 1, %v1899_v57  ;;  %v1943_v45 = vand.u32 2, %v1895_v25  ;;  %v1947_v56 = vand.u32 2, %v1899_v57 }
 0x1ea   :  { %v1868_v51 = vpack.c.bf16 %v1860_v60, %v1856_v30  ;;  %v1975_v63 = vand.u32 4, %v1895_v25  ;;  %v1979_v62 = vand.u32 4, %v1899_v57  ;;  %v2007_v33 = vand.u32 8, %v1895_v25 }
 0x1eb   :  { %vm7988_vm0 = vcmp.ne.s32.totalorder %v1911_v19, 0  ;;  %vm7992_vm1 = vcmp.ne.s32.totalorder %v1915_v8, 0  ;;  %vm7996_vm2 = vcmp.ne.s32.totalorder %v1943_v45, 0  ;;  %vm8000_vm3 = vcmp.ne.s32.totalorder %v1947_v56, 0 }
 0x1ec   :  { %3874 = vmatpush1.bf16.msra.mxu1 %v1868_v51  ;;  %vm8004_vm4 = vcmp.ne.s32.totalorder %v1975_v63, 0  ;;  %vm8008_vm5 = vcmp.ne.s32.totalorder %v1979_v62, 0  ;;  %v2011_v50 = vand.u32 8, %v1899_v57  ;;  %vm8012_vm6 = vcmp.ne.s32.totalorder %v2007_v33, 0  ;;  %v8100_v63 = vld [vmem:[#allocation6] sm:$0xff] }
 0x1ed   :  { %v2039_v36 = vsel %vm7988_vm0, -0.6961928, %v4137_v35  ;;  %v2043_v9 = vsel %vm7992_vm1, -0.6961928, %v4137_v35  ;;  %v2055_v18 = vsel %vm7988_vm0, -0.3949175, %v4138_v38  ;;  %v8027_v12 = vrot.slane %v7986_v39, %v4210_v2 }
 0x1ee   :  { %vm8029_vm7 = vcmp.ne.s32.totalorder %v2011_v50, 0  ;;  %v2059_v20 = vsel %vm7992_vm1, -0.3949175, %v4138_v38  ;;  %v2071_v40 = vsel %vm7988_vm0, -0.18477343, %v4139_v42  ;;  %v2087_v48 = vsel %vm7988_vm0, 0.0, %v4140_v46 }
 0x1ef   :  { %v2075_v16 = vsel %vm7992_vm1, -0.18477343, %v4139_v42  ;;  %v2091_v17 = vsel %vm7992_vm1, 0.0, %v4140_v46  ;;  %v2103_v32 = vsel %vm7988_vm0, 0.1609302, %v4141_v49  ;;  %v2151_v10 = vsel %vm7988_vm0, 1.0, %v4144_v59 }
 0x1f0   :  { %v2107_v23 = vsel %vm7992_vm1, 0.1609302, %v4141_v49  ;;  %v2119_v6 = vsel %vm7988_vm0, 0.33791524, %v4142_v52  ;;  %v2123_v41 = vsel %vm7992_vm1, 0.33791524, %v4142_v52  ;;  %v2167_v27 = vsel %vm7996_vm2, %v2055_v18, %v2039_v36 }
 0x1f1   :  { %v2135_v11 = vsel %vm7988_vm0, 0.562617, %v4143_v55  ;;  %v2139_v61 = vsel %vm7992_vm1, 0.562617, %v4143_v55  ;;  %v2155_v5 = vsel %vm7992_vm1, 1.0, %v4144_v59  ;;  %v2171_v31 = vsel %vm8000_vm3, %v2059_v20, %v2043_v9  ;;  %v8103_v33 = vld [vmem:[#allocation6 + $0x20] sm:$0xff] }
 0x1f2   :  { %v2183_v53 = vsel %vm7996_vm2, %v2087_v48, %v2071_v40  ;;  %v2187_v0 = vsel %vm8000_vm3, %v2091_v17, %v2075_v16  ;;  %v2199_v21 = vsel %vm7996_vm2, %v2119_v6, %v2103_v32  ;;  %v2203_v24 = vsel %vm8000_vm3, %v2123_v41, %v2107_v23  ;;  %v8225_v40 = vld [vmem:[#allocation6 + $0x30] sm:$0xff] }
 0x1f3   :  { %v2215_v1 = vsel %vm7996_vm2, %v2151_v10, %v2135_v11  ;;  %v2219_v25 = vsel %vm8000_vm3, %v2155_v5, %v2139_v61  ;;  %v2231_v57 = vsel %vm8004_vm4, %v2183_v53, %v2167_v27  ;;  %v2235_v30 = vsel %vm8008_vm5, %v2187_v0, %v2171_v31 }
 0x1f4   :  { %v2247_v60 = vsel %vm8004_vm4, %v2215_v1, %v2199_v21  ;;  %v2251_v19 = vsel %vm8008_vm5, %v2219_v25, %v2203_v24  ;;  %v1897_v8 = vand.u32 15, %v1881_v44  ;;  %v1901_v45 = vand.u32 15, %v1885_v43 }
 0x1f5   :  { %v2263_v56 = vsel %vm8012_vm6, %v2247_v60, %v2231_v57  ;;  %v2267_v51 = vsel %vm8029_vm7, %v2251_v19, %v2235_v30  ;;  %v1878_v62 = vshrl.u32 %v8100_v63, 16  ;;  %v1882_v4 = vshrl.u32 %v8103_v33, 16 }
 0x1f6   :  { %v2302_v37 = vmul.f32 %v8027_v12, %v2263_v56  ;;  %v2306_v58 = vmul.f32 %v8027_v12, %v2267_v51  ;;  %v1913_v44 = vand.u32 1, %v1897_v8  ;;  %v1917_v43 = vand.u32 1, %v1901_v45 }
 0x1f7   :  { %v1945_v34 = vand.u32 2, %v1897_v8  ;;  %v1949_v22 = vand.u32 2, %v1901_v45  ;;  %v1977_v15 = vand.u32 4, %v1897_v8  ;;  %v1981_v50 = vand.u32 4, %v1901_v45 }
 0x1f8   :  { %v2318_v47 = vpack.c.bf16 %v2306_v58, %v2302_v37  ;;  %vm8108_vm8 = vcmp.ne.s32.totalorder %v1913_v44, 0  ;;  %vm8112_vm9 = vcmp.ne.s32.totalorder %v1917_v43, 0  ;;  %v2009_v18 = vand.u32 8, %v1897_v8 }
 0x1f9   :  { %vm8116_vm10 = vcmp.ne.s32.totalorder %v1945_v34, 0  ;;  %vm8120_vm11 = vcmp.ne.s32.totalorder %v1949_v22, 0  ;;  %vm8124_vm12 = vcmp.ne.s32.totalorder %v1977_v15, 0  ;;  %vm8128_vm13 = vcmp.ne.s32.totalorder %v1981_v50, 0 }
 0x1fa   :  { %3822 = vmatprep.subr.bf16.mxu0 %v2318_v47  ;;  %v2013_v16 = vand.u32 8, %v1901_v45  ;;  %vm8132_vm14 = vcmp.ne.s32.totalorder %v2009_v18, 0  ;;  %v2041_v32 = vsel %vm8108_vm8, -0.6961928, %v4137_v35  ;;  %v2045_v10 = vsel %vm8112_vm9, -0.6961928, %v4137_v35 }
 0x1fb   :  { %v2057_v23 = vsel %vm8108_vm8, -0.3949175, %v4138_v38  ;;  %v2061_v6 = vsel %vm8112_vm9, -0.3949175, %v4138_v38  ;;  %v2073_v41 = vsel %vm8108_vm8, -0.18477343, %v4139_v42  ;;  %v8153_v27 = vrot.slane %v7986_v39, %v4212_v3 }
 0x1fc   :  { %vm8155_vm15 = vcmp.ne.s32.totalorder %v2013_v16, 0  ;;  %v2077_v61 = vsel %vm8112_vm9, -0.18477343, %v4139_v42  ;;  %v2089_v5 = vsel %vm8108_vm8, 0.0, %v4140_v46  ;;  %v2093_v31 = vsel %vm8112_vm9, 0.0, %v4140_v46 }
 0x1fd   :  { %v2105_v53 = vsel %vm8108_vm8, 0.1609302, %v4141_v49  ;;  %v2109_v0 = vsel %vm8112_vm9, 0.1609302, %v4141_v49  ;;  %v2121_v21 = vsel %vm8108_vm8, 0.33791524, %v4142_v52  ;;  %v2169_v24 = vsel %vm8116_vm10, %v2057_v23, %v2041_v32 }
 0x1fe   :  { %v2125_v1 = vsel %vm8112_vm9, 0.33791524, %v4142_v52  ;;  %v2137_v25 = vsel %vm8108_vm8, 0.562617, %v4143_v55  ;;  %v2141_v57 = vsel %vm8112_vm9, 0.562617, %v4143_v55  ;;  %v2173_v30 = vsel %vm8120_vm11, %v2061_v6, %v2045_v10 }
 0x1ff   :  { %v2153_v60 = vsel %vm8108_vm8, 1.0, %v4144_v59  ;;  %v2157_v19 = vsel %vm8112_vm9, 1.0, %v4144_v59  ;;  %v2185_v8 = vsel %vm8116_vm10, %v2089_v5, %v2073_v41  ;;  %v2189_v45 = vsel %vm8120_vm11, %v2093_v31, %v2077_v61  ;;  %v8340_v5 = vld [vmem:[#allocation6 + $0x48] sm:$0xff] }
 0x200   :  { %v2201_v56 = vsel %vm8116_vm10, %v2121_v21, %v2105_v53  ;;  %v2205_v51 = vsel %vm8120_vm11, %v2125_v1, %v2109_v0  ;;  %v2217_v37 = vsel %vm8116_vm10, %v2153_v60, %v2137_v25  ;;  %v2221_v58 = vsel %vm8120_vm11, %v2157_v19, %v2141_v57 }
 0x201   :  { %v2233_v44 = vsel %vm8124_vm12, %v2185_v8, %v2169_v24  ;;  %v2237_v43 = vsel %vm8128_vm13, %v2189_v45, %v2173_v30  ;;  %v2249_v34 = vsel %vm8124_vm12, %v2217_v37, %v2201_v56  ;;  %v2253_v22 = vsel %vm8128_vm13, %v2221_v58, %v2205_v51 }
 0x202   :  { %v2265_v15 = vsel %vm8132_vm14, %v2249_v34, %v2233_v44  ;;  %v2269_v50 = vsel %vm8155_vm15, %v2253_v22, %v2237_v43  ;;  %v1894_v47 = vand.u32 15, %v1878_v62  ;;  %v1898_v36 = vand.u32 15, %v1882_v4 }
 0x203   :  { %v2304_v9 = vmul.f32 %v8153_v27, %v2265_v15  ;;  %v2308_v18 = vmul.f32 %v8153_v27, %v2269_v50  ;;  %v1880_v20 = vshrl.u32 %v8222_v26, 16  ;;  %v1884_v48 = vshrl.u32 %v8225_v40, 16 }
 0x204   :  { %v1910_v16 = vand.u32 1, %v1894_v47  ;;  %v1914_v17 = vand.u32 1, %v1898_v36  ;;  %v1942_v32 = vand.u32 2, %v1894_v47  ;;  %v1946_v10 = vand.u32 2, %v1898_v36 }
 0x205   :  { %v2320_v23 = vpack.c.bf16 %v2308_v18, %v2304_v9  ;;  %v1974_v6 = vand.u32 4, %v1894_v47  ;;  %v1978_v62 = vand.u32 4, %v1898_v36  ;;  %v2006_v4 = vand.u32 8, %v1894_v47 }
 0x206   :  { %vm8228_vm0 = vcmp.ne.s32.totalorder %v1910_v16, 0  ;;  %vm8232_vm1 = vcmp.ne.s32.totalorder %v1914_v17, 0  ;;  %vm8236_vm2 = vcmp.ne.s32.totalorder %v1942_v32, 0  ;;  %vm8240_vm3 = vcmp.ne.s32.totalorder %v1946_v10, 0 }
 0x207   :  { %3875 = vmatprep.subr.bf16.mxu1 %v2320_v23  ;;  %vm8244_vm4 = vcmp.ne.s32.totalorder %v1974_v6, 0  ;;  %vm8248_vm5 = vcmp.ne.s32.totalorder %v1978_v62, 0  ;;  %v2010_v0 = vand.u32 8, %v1898_v36  ;;  %vm8252_vm6 = vcmp.ne.s32.totalorder %v2006_v4, 0 }
 0x208   :  { %v2038_v24 = vsel %vm8228_vm0, -0.6961928, %v4137_v35  ;;  %v2042_v1 = vsel %vm8232_vm1, -0.6961928, %v4137_v35  ;;  %v2054_v25 = vsel %vm8228_vm0, -0.3949175, %v4138_v38  ;;  %v8267_v57 = vrot.slane %v7986_v39, %v4220_v7 }
 0x209   :  { %vm8269_vm7 = vcmp.ne.s32.totalorder %v2010_v0, 0  ;;  %v2058_v60 = vsel %vm8232_vm1, -0.3949175, %v4138_v38  ;;  %v2070_v19 = vsel %vm8228_vm0, -0.18477343, %v4139_v42  ;;  %v2086_v8 = vsel %vm8228_vm0, 0.0, %v4140_v46 }
 0x20a   :  { %v2074_v45 = vsel %vm8232_vm1, -0.18477343, %v4139_v42  ;;  %v2090_v56 = vsel %vm8232_vm1, 0.0, %v4140_v46  ;;  %v2102_v51 = vsel %vm8228_vm0, 0.1609302, %v4141_v49  ;;  %v2150_v37 = vsel %vm8228_vm0, 1.0, %v4144_v59 }
 0x20b   :  { %v2106_v58 = vsel %vm8232_vm1, 0.1609302, %v4141_v49  ;;  %v2118_v44 = vsel %vm8228_vm0, 0.33791524, %v4142_v52  ;;  %v2122_v43 = vsel %vm8232_vm1, 0.33791524, %v4142_v52  ;;  %v2166_v34 = vsel %vm8236_vm2, %v2054_v25, %v2038_v24 }
 0x20c   :  { %v2134_v22 = vsel %vm8228_vm0, 0.562617, %v4143_v55  ;;  %v2138_v15 = vsel %vm8232_vm1, 0.562617, %v4143_v55  ;;  %v2154_v50 = vsel %vm8232_vm1, 1.0, %v4144_v59  ;;  %v2170_v47 = vsel %vm8240_vm3, %v2058_v60, %v2042_v1  ;;  %v8343_v24 = vld [vmem:[#allocation6 + $0x68] sm:$0xff] }
 0x20d   :  { %v2182_v36 = vsel %vm8236_vm2, %v2086_v8, %v2070_v19  ;;  %v2186_v9 = vsel %vm8240_vm3, %v2090_v56, %v2074_v45  ;;  %v2198_v18 = vsel %vm8236_vm2, %v2118_v44, %v2102_v51  ;;  %v2202_v16 = vsel %vm8240_vm3, %v2122_v43, %v2106_v58 }
 0x20e   :  { %v2214_v17 = vsel %vm8236_vm2, %v2150_v37, %v2134_v22  ;;  %v2218_v32 = vsel %vm8240_vm3, %v2154_v50, %v2138_v15  ;;  %v2230_v10 = vsel %vm8244_vm4, %v2182_v36, %v2166_v34  ;;  %v2234_v23 = vsel %vm8248_vm5, %v2186_v9, %v2170_v47 }
 0x20f   :  { %v2246_v6 = vsel %vm8244_vm4, %v2214_v17, %v2198_v18  ;;  %v2250_v62 = vsel %vm8248_vm5, %v2218_v32, %v2202_v16  ;;  %v1896_v4 = vand.u32 15, %v1880_v20  ;;  %v1900_v41 = vand.u32 15, %v1884_v48 }
 0x210   :  { %v2262_v11 = vsel %vm8252_vm6, %v2246_v6, %v2230_v10  ;;  %v2266_v61 = vsel %vm8269_vm7, %v2250_v62, %v2234_v23  ;;  %v1887_v0 = vshrl.u32 %v8340_v5, 16  ;;  %v1891_v31 = vshrl.u32 %v8343_v24, 16 }
 0x211   :  { %v2301_v1 = vmul.f32 %v8267_v57, %v2262_v11  ;;  %v2305_v53 = vmul.f32 %v8267_v57, %v2266_v61  ;;  %v1912_v20 = vand.u32 1, %v1896_v4  ;;  %v1916_v48 = vand.u32 1, %v1900_v41 }
 0x212   :  { %v1944_v25 = vand.u32 2, %v1896_v4  ;;  %v1948_v21 = vand.u32 2, %v1900_v41  ;;  %v1976_v60 = vand.u32 4, %v1896_v4  ;;  %v1980_v19 = vand.u32 4, %v1900_v41 }
 0x213   :  { %v2317_v30 = vpack.c.bf16 %v2305_v53, %v2301_v1  ;;  %vm8348_vm8 = vcmp.ne.s32.totalorder %v1912_v20, 0  ;;  %vm8352_vm9 = vcmp.ne.s32.totalorder %v1916_v48, 0  ;;  %v2008_v56 = vand.u32 8, %v1896_v4 }
 0x214   :  { %vm8356_vm10 = vcmp.ne.s32.totalorder %v1944_v25, 0  ;;  %vm8360_vm11 = vcmp.ne.s32.totalorder %v1948_v21, 0  ;;  %vm8364_vm12 = vcmp.ne.s32.totalorder %v1976_v60, 0  ;;  %vm8368_vm13 = vcmp.ne.s32.totalorder %v1980_v19, 0 }
 0x215   :  { %3823 = vmatpush1.bf16.msra.mxu0 %v2317_v30  ;;  %v2012_v43 = vand.u32 8, %v1900_v41  ;;  %vm8372_vm14 = vcmp.ne.s32.totalorder %v2008_v56, 0  ;;  %v2040_v22 = vsel %vm8348_vm8, -0.6961928, %v4137_v35  ;;  %v2044_v15 = vsel %vm8352_vm9, -0.6961928, %v4137_v35 }
 0x216   :  { %v2056_v50 = vsel %vm8348_vm8, -0.3949175, %v4138_v38  ;;  %v2060_v47 = vsel %vm8352_vm9, -0.3949175, %v4138_v38  ;;  %v2072_v36 = vsel %vm8348_vm8, -0.18477343, %v4139_v42  ;;  %v8393_v9 = vrot.slane %v7986_v39, %v4234_v14 }
 0x217   :  { %vm8395_vm15 = vcmp.ne.s32.totalorder %v2012_v43, 0  ;;  %v2076_v16 = vsel %vm8352_vm9, -0.18477343, %v4139_v42  ;;  %v2088_v17 = vsel %vm8348_vm8, 0.0, %v4140_v46  ;;  %v2092_v32 = vsel %vm8352_vm9, 0.0, %v4140_v46 }
 0x218   :  { %v2104_v39 = vsel %vm8348_vm8, 0.1609302, %v4141_v49  ;;  %v2108_v10 = vsel %vm8352_vm9, 0.1609302, %v4141_v49  ;;  %v2120_v23 = vsel %vm8348_vm8, 0.33791524, %v4142_v52  ;;  %v2168_v6 = vsel %vm8356_vm10, %v2056_v50, %v2040_v22 }
 0x219   :  { %v2124_v62 = vsel %vm8352_vm9, 0.33791524, %v4142_v52  ;;  %v2136_v4 = vsel %vm8348_vm8, 0.562617, %v4143_v55  ;;  %v2140_v41 = vsel %vm8352_vm9, 0.562617, %v4143_v55  ;;  %v2172_v11 = vsel %vm8360_vm11, %v2060_v47, %v2044_v15 }
 0x21a   :  { %v2152_v61 = vsel %vm8348_vm8, 1.0, %v4144_v59  ;;  %v2156_v1 = vsel %vm8352_vm9, 1.0, %v4144_v59  ;;  %v2184_v53 = vsel %vm8356_vm10, %v2088_v17, %v2072_v36  ;;  %v2188_v20 = vsel %vm8360_vm11, %v2092_v32, %v2076_v16  ;;  %v8462_v50 = vld [vmem:[#allocation6 + $0x58] sm:$0xff] }
 0x21b   :  { %v2200_v48 = vsel %vm8356_vm10, %v2120_v23, %v2104_v39  ;;  %v2204_v25 = vsel %vm8360_vm11, %v2124_v62, %v2108_v10  ;;  %v2216_v21 = vsel %vm8356_vm10, %v2152_v61, %v2136_v4  ;;  %v2220_v60 = vsel %vm8360_vm11, %v2156_v1, %v2140_v41  ;;  %v8465_v47 = vld [vmem:[#allocation6 + $0x78] sm:$0xff] }
 0x21c   :  { %v2232_v19 = vsel %vm8364_vm12, %v2184_v53, %v2168_v6  ;;  %v2236_v30 = vsel %vm8368_vm13, %v2188_v20, %v2172_v11  ;;  %v2248_v8 = vsel %vm8364_vm12, %v2216_v21, %v2200_v48  ;;  %v2252_v45 = vsel %vm8368_vm13, %v2220_v60, %v2204_v25 }
 0x21d   :  { %v2264_v56 = vsel %vm8372_vm14, %v2248_v8, %v2232_v19  ;;  %v2268_v51 = vsel %vm8395_vm15, %v2252_v45, %v2236_v30  ;;  %v1903_v37 = vand.u32 15, %v1887_v0  ;;  %v1907_v43 = vand.u32 15, %v1891_v31 }
 0x21e   :  { %v2303_v22 = vmul.f32 %v8393_v9, %v2264_v56  ;;  %v2307_v15 = vmul.f32 %v8393_v9, %v2268_v51  ;;  %v1889_v58 = vshrl.u32 %v8462_v50, 16  ;;  %v1893_v44 = vshrl.u32 %v8465_v47, 16 }
 0x21f   :  { %v1919_v36 = vand.u32 1, %v1903_v37  ;;  %v1923_v34 = vand.u32 1, %v1907_v43  ;;  %v1951_v16 = vand.u32 2, %v1903_v37  ;;  %v1955_v17 = vand.u32 2, %v1907_v43 }
 0x220   :  { %v2319_v18 = vpack.c.bf16 %v2307_v15, %v2303_v22  ;;  %v1983_v32 = vand.u32 4, %v1903_v37  ;;  %v1987_v0 = vand.u32 4, %v1907_v43  ;;  %v2015_v31 = vand.u32 8, %v1903_v37 }
 0x221   :  { %vm8468_vm0 = vcmp.ne.s32.totalorder %v1919_v36, 0  ;;  %vm8472_vm1 = vcmp.ne.s32.totalorder %v1923_v34, 0  ;;  %vm8476_vm2 = vcmp.ne.s32.totalorder %v1951_v16, 0  ;;  %vm8480_vm3 = vcmp.ne.s32.totalorder %v1955_v17, 0 }
 0x222   :  { %3876 = vmatpush1.bf16.msra.mxu1 %v2319_v18  ;;  %vm8484_vm4 = vcmp.ne.s32.totalorder %v1983_v32, 0  ;;  %vm8488_vm5 = vcmp.ne.s32.totalorder %v1987_v0, 0  ;;  %v2019_v41 = vand.u32 8, %v1907_v43  ;;  %vm8492_vm6 = vcmp.ne.s32.totalorder %v2015_v31, 0 }
 0x223   :  { %v2047_v61 = vsel %vm8468_vm0, -0.6961928, %v4137_v35  ;;  %v2051_v1 = vsel %vm8472_vm1, -0.6961928, %v4137_v35  ;;  %v2063_v53 = vsel %vm8468_vm0, -0.3949175, %v4138_v38 }
 0x224   :  { %vm8505_vm7 = vcmp.ne.s32.totalorder %v2019_v41, 0  ;;  %v2067_v48 = vsel %vm8472_vm1, -0.3949175, %v4138_v38  ;;  %v2079_v25 = vsel %vm8468_vm0, -0.18477343, %v4139_v42  ;;  %v2095_v21 = vsel %vm8468_vm0, 0.0, %v4140_v46 }
 0x225   :  { %v2083_v60 = vsel %vm8472_vm1, -0.18477343, %v4139_v42  ;;  %v2099_v19 = vsel %vm8472_vm1, 0.0, %v4140_v46  ;;  %v2111_v30 = vsel %vm8468_vm0, 0.1609302, %v4141_v49  ;;  %v2159_v8 = vsel %vm8468_vm0, 1.0, %v4144_v59 }
 0x226   :  { %v2115_v45 = vsel %vm8472_vm1, 0.1609302, %v4141_v49  ;;  %v2127_v56 = vsel %vm8468_vm0, 0.33791524, %v4142_v52  ;;  %v2131_v51 = vsel %vm8472_vm1, 0.33791524, %v4142_v52  ;;  %v2175_v37 = vsel %vm8476_vm2, %v2063_v53, %v2047_v61 }
 0x227   :  { %v2143_v43 = vsel %vm8468_vm0, 0.562617, %v4143_v55  ;;  %v2147_v22 = vsel %vm8472_vm1, 0.562617, %v4143_v55  ;;  %v2163_v15 = vsel %vm8472_vm1, 1.0, %v4144_v59  ;;  %v2179_v36 = vsel %vm8480_vm3, %v2067_v48, %v2051_v1  ;;  %v8576_v53 = vld [vmem:[#allocation6 + $0x40] sm:$0xff] }
 0x228   :  { %v2191_v34 = vsel %vm8476_vm2, %v2095_v21, %v2079_v25  ;;  %v2195_v16 = vsel %vm8480_vm3, %v2099_v19, %v2083_v60  ;;  %v2207_v17 = vsel %vm8476_vm2, %v2127_v56, %v2111_v30  ;;  %v2211_v18 = vsel %vm8480_vm3, %v2131_v51, %v2115_v45  ;;  %v8579_v25 = vld [vmem:[#allocation6 + $0x60] sm:$0xff] }
 0x229   :  { %v2223_v32 = vsel %vm8476_vm2, %v2159_v8, %v2143_v43  ;;  %v2227_v0 = vsel %vm8480_vm3, %v2163_v15, %v2147_v22  ;;  %v2239_v31 = vsel %vm8484_vm4, %v2191_v34, %v2175_v37  ;;  %v2243_v39 = vsel %vm8488_vm5, %v2195_v16, %v2179_v36 }
 0x22a   :  { %v2255_v10 = vsel %vm8484_vm4, %v2223_v32, %v2207_v17  ;;  %v2259_v41 = vsel %vm8488_vm5, %v2227_v0, %v2211_v18  ;;  %v1905_v61 = vand.u32 15, %v1889_v58  ;;  %v1909_v1 = vand.u32 15, %v1893_v44 }
 0x22b   :  { %v2271_v23 = vsel %vm8492_vm6, %v2255_v10, %v2239_v31  ;;  %v2275_v6 = vsel %vm8505_vm7, %v2259_v41, %v2243_v39  ;;  %v1886_v48 = vshrl.u32 %v8576_v53, 16  ;;  %v1890_v62 = vshrl.u32 %v8579_v25, 16 }
 0x22c   :  { %v2310_v21 = vmul.f32 %v8027_v12, %v2271_v23  ;;  %v2314_v4 = vmul.f32 %v8027_v12, %v2275_v6  ;;  %v1921_v58 = vand.u32 1, %v1905_v61  ;;  %v1925_v44 = vand.u32 1, %v1909_v1 }
 0x22d   :  { %v1953_v60 = vand.u32 2, %v1905_v61  ;;  %v1957_v11 = vand.u32 2, %v1909_v1  ;;  %v1985_v19 = vand.u32 4, %v1905_v61  ;;  %v1989_v30 = vand.u32 4, %v1909_v1 }
 0x22e   :  { %v2322_v20 = vpack.c.bf16 %v2314_v4, %v2310_v21  ;;  %vm8584_vm8 = vcmp.ne.s32.totalorder %v1921_v58, 0  ;;  %vm8588_vm9 = vcmp.ne.s32.totalorder %v1925_v44, 0  ;;  %v2017_v56 = vand.u32 8, %v1905_v61 }
 0x22f   :  { %vm8592_vm10 = vcmp.ne.s32.totalorder %v1953_v60, 0  ;;  %vm8596_vm11 = vcmp.ne.s32.totalorder %v1957_v11, 0  ;;  %vm8600_vm12 = vcmp.ne.s32.totalorder %v1985_v19, 0  ;;  %vm8604_vm13 = vcmp.ne.s32.totalorder %v1989_v30, 0 }
 0x230   :  { %3824 = vmatprep.subr.bf16.mxu0 %v2322_v20  ;;  %v2021_v22 = vand.u32 8, %v1909_v1  ;;  %vm8608_vm14 = vcmp.ne.s32.totalorder %v2017_v56, 0  ;;  %v2049_v36 = vsel %vm8584_vm8, -0.6961928, %v4137_v35  ;;  %v2053_v34 = vsel %vm8588_vm9, -0.6961928, %v4137_v35 }
 0x231   :  { %v2065_v16 = vsel %vm8584_vm8, -0.3949175, %v4138_v38  ;;  %v2069_v17 = vsel %vm8588_vm9, -0.3949175, %v4138_v38  ;;  %v2081_v18 = vsel %vm8584_vm8, -0.18477343, %v4139_v42 }
 0x232   :  { %vm8627_vm15 = vcmp.ne.s32.totalorder %v2021_v22, 0  ;;  %v2085_v0 = vsel %vm8588_vm9, -0.18477343, %v4139_v42  ;;  %v2097_v31 = vsel %vm8584_vm8, 0.0, %v4140_v46  ;;  %v2101_v39 = vsel %vm8588_vm9, 0.0, %v4140_v46 }
 0x233   :  { %v2113_v10 = vsel %vm8584_vm8, 0.1609302, %v4141_v49  ;;  %v2117_v41 = vsel %vm8588_vm9, 0.1609302, %v4141_v49  ;;  %v2129_v61 = vsel %vm8584_vm8, 0.33791524, %v4142_v52  ;;  %v2177_v1 = vsel %vm8592_vm10, %v2065_v16, %v2049_v36 }
 0x234   :  { %v2133_v23 = vsel %vm8588_vm9, 0.33791524, %v4142_v52  ;;  %v2145_v6 = vsel %vm8584_vm8, 0.562617, %v4143_v55  ;;  %v2149_v21 = vsel %vm8588_vm9, 0.562617, %v4143_v55  ;;  %v2181_v4 = vsel %vm8596_vm11, %v2069_v17, %v2053_v34 }
 0x235   :  { %v2161_v58 = vsel %vm8584_vm8, 1.0, %v4144_v59  ;;  %v2165_v44 = vsel %vm8588_vm9, 1.0, %v4144_v59  ;;  %v2193_v60 = vsel %vm8592_vm10, %v2097_v31, %v2081_v18  ;;  %v2197_v11 = vsel %vm8596_vm11, %v2101_v39, %v2085_v0  ;;  %v8694_v0 = vld [vmem:[#allocation6 + $0x50] sm:$0xff] }
 0x236   :  { %v2209_v19 = vsel %vm8592_vm10, %v2129_v61, %v2113_v10  ;;  %v2213_v30 = vsel %vm8596_vm11, %v2133_v23, %v2117_v41  ;;  %v2225_v20 = vsel %vm8592_vm10, %v2161_v58, %v2145_v6  ;;  %v2229_v8 = vsel %vm8596_vm11, %v2165_v44, %v2149_v21  ;;  %v8697_v31 = vld [vmem:[#allocation6 + $0x70] sm:$0xff] }
 0x237   :  { %v2241_v45 = vsel %vm8600_vm12, %v2193_v60, %v2177_v1  ;;  %v2245_v56 = vsel %vm8604_vm13, %v2197_v11, %v2181_v4  ;;  %v2257_v22 = vsel %vm8600_vm12, %v2225_v20, %v2209_v19  ;;  %v2261_v36 = vsel %vm8604_vm13, %v2229_v8, %v2213_v30 }
 0x238   :  { %v2273_v34 = vsel %vm8608_vm14, %v2257_v22, %v2241_v45  ;;  %v2277_v51 = vsel %vm8627_vm15, %v2261_v36, %v2245_v56  ;;  %v1902_v12 = vand.u32 15, %v1886_v48  ;;  %v1906_v16 = vand.u32 15, %v1890_v62 }
 0x239   :  { %v2312_v17 = vmul.f32 %v8153_v27, %v2273_v34  ;;  %v2316_v18 = vmul.f32 %v8153_v27, %v2277_v51  ;;  %v1888_v37 = vshrl.u32 %v8694_v0, 16  ;;  %v1892_v43 = vshrl.u32 %v8697_v31, 16 }
 0x23a   :  { %v1918_v39 = vand.u32 1, %v1902_v12  ;;  %v1922_v15 = vand.u32 1, %v1906_v16  ;;  %v1950_v10 = vand.u32 2, %v1902_v12  ;;  %v1954_v41 = vand.u32 2, %v1906_v16 }
 0x23b   :  { %v2324_v32 = vpack.c.bf16 %v2316_v18, %v2312_v17  ;;  %v1982_v61 = vand.u32 4, %v1902_v12  ;;  %v1986_v48 = vand.u32 4, %v1906_v16  ;;  %v2014_v62 = vand.u32 8, %v1902_v12 }
 0x23c   :  { %vm8700_vm0 = vcmp.ne.s32.totalorder %v1918_v39, 0  ;;  %vm8704_vm1 = vcmp.ne.s32.totalorder %v1922_v15, 0  ;;  %vm8708_vm2 = vcmp.ne.s32.totalorder %v1950_v10, 0  ;;  %vm8712_vm3 = vcmp.ne.s32.totalorder %v1954_v41, 0 }
 0x23d   :  { %3877 = vmatprep.subr.bf16.mxu1 %v2324_v32  ;;  %vm8716_vm4 = vcmp.ne.s32.totalorder %v1982_v61, 0  ;;  %vm8720_vm5 = vcmp.ne.s32.totalorder %v1986_v48, 0  ;;  %v2018_v58 = vand.u32 8, %v1906_v16  ;;  %vm8724_vm6 = vcmp.ne.s32.totalorder %v2014_v62, 0 }
 0x23e   :  { %v2046_v60 = vsel %vm8700_vm0, -0.6961928, %v4137_v35  ;;  %v2050_v11 = vsel %vm8704_vm1, -0.6961928, %v4137_v35  ;;  %v2062_v19 = vsel %vm8700_vm0, -0.3949175, %v4138_v38 }
 0x23f   :  { %vm8737_vm7 = vcmp.ne.s32.totalorder %v2018_v58, 0  ;;  %v2066_v20 = vsel %vm8704_vm1, -0.3949175, %v4138_v38  ;;  %v2078_v8 = vsel %vm8700_vm0, -0.18477343, %v4139_v42  ;;  %v2094_v45 = vsel %vm8700_vm0, 0.0, %v4140_v46 }
 0x240   :  { %v2082_v56 = vsel %vm8704_vm1, -0.18477343, %v4139_v42  ;;  %v2098_v22 = vsel %vm8704_vm1, 0.0, %v4140_v46  ;;  %v2110_v36 = vsel %vm8700_vm0, 0.1609302, %v4141_v49  ;;  %v2158_v34 = vsel %vm8700_vm0, 1.0, %v4144_v59 }
 0x241   :  { %v2114_v51 = vsel %vm8704_vm1, 0.1609302, %v4141_v49  ;;  %v2126_v12 = vsel %vm8700_vm0, 0.33791524, %v4142_v52  ;;  %v2130_v16 = vsel %vm8704_vm1, 0.33791524, %v4142_v52  ;;  %v2174_v17 = vsel %vm8708_vm2, %v2062_v19, %v2046_v60 }
 0x242   :  { %v2142_v18 = vsel %vm8700_vm0, 0.562617, %v4143_v55  ;;  %v2146_v39 = vsel %vm8704_vm1, 0.562617, %v4143_v55  ;;  %v2162_v15 = vsel %vm8704_vm1, 1.0, %v4144_v59  ;;  %v2178_v10 = vsel %vm8712_vm3, %v2066_v20, %v2050_v11 }
 0x243   :  { %v2190_v41 = vsel %vm8708_vm2, %v2094_v45, %v2078_v8  ;;  %v2194_v32 = vsel %vm8712_vm3, %v2098_v22, %v2082_v56  ;;  %v2206_v61 = vsel %vm8708_vm2, %v2126_v12, %v2110_v36  ;;  %v2210_v48 = vsel %vm8712_vm3, %v2130_v16, %v2114_v51 }
 0x244   :  { %v2222_v62 = vsel %vm8708_vm2, %v2158_v34, %v2142_v18  ;;  %v2226_v1 = vsel %vm8712_vm3, %v2162_v15, %v2146_v39  ;;  %v2238_v27 = vsel %vm8716_vm4, %v2190_v41, %v2174_v17  ;;  %v2242_v58 = vsel %vm8720_vm5, %v2194_v32, %v2178_v10 }
 0x245   :  { %v2254_v60 = vsel %vm8716_vm4, %v2222_v62, %v2206_v61  ;;  %v2258_v11 = vsel %vm8720_vm5, %v2226_v1, %v2210_v48  ;;  %v1904_v19 = vand.u32 15, %v1888_v37  ;;  %v1908_v20 = vand.u32 15, %v1892_v43  ;;  %v8924_v61 = vld [vmem:[#allocation8 + $0x2] ss:$4 sm:$0xf] }
 0x246   :  { %v2270_v23 = vsel %vm8724_vm6, %v2254_v60, %v2238_v27  ;;  %v2274_v6 = vsel %vm8737_vm7, %v2258_v11, %v2242_v58  ;;  %v2334_v8 = vshrl.u32 %v7862_v29, 20  ;;  %v2338_v45 = vshrl.u32 %v7865_v28, 20 }
 0x247   :  { %v2309_v56 = vmul.f32 %v8267_v57, %v2270_v23  ;;  %v2313_v21 = vmul.f32 %v8267_v57, %v2274_v6  ;;  %v1920_v22 = vand.u32 1, %v1904_v19  ;;  %v1924_v36 = vand.u32 1, %v1908_v20 }
 0x248   :  { %v1952_v4 = vand.u32 2, %v1904_v19  ;;  %v1956_v34 = vand.u32 2, %v1908_v20  ;;  %v1984_v37 = vand.u32 4, %v1904_v19  ;;  %v1988_v43 = vand.u32 4, %v1908_v20 }
 0x249   :  { %v2321_v51 = vpack.c.bf16 %v2313_v21, %v2309_v56  ;;  %vm8812_vm8 = vcmp.ne.s32.totalorder %v1920_v22, 0  ;;  %vm8816_vm9 = vcmp.ne.s32.totalorder %v1924_v36, 0  ;;  %v2016_v29 = vand.u32 8, %v1904_v19 }
 0x24a   :  { %vm8820_vm10 = vcmp.ne.s32.totalorder %v1952_v4, 0  ;;  %vm8824_vm11 = vcmp.ne.s32.totalorder %v1956_v34, 0  ;;  %vm8828_vm12 = vcmp.ne.s32.totalorder %v1984_v37, 0  ;;  %vm8832_vm13 = vcmp.ne.s32.totalorder %v1988_v43, 0 }
 0x24b   :  { %3825 = vmatpush1.bf16.msra.mxu0 %v2321_v51  ;;  %v2020_v17 = vand.u32 8, %v1908_v20  ;;  %vm8836_vm14 = vcmp.ne.s32.totalorder %v2016_v29, 0  ;;  %v2048_v39 = vsel %vm8812_vm8, -0.6961928, %v4137_v35  ;;  %v2052_v15 = vsel %vm8816_vm9, -0.6961928, %v4137_v35 }
 0x24c   :  { %v2064_v10 = vsel %vm8812_vm8, -0.3949175, %v4138_v38  ;;  %v2068_v41 = vsel %vm8816_vm9, -0.3949175, %v4138_v38  ;;  %v2080_v32 = vsel %vm8812_vm8, -0.18477343, %v4139_v42 }
 0x24d   :  { %vm8855_vm15 = vcmp.ne.s32.totalorder %v2020_v17, 0  ;;  %v2084_v48 = vsel %vm8816_vm9, -0.18477343, %v4139_v42  ;;  %v2096_v62 = vsel %vm8812_vm8, 0.0, %v4140_v46  ;;  %v2100_v1 = vsel %vm8816_vm9, 0.0, %v4140_v46 }
 0x24e   :  { %v2112_v27 = vsel %vm8812_vm8, 0.1609302, %v4141_v49  ;;  %v2116_v58 = vsel %vm8816_vm9, 0.1609302, %v4141_v49  ;;  %v2128_v60 = vsel %vm8812_vm8, 0.33791524, %v4142_v52  ;;  %v2176_v11 = vsel %vm8820_vm10, %v2064_v10, %v2048_v39 }
 0x24f   :  { %v2132_v19 = vsel %vm8816_vm9, 0.33791524, %v4142_v52  ;;  %v2144_v20 = vsel %vm8812_vm8, 0.562617, %v4143_v55  ;;  %v2148_v23 = vsel %vm8816_vm9, 0.562617, %v4143_v55  ;;  %v2180_v6 = vsel %vm8824_vm11, %v2068_v41, %v2052_v15 }
 0x250   :  { %v2160_v56 = vsel %vm8812_vm8, 1.0, %v4144_v59  ;;  %v2164_v21 = vsel %vm8816_vm9, 1.0, %v4144_v59  ;;  %v2192_v22 = vsel %vm8820_vm10, %v2096_v62, %v2080_v32  ;;  %v2196_v36 = vsel %vm8824_vm11, %v2100_v1, %v2084_v48 }
 0x251   :  { %v2208_v4 = vsel %vm8820_vm10, %v2128_v60, %v2112_v27  ;;  %v2212_v34 = vsel %vm8824_vm11, %v2132_v19, %v2116_v58  ;;  %v2224_v37 = vsel %vm8820_vm10, %v2160_v56, %v2144_v20  ;;  %v2228_v43 = vsel %vm8824_vm11, %v2164_v21, %v2148_v23 }
 0x252   :  { %v2240_v51 = vsel %vm8828_vm12, %v2192_v22, %v2176_v11  ;;  %v2244_v44 = vsel %vm8832_vm13, %v2196_v36, %v2180_v6  ;;  %v2256_v30 = vsel %vm8828_vm12, %v2224_v37, %v2208_v4  ;;  %v2260_v29 = vsel %vm8832_vm13, %v2228_v43, %v2212_v34 }
 0x253   :  { %v2272_v17 = vsel %vm8836_vm14, %v2256_v30, %v2240_v51  ;;  %v2276_v28 = vsel %vm8855_vm15, %v2260_v29, %v2244_v44  ;;  %v2350_v57 = vand.u32 15, %v2334_v8  ;;  %v2354_v39 = vand.u32 15, %v2338_v45 }
 0x254   :  { %v2311_v15 = vmul.f32 %v8393_v9, %v2272_v17  ;;  %v2315_v10 = vmul.f32 %v8393_v9, %v2276_v28  ;;  %v2336_v41 = vshrl.u32 %v7980_v13, 20  ;;  %v2340_v12 = vshrl.u32 %v7983_v54, 20 }
 0x255   :  { %v2366_v32 = vand.u32 1, %v2350_v57  ;;  %v2370_v48 = vand.u32 1, %v2354_v39  ;;  %v2398_v16 = vand.u32 2, %v2350_v57  ;;  %v2402_v62 = vand.u32 2, %v2354_v39 }
 0x256   :  { %v2323_v1 = vpack.c.bf16 %v2315_v10, %v2311_v15  ;;  %v2430_v18 = vand.u32 4, %v2350_v57  ;;  %v2434_v27 = vand.u32 4, %v2354_v39  ;;  %v2462_v58 = vand.u32 8, %v2350_v57 }
 0x257   :  { %vm8926_vm0 = vcmp.ne.s32.totalorder %v2366_v32, 0  ;;  %vm8930_vm1 = vcmp.ne.s32.totalorder %v2370_v48, 0  ;;  %vm8934_vm2 = vcmp.ne.s32.totalorder %v2398_v16, 0  ;;  %vm8938_vm3 = vcmp.ne.s32.totalorder %v2402_v62, 0 }
 0x258   :  { %3878 = vmatpush1.bf16.msra.mxu1 %v2323_v1  ;;  %vm8942_vm4 = vcmp.ne.s32.totalorder %v2430_v18, 0  ;;  %vm8946_vm5 = vcmp.ne.s32.totalorder %v2434_v27, 0  ;;  %v2466_v11 = vand.u32 8, %v2354_v39  ;;  %vm8950_vm6 = vcmp.ne.s32.totalorder %v2462_v58, 0 }
 0x259   :  { %v2494_v20 = vsel %vm8926_vm0, -0.6961928, %v4137_v35  ;;  %v2498_v23 = vsel %vm8930_vm1, -0.6961928, %v4137_v35  ;;  %v2510_v6 = vsel %vm8926_vm0, -0.3949175, %v4138_v38  ;;  %v8965_v56 = vrot.slane %v8924_v61, %v4210_v2 }
 0x25a   :  { %vm8967_vm7 = vcmp.ne.s32.totalorder %v2466_v11, 0  ;;  %v2514_v22 = vsel %vm8930_vm1, -0.3949175, %v4138_v38  ;;  %v2526_v36 = vsel %vm8926_vm0, -0.18477343, %v4139_v42  ;;  %v2542_v4 = vsel %vm8926_vm0, 0.0, %v4140_v46 }
 0x25b   :  { %v2530_v34 = vsel %vm8930_vm1, -0.18477343, %v4139_v42  ;;  %v2546_v37 = vsel %vm8930_vm1, 0.0, %v4140_v46  ;;  %v2558_v43 = vsel %vm8926_vm0, 0.1609302, %v4141_v49  ;;  %v2606_v51 = vsel %vm8926_vm0, 1.0, %v4144_v59 }
 0x25c   :  { %v2562_v44 = vsel %vm8930_vm1, 0.1609302, %v4141_v49  ;;  %v2574_v30 = vsel %vm8926_vm0, 0.33791524, %v4142_v52  ;;  %v2578_v29 = vsel %vm8930_vm1, 0.33791524, %v4142_v52  ;;  %v2622_v17 = vsel %vm8934_vm2, %v2510_v6, %v2494_v20 }
 0x25d   :  { %v2590_v28 = vsel %vm8926_vm0, 0.562617, %v4143_v55  ;;  %v2594_v57 = vsel %vm8930_vm1, 0.562617, %v4143_v55  ;;  %v2610_v39 = vsel %vm8930_vm1, 1.0, %v4144_v59  ;;  %v2626_v15 = vsel %vm8938_vm3, %v2514_v22, %v2498_v23 }
 0x25e   :  { %v2638_v10 = vsel %vm8934_vm2, %v2542_v4, %v2526_v36  ;;  %v2642_v32 = vsel %vm8938_vm3, %v2546_v37, %v2530_v34  ;;  %v2654_v48 = vsel %vm8934_vm2, %v2574_v30, %v2558_v43  ;;  %v2658_v16 = vsel %vm8938_vm3, %v2578_v29, %v2562_v44 }
 0x25f   :  { %v2670_v62 = vsel %vm8934_vm2, %v2606_v51, %v2590_v28  ;;  %v2674_v1 = vsel %vm8938_vm3, %v2610_v39, %v2594_v57  ;;  %v2686_v18 = vsel %vm8942_vm4, %v2638_v10, %v2622_v17  ;;  %v2690_v27 = vsel %vm8946_vm5, %v2642_v32, %v2626_v15 }
 0x260   :  { %v2702_v58 = vsel %vm8942_vm4, %v2670_v62, %v2654_v48  ;;  %v2706_v8 = vsel %vm8946_vm5, %v2674_v1, %v2658_v16  ;;  %v2352_v9 = vand.u32 15, %v2336_v41  ;;  %v2356_v11 = vand.u32 15, %v2340_v12 }
 0x261   :  { %v2718_v13 = vsel %vm8950_vm6, %v2702_v58, %v2686_v18  ;;  %v2722_v54 = vsel %vm8967_vm7, %v2706_v8, %v2690_v27  ;;  %v2333_v20 = vshrl.u32 %v8100_v63, 20  ;;  %v2337_v23 = vshrl.u32 %v8103_v33, 20 }
 0x262   :  { %v2756_v6 = vmul.f32 %v8965_v56, %v2718_v13  ;;  %v2760_v45 = vmul.f32 %v8965_v56, %v2722_v54  ;;  %v2368_v22 = vand.u32 1, %v2352_v9  ;;  %v2372_v36 = vand.u32 1, %v2356_v11 }
 0x263   :  { %v2400_v60 = vand.u32 2, %v2352_v9  ;;  %v2404_v4 = vand.u32 2, %v2356_v11  ;;  %v2432_v41 = vand.u32 4, %v2352_v9  ;;  %v2436_v12 = vand.u32 4, %v2356_v11 }
 0x264   :  { %v2772_v34 = vpack.c.bf16 %v2760_v45, %v2756_v6  ;;  %vm9042_vm8 = vcmp.ne.s32.totalorder %v2368_v22, 0  ;;  %vm9046_vm9 = vcmp.ne.s32.totalorder %v2372_v36, 0  ;;  %v2464_v63 = vand.u32 8, %v2352_v9 }
 0x265   :  { %vm9050_vm10 = vcmp.ne.s32.totalorder %v2400_v60, 0  ;;  %vm9054_vm11 = vcmp.ne.s32.totalorder %v2404_v4, 0  ;;  %vm9058_vm12 = vcmp.ne.s32.totalorder %v2432_v41, 0  ;;  %vm9062_vm13 = vcmp.ne.s32.totalorder %v2436_v12, 0 }
 0x266   :  { %3826 = vmatprep.subr.bf16.mxu0 %v2772_v34  ;;  %v2468_v44 = vand.u32 8, %v2356_v11  ;;  %vm9066_vm14 = vcmp.ne.s32.totalorder %v2464_v63, 0  ;;  %v2496_v29 = vsel %vm9042_vm8, -0.6961928, %v4137_v35  ;;  %v2500_v17 = vsel %vm9046_vm9, -0.6961928, %v4137_v35 }
 0x267   :  { %v2512_v28 = vsel %vm9042_vm8, -0.3949175, %v4138_v38  ;;  %v2516_v57 = vsel %vm9046_vm9, -0.3949175, %v4138_v38  ;;  %v2528_v39 = vsel %vm9042_vm8, -0.18477343, %v4139_v42  ;;  %v9087_v15 = vrot.slane %v8924_v61, %v4212_v3 }
 0x268   :  { %vm9089_vm15 = vcmp.ne.s32.totalorder %v2468_v44, 0  ;;  %v2532_v32 = vsel %vm9046_vm9, -0.18477343, %v4139_v42  ;;  %v2544_v48 = vsel %vm9042_vm8, 0.0, %v4140_v46  ;;  %v2548_v16 = vsel %vm9046_vm9, 0.0, %v4140_v46 }
 0x269   :  { %v2560_v62 = vsel %vm9042_vm8, 0.1609302, %v4141_v49  ;;  %v2564_v1 = vsel %vm9046_vm9, 0.1609302, %v4141_v49  ;;  %v2576_v18 = vsel %vm9042_vm8, 0.33791524, %v4142_v52  ;;  %v2624_v27 = vsel %vm9050_vm10, %v2512_v28, %v2496_v29 }
 0x26a   :  { %v2580_v58 = vsel %vm9046_vm9, 0.33791524, %v4142_v52  ;;  %v2592_v8 = vsel %vm9042_vm8, 0.562617, %v4143_v55  ;;  %v2596_v9 = vsel %vm9046_vm9, 0.562617, %v4143_v55  ;;  %v2628_v11 = vsel %vm9054_vm11, %v2516_v57, %v2500_v17 }
 0x26b   :  { %v2608_v13 = vsel %vm9042_vm8, 1.0, %v4144_v59  ;;  %v2612_v54 = vsel %vm9046_vm9, 1.0, %v4144_v59  ;;  %v2640_v6 = vsel %vm9050_vm10, %v2544_v48, %v2528_v39  ;;  %v2644_v45 = vsel %vm9054_vm11, %v2548_v16, %v2532_v32 }
 0x26c   :  { %v2656_v22 = vsel %vm9050_vm10, %v2576_v18, %v2560_v62  ;;  %v2660_v36 = vsel %vm9054_vm11, %v2580_v58, %v2564_v1  ;;  %v2672_v60 = vsel %vm9050_vm10, %v2608_v13, %v2592_v8  ;;  %v2676_v4 = vsel %vm9054_vm11, %v2612_v54, %v2596_v9 }
 0x26d   :  { %v2688_v41 = vsel %vm9058_vm12, %v2640_v6, %v2624_v27  ;;  %v2692_v12 = vsel %vm9062_vm13, %v2644_v45, %v2628_v11  ;;  %v2704_v34 = vsel %vm9058_vm12, %v2672_v60, %v2656_v22  ;;  %v2708_v19 = vsel %vm9062_vm13, %v2676_v4, %v2660_v36 }
 0x26e   :  { %v2720_v21 = vsel %vm9066_vm14, %v2704_v34, %v2688_v41  ;;  %v2724_v63 = vsel %vm9089_vm15, %v2708_v19, %v2692_v12  ;;  %v2349_v33 = vand.u32 15, %v2333_v20  ;;  %v2353_v37 = vand.u32 15, %v2337_v23 }
 0x26f   :  { %v2758_v44 = vmul.f32 %v9087_v15, %v2720_v21  ;;  %v2762_v29 = vmul.f32 %v9087_v15, %v2724_v63  ;;  %v2335_v17 = vshrl.u32 %v8222_v26, 20  ;;  %v2339_v43 = vshrl.u32 %v8225_v40, 20 }
 0x270   :  { %v2365_v28 = vand.u32 1, %v2349_v33  ;;  %v2369_v57 = vand.u32 1, %v2353_v37  ;;  %v2397_v51 = vand.u32 2, %v2349_v33  ;;  %v2401_v39 = vand.u32 2, %v2353_v37 }
 0x271   :  { %v2774_v32 = vpack.c.bf16 %v2762_v29, %v2758_v44  ;;  %v2429_v30 = vand.u32 4, %v2349_v33  ;;  %v2433_v48 = vand.u32 4, %v2353_v37  ;;  %v2461_v16 = vand.u32 8, %v2349_v33 }
 0x272   :  { %vm9158_vm0 = vcmp.ne.s32.totalorder %v2365_v28, 0  ;;  %vm9162_vm1 = vcmp.ne.s32.totalorder %v2369_v57, 0  ;;  %vm9166_vm2 = vcmp.ne.s32.totalorder %v2397_v51, 0  ;;  %vm9170_vm3 = vcmp.ne.s32.totalorder %v2401_v39, 0 }
 0x273   :  { %3879 = vmatprep.subr.bf16.mxu1 %v2774_v32  ;;  %vm9174_vm4 = vcmp.ne.s32.totalorder %v2429_v30, 0  ;;  %vm9178_vm5 = vcmp.ne.s32.totalorder %v2433_v48, 0  ;;  %v2465_v1 = vand.u32 8, %v2353_v37  ;;  %vm9182_vm6 = vcmp.ne.s32.totalorder %v2461_v16, 0 }
 0x274   :  { %v2493_v27 = vsel %vm9158_vm0, -0.6961928, %v4137_v35  ;;  %v2497_v58 = vsel %vm9162_vm1, -0.6961928, %v4137_v35  ;;  %v2509_v8 = vsel %vm9158_vm0, -0.3949175, %v4138_v38  ;;  %v9197_v9 = vrot.slane %v8924_v61, %v4220_v7 }
 0x275   :  { %vm9199_vm7 = vcmp.ne.s32.totalorder %v2465_v1, 0  ;;  %v2513_v13 = vsel %vm9162_vm1, -0.3949175, %v4138_v38  ;;  %v2525_v54 = vsel %vm9158_vm0, -0.18477343, %v4139_v42  ;;  %v2541_v6 = vsel %vm9158_vm0, 0.0, %v4140_v46 }
 0x276   :  { %v2529_v45 = vsel %vm9162_vm1, -0.18477343, %v4139_v42  ;;  %v2545_v22 = vsel %vm9162_vm1, 0.0, %v4140_v46  ;;  %v2557_v36 = vsel %vm9158_vm0, 0.1609302, %v4141_v49  ;;  %v2605_v60 = vsel %vm9158_vm0, 1.0, %v4144_v59 }
 0x277   :  { %v2561_v4 = vsel %vm9162_vm1, 0.1609302, %v4141_v49  ;;  %v2573_v41 = vsel %vm9158_vm0, 0.33791524, %v4142_v52  ;;  %v2577_v12 = vsel %vm9162_vm1, 0.33791524, %v4142_v52  ;;  %v2621_v34 = vsel %vm9166_vm2, %v2509_v8, %v2493_v27 }
 0x278   :  { %v2589_v19 = vsel %vm9158_vm0, 0.562617, %v4143_v55  ;;  %v2593_v21 = vsel %vm9162_vm1, 0.562617, %v4143_v55  ;;  %v2609_v63 = vsel %vm9162_vm1, 1.0, %v4144_v59  ;;  %v2625_v33 = vsel %vm9170_vm3, %v2513_v13, %v2497_v58 }
 0x279   :  { %v2637_v37 = vsel %vm9166_vm2, %v2541_v6, %v2525_v54  ;;  %v2641_v44 = vsel %vm9170_vm3, %v2545_v22, %v2529_v45  ;;  %v2653_v29 = vsel %vm9166_vm2, %v2573_v41, %v2557_v36  ;;  %v2657_v28 = vsel %vm9170_vm3, %v2577_v12, %v2561_v4 }
 0x27a   :  { %v2669_v57 = vsel %vm9166_vm2, %v2605_v60, %v2589_v19  ;;  %v2673_v51 = vsel %vm9170_vm3, %v2609_v63, %v2593_v21  ;;  %v2685_v39 = vsel %vm9174_vm4, %v2637_v37, %v2621_v34  ;;  %v2689_v32 = vsel %vm9178_vm5, %v2641_v44, %v2625_v33 }
 0x27b   :  { %v2701_v30 = vsel %vm9174_vm4, %v2669_v57, %v2653_v29  ;;  %v2705_v48 = vsel %vm9178_vm5, %v2673_v51, %v2657_v28  ;;  %v2351_v16 = vand.u32 15, %v2335_v17  ;;  %v2355_v10 = vand.u32 15, %v2339_v43 }
 0x27c   :  { %v2717_v20 = vsel %vm9182_vm6, %v2701_v30, %v2685_v39  ;;  %v2721_v26 = vsel %vm9199_vm7, %v2705_v48, %v2689_v32  ;;  %v2342_v40 = vshrl.u32 %v8340_v5, 20  ;;  %v2346_v1 = vshrl.u32 %v8343_v24, 20 }
 0x27d   :  { %v2755_v27 = vmul.f32 %v9197_v9, %v2717_v20  ;;  %v2759_v23 = vmul.f32 %v9197_v9, %v2721_v26  ;;  %v2367_v58 = vand.u32 1, %v2351_v16  ;;  %v2371_v8 = vand.u32 1, %v2355_v10 }
 0x27e   :  { %v2399_v62 = vand.u32 2, %v2351_v16  ;;  %v2403_v13 = vand.u32 2, %v2355_v10  ;;  %v2431_v17 = vand.u32 4, %v2351_v16  ;;  %v2435_v43 = vand.u32 4, %v2355_v10 }
 0x27f   :  { %v2771_v54 = vpack.c.bf16 %v2759_v23, %v2755_v27  ;;  %vm9274_vm8 = vcmp.ne.s32.totalorder %v2367_v58, 0  ;;  %vm9278_vm9 = vcmp.ne.s32.totalorder %v2371_v8, 0  ;;  %v2463_v5 = vand.u32 8, %v2351_v16 }
 0x280   :  { %vm9282_vm10 = vcmp.ne.s32.totalorder %v2399_v62, 0  ;;  %vm9286_vm11 = vcmp.ne.s32.totalorder %v2403_v13, 0  ;;  %vm9290_vm12 = vcmp.ne.s32.totalorder %v2431_v17, 0  ;;  %vm9294_vm13 = vcmp.ne.s32.totalorder %v2435_v43, 0 }
 0x281   :  { %3827 = vmatpush1.bf16.msra.mxu0 %v2771_v54  ;;  %v2467_v36 = vand.u32 8, %v2355_v10  ;;  %vm9298_vm14 = vcmp.ne.s32.totalorder %v2463_v5, 0  ;;  %v2495_v4 = vsel %vm9274_vm8, -0.6961928, %v4137_v35  ;;  %v2499_v41 = vsel %vm9278_vm9, -0.6961928, %v4137_v35 }
 0x282   :  { %v2511_v12 = vsel %vm9274_vm8, -0.3949175, %v4138_v38  ;;  %v2515_v34 = vsel %vm9278_vm9, -0.3949175, %v4138_v38  ;;  %v2527_v19 = vsel %vm9274_vm8, -0.18477343, %v4139_v42  ;;  %v9319_v21 = vrot.slane %v8924_v61, %v4234_v14 }
 0x283   :  { %vm9321_vm15 = vcmp.ne.s32.totalorder %v2467_v36, 0  ;;  %v2531_v33 = vsel %vm9278_vm9, -0.18477343, %v4139_v42  ;;  %v2543_v37 = vsel %vm9274_vm8, 0.0, %v4140_v46  ;;  %v2547_v44 = vsel %vm9278_vm9, 0.0, %v4140_v46 }
 0x284   :  { %v2559_v61 = vsel %vm9274_vm8, 0.1609302, %v4141_v49  ;;  %v2563_v29 = vsel %vm9278_vm9, 0.1609302, %v4141_v49  ;;  %v2575_v28 = vsel %vm9274_vm8, 0.33791524, %v4142_v52  ;;  %v2623_v57 = vsel %vm9282_vm10, %v2511_v12, %v2495_v4 }
 0x285   :  { %v2579_v51 = vsel %vm9278_vm9, 0.33791524, %v4142_v52  ;;  %v2591_v39 = vsel %vm9274_vm8, 0.562617, %v4143_v55  ;;  %v2595_v32 = vsel %vm9278_vm9, 0.562617, %v4143_v55  ;;  %v2627_v30 = vsel %vm9286_vm11, %v2515_v34, %v2499_v41 }
 0x286   :  { %v2607_v48 = vsel %vm9274_vm8, 1.0, %v4144_v59  ;;  %v2611_v16 = vsel %vm9278_vm9, 1.0, %v4144_v59  ;;  %v2639_v10 = vsel %vm9282_vm10, %v2543_v37, %v2527_v19  ;;  %v2643_v20 = vsel %vm9286_vm11, %v2547_v44, %v2531_v33 }
 0x287   :  { %v2655_v26 = vsel %vm9282_vm10, %v2575_v28, %v2559_v61  ;;  %v2659_v27 = vsel %vm9286_vm11, %v2579_v51, %v2563_v29  ;;  %v2671_v23 = vsel %vm9282_vm10, %v2607_v48, %v2591_v39  ;;  %v2675_v58 = vsel %vm9286_vm11, %v2611_v16, %v2595_v32 }
 0x288   :  { %v2687_v8 = vsel %vm9290_vm12, %v2639_v10, %v2623_v57  ;;  %v2691_v62 = vsel %vm9294_vm13, %v2643_v20, %v2627_v30  ;;  %v2703_v13 = vsel %vm9290_vm12, %v2671_v23, %v2655_v26  ;;  %v2707_v17 = vsel %vm9294_vm13, %v2675_v58, %v2659_v27 }
 0x289   :  { %v2719_v43 = vsel %vm9298_vm14, %v2703_v13, %v2687_v8  ;;  %v2723_v54 = vsel %vm9321_vm15, %v2707_v17, %v2691_v62  ;;  %v2358_v18 = vand.u32 15, %v2342_v40  ;;  %v2362_v11 = vand.u32 15, %v2346_v1 }
 0x28a   :  { %v2757_v5 = vmul.f32 %v9319_v21, %v2719_v43  ;;  %v2761_v24 = vmul.f32 %v9319_v21, %v2723_v54  ;;  %v2344_v6 = vshrl.u32 %v8462_v50, 20  ;;  %v2348_v45 = vshrl.u32 %v8465_v47, 20 }
 0x28b   :  { %v2374_v36 = vand.u32 1, %v2358_v18  ;;  %v2378_v4 = vand.u32 1, %v2362_v11  ;;  %v2406_v22 = vand.u32 2, %v2358_v18  ;;  %v2410_v41 = vand.u32 2, %v2362_v11 }
 0x28c   :  { %v2773_v12 = vpack.c.bf16 %v2761_v24, %v2757_v5  ;;  %v2438_v60 = vand.u32 4, %v2358_v18  ;;  %v2442_v34 = vand.u32 4, %v2362_v11  ;;  %v2470_v19 = vand.u32 8, %v2358_v18 }
 0x28d   :  { %vm9390_vm0 = vcmp.ne.s32.totalorder %v2374_v36, 0  ;;  %vm9394_vm1 = vcmp.ne.s32.totalorder %v2378_v4, 0  ;;  %vm9398_vm2 = vcmp.ne.s32.totalorder %v2406_v22, 0  ;;  %vm9402_vm3 = vcmp.ne.s32.totalorder %v2410_v41, 0 }
 0x28e   :  { %3880 = vmatpush1.bf16.msra.mxu1 %v2773_v12  ;;  %vm9406_vm4 = vcmp.ne.s32.totalorder %v2438_v60, 0  ;;  %vm9410_vm5 = vcmp.ne.s32.totalorder %v2442_v34, 0  ;;  %v2474_v37 = vand.u32 8, %v2362_v11  ;;  %vm9414_vm6 = vcmp.ne.s32.totalorder %v2470_v19, 0 }
 0x28f   :  { %v2502_v61 = vsel %vm9390_vm0, -0.6961928, %v4137_v35  ;;  %v2506_v29 = vsel %vm9394_vm1, -0.6961928, %v4137_v35  ;;  %v2518_v28 = vsel %vm9390_vm0, -0.3949175, %v4138_v38 }
 0x290   :  { %vm9427_vm7 = vcmp.ne.s32.totalorder %v2474_v37, 0  ;;  %v2522_v51 = vsel %vm9394_vm1, -0.3949175, %v4138_v38  ;;  %v2534_v39 = vsel %vm9390_vm0, -0.18477343, %v4139_v42  ;;  %v2550_v32 = vsel %vm9390_vm0, 0.0, %v4140_v46 }
 0x291   :  { %v2538_v30 = vsel %vm9394_vm1, -0.18477343, %v4139_v42  ;;  %v2554_v48 = vsel %vm9394_vm1, 0.0, %v4140_v46  ;;  %v2566_v16 = vsel %vm9390_vm0, 0.1609302, %v4141_v49  ;;  %v2614_v10 = vsel %vm9390_vm0, 1.0, %v4144_v59 }
 0x292   :  { %v2570_v20 = vsel %vm9394_vm1, 0.1609302, %v4141_v49  ;;  %v2582_v26 = vsel %vm9390_vm0, 0.33791524, %v4142_v52  ;;  %v2586_v27 = vsel %vm9394_vm1, 0.33791524, %v4142_v52  ;;  %v2630_v23 = vsel %vm9398_vm2, %v2518_v28, %v2502_v61 }
 0x293   :  { %v2598_v58 = vsel %vm9390_vm0, 0.562617, %v4143_v55  ;;  %v2602_v8 = vsel %vm9394_vm1, 0.562617, %v4143_v55  ;;  %v2618_v62 = vsel %vm9394_vm1, 1.0, %v4144_v59  ;;  %v2634_v13 = vsel %vm9402_vm3, %v2522_v51, %v2506_v29 }
 0x294   :  { %v2646_v17 = vsel %vm9398_vm2, %v2550_v32, %v2534_v39  ;;  %v2650_v43 = vsel %vm9402_vm3, %v2554_v48, %v2538_v30  ;;  %v2662_v54 = vsel %vm9398_vm2, %v2582_v26, %v2566_v16  ;;  %v2666_v18 = vsel %vm9402_vm3, %v2586_v27, %v2570_v20 }
 0x295   :  { %v2678_v11 = vsel %vm9398_vm2, %v2614_v10, %v2598_v58  ;;  %v2682_v5 = vsel %vm9402_vm3, %v2618_v62, %v2602_v8  ;;  %v2694_v24 = vsel %vm9406_vm4, %v2646_v17, %v2630_v23  ;;  %v2698_v36 = vsel %vm9410_vm5, %v2650_v43, %v2634_v13 }
 0x296   :  { %v2710_v4 = vsel %vm9406_vm4, %v2678_v11, %v2662_v54  ;;  %v2714_v22 = vsel %vm9410_vm5, %v2682_v5, %v2666_v18  ;;  %v2360_v41 = vand.u32 15, %v2344_v6  ;;  %v2364_v12 = vand.u32 15, %v2348_v45 }
 0x297   :  { %v2726_v60 = vsel %vm9414_vm6, %v2710_v4, %v2694_v24  ;;  %v2730_v34 = vsel %vm9427_vm7, %v2714_v22, %v2698_v36  ;;  %v2341_v19 = vshrl.u32 %v8576_v53, 20  ;;  %v2345_v63 = vshrl.u32 %v8579_v25, 20 }
 0x298   :  { %v2764_v40 = vmul.f32 %v8965_v56, %v2726_v60  ;;  %v2768_v50 = vmul.f32 %v8965_v56, %v2730_v34  ;;  %v2376_v47 = vand.u32 1, %v2360_v41  ;;  %v2380_v1 = vand.u32 1, %v2364_v12 }
 0x299   :  { %v2408_v33 = vand.u32 2, %v2360_v41  ;;  %v2412_v37 = vand.u32 2, %v2364_v12  ;;  %v2440_v6 = vand.u32 4, %v2360_v41  ;;  %v2444_v45 = vand.u32 4, %v2364_v12 }
 0x29a   :  { %v2776_v61 = vpack.c.bf16 %v2768_v50, %v2764_v40  ;;  %vm9502_vm8 = vcmp.ne.s32.totalorder %v2376_v47, 0  ;;  %vm9506_vm9 = vcmp.ne.s32.totalorder %v2380_v1, 0  ;;  %v2472_v53 = vand.u32 8, %v2360_v41 }
 0x29b   :  { %vm9510_vm10 = vcmp.ne.s32.totalorder %v2408_v33, 0  ;;  %vm9514_vm11 = vcmp.ne.s32.totalorder %v2412_v37, 0  ;;  %vm9518_vm12 = vcmp.ne.s32.totalorder %v2440_v6, 0  ;;  %vm9522_vm13 = vcmp.ne.s32.totalorder %v2444_v45, 0 }
 0x29c   :  { %3828 = vmatprep.subr.bf16.mxu0 %v2776_v61  ;;  %v2476_v51 = vand.u32 8, %v2364_v12  ;;  %vm9526_vm14 = vcmp.ne.s32.totalorder %v2472_v53, 0  ;;  %v2504_v32 = vsel %vm9502_vm8, -0.6961928, %v4137_v35  ;;  %v2508_v30 = vsel %vm9506_vm9, -0.6961928, %v4137_v35 }
 0x29d   :  { %v2520_v48 = vsel %vm9502_vm8, -0.3949175, %v4138_v38  ;;  %v2524_v16 = vsel %vm9506_vm9, -0.3949175, %v4138_v38  ;;  %v2536_v10 = vsel %vm9502_vm8, -0.18477343, %v4139_v42 }
 0x29e   :  { %vm9545_vm15 = vcmp.ne.s32.totalorder %v2476_v51, 0  ;;  %v2540_v26 = vsel %vm9506_vm9, -0.18477343, %v4139_v42  ;;  %v2552_v27 = vsel %vm9502_vm8, 0.0, %v4140_v46  ;;  %v2556_v23 = vsel %vm9506_vm9, 0.0, %v4140_v46 }
 0x29f   :  { %v2568_v58 = vsel %vm9502_vm8, 0.1609302, %v4141_v49  ;;  %v2572_v8 = vsel %vm9506_vm9, 0.1609302, %v4141_v49  ;;  %v2584_v62 = vsel %vm9502_vm8, 0.33791524, %v4142_v52  ;;  %v2632_v13 = vsel %vm9510_vm10, %v2520_v48, %v2504_v32 }
 0x2a0   :  { %v2588_v17 = vsel %vm9506_vm9, 0.33791524, %v4142_v52  ;;  %v2600_v43 = vsel %vm9502_vm8, 0.562617, %v4143_v55  ;;  %v2604_v54 = vsel %vm9506_vm9, 0.562617, %v4143_v55  ;;  %v2636_v18 = vsel %vm9514_vm11, %v2524_v16, %v2508_v30 }
 0x2a1   :  { %v2616_v11 = vsel %vm9502_vm8, 1.0, %v4144_v59  ;;  %v2620_v5 = vsel %vm9506_vm9, 1.0, %v4144_v59  ;;  %v2648_v24 = vsel %vm9510_vm10, %v2552_v27, %v2536_v10  ;;  %v2652_v36 = vsel %vm9514_vm11, %v2556_v23, %v2540_v26 }
 0x2a2   :  { %v2664_v4 = vsel %vm9510_vm10, %v2584_v62, %v2568_v58  ;;  %v2668_v22 = vsel %vm9514_vm11, %v2588_v17, %v2572_v8  ;;  %v2680_v41 = vsel %vm9510_vm10, %v2616_v11, %v2600_v43  ;;  %v2684_v12 = vsel %vm9514_vm11, %v2620_v5, %v2604_v54 }
 0x2a3   :  { %v2696_v60 = vsel %vm9518_vm12, %v2648_v24, %v2632_v13  ;;  %v2700_v34 = vsel %vm9522_vm13, %v2652_v36, %v2636_v18  ;;  %v2712_v40 = vsel %vm9518_vm12, %v2680_v41, %v2664_v4  ;;  %v2716_v50 = vsel %vm9522_vm13, %v2684_v12, %v2668_v22 }
 0x2a4   :  { %v2728_v47 = vsel %vm9526_vm14, %v2712_v40, %v2696_v60  ;;  %v2732_v1 = vsel %vm9545_vm15, %v2716_v50, %v2700_v34  ;;  %v2357_v33 = vand.u32 15, %v2341_v19  ;;  %v2361_v37 = vand.u32 15, %v2345_v63 }
 0x2a5   :  { %v2766_v6 = vmul.f32 %v9087_v15, %v2728_v47  ;;  %v2770_v45 = vmul.f32 %v9087_v15, %v2732_v1  ;;  %v2343_v61 = vshrl.u32 %v8694_v0, 20  ;;  %v2347_v44 = vshrl.u32 %v8697_v31, 20 }
 0x2a6   :  { %v2373_v29 = vand.u32 1, %v2357_v33  ;;  %v2377_v53 = vand.u32 1, %v2361_v37  ;;  %v2405_v25 = vand.u32 2, %v2357_v33  ;;  %v2409_v56 = vand.u32 2, %v2361_v37 }
 0x2a7   :  { %v2778_v28 = vpack.c.bf16 %v2770_v45, %v2766_v6  ;;  %v2437_v57 = vand.u32 4, %v2357_v33  ;;  %v2441_v51 = vand.u32 4, %v2361_v37  ;;  %v2469_v39 = vand.u32 8, %v2357_v33 }
 0x2a8   :  { %vm9614_vm0 = vcmp.ne.s32.totalorder %v2373_v29, 0  ;;  %vm9618_vm1 = vcmp.ne.s32.totalorder %v2377_v53, 0  ;;  %vm9622_vm2 = vcmp.ne.s32.totalorder %v2405_v25, 0  ;;  %vm9626_vm3 = vcmp.ne.s32.totalorder %v2409_v56, 0  ;;  %v9722_v53 = vld [vmem:[#allocation6 + $0x8] sm:$0xff] }
 0x2a9   :  { %3881 = vmatprep.subr.bf16.mxu1 %v2778_v28  ;;  %vm9630_vm4 = vcmp.ne.s32.totalorder %v2437_v57, 0  ;;  %vm9634_vm5 = vcmp.ne.s32.totalorder %v2441_v51, 0  ;;  %v2473_v30 = vand.u32 8, %v2361_v37  ;;  %vm9638_vm6 = vcmp.ne.s32.totalorder %v2469_v39, 0  ;;  %v9725_v56 = vld [vmem:[#allocation6 + $0x28] sm:$0xff] }
 0x2aa   :  { %v2501_v16 = vsel %vm9614_vm0, -0.6961928, %v4137_v35  ;;  %v2505_v10 = vsel %vm9618_vm1, -0.6961928, %v4137_v35  ;;  %v2517_v20 = vsel %vm9614_vm0, -0.3949175, %v4138_v38 }
 0x2ab   :  { %vm9651_vm7 = vcmp.ne.s32.totalorder %v2473_v30, 0  ;;  %v2521_v27 = vsel %vm9618_vm1, -0.3949175, %v4138_v38  ;;  %v2533_v23 = vsel %vm9614_vm0, -0.18477343, %v4139_v42  ;;  %v2549_v58 = vsel %vm9614_vm0, 0.0, %v4140_v46 }
 0x2ac   :  { %v2537_v8 = vsel %vm9618_vm1, -0.18477343, %v4139_v42  ;;  %v2553_v62 = vsel %vm9618_vm1, 0.0, %v4140_v46  ;;  %v2565_v13 = vsel %vm9614_vm0, 0.1609302, %v4141_v49  ;;  %v2613_v17 = vsel %vm9614_vm0, 1.0, %v4144_v59 }
 0x2ad   :  { %v2569_v43 = vsel %vm9618_vm1, 0.1609302, %v4141_v49  ;;  %v2581_v54 = vsel %vm9614_vm0, 0.33791524, %v4142_v52  ;;  %v2585_v18 = vsel %vm9618_vm1, 0.33791524, %v4142_v52  ;;  %v2629_v11 = vsel %vm9622_vm2, %v2517_v20, %v2501_v16 }
 0x2ae   :  { %v2597_v5 = vsel %vm9614_vm0, 0.562617, %v4143_v55  ;;  %v2601_v24 = vsel %vm9618_vm1, 0.562617, %v4143_v55  ;;  %v2617_v36 = vsel %vm9618_vm1, 1.0, %v4144_v59  ;;  %v2633_v4 = vsel %vm9626_vm3, %v2521_v27, %v2505_v10 }
 0x2af   :  { %v2645_v22 = vsel %vm9622_vm2, %v2549_v58, %v2533_v23  ;;  %v2649_v41 = vsel %vm9626_vm3, %v2553_v62, %v2537_v8  ;;  %v2661_v12 = vsel %vm9622_vm2, %v2581_v54, %v2565_v13  ;;  %v2665_v60 = vsel %vm9626_vm3, %v2585_v18, %v2569_v43 }
 0x2b0   :  { %v2677_v34 = vsel %vm9622_vm2, %v2613_v17, %v2597_v5  ;;  %v2681_v40 = vsel %vm9626_vm3, %v2617_v36, %v2601_v24  ;;  %v2693_v50 = vsel %vm9630_vm4, %v2645_v22, %v2629_v11  ;;  %v2697_v47 = vsel %vm9634_vm5, %v2649_v41, %v2633_v4 }
 0x2b1   :  { %v2709_v1 = vsel %vm9630_vm4, %v2677_v34, %v2661_v12  ;;  %v2713_v33 = vsel %vm9634_vm5, %v2681_v40, %v2665_v60  ;;  %v2359_v37 = vand.u32 15, %v2343_v61  ;;  %v2363_v6 = vand.u32 15, %v2347_v44 }
 0x2b2   :  { %v2725_v45 = vsel %vm9638_vm6, %v2709_v1, %v2693_v50  ;;  %v2729_v29 = vsel %vm9651_vm7, %v2713_v33, %v2697_v47  ;;  %v2788_v25 = vshrl.u32 %v9722_v53, 24  ;;  %v2792_v28 = vshrl.u32 %v9725_v56, 24 }
 0x2b3   :  { %v2763_v57 = vmul.f32 %v9197_v9, %v2725_v45  ;;  %v2767_v51 = vmul.f32 %v9197_v9, %v2729_v29  ;;  %v2375_v61 = vand.u32 1, %v2359_v37  ;;  %v2379_v44 = vand.u32 1, %v2363_v6 }
 0x2b4   :  { %v2407_v39 = vand.u32 2, %v2359_v37  ;;  %v2411_v32 = vand.u32 2, %v2363_v6  ;;  %v2439_v19 = vand.u32 4, %v2359_v37  ;;  %v2443_v0 = vand.u32 4, %v2363_v6 }
 0x2b5   :  { %v2775_v31 = vpack.c.bf16 %v2767_v51, %v2763_v57  ;;  %vm9730_vm8 = vcmp.ne.s32.totalorder %v2375_v61, 0  ;;  %vm9734_vm9 = vcmp.ne.s32.totalorder %v2379_v44, 0  ;;  %v2471_v30 = vand.u32 8, %v2359_v37 }
 0x2b6   :  { %vm9738_vm10 = vcmp.ne.s32.totalorder %v2407_v39, 0  ;;  %vm9742_vm11 = vcmp.ne.s32.totalorder %v2411_v32, 0  ;;  %vm9746_vm12 = vcmp.ne.s32.totalorder %v2439_v19, 0  ;;  %vm9750_vm13 = vcmp.ne.s32.totalorder %v2443_v0, 0  ;;  %v9840_v19 = vld [vmem:[#allocation6 + $0x18] sm:$0xff] }
 0x2b7   :  { %3829 = vmatpush1.bf16.msra.mxu0 %v2775_v31  ;;  %v2475_v20 = vand.u32 8, %v2363_v6  ;;  %vm9754_vm14 = vcmp.ne.s32.totalorder %v2471_v30, 0  ;;  %v2503_v27 = vsel %vm9730_vm8, -0.6961928, %v4137_v35  ;;  %v2507_v23 = vsel %vm9734_vm9, -0.6961928, %v4137_v35 }
 0x2b8   :  { %v2519_v58 = vsel %vm9730_vm8, -0.3949175, %v4138_v38  ;;  %v2523_v8 = vsel %vm9734_vm9, -0.3949175, %v4138_v38  ;;  %v2535_v62 = vsel %vm9730_vm8, -0.18477343, %v4139_v42 }
 0x2b9   :  { %vm9773_vm15 = vcmp.ne.s32.totalorder %v2475_v20, 0  ;;  %v2539_v17 = vsel %vm9734_vm9, -0.18477343, %v4139_v42  ;;  %v2551_v43 = vsel %vm9730_vm8, 0.0, %v4140_v46  ;;  %v2555_v54 = vsel %vm9734_vm9, 0.0, %v4140_v46  ;;  %v9843_v31 = vld [vmem:[#allocation6 + $0x38] sm:$0xff] }
 0x2ba   :  { %v2567_v18 = vsel %vm9730_vm8, 0.1609302, %v4141_v49  ;;  %v2571_v11 = vsel %vm9734_vm9, 0.1609302, %v4141_v49  ;;  %v2583_v5 = vsel %vm9730_vm8, 0.33791524, %v4142_v52  ;;  %v2631_v24 = vsel %vm9738_vm10, %v2519_v58, %v2503_v27 }
 0x2bb   :  { %v2587_v36 = vsel %vm9734_vm9, 0.33791524, %v4142_v52  ;;  %v2599_v4 = vsel %vm9730_vm8, 0.562617, %v4143_v55  ;;  %v2603_v22 = vsel %vm9734_vm9, 0.562617, %v4143_v55  ;;  %v2635_v41 = vsel %vm9742_vm11, %v2523_v8, %v2507_v23 }
 0x2bc   :  { %v2615_v12 = vsel %vm9730_vm8, 1.0, %v4144_v59  ;;  %v2619_v60 = vsel %vm9734_vm9, 1.0, %v4144_v59  ;;  %v2647_v34 = vsel %vm9738_vm10, %v2551_v43, %v2535_v62  ;;  %v2651_v40 = vsel %vm9742_vm11, %v2555_v54, %v2539_v17  ;;  %v9846_v20 = vld [vmem:[#allocation8 + $0x3] ss:$4 sm:$0xf] }
 0x2bd   :  { %v2663_v50 = vsel %vm9738_vm10, %v2583_v5, %v2567_v18  ;;  %v2667_v47 = vsel %vm9742_vm11, %v2587_v36, %v2571_v11  ;;  %v2679_v1 = vsel %vm9738_vm10, %v2615_v12, %v2599_v4  ;;  %v2683_v33 = vsel %vm9742_vm11, %v2619_v60, %v2603_v22  ;;  %v10082_v11 = vld [vmem:[#allocation6 + $0x10] sm:$0xff] }
 0x2be   :  { %v2695_v37 = vsel %vm9746_vm12, %v2647_v34, %v2631_v24  ;;  %v2699_v6 = vsel %vm9750_vm13, %v2651_v40, %v2635_v41  ;;  %v2711_v45 = vsel %vm9746_vm12, %v2679_v1, %v2663_v50  ;;  %v2715_v29 = vsel %vm9750_vm13, %v2683_v33, %v2667_v47 }
 0x2bf   :  { %v2727_v57 = vsel %vm9754_vm14, %v2711_v45, %v2695_v37  ;;  %v2731_v51 = vsel %vm9773_vm15, %v2715_v29, %v2699_v6  ;;  %v2804_v61 = vand.u32 15, %v2788_v25  ;;  %v2808_v44 = vand.u32 15, %v2792_v28 }
 0x2c0   :  { %v2765_v39 = vmul.f32 %v9319_v21, %v2727_v57  ;;  %v2769_v32 = vmul.f32 %v9319_v21, %v2731_v51  ;;  %v2790_v0 = vshrl.u32 %v9840_v19, 24  ;;  %v2794_v15 = vshrl.u32 %v9843_v31, 24 }
 0x2c1   :  { %v2820_v63 = vand.u32 1, %v2804_v61  ;;  %v2824_v30 = vand.u32 1, %v2808_v44  ;;  %v2852_v48 = vand.u32 2, %v2804_v61  ;;  %v2856_v9 = vand.u32 2, %v2808_v44 }
 0x2c2   :  { %v2777_v16 = vpack.c.bf16 %v2769_v32, %v2765_v39  ;;  %v2884_v10 = vand.u32 4, %v2804_v61  ;;  %v2888_v25 = vand.u32 4, %v2808_v44  ;;  %v2916_v28 = vand.u32 8, %v2804_v61 }
 0x2c3   :  { %vm9848_vm0 = vcmp.ne.s32.totalorder %v2820_v63, 0  ;;  %vm9852_vm1 = vcmp.ne.s32.totalorder %v2824_v30, 0  ;;  %vm9856_vm2 = vcmp.ne.s32.totalorder %v2852_v48, 0  ;;  %vm9860_vm3 = vcmp.ne.s32.totalorder %v2856_v9, 0 }
 0x2c4   :  { %3882 = vmatpush1.bf16.msra.mxu1 %v2777_v16  ;;  %vm9864_vm4 = vcmp.ne.s32.totalorder %v2884_v10, 0  ;;  %vm9868_vm5 = vcmp.ne.s32.totalorder %v2888_v25, 0  ;;  %v2920_v62 = vand.u32 8, %v2808_v44  ;;  %vm9872_vm6 = vcmp.ne.s32.totalorder %v2916_v28, 0  ;;  %v9960_v10 = vld [vmem:[#allocation6] sm:$0xff] }
 0x2c5   :  { %v2948_v17 = vsel %vm9848_vm0, -0.6961928, %v4137_v35  ;;  %v2952_v43 = vsel %vm9852_vm1, -0.6961928, %v4137_v35  ;;  %v2964_v54 = vsel %vm9848_vm0, -0.3949175, %v4138_v38  ;;  %v9887_v18 = vrot.slane %v9846_v20, %v4210_v2 }
 0x2c6   :  { %vm9889_vm7 = vcmp.ne.s32.totalorder %v2920_v62, 0  ;;  %v2968_v5 = vsel %vm9852_vm1, -0.3949175, %v4138_v38  ;;  %v2980_v24 = vsel %vm9848_vm0, -0.18477343, %v4139_v42  ;;  %v2996_v36 = vsel %vm9848_vm0, 0.0, %v4140_v46 }
 0x2c7   :  { %v2984_v4 = vsel %vm9852_vm1, -0.18477343, %v4139_v42  ;;  %v3000_v22 = vsel %vm9852_vm1, 0.0, %v4140_v46  ;;  %v3012_v41 = vsel %vm9848_vm0, 0.1609302, %v4141_v49  ;;  %v3060_v12 = vsel %vm9848_vm0, 1.0, %v4144_v59 }
 0x2c8   :  { %v3016_v60 = vsel %vm9852_vm1, 0.1609302, %v4141_v49  ;;  %v3028_v34 = vsel %vm9848_vm0, 0.33791524, %v4142_v52  ;;  %v3032_v40 = vsel %vm9852_vm1, 0.33791524, %v4142_v52  ;;  %v3076_v50 = vsel %vm9856_vm2, %v2964_v54, %v2948_v17 }
 0x2c9   :  { %v3044_v47 = vsel %vm9848_vm0, 0.562617, %v4143_v55  ;;  %v3048_v1 = vsel %vm9852_vm1, 0.562617, %v4143_v55  ;;  %v3064_v33 = vsel %vm9852_vm1, 1.0, %v4144_v59  ;;  %v3080_v37 = vsel %vm9860_vm3, %v2968_v5, %v2952_v43  ;;  %v9963_v28 = vld [vmem:[#allocation6 + $0x20] sm:$0xff] }
 0x2ca   :  { %v3092_v6 = vsel %vm9856_vm2, %v2996_v36, %v2980_v24  ;;  %v3096_v45 = vsel %vm9860_vm3, %v3000_v22, %v2984_v4  ;;  %v3108_v29 = vsel %vm9856_vm2, %v3028_v34, %v3012_v41  ;;  %v3112_v57 = vsel %vm9860_vm3, %v3032_v40, %v3016_v60  ;;  %v10085_v24 = vld [vmem:[#allocation6 + $0x30] sm:$0xff] }
 0x2cb   :  { %v3124_v51 = vsel %vm9856_vm2, %v3060_v12, %v3044_v47  ;;  %v3128_v61 = vsel %vm9860_vm3, %v3064_v33, %v3048_v1  ;;  %v3140_v44 = vsel %vm9864_vm4, %v3092_v6, %v3076_v50  ;;  %v3144_v39 = vsel %vm9868_vm5, %v3096_v45, %v3080_v37 }
 0x2cc   :  { %v3156_v32 = vsel %vm9864_vm4, %v3124_v51, %v3108_v29  ;;  %v3160_v63 = vsel %vm9868_vm5, %v3128_v61, %v3112_v57  ;;  %v2806_v30 = vand.u32 15, %v2790_v0  ;;  %v2810_v48 = vand.u32 15, %v2794_v15 }
 0x2cd   :  { %v3172_v9 = vsel %vm9872_vm6, %v3156_v32, %v3140_v44  ;;  %v3176_v16 = vsel %vm9889_vm7, %v3160_v63, %v3144_v39  ;;  %v2787_v25 = vshrl.u32 %v9960_v10, 24  ;;  %v2791_v21 = vshrl.u32 %v9963_v28, 24 }
 0x2ce   :  { %v3211_v26 = vmul.f32 %v9887_v18, %v3172_v9  ;;  %v3215_v27 = vmul.f32 %v9887_v18, %v3176_v16  ;;  %v2822_v0 = vand.u32 1, %v2806_v30  ;;  %v2826_v15 = vand.u32 1, %v2810_v48 }
 0x2cf   :  { %v2854_v23 = vand.u32 2, %v2806_v30  ;;  %v2858_v58 = vand.u32 2, %v2810_v48  ;;  %v2886_v8 = vand.u32 4, %v2806_v30  ;;  %v2890_v62 = vand.u32 4, %v2810_v48 }
 0x2d0   :  { %v3227_v13 = vpack.c.bf16 %v3215_v27, %v3211_v26  ;;  %vm9968_vm8 = vcmp.ne.s32.totalorder %v2822_v0, 0  ;;  %vm9972_vm9 = vcmp.ne.s32.totalorder %v2826_v15, 0  ;;  %v2918_v54 = vand.u32 8, %v2806_v30 }
 0x2d1   :  { %vm9976_vm10 = vcmp.ne.s32.totalorder %v2854_v23, 0  ;;  %vm9980_vm11 = vcmp.ne.s32.totalorder %v2858_v58, 0  ;;  %vm9984_vm12 = vcmp.ne.s32.totalorder %v2886_v8, 0  ;;  %vm9988_vm13 = vcmp.ne.s32.totalorder %v2890_v62, 0 }
 0x2d2   :  { %3830 = vmatprep.subr.bf16.mxu0 %v3227_v13  ;;  %v2922_v4 = vand.u32 8, %v2810_v48  ;;  %vm9992_vm14 = vcmp.ne.s32.totalorder %v2918_v54, 0  ;;  %v2950_v41 = vsel %vm9968_vm8, -0.6961928, %v4137_v35  ;;  %v2954_v12 = vsel %vm9972_vm9, -0.6961928, %v4137_v35 }
 0x2d3   :  { %v2966_v60 = vsel %vm9968_vm8, -0.3949175, %v4138_v38  ;;  %v2970_v34 = vsel %vm9972_vm9, -0.3949175, %v4138_v38  ;;  %v2982_v40 = vsel %vm9968_vm8, -0.18477343, %v4139_v42  ;;  %v10013_v50 = vrot.slane %v9846_v20, %v4212_v3 }
 0x2d4   :  { %vm10015_vm15 = vcmp.ne.s32.totalorder %v2922_v4, 0  ;;  %v2986_v1 = vsel %vm9972_vm9, -0.18477343, %v4139_v42  ;;  %v2998_v33 = vsel %vm9968_vm8, 0.0, %v4140_v46  ;;  %v3002_v37 = vsel %vm9972_vm9, 0.0, %v4140_v46 }
 0x2d5   :  { %v3014_v6 = vsel %vm9968_vm8, 0.1609302, %v4141_v49  ;;  %v3018_v45 = vsel %vm9972_vm9, 0.1609302, %v4141_v49  ;;  %v3030_v29 = vsel %vm9968_vm8, 0.33791524, %v4142_v52  ;;  %v3078_v57 = vsel %vm9976_vm10, %v2966_v60, %v2950_v41 }
 0x2d6   :  { %v3034_v51 = vsel %vm9972_vm9, 0.33791524, %v4142_v52  ;;  %v3046_v61 = vsel %vm9968_vm8, 0.562617, %v4143_v55  ;;  %v3050_v44 = vsel %vm9972_vm9, 0.562617, %v4143_v55  ;;  %v3082_v39 = vsel %vm9980_vm11, %v2970_v34, %v2954_v12 }
 0x2d7   :  { %v3062_v32 = vsel %vm9968_vm8, 1.0, %v4144_v59  ;;  %v3066_v63 = vsel %vm9972_vm9, 1.0, %v4144_v59  ;;  %v3094_v30 = vsel %vm9976_vm10, %v2998_v33, %v2982_v40  ;;  %v3098_v48 = vsel %vm9980_vm11, %v3002_v37, %v2986_v1  ;;  %v10200_v33 = vld [vmem:[#allocation6 + $0x48] sm:$0xff] }
 0x2d8   :  { %v3110_v9 = vsel %vm9976_vm10, %v3030_v29, %v3014_v6  ;;  %v3114_v16 = vsel %vm9980_vm11, %v3034_v51, %v3018_v45  ;;  %v3126_v26 = vsel %vm9976_vm10, %v3062_v32, %v3046_v61  ;;  %v3130_v27 = vsel %vm9980_vm11, %v3066_v63, %v3050_v44 }
 0x2d9   :  { %v3142_v0 = vsel %vm9984_vm12, %v3094_v30, %v3078_v57  ;;  %v3146_v15 = vsel %vm9988_vm13, %v3098_v48, %v3082_v39  ;;  %v3158_v23 = vsel %vm9984_vm12, %v3126_v26, %v3110_v9  ;;  %v3162_v58 = vsel %vm9988_vm13, %v3130_v27, %v3114_v16 }
 0x2da   :  { %v3174_v8 = vsel %vm9992_vm14, %v3158_v23, %v3142_v0  ;;  %v3178_v62 = vsel %vm10015_vm15, %v3162_v58, %v3146_v15  ;;  %v2803_v13 = vand.u32 15, %v2787_v25  ;;  %v2807_v17 = vand.u32 15, %v2791_v21 }
 0x2db   :  { %v3213_v43 = vmul.f32 %v10013_v50, %v3174_v8  ;;  %v3217_v54 = vmul.f32 %v10013_v50, %v3178_v62  ;;  %v2789_v5 = vshrl.u32 %v10082_v11, 24  ;;  %v2793_v36 = vshrl.u32 %v10085_v24, 24 }
 0x2dc   :  { %v2819_v4 = vand.u32 1, %v2803_v13  ;;  %v2823_v22 = vand.u32 1, %v2807_v17  ;;  %v2851_v41 = vand.u32 2, %v2803_v13  ;;  %v2855_v12 = vand.u32 2, %v2807_v17 }
 0x2dd   :  { %v3229_v60 = vpack.c.bf16 %v3217_v54, %v3213_v43  ;;  %v2883_v34 = vand.u32 4, %v2803_v13  ;;  %v2887_v25 = vand.u32 4, %v2807_v17  ;;  %v2915_v21 = vand.u32 8, %v2803_v13 }
 0x2de   :  { %vm10088_vm0 = vcmp.ne.s32.totalorder %v2819_v4, 0  ;;  %vm10092_vm1 = vcmp.ne.s32.totalorder %v2823_v22, 0  ;;  %vm10096_vm2 = vcmp.ne.s32.totalorder %v2851_v41, 0  ;;  %vm10100_vm3 = vcmp.ne.s32.totalorder %v2855_v12, 0 }
 0x2df   :  { %3883 = vmatprep.subr.bf16.mxu1 %v3229_v60  ;;  %vm10104_vm4 = vcmp.ne.s32.totalorder %v2883_v34, 0  ;;  %vm10108_vm5 = vcmp.ne.s32.totalorder %v2887_v25, 0  ;;  %v2919_v45 = vand.u32 8, %v2807_v17  ;;  %vm10112_vm6 = vcmp.ne.s32.totalorder %v2915_v21, 0 }
 0x2e0   :  { %v2947_v57 = vsel %vm10088_vm0, -0.6961928, %v4137_v35  ;;  %v2951_v51 = vsel %vm10092_vm1, -0.6961928, %v4137_v35  ;;  %v2963_v61 = vsel %vm10088_vm0, -0.3949175, %v4138_v38  ;;  %v10127_v44 = vrot.slane %v9846_v20, %v4220_v7 }
 0x2e1   :  { %vm10129_vm7 = vcmp.ne.s32.totalorder %v2919_v45, 0  ;;  %v2967_v32 = vsel %vm10092_vm1, -0.3949175, %v4138_v38  ;;  %v2979_v63 = vsel %vm10088_vm0, -0.18477343, %v4139_v42  ;;  %v2995_v30 = vsel %vm10088_vm0, 0.0, %v4140_v46 }
 0x2e2   :  { %v2983_v48 = vsel %vm10092_vm1, -0.18477343, %v4139_v42  ;;  %v2999_v9 = vsel %vm10092_vm1, 0.0, %v4140_v46  ;;  %v3011_v16 = vsel %vm10088_vm0, 0.1609302, %v4141_v49  ;;  %v3059_v26 = vsel %vm10088_vm0, 1.0, %v4144_v59 }
 0x2e3   :  { %v3015_v27 = vsel %vm10092_vm1, 0.1609302, %v4141_v49  ;;  %v3027_v0 = vsel %vm10088_vm0, 0.33791524, %v4142_v52  ;;  %v3031_v15 = vsel %vm10092_vm1, 0.33791524, %v4142_v52  ;;  %v3075_v23 = vsel %vm10096_vm2, %v2963_v61, %v2947_v57 }
 0x2e4   :  { %v3043_v58 = vsel %vm10088_vm0, 0.562617, %v4143_v55  ;;  %v3047_v8 = vsel %vm10092_vm1, 0.562617, %v4143_v55  ;;  %v3063_v62 = vsel %vm10092_vm1, 1.0, %v4144_v59  ;;  %v3079_v13 = vsel %vm10100_vm3, %v2967_v32, %v2951_v51  ;;  %v10203_v57 = vld [vmem:[#allocation6 + $0x68] sm:$0xff] }
 0x2e5   :  { %v3091_v17 = vsel %vm10096_vm2, %v2995_v30, %v2979_v63  ;;  %v3095_v43 = vsel %vm10100_vm3, %v2999_v9, %v2983_v48  ;;  %v3107_v54 = vsel %vm10096_vm2, %v3027_v0, %v3011_v16  ;;  %v3111_v4 = vsel %vm10100_vm3, %v3031_v15, %v3015_v27 }
 0x2e6   :  { %v3123_v22 = vsel %vm10096_vm2, %v3059_v26, %v3043_v58  ;;  %v3127_v41 = vsel %vm10100_vm3, %v3063_v62, %v3047_v8  ;;  %v3139_v12 = vsel %vm10104_vm4, %v3091_v17, %v3075_v23  ;;  %v3143_v60 = vsel %vm10108_vm5, %v3095_v43, %v3079_v13 }
 0x2e7   :  { %v3155_v34 = vsel %vm10104_vm4, %v3123_v22, %v3107_v54  ;;  %v3159_v25 = vsel %vm10108_vm5, %v3127_v41, %v3111_v4  ;;  %v2805_v21 = vand.u32 15, %v2789_v5  ;;  %v2809_v40 = vand.u32 15, %v2793_v36 }
 0x2e8   :  { %v3171_v47 = vsel %vm10112_vm6, %v3155_v34, %v3139_v12  ;;  %v3175_v1 = vsel %vm10129_vm7, %v3159_v25, %v3143_v60  ;;  %v2796_v45 = vshrl.u32 %v10200_v33, 24  ;;  %v2800_v37 = vshrl.u32 %v10203_v57, 24 }
 0x2e9   :  { %v3210_v51 = vmul.f32 %v10127_v44, %v3171_v47  ;;  %v3214_v6 = vmul.f32 %v10127_v44, %v3175_v1  ;;  %v2821_v5 = vand.u32 1, %v2805_v21  ;;  %v2825_v36 = vand.u32 1, %v2809_v40 }
 0x2ea   :  { %v2853_v61 = vand.u32 2, %v2805_v21  ;;  %v2857_v29 = vand.u32 2, %v2809_v40  ;;  %v2885_v32 = vand.u32 4, %v2805_v21  ;;  %v2889_v63 = vand.u32 4, %v2809_v40 }
 0x2eb   :  { %v3226_v39 = vpack.c.bf16 %v3214_v6, %v3210_v51  ;;  %vm10208_vm8 = vcmp.ne.s32.totalorder %v2821_v5, 0  ;;  %vm10212_vm9 = vcmp.ne.s32.totalorder %v2825_v36, 0  ;;  %v2917_v9 = vand.u32 8, %v2805_v21 }
 0x2ec   :  { %vm10216_vm10 = vcmp.ne.s32.totalorder %v2853_v61, 0  ;;  %vm10220_vm11 = vcmp.ne.s32.totalorder %v2857_v29, 0  ;;  %vm10224_vm12 = vcmp.ne.s32.totalorder %v2885_v32, 0  ;;  %vm10228_vm13 = vcmp.ne.s32.totalorder %v2889_v63, 0 }
 0x2ed   :  { %3831 = vmatpush1.bf16.msra.mxu0 %v3226_v39  ;;  %v2921_v15 = vand.u32 8, %v2809_v40  ;;  %vm10232_vm14 = vcmp.ne.s32.totalorder %v2917_v9, 0  ;;  %v2949_v58 = vsel %vm10208_vm8, -0.6961928, %v4137_v35  ;;  %v2953_v8 = vsel %vm10212_vm9, -0.6961928, %v4137_v35 }
 0x2ee   :  { %v2965_v62 = vsel %vm10208_vm8, -0.3949175, %v4138_v38  ;;  %v2969_v13 = vsel %vm10212_vm9, -0.3949175, %v4138_v38  ;;  %v2981_v17 = vsel %vm10208_vm8, -0.18477343, %v4139_v42  ;;  %v10253_v43 = vrot.slane %v9846_v20, %v4234_v14 }
 0x2ef   :  { %vm10255_vm15 = vcmp.ne.s32.totalorder %v2921_v15, 0  ;;  %v2985_v4 = vsel %vm10212_vm9, -0.18477343, %v4139_v42  ;;  %v2997_v22 = vsel %vm10208_vm8, 0.0, %v4140_v46  ;;  %v3001_v41 = vsel %vm10212_vm9, 0.0, %v4140_v46 }
 0x2f0   :  { %v3013_v20 = vsel %vm10208_vm8, 0.1609302, %v4141_v49  ;;  %v3017_v12 = vsel %vm10212_vm9, 0.1609302, %v4141_v49  ;;  %v3029_v60 = vsel %vm10208_vm8, 0.33791524, %v4142_v52  ;;  %v3077_v34 = vsel %vm10216_vm10, %v2965_v62, %v2949_v58 }
 0x2f1   :  { %v3033_v25 = vsel %vm10212_vm9, 0.33791524, %v4142_v52  ;;  %v3045_v21 = vsel %vm10208_vm8, 0.562617, %v4143_v55  ;;  %v3049_v40 = vsel %vm10212_vm9, 0.562617, %v4143_v55  ;;  %v3081_v47 = vsel %vm10220_vm11, %v2969_v13, %v2953_v8 }
 0x2f2   :  { %v3061_v1 = vsel %vm10208_vm8, 1.0, %v4144_v59  ;;  %v3065_v51 = vsel %vm10212_vm9, 1.0, %v4144_v59  ;;  %v3093_v6 = vsel %vm10216_vm10, %v2997_v22, %v2981_v17  ;;  %v3097_v5 = vsel %vm10220_vm11, %v3001_v41, %v2985_v4  ;;  %v10322_v62 = vld [vmem:[#allocation6 + $0x58] sm:$0xff] }
 0x2f3   :  { %v3109_v36 = vsel %vm10216_vm10, %v3029_v60, %v3013_v20  ;;  %v3113_v61 = vsel %vm10220_vm11, %v3033_v25, %v3017_v12  ;;  %v3125_v29 = vsel %vm10216_vm10, %v3061_v1, %v3045_v21  ;;  %v3129_v32 = vsel %vm10220_vm11, %v3065_v51, %v3049_v40  ;;  %v10325_v13 = vld [vmem:[#allocation6 + $0x78] sm:$0xff] }
 0x2f4   :  { %v3141_v63 = vsel %vm10224_vm12, %v3093_v6, %v3077_v34  ;;  %v3145_v39 = vsel %vm10228_vm13, %v3097_v5, %v3081_v47  ;;  %v3157_v30 = vsel %vm10224_vm12, %v3125_v29, %v3109_v36  ;;  %v3161_v48 = vsel %vm10228_vm13, %v3129_v32, %v3113_v61 }
 0x2f5   :  { %v3173_v9 = vsel %vm10232_vm14, %v3157_v30, %v3141_v63  ;;  %v3177_v16 = vsel %vm10255_vm15, %v3161_v48, %v3145_v39  ;;  %v2812_v26 = vand.u32 15, %v2796_v45  ;;  %v2816_v15 = vand.u32 15, %v2800_v37 }
 0x2f6   :  { %v3212_v58 = vmul.f32 %v10253_v43, %v3173_v9  ;;  %v3216_v8 = vmul.f32 %v10253_v43, %v3177_v16  ;;  %v2798_v27 = vshrl.u32 %v10322_v62, 24  ;;  %v2802_v0 = vshrl.u32 %v10325_v13, 24 }
 0x2f7   :  { %v2828_v17 = vand.u32 1, %v2812_v26  ;;  %v2832_v23 = vand.u32 1, %v2816_v15  ;;  %v2860_v4 = vand.u32 2, %v2812_v26  ;;  %v2864_v22 = vand.u32 2, %v2816_v15 }
 0x2f8   :  { %v3228_v54 = vpack.c.bf16 %v3216_v8, %v3212_v58  ;;  %v2892_v41 = vand.u32 4, %v2812_v26  ;;  %v2896_v45 = vand.u32 4, %v2816_v15  ;;  %v2924_v37 = vand.u32 8, %v2812_v26 }
 0x2f9   :  { %vm10328_vm0 = vcmp.ne.s32.totalorder %v2828_v17, 0  ;;  %vm10332_vm1 = vcmp.ne.s32.totalorder %v2832_v23, 0  ;;  %vm10336_vm2 = vcmp.ne.s32.totalorder %v2860_v4, 0  ;;  %vm10340_vm3 = vcmp.ne.s32.totalorder %v2864_v22, 0 }
 0x2fa   :  { %3884 = vmatpush1.bf16.msra.mxu1 %v3228_v54  ;;  %vm10344_vm4 = vcmp.ne.s32.totalorder %v2892_v41, 0  ;;  %vm10348_vm5 = vcmp.ne.s32.totalorder %v2896_v45, 0  ;;  %v2928_v40 = vand.u32 8, %v2816_v15  ;;  %vm10352_vm6 = vcmp.ne.s32.totalorder %v2924_v37, 0 }
 0x2fb   :  { %v2956_v1 = vsel %vm10328_vm0, -0.6961928, %v4137_v35  ;;  %v2960_v51 = vsel %vm10332_vm1, -0.6961928, %v4137_v35  ;;  %v2972_v6 = vsel %vm10328_vm0, -0.3949175, %v4138_v38 }
 0x2fc   :  { %vm10365_vm7 = vcmp.ne.s32.totalorder %v2928_v40, 0  ;;  %v2976_v36 = vsel %vm10332_vm1, -0.3949175, %v4138_v38  ;;  %v2988_v61 = vsel %vm10328_vm0, -0.18477343, %v4139_v42  ;;  %v3004_v29 = vsel %vm10328_vm0, 0.0, %v4140_v46 }
 0x2fd   :  { %v2992_v32 = vsel %vm10332_vm1, -0.18477343, %v4139_v42  ;;  %v3008_v63 = vsel %vm10332_vm1, 0.0, %v4140_v46  ;;  %v3020_v39 = vsel %vm10328_vm0, 0.1609302, %v4141_v49  ;;  %v3068_v30 = vsel %vm10328_vm0, 1.0, %v4144_v59 }
 0x2fe   :  { %v3024_v48 = vsel %vm10332_vm1, 0.1609302, %v4141_v49  ;;  %v3036_v9 = vsel %vm10328_vm0, 0.33791524, %v4142_v52  ;;  %v3040_v16 = vsel %vm10332_vm1, 0.33791524, %v4142_v52  ;;  %v3084_v26 = vsel %vm10336_vm2, %v2972_v6, %v2956_v1 }
 0x2ff   :  { %v3052_v15 = vsel %vm10328_vm0, 0.562617, %v4143_v55  ;;  %v3056_v58 = vsel %vm10332_vm1, 0.562617, %v4143_v55  ;;  %v3072_v8 = vsel %vm10332_vm1, 1.0, %v4144_v59  ;;  %v3088_v17 = vsel %vm10340_vm3, %v2976_v36, %v2960_v51  ;;  %v10436_v6 = vld [vmem:[#allocation6 + $0x40] sm:$0xff] }
 0x300   :  { %v3100_v23 = vsel %vm10336_vm2, %v3004_v29, %v2988_v61  ;;  %v3104_v4 = vsel %vm10340_vm3, %v3008_v63, %v2992_v32  ;;  %v3116_v22 = vsel %vm10336_vm2, %v3036_v9, %v3020_v39  ;;  %v3120_v54 = vsel %vm10340_vm3, %v3040_v16, %v3024_v48  ;;  %v10439_v61 = vld [vmem:[#allocation6 + $0x60] sm:$0xff] }
 0x301   :  { %v3132_v41 = vsel %vm10336_vm2, %v3068_v30, %v3052_v15  ;;  %v3136_v45 = vsel %vm10340_vm3, %v3072_v8, %v3056_v58  ;;  %v3148_v37 = vsel %vm10344_vm4, %v3100_v23, %v3084_v26  ;;  %v3152_v20 = vsel %vm10348_vm5, %v3104_v4, %v3088_v17  ;;  %v10452_v16 = vld [vmem:[#allocation8 + $0x3] ss:$4 sm:$0xf] }
 0x302   :  { %v3164_v12 = vsel %vm10344_vm4, %v3132_v41, %v3116_v22  ;;  %v3168_v40 = vsel %vm10348_vm5, %v3136_v45, %v3120_v54  ;;  %v2814_v1 = vand.u32 15, %v2798_v27  ;;  %v2818_v51 = vand.u32 15, %v2802_v0 }
 0x303   :  { %v3180_v60 = vsel %vm10352_vm6, %v3164_v12, %v3148_v37  ;;  %v3184_v34 = vsel %vm10365_vm7, %v3168_v40, %v3152_v20  ;;  %v2795_v36 = vshrl.u32 %v10436_v6, 24  ;;  %v2799_v25 = vshrl.u32 %v10439_v61, 24 }
 0x304   :  { %v3219_v29 = vmul.f32 %v9887_v18, %v3180_v60  ;;  %v3223_v21 = vmul.f32 %v9887_v18, %v3184_v34  ;;  %v2830_v27 = vand.u32 1, %v2814_v1  ;;  %v2834_v0 = vand.u32 1, %v2818_v51 }
 0x305   :  { %v2862_v32 = vand.u32 2, %v2814_v1  ;;  %v2866_v47 = vand.u32 2, %v2818_v51  ;;  %v2894_v63 = vand.u32 4, %v2814_v1  ;;  %v2898_v39 = vand.u32 4, %v2818_v51 }
 0x306   :  { %v3231_v5 = vpack.c.bf16 %v3223_v21, %v3219_v29  ;;  %vm10444_vm8 = vcmp.ne.s32.totalorder %v2830_v27, 0  ;;  %vm10448_vm9 = vcmp.ne.s32.totalorder %v2834_v0, 0  ;;  %v2926_v9 = vand.u32 8, %v2814_v1 }
 0x307   :  { %vm10454_vm10 = vcmp.ne.s32.totalorder %v2862_v32, 0  ;;  %vm10458_vm11 = vcmp.ne.s32.totalorder %v2866_v47, 0  ;;  %vm10462_vm12 = vcmp.ne.s32.totalorder %v2894_v63, 0  ;;  %vm10466_vm13 = vcmp.ne.s32.totalorder %v2898_v39, 0 }
 0x308   :  { %3832 = vmatprep.subr.bf16.mxu0 %v3231_v5  ;;  %v2930_v8 = vand.u32 8, %v2818_v51  ;;  %vm10470_vm14 = vcmp.ne.s32.totalorder %v2926_v9, 0  ;;  %v2958_v23 = vsel %vm10444_vm8, -0.6961928, %v4137_v35  ;;  %v2962_v4 = vsel %vm10448_vm9, -0.6961928, %v4137_v35 }
 0x309   :  { %v2974_v22 = vsel %vm10444_vm8, -0.3949175, %v4138_v38  ;;  %v2978_v54 = vsel %vm10448_vm9, -0.3949175, %v4138_v38  ;;  %v2990_v41 = vsel %vm10444_vm8, -0.18477343, %v4139_v42  ;;  %v10491_v45 = vrot.slane %v10452_v16, %v4210_v2 }
 0x30a   :  { %vm10493_vm15 = vcmp.ne.s32.totalorder %v2930_v8, 0  ;;  %v2994_v20 = vsel %vm10448_vm9, -0.18477343, %v4139_v42  ;;  %v3006_v12 = vsel %vm10444_vm8, 0.0, %v4140_v46  ;;  %v3010_v40 = vsel %vm10448_vm9, 0.0, %v4140_v46 }
 0x30b   :  { %v3022_v1 = vsel %vm10444_vm8, 0.1609302, %v4141_v49  ;;  %v3026_v51 = vsel %vm10448_vm9, 0.1609302, %v4141_v49  ;;  %v3038_v60 = vsel %vm10444_vm8, 0.33791524, %v4142_v52  ;;  %v3086_v34 = vsel %vm10454_vm10, %v2974_v22, %v2958_v23 }
 0x30c   :  { %v3042_v29 = vsel %vm10448_vm9, 0.33791524, %v4142_v52  ;;  %v3054_v21 = vsel %vm10444_vm8, 0.562617, %v4143_v55  ;;  %v3058_v27 = vsel %vm10448_vm9, 0.562617, %v4143_v55  ;;  %v3090_v0 = vsel %vm10458_vm11, %v2978_v54, %v2962_v4 }
 0x30d   :  { %v3070_v32 = vsel %vm10444_vm8, 1.0, %v4144_v59  ;;  %v3074_v47 = vsel %vm10448_vm9, 1.0, %v4144_v59  ;;  %v3102_v63 = vsel %vm10454_vm10, %v3006_v12, %v2990_v41  ;;  %v3106_v39 = vsel %vm10458_vm11, %v3010_v40, %v2994_v20  ;;  %v10560_v40 = vld [vmem:[#allocation6 + $0x50] sm:$0xff] }
 0x30e   :  { %v3118_v5 = vsel %vm10454_vm10, %v3038_v60, %v3022_v1  ;;  %v3122_v9 = vsel %vm10458_vm11, %v3042_v29, %v3026_v51  ;;  %v3134_v30 = vsel %vm10454_vm10, %v3070_v32, %v3054_v21  ;;  %v3138_v8 = vsel %vm10458_vm11, %v3074_v47, %v3058_v27  ;;  %v10563_v1 = vld [vmem:[#allocation6 + $0x70] sm:$0xff] }
 0x30f   :  { %v3150_v48 = vsel %vm10462_vm12, %v3102_v63, %v3086_v34  ;;  %v3154_v23 = vsel %vm10466_vm13, %v3106_v39, %v3090_v0  ;;  %v3166_v4 = vsel %vm10462_vm12, %v3134_v30, %v3118_v5  ;;  %v3170_v22 = vsel %vm10466_vm13, %v3138_v8, %v3122_v9 }
 0x310   :  { %v3182_v54 = vsel %vm10470_vm14, %v3166_v4, %v3150_v48  ;;  %v3186_v18 = vsel %vm10493_vm15, %v3170_v22, %v3154_v23  ;;  %v2811_v26 = vand.u32 15, %v2795_v36  ;;  %v2815_v41 = vand.u32 15, %v2799_v25 }
 0x311   :  { %v3221_v20 = vmul.f32 %v10013_v50, %v3182_v54  ;;  %v3225_v12 = vmul.f32 %v10013_v50, %v3186_v18  ;;  %v2797_v15 = vshrl.u32 %v10560_v40, 24  ;;  %v2801_v58 = vshrl.u32 %v10563_v1, 24 }
 0x312   :  { %v2827_v51 = vand.u32 1, %v2811_v26  ;;  %v2831_v17 = vand.u32 1, %v2815_v41  ;;  %v2859_v60 = vand.u32 2, %v2811_v26  ;;  %v2863_v34 = vand.u32 2, %v2815_v41 }
 0x313   :  { %v3233_v37 = vpack.c.bf16 %v3225_v12, %v3221_v20  ;;  %v2891_v29 = vand.u32 4, %v2811_v26  ;;  %v2895_v36 = vand.u32 4, %v2815_v41  ;;  %v2923_v25 = vand.u32 8, %v2811_v26 }
 0x314   :  { %vm10566_vm0 = vcmp.ne.s32.totalorder %v2827_v51, 0  ;;  %vm10570_vm1 = vcmp.ne.s32.totalorder %v2831_v17, 0  ;;  %vm10574_vm2 = vcmp.ne.s32.totalorder %v2859_v60, 0  ;;  %vm10578_vm3 = vcmp.ne.s32.totalorder %v2863_v34, 0 }
 0x315   :  { %3885 = vmatprep.subr.bf16.mxu1 %v3233_v37  ;;  %vm10582_vm4 = vcmp.ne.s32.totalorder %v2891_v29, 0  ;;  %vm10586_vm5 = vcmp.ne.s32.totalorder %v2895_v36, 0  ;;  %v2927_v63 = vand.u32 8, %v2815_v41  ;;  %vm10590_vm6 = vcmp.ne.s32.totalorder %v2923_v25, 0 }
 0x316   :  { %v2955_v5 = vsel %vm10566_vm0, -0.6961928, %v4137_v35  ;;  %v2959_v9 = vsel %vm10570_vm1, -0.6961928, %v4137_v35  ;;  %v2971_v30 = vsel %vm10566_vm0, -0.3949175, %v4138_v38  ;;  %v10605_v8 = vrot.slane %v10452_v16, %v4212_v3 }
 0x317   :  { %vm10607_vm7 = vcmp.ne.s32.totalorder %v2927_v63, 0  ;;  %v2975_v23 = vsel %vm10570_vm1, -0.3949175, %v4138_v38  ;;  %v2987_v4 = vsel %vm10566_vm0, -0.18477343, %v4139_v42  ;;  %v3003_v22 = vsel %vm10566_vm0, 0.0, %v4140_v46 }
 0x318   :  { %v2991_v54 = vsel %vm10570_vm1, -0.18477343, %v4139_v42  ;;  %v3007_v18 = vsel %vm10570_vm1, 0.0, %v4140_v46  ;;  %v3019_v26 = vsel %vm10566_vm0, 0.1609302, %v4141_v49  ;;  %v3067_v41 = vsel %vm10566_vm0, 1.0, %v4144_v59 }
 0x319   :  { %v3023_v20 = vsel %vm10570_vm1, 0.1609302, %v4141_v49  ;;  %v3035_v12 = vsel %vm10566_vm0, 0.33791524, %v4142_v52  ;;  %v3039_v51 = vsel %vm10570_vm1, 0.33791524, %v4142_v52  ;;  %v3083_v17 = vsel %vm10574_vm2, %v2971_v30, %v2955_v5 }
 0x31a   :  { %v3051_v60 = vsel %vm10566_vm0, 0.562617, %v4143_v55  ;;  %v3055_v34 = vsel %vm10570_vm1, 0.562617, %v4143_v55  ;;  %v3071_v37 = vsel %vm10570_vm1, 1.0, %v4144_v59  ;;  %v3087_v29 = vsel %vm10578_vm3, %v2975_v23, %v2959_v9 }
 0x31b   :  { %v3099_v36 = vsel %vm10574_vm2, %v3003_v22, %v2987_v4  ;;  %v3103_v25 = vsel %vm10578_vm3, %v3007_v18, %v2991_v54  ;;  %v3115_v21 = vsel %vm10574_vm2, %v3035_v12, %v3019_v26  ;;  %v3119_v63 = vsel %vm10578_vm3, %v3039_v51, %v3023_v20  ;;  %v3984_v5 = vld [vmem:[#allocation3 + $0x4] ss:$8 sps:$4 sm:$0xff]  }
 0x31c   :  { %v3131_v50 = vsel %vm10574_vm2, %v3067_v41, %v3051_v60  ;;  %v3135_v30 = vsel %vm10578_vm3, %v3071_v37, %v3055_v34  ;;  %v3147_v9 = vsel %vm10582_vm4, %v3099_v36, %v3083_v17  ;;  %v3151_v23 = vsel %vm10586_vm5, %v3103_v25, %v3087_v29  ;;  %3838 = vmatprep.mubr.bf16.mxu0 %v3984_v5 }
 0x31d   :  { %v3163_v4 = vsel %vm10582_vm4, %v3131_v50, %v3115_v21  ;;  %v3167_v22 = vsel %vm10586_vm5, %v3135_v30, %v3119_v63  ;;  %v2813_v54 = vand.u32 15, %v2797_v15  ;;  %v2817_v18 = vand.u32 15, %v2801_v58  ;;  %3891 = vmatprep.mubr.bf16.mxu1 %v3984_v5 }
 0x31e   :  { %v3179_v27 = vsel %vm10590_vm6, %v3163_v4, %v3147_v9  ;;  %v3183_v0 = vsel %vm10607_vm7, %v3167_v22, %v3151_v23  ;;  %v10679_v26 = vshrl.u32 %v9722_v53, 28  ;;  %v10682_v41 = vshrl.u32 %v9725_v56, 28 }
 0x31f   :  { %v3218_v32 = vmul.f32 %v10127_v44, %v3179_v27  ;;  %v3222_v47 = vmul.f32 %v10127_v44, %v3183_v0  ;;  %v2829_v15 = vand.u32 1, %v2813_v54  ;;  %v2833_v58 = vand.u32 1, %v2817_v18 }
 0x320   :  { %v2861_v20 = vand.u32 2, %v2813_v54  ;;  %v2865_v12 = vand.u32 2, %v2817_v18  ;;  %v2893_v51 = vand.u32 4, %v2813_v54  ;;  %v2897_v39 = vand.u32 4, %v2817_v18 }
 0x321   :  { %v3230_v17 = vpack.c.bf16 %v3222_v47, %v3218_v32  ;;  %vm10686_vm8 = vcmp.ne.s32.totalorder %v2829_v15, 0  ;;  %vm10690_vm9 = vcmp.ne.s32.totalorder %v2833_v58, 0  ;;  %v2925_v56 = vand.u32 8, %v2813_v54 }
 0x322   :  { %vm10694_vm10 = vcmp.ne.s32.totalorder %v2861_v20, 0  ;;  %vm10698_vm11 = vcmp.ne.s32.totalorder %v2865_v12, 0  ;;  %vm10702_vm12 = vcmp.ne.s32.totalorder %v2893_v51, 0  ;;  %vm10706_vm13 = vcmp.ne.s32.totalorder %v2897_v39, 0 }
 0x323   :  { %3833 = vmatpush1.bf16.msra.mxu0 %v3230_v17  ;;  %v2929_v29 = vand.u32 8, %v2817_v18  ;;  %vm10710_vm14 = vcmp.ne.s32.totalorder %v2925_v56, 0  ;;  %v2957_v25 = vsel %vm10686_vm8, -0.6961928, %v4137_v35  ;;  %v2961_v21 = vsel %vm10690_vm9, -0.6961928, %v4137_v35 }
 0x324   :  { %v2973_v63 = vsel %vm10686_vm8, -0.3949175, %v4138_v38  ;;  %v2977_v5 = vsel %vm10690_vm9, -0.3949175, %v4138_v38  ;;  %v2989_v50 = vsel %vm10686_vm8, -0.18477343, %v4139_v42  ;;  %v10731_v30 = vrot.slane %v10452_v16, %v4220_v7 }
 0x325   :  { %vm10733_vm15 = vcmp.ne.s32.totalorder %v2929_v29, 0  ;;  %v2993_v23 = vsel %vm10690_vm9, -0.18477343, %v4139_v42  ;;  %v3005_v4 = vsel %vm10686_vm8, 0.0, %v4140_v46  ;;  %v3009_v22 = vsel %vm10690_vm9, 0.0, %v4140_v46 }
 0x326   :  { %v3021_v54 = vsel %vm10686_vm8, 0.1609302, %v4141_v49  ;;  %v3025_v18 = vsel %vm10690_vm9, 0.1609302, %v4141_v49  ;;  %v3037_v27 = vsel %vm10686_vm8, 0.33791524, %v4142_v52  ;;  %v3085_v0 = vsel %vm10694_vm10, %v2973_v63, %v2957_v25 }
 0x327   :  { %v3041_v32 = vsel %vm10690_vm9, 0.33791524, %v4142_v52  ;;  %v3053_v47 = vsel %vm10686_vm8, 0.562617, %v4143_v55  ;;  %v3057_v15 = vsel %vm10690_vm9, 0.562617, %v4143_v55  ;;  %v3089_v58 = vsel %vm10698_vm11, %v2977_v5, %v2961_v21 }
 0x328   :  { %v3069_v20 = vsel %vm10686_vm8, 1.0, %v4144_v59  ;;  %v3073_v12 = vsel %vm10690_vm9, 1.0, %v4144_v59  ;;  %v3101_v51 = vsel %vm10694_vm10, %v3005_v4, %v2989_v50  ;;  %v3105_v39 = vsel %vm10698_vm11, %v3009_v22, %v2993_v23 }
 0x329   :  { %v3117_v17 = vsel %vm10694_vm10, %v3037_v27, %v3021_v54  ;;  %v3121_v56 = vsel %vm10698_vm11, %v3041_v32, %v3025_v18  ;;  %v3133_v48 = vsel %vm10694_vm10, %v3069_v20, %v3053_v47  ;;  %v3137_v29 = vsel %vm10698_vm11, %v3073_v12, %v3057_v15 }
 0x32a   :  { %v3149_v53 = vsel %vm10702_vm12, %v3101_v51, %v3085_v0  ;;  %v3153_v25 = vsel %vm10706_vm13, %v3105_v39, %v3089_v58  ;;  %v3165_v21 = vsel %vm10702_vm12, %v3133_v48, %v3117_v17  ;;  %v3169_v63 = vsel %vm10706_vm13, %v3137_v29, %v3121_v56 }
 0x32b   :  { %v3181_v5 = vsel %vm10710_vm14, %v3165_v21, %v3149_v53  ;;  %v3185_v60 = vsel %vm10733_vm15, %v3169_v63, %v3153_v25  ;;  %v3275_v44 = vand.u32 1, %v10679_v26  ;;  %v3279_v50 = vand.u32 1, %v10682_v41 }
 0x32c   :  { %v3220_v23 = vmul.f32 %v10253_v43, %v3181_v5  ;;  %v3224_v4 = vmul.f32 %v10253_v43, %v3185_v60  ;;  %v3307_v34 = vand.u32 2, %v10679_v26  ;;  %v3311_v22 = vand.u32 2, %v10682_v41 }
 0x32d   :  { %vm10804_vm0 = vcmp.ne.s32.totalorder %v3275_v44, 0  ;;  %vm10808_vm1 = vcmp.ne.s32.totalorder %v3279_v50, 0  ;;  %v3339_v9 = vand.u32 4, %v10679_v26  ;;  %v3343_v54 = vand.u32 4, %v10682_v41 }
 0x32e   :  { %v3232_v18 = vpack.c.bf16 %v3224_v4, %v3220_v23  ;;  %vm10814_vm2 = vcmp.ne.s32.totalorder %v3307_v34, 0  ;;  %vm10818_vm3 = vcmp.ne.s32.totalorder %v3311_v22, 0  ;;  %v3371_v0 = vand.u32 8, %v10679_v26 }
 0x32f   :  { %vm10823_vm4 = vcmp.ne.s32.totalorder %v3339_v9, 0  ;;  %vm10827_vm5 = vcmp.ne.s32.totalorder %v3343_v54, 0  ;;  %v3375_v15 = vand.u32 8, %v10682_v41  ;;  %v3403_v58 = vsel %vm10804_vm0, -0.6961928, %v4137_v35 }
 0x330   :  { %3886 = vmatpush1.bf16.msra.mxu1 %v3232_v18  ;;  %vm10835_vm6 = vcmp.ne.s32.totalorder %v3371_v0, 0  ;;  %v3407_v26 = vsel %vm10808_vm1, -0.6961928, %v4137_v35  ;;  %v3419_v12 = vsel %vm10804_vm0, -0.3949175, %v4138_v38  ;;  %v3451_v41 = vsel %vm10804_vm0, 0.0, %v4140_v46 }
 0x331   :  { %vm10848_vm7 = vcmp.ne.s32.totalorder %v3375_v15, 0  ;;  %v3423_v39 = vsel %vm10808_vm1, -0.3949175, %v4138_v38  ;;  %v3435_v17 = vsel %vm10804_vm0, -0.18477343, %v4139_v42  ;;  %v3455_v56 = vsel %vm10808_vm1, 0.0, %v4140_v46 }
 0x332   :  { %v3439_v48 = vsel %vm10808_vm1, -0.18477343, %v4139_v42  ;;  %v3467_v29 = vsel %vm10804_vm0, 0.1609302, %v4141_v49  ;;  %v3471_v53 = vsel %vm10808_vm1, 0.1609302, %v4141_v49  ;;  %v3531_v25 = vsel %vm10814_vm2, %v3419_v12, %v3403_v58 }
 0x333   :  { %v3483_v21 = vsel %vm10804_vm0, 0.33791524, %v4142_v52  ;;  %v3487_v63 = vsel %vm10808_vm1, 0.33791524, %v4142_v52  ;;  %v3499_v5 = vsel %vm10804_vm0, 0.562617, %v4143_v55  ;;  %v3535_v60 = vsel %vm10818_vm3, %v3423_v39, %v3407_v26 }
 0x334   :  { %v3503_v44 = vsel %vm10808_vm1, 0.562617, %v4143_v55  ;;  %v3515_v50 = vsel %vm10804_vm0, 1.0, %v4144_v59  ;;  %v3519_v23 = vsel %vm10808_vm1, 1.0, %v4144_v59  ;;  %v3547_v4 = vsel %vm10814_vm2, %v3451_v41, %v3435_v17 }
 0x335   :  { %v3551_v34 = vsel %vm10818_vm3, %v3455_v56, %v3439_v48  ;;  %v3563_v22 = vsel %vm10814_vm2, %v3483_v21, %v3467_v29  ;;  %v3567_v9 = vsel %vm10818_vm3, %v3487_v63, %v3471_v53  ;;  %v3579_v37 = vsel %vm10814_vm2, %v3515_v50, %v3499_v5 }
 0x336   :  { %v3583_v54 = vsel %vm10818_vm3, %v3519_v23, %v3503_v44  ;;  %v3595_v36 = vsel %vm10823_vm4, %v3547_v4, %v3531_v25  ;;  %v3599_v18 = vsel %vm10827_vm5, %v3551_v34, %v3535_v60  ;;  %v3611_v0 = vsel %vm10823_vm4, %v3579_v37, %v3563_v22 }
 0x337   :  { %v3615_v15 = vsel %vm10827_vm5, %v3583_v54, %v3567_v9  ;;  %v3627_v58 = vsel %vm10835_vm6, %v3611_v0, %v3595_v36  ;;  %v3949_v27 = vshrl.u32 %v9840_v19, 28  ;;  %v3953_v43 = vshrl.u32 %v9843_v31, 28 }
 0x338   :  { %v3631_v26 = vsel %vm10848_vm7, %v3615_v15, %v3599_v18  ;;  %v3665_v12 = vmul.f32 %v10491_v45, %v3627_v58  ;;  %v10920_v41 = vshrl.u32 %v9960_v10, 28  ;;  %v10923_v32 = vshrl.u32 %v9963_v28, 28 }
 0x339   :  { %v3669_v47 = vmul.f32 %v10491_v45, %v3631_v26  ;;  %v3277_v39 = vand.u32 1, %v3949_v27  ;;  %v3281_v20 = vand.u32 1, %v3953_v43  ;;  %v3309_v17 = vand.u32 2, %v3949_v27 }
 0x33a   :  { %v3313_v56 = vand.u32 2, %v3953_v43  ;;  %v3341_v19 = vand.u32 4, %v3949_v27  ;;  %v3345_v48 = vand.u32 4, %v3953_v43  ;;  %v3373_v31 = vand.u32 8, %v3949_v27 }
 0x33b   :  { %v3681_v29 = vpack.c.bf16 %v3669_v47, %v3665_v12  ;;  %vm10926_vm8 = vcmp.ne.s32.totalorder %v3277_v39, 0  ;;  %vm10930_vm9 = vcmp.ne.s32.totalorder %v3281_v20, 0  ;;  %vm10934_vm10 = vcmp.ne.s32.totalorder %v3309_v17, 0 }
 0x33c   :  { %vm10938_vm11 = vcmp.ne.s32.totalorder %v3313_v56, 0  ;;  %vm10942_vm12 = vcmp.ne.s32.totalorder %v3341_v19, 0  ;;  %vm10946_vm13 = vcmp.ne.s32.totalorder %v3345_v48, 0  ;;  %v3377_v63 = vand.u32 8, %v3953_v43 }
 0x33d   :  { %3834 = vmatprep.subr.bf16.mxu0 %v3681_v29  ;;  %vm10950_vm14 = vcmp.ne.s32.totalorder %v3373_v31, 0  ;;  %v3405_v60 = vsel %vm10926_vm8, -0.6961928, %v4137_v35  ;;  %v3409_v44 = vsel %vm10930_vm9, -0.6961928, %v4137_v35  ;;  %v3453_v50 = vsel %vm10926_vm8, 0.0, %v4140_v46 }
 0x33e   :  { %vm10963_vm15 = vcmp.ne.s32.totalorder %v3377_v63, 0  ;;  %v3421_v4 = vsel %vm10926_vm8, -0.3949175, %v4138_v38  ;;  %v3425_v34 = vsel %vm10930_vm9, -0.3949175, %v4138_v38  ;;  %v3457_v22 = vsel %vm10930_vm9, 0.0, %v4140_v46 }
 0x33f   :  { %v3437_v9 = vsel %vm10926_vm8, -0.18477343, %v4139_v42  ;;  %v3441_v37 = vsel %vm10930_vm9, -0.18477343, %v4139_v42  ;;  %v3469_v54 = vsel %vm10926_vm8, 0.1609302, %v4141_v49  ;;  %v3533_v36 = vsel %vm10934_vm10, %v3421_v4, %v3405_v60 }
 0x340   :  { %v3473_v18 = vsel %vm10930_vm9, 0.1609302, %v4141_v49  ;;  %v3485_v0 = vsel %vm10926_vm8, 0.33791524, %v4142_v52  ;;  %v3489_v15 = vsel %vm10930_vm9, 0.33791524, %v4142_v52  ;;  %v3537_v58 = vsel %vm10938_vm11, %v3425_v34, %v3409_v44 }
 0x341   :  { %v3501_v27 = vsel %vm10926_vm8, 0.562617, %v4143_v55  ;;  %v3505_v43 = vsel %vm10930_vm9, 0.562617, %v4143_v55  ;;  %v3517_v26 = vsel %vm10926_vm8, 1.0, %v4144_v59  ;;  %v3521_v12 = vsel %vm10930_vm9, 1.0, %v4144_v59 }
 0x342   :  { %v3549_v47 = vsel %vm10934_vm10, %v3453_v50, %v3437_v9  ;;  %v3553_v39 = vsel %vm10938_vm11, %v3457_v22, %v3441_v37  ;;  %v3565_v20 = vsel %vm10934_vm10, %v3485_v0, %v3469_v54  ;;  %v3569_v17 = vsel %vm10938_vm11, %v3489_v15, %v3473_v18 }
 0x343   :  { %v3581_v56 = vsel %vm10934_vm10, %v3517_v26, %v3501_v27  ;;  %v3585_v19 = vsel %vm10938_vm11, %v3521_v12, %v3505_v43  ;;  %v3597_v48 = vsel %vm10942_vm12, %v3549_v47, %v3533_v36  ;;  %v3601_v31 = vsel %vm10946_vm13, %v3553_v39, %v3537_v58 }
 0x344   :  { %v3613_v29 = vsel %vm10942_vm12, %v3581_v56, %v3565_v20  ;;  %v3617_v51 = vsel %vm10946_vm13, %v3585_v19, %v3569_v17  ;;  %v3274_v10 = vand.u32 1, %v10920_v41  ;;  %v3278_v28 = vand.u32 1, %v10923_v32 }
 0x345   :  { %v3629_v53 = vsel %vm10950_vm14, %v3613_v29, %v3597_v48  ;;  %v3633_v63 = vsel %vm10963_vm15, %v3617_v51, %v3601_v31  ;;  %v3306_v60 = vand.u32 2, %v10920_v41  ;;  %v3310_v44 = vand.u32 2, %v10923_v32 }
 0x346   :  { %v3667_v25 = vmul.f32 %v10605_v8, %v3629_v53  ;;  %v3671_v50 = vmul.f32 %v10605_v8, %v3633_v63  ;;  %vm11040_vm0 = vcmp.ne.s32.totalorder %v3274_v10, 0  ;;  %vm11044_vm1 = vcmp.ne.s32.totalorder %v3278_v28, 0 }
 0x347   :  { %vm11048_vm2 = vcmp.ne.s32.totalorder %v3306_v60, 0  ;;  %vm11052_vm3 = vcmp.ne.s32.totalorder %v3310_v44, 0  ;;  %v3338_v34 = vand.u32 4, %v10920_v41  ;;  %v3342_v22 = vand.u32 4, %v10923_v32 }
 0x348   :  { %v3683_v9 = vpack.c.bf16 %v3671_v50, %v3667_v25  ;;  %v3370_v37 = vand.u32 8, %v10920_v41  ;;  %v3374_v54 = vand.u32 8, %v10923_v32  ;;  %v3402_v36 = vsel %vm11040_vm0, -0.6961928, %v4137_v35 }
 0x349   :  { %vm11063_vm4 = vcmp.ne.s32.totalorder %v3338_v34, 0  ;;  %vm11067_vm5 = vcmp.ne.s32.totalorder %v3342_v22, 0  ;;  %v3406_v15 = vsel %vm11044_vm1, -0.6961928, %v4137_v35  ;;  %v3418_v41 = vsel %vm11040_vm0, -0.3949175, %v4138_v38 }
 0x34a   :  { %3887 = vmatprep.subr.bf16.mxu1 %v3683_v9  ;;  %vm11077_vm6 = vcmp.ne.s32.totalorder %v3370_v37, 0  ;;  %vm11081_vm7 = vcmp.ne.s32.totalorder %v3374_v54, 0  ;;  %v3422_v27 = vsel %vm11044_vm1, -0.3949175, %v4138_v38  ;;  %v3434_v43 = vsel %vm11040_vm0, -0.18477343, %v4139_v42 }
 0x34b   :  { %v3438_v26 = vsel %vm11044_vm1, -0.18477343, %v4139_v42  ;;  %v3450_v12 = vsel %vm11040_vm0, 0.0, %v4140_v46  ;;  %v3454_v47 = vsel %vm11044_vm1, 0.0, %v4140_v46  ;;  %v3466_v39 = vsel %vm11040_vm0, 0.1609302, %v4141_v49 }
 0x34c   :  { %v3470_v20 = vsel %vm11044_vm1, 0.1609302, %v4141_v49  ;;  %v3482_v17 = vsel %vm11040_vm0, 0.33791524, %v4142_v52  ;;  %v3486_v56 = vsel %vm11044_vm1, 0.33791524, %v4142_v52  ;;  %v3530_v19 = vsel %vm11048_vm2, %v3418_v41, %v3402_v36 }
 0x34d   :  { %v3498_v48 = vsel %vm11040_vm0, 0.562617, %v4143_v55  ;;  %v3502_v31 = vsel %vm11044_vm1, 0.562617, %v4143_v55  ;;  %v3514_v29 = vsel %vm11040_vm0, 1.0, %v4144_v59  ;;  %v3518_v51 = vsel %vm11044_vm1, 1.0, %v4144_v59 }
 0x34e   :  { %v3534_v10 = vsel %vm11052_vm3, %v3422_v27, %v3406_v15  ;;  %v3546_v28 = vsel %vm11048_vm2, %v3450_v12, %v3434_v43  ;;  %v3550_v53 = vsel %vm11052_vm3, %v3454_v47, %v3438_v26  ;;  %v3562_v63 = vsel %vm11048_vm2, %v3482_v17, %v3466_v39 }
 0x34f   :  { %v3566_v60 = vsel %vm11052_vm3, %v3486_v56, %v3470_v20  ;;  %v3578_v44 = vsel %vm11048_vm2, %v3514_v29, %v3498_v48  ;;  %v3582_v25 = vsel %vm11052_vm3, %v3518_v51, %v3502_v31  ;;  %v3594_v50 = vsel %vm11063_vm4, %v3546_v28, %v3530_v19 }
 0x350   :  { %v3598_v21 = vsel %vm11067_vm5, %v3550_v53, %v3534_v10  ;;  %v3610_v4 = vsel %vm11063_vm4, %v3578_v44, %v3562_v63  ;;  %v3614_v34 = vsel %vm11067_vm5, %v3582_v25, %v3566_v60  ;;  %v3948_v22 = vshrl.u32 %v10082_v11, 28 }
 0x351   :  { %v3626_v5 = vsel %vm11077_vm6, %v3610_v4, %v3594_v50  ;;  %v3630_v23 = vsel %vm11081_vm7, %v3614_v34, %v3598_v21  ;;  %v3952_v9 = vshrl.u32 %v10085_v24, 28  ;;  %v11155_v37 = vshrl.u32 %v10200_v33, 28 }
 0x352   :  { %v3664_v54 = vmul.f32 %v10731_v30, %v3626_v5  ;;  %v3668_v36 = vmul.f32 %v10731_v30, %v3630_v23  ;;  %v3276_v18 = vand.u32 1, %v3948_v22  ;;  %v3308_v0 = vand.u32 2, %v3948_v22 }
 0x353   :  { %v3280_v15 = vand.u32 1, %v3952_v9  ;;  %v3312_v41 = vand.u32 2, %v3952_v9  ;;  %v3340_v11 = vand.u32 4, %v3948_v22  ;;  %v3344_v27 = vand.u32 4, %v3952_v9 }
 0x354   :  { %v3680_v32 = vpack.c.bf16 %v3668_v36, %v3664_v54  ;;  %vm11159_vm8 = vcmp.ne.s32.totalorder %v3276_v18, 0  ;;  %vm11163_vm9 = vcmp.ne.s32.totalorder %v3308_v0, 0  ;;  %v3372_v33 = vand.u32 8, %v3948_v22 }
 0x355   :  { %vm11167_vm10 = vcmp.ne.s32.totalorder %v3280_v15, 0  ;;  %vm11171_vm11 = vcmp.ne.s32.totalorder %v3312_v41, 0  ;;  %vm11175_vm12 = vcmp.ne.s32.totalorder %v3340_v11, 0  ;;  %vm11179_vm13 = vcmp.ne.s32.totalorder %v3344_v27, 0 }
 0x356   :  { %3835 = vmatpush1.bf16.msra.mxu0 %v3680_v32  ;;  %v3376_v39 = vand.u32 8, %v3952_v9  ;;  %vm11183_vm14 = vcmp.ne.s32.totalorder %v3372_v33, 0  ;;  %v3404_v17 = vsel %vm11159_vm8, -0.6961928, %v4137_v35  ;;  %v3408_v56 = vsel %vm11167_vm10, -0.6961928, %v4137_v35 }
 0x357   :  { %v3420_v19 = vsel %vm11159_vm8, -0.3949175, %v4138_v38  ;;  %v3424_v48 = vsel %vm11167_vm10, -0.3949175, %v4138_v38  ;;  %v3436_v31 = vsel %vm11159_vm8, -0.18477343, %v4139_v42  ;;  %v11204_v29 = vrot.slane %v10452_v16, %v4234_v14 }
 0x358   :  { %vm11206_vm15 = vcmp.ne.s32.totalorder %v3376_v39, 0  ;;  %v3440_v10 = vsel %vm11167_vm10, -0.18477343, %v4139_v42  ;;  %v3452_v28 = vsel %vm11159_vm8, 0.0, %v4140_v46  ;;  %v3456_v53 = vsel %vm11167_vm10, 0.0, %v4140_v46 }
 0x359   :  { %v3468_v16 = vsel %vm11159_vm8, 0.1609302, %v4141_v49  ;;  %v3472_v63 = vsel %vm11167_vm10, 0.1609302, %v4141_v49  ;;  %v3484_v60 = vsel %vm11159_vm8, 0.33791524, %v4142_v52  ;;  %v3532_v44 = vsel %vm11163_vm9, %v3420_v19, %v3404_v17 }
 0x35a   :  { %v3488_v25 = vsel %vm11167_vm10, 0.33791524, %v4142_v52  ;;  %v3500_v50 = vsel %vm11159_vm8, 0.562617, %v4143_v55  ;;  %v3504_v21 = vsel %vm11167_vm10, 0.562617, %v4143_v55  ;;  %v3536_v4 = vsel %vm11171_vm11, %v3424_v48, %v3408_v56 }
 0x35b   :  { %v3516_v34 = vsel %vm11159_vm8, 1.0, %v4144_v59  ;;  %v3520_v22 = vsel %vm11167_vm10, 1.0, %v4144_v59  ;;  %v3548_v5 = vsel %vm11163_vm9, %v3452_v28, %v3436_v31  ;;  %v3552_v23 = vsel %vm11171_vm11, %v3456_v53, %v3440_v10 }
 0x35c   :  { %v3564_v9 = vsel %vm11163_vm9, %v3484_v60, %v3468_v16  ;;  %v3568_v54 = vsel %vm11171_vm11, %v3488_v25, %v3472_v63  ;;  %v3580_v36 = vsel %vm11163_vm9, %v3516_v34, %v3500_v50  ;;  %v3584_v18 = vsel %vm11171_vm11, %v3520_v22, %v3504_v21 }
 0x35d   :  { %v3596_v0 = vsel %vm11175_vm12, %v3548_v5, %v3532_v44  ;;  %v3600_v15 = vsel %vm11179_vm13, %v3552_v23, %v3536_v4  ;;  %v3612_v41 = vsel %vm11175_vm12, %v3580_v36, %v3564_v9  ;;  %v3616_v11 = vsel %vm11179_vm13, %v3584_v18, %v3568_v54 }
 0x35e   :  { %v3628_v27 = vsel %vm11183_vm14, %v3612_v41, %v3596_v0  ;;  %v3632_v32 = vsel %vm11206_vm15, %v3616_v11, %v3600_v15  ;;  %v3959_v43 = vshrl.u32 %v10203_v57, 28  ;;  %v3283_v24 = vand.u32 1, %v11155_v37 }
 0x35f   :  { %v3666_v33 = vmul.f32 %v11204_v29, %v3628_v27  ;;  %v3670_v58 = vmul.f32 %v11204_v29, %v3632_v32  ;;  %v3315_v26 = vand.u32 2, %v11155_v37  ;;  %v3347_v12 = vand.u32 4, %v11155_v37 }
 0x360   :  { %v3287_v47 = vand.u32 1, %v3959_v43  ;;  %vm11277_vm0 = vcmp.ne.s32.totalorder %v3283_v24, 0  ;;  %v3319_v20 = vand.u32 2, %v3959_v43  ;;  %v3351_v17 = vand.u32 4, %v3959_v43 }
 0x361   :  { %v3682_v56 = vpack.c.bf16 %v3670_v58, %v3666_v33  ;;  %vm11281_vm1 = vcmp.ne.s32.totalorder %v3315_v26, 0  ;;  %vm11285_vm2 = vcmp.ne.s32.totalorder %v3347_v12, 0  ;;  %v3379_v48 = vand.u32 8, %v11155_v37 }
 0x362   :  { %vm11290_vm3 = vcmp.ne.s32.totalorder %v3287_v47, 0  ;;  %vm11294_vm4 = vcmp.ne.s32.totalorder %v3319_v20, 0  ;;  %vm11298_vm5 = vcmp.ne.s32.totalorder %v3351_v17, 0  ;;  %v3383_v28 = vand.u32 8, %v3959_v43 }
 0x363   :  { %3888 = vmatpush1.bf16.msra.mxu1 %v3682_v56  ;;  %vm11302_vm6 = vcmp.ne.s32.totalorder %v3379_v48, 0  ;;  %v3411_v37 = vsel %vm11277_vm0, -0.6961928, %v4137_v35  ;;  %v3415_v16 = vsel %vm11290_vm3, -0.6961928, %v4137_v35  ;;  %v3459_v63 = vsel %vm11277_vm0, 0.0, %v4140_v46 }
 0x364   :  { %vm11315_vm7 = vcmp.ne.s32.totalorder %v3383_v28, 0  ;;  %v3427_v44 = vsel %vm11277_vm0, -0.3949175, %v4138_v38  ;;  %v3431_v25 = vsel %vm11290_vm3, -0.3949175, %v4138_v38  ;;  %v3463_v50 = vsel %vm11290_vm3, 0.0, %v4140_v46 }
 0x365   :  { %v3443_v21 = vsel %vm11277_vm0, -0.18477343, %v4139_v42  ;;  %v3447_v4 = vsel %vm11290_vm3, -0.18477343, %v4139_v42  ;;  %v3475_v34 = vsel %vm11277_vm0, 0.1609302, %v4141_v49  ;;  %v3539_v22 = vsel %vm11281_vm1, %v3427_v44, %v3411_v37 }
 0x366   :  { %v3479_v5 = vsel %vm11290_vm3, 0.1609302, %v4141_v49  ;;  %v3491_v23 = vsel %vm11277_vm0, 0.33791524, %v4142_v52  ;;  %v3495_v9 = vsel %vm11290_vm3, 0.33791524, %v4142_v52  ;;  %v3543_v54 = vsel %vm11294_vm4, %v3431_v25, %v3415_v16 }
 0x367   :  { %v3507_v36 = vsel %vm11277_vm0, 0.562617, %v4143_v55  ;;  %v3511_v18 = vsel %vm11290_vm3, 0.562617, %v4143_v55  ;;  %v3523_v0 = vsel %vm11277_vm0, 1.0, %v4144_v59  ;;  %v3527_v15 = vsel %vm11290_vm3, 1.0, %v4144_v59 }
 0x368   :  { %v3555_v41 = vsel %vm11281_vm1, %v3459_v63, %v3443_v21  ;;  %v3559_v11 = vsel %vm11294_vm4, %v3463_v50, %v3447_v4  ;;  %v3571_v27 = vsel %vm11281_vm1, %v3491_v23, %v3475_v34  ;;  %v3575_v32 = vsel %vm11294_vm4, %v3495_v9, %v3479_v5 }
 0x369   :  { %v3587_v43 = vsel %vm11281_vm1, %v3523_v0, %v3507_v36  ;;  %v3591_v24 = vsel %vm11294_vm4, %v3527_v15, %v3511_v18  ;;  %v3603_v33 = vsel %vm11285_vm2, %v3555_v41, %v3539_v22  ;;  %v3607_v58 = vsel %vm11298_vm5, %v3559_v11, %v3543_v54 }
 0x36a   :  { %v3619_v26 = vsel %vm11285_vm2, %v3587_v43, %v3571_v27  ;;  %v3623_v12 = vsel %vm11298_vm5, %v3591_v24, %v3575_v32  ;;  %v3957_v47 = vshrl.u32 %v10322_v62, 28  ;;  %v3961_v39 = vshrl.u32 %v10325_v13, 28 }
 0x36b   :  { %v3635_v20 = vsel %vm11302_vm6, %v3619_v26, %v3603_v33  ;;  %v3639_v17 = vsel %vm11315_vm7, %v3623_v12, %v3607_v58  ;;  %v11389_v56 = vshrl.u32 %v10436_v6, 28  ;;  %v11392_v57 = vshrl.u32 %v10439_v61, 28 }
 0x36c   :  { %v3673_v19 = vmul.f32 %v10491_v45, %v3635_v20  ;;  %v3677_v48 = vmul.f32 %v10491_v45, %v3639_v17  ;;  %v3285_v31 = vand.u32 1, %v3957_v47  ;;  %v3289_v62 = vand.u32 1, %v3961_v39 }
 0x36d   :  { %v3317_v51 = vand.u32 2, %v3957_v47  ;;  %v3321_v13 = vand.u32 2, %v3961_v39  ;;  %v3349_v10 = vand.u32 4, %v3957_v47  ;;  %v3353_v28 = vand.u32 4, %v3961_v39 }
 0x36e   :  { %v3685_v53 = vpack.c.bf16 %v3677_v48, %v3673_v19  ;;  %vm11396_vm8 = vcmp.ne.s32.totalorder %v3285_v31, 0  ;;  %vm11400_vm9 = vcmp.ne.s32.totalorder %v3289_v62, 0  ;;  %v3381_v61 = vand.u32 8, %v3957_v47 }
 0x36f   :  { %vm11404_vm10 = vcmp.ne.s32.totalorder %v3317_v51, 0  ;;  %vm11408_vm11 = vcmp.ne.s32.totalorder %v3321_v13, 0  ;;  %vm11412_vm12 = vcmp.ne.s32.totalorder %v3349_v10, 0  ;;  %vm11416_vm13 = vcmp.ne.s32.totalorder %v3353_v28, 0 }
 0x370   :  { %3836 = vmatprep.subr.bf16.mxu0 %v3685_v53  ;;  %v3385_v44 = vand.u32 8, %v3961_v39  ;;  %vm11420_vm14 = vcmp.ne.s32.totalorder %v3381_v61, 0  ;;  %v3413_v50 = vsel %vm11396_vm8, -0.6961928, %v4137_v35  ;;  %v3417_v21 = vsel %vm11400_vm9, -0.6961928, %v4137_v35 }
 0x371   :  { %v3429_v4 = vsel %vm11396_vm8, -0.3949175, %v4138_v38  ;;  %v3433_v34 = vsel %vm11400_vm9, -0.3949175, %v4138_v38  ;;  %v3445_v22 = vsel %vm11396_vm8, -0.18477343, %v4139_v42 }
 0x372   :  { %vm11439_vm15 = vcmp.ne.s32.totalorder %v3385_v44, 0  ;;  %v3449_v23 = vsel %vm11400_vm9, -0.18477343, %v4139_v42  ;;  %v3461_v9 = vsel %vm11396_vm8, 0.0, %v4140_v46  ;;  %v3465_v54 = vsel %vm11400_vm9, 0.0, %v4140_v46 }
 0x373   :  { %v3477_v36 = vsel %vm11396_vm8, 0.1609302, %v4141_v49  ;;  %v3481_v18 = vsel %vm11400_vm9, 0.1609302, %v4141_v49  ;;  %v3493_v0 = vsel %vm11396_vm8, 0.33791524, %v4142_v52  ;;  %v3541_v15 = vsel %vm11404_vm10, %v3429_v4, %v3413_v50 }
 0x374   :  { %v3497_v41 = vsel %vm11400_vm9, 0.33791524, %v4142_v52  ;;  %v3509_v11 = vsel %vm11396_vm8, 0.562617, %v4143_v55  ;;  %v3513_v27 = vsel %vm11400_vm9, 0.562617, %v4143_v55  ;;  %v3545_v32 = vsel %vm11408_vm11, %v3433_v34, %v3417_v21 }
 0x375   :  { %v3525_v43 = vsel %vm11396_vm8, 1.0, %v4144_v59  ;;  %v3529_v24 = vsel %vm11400_vm9, 1.0, %v4144_v59  ;;  %v3557_v33 = vsel %vm11404_vm10, %v3461_v9, %v3445_v22  ;;  %v3561_v58 = vsel %vm11408_vm11, %v3465_v54, %v3449_v23  ;;  %v3985_v34 = vld [vmem:[#allocation3 + $0x14] ss:$8 sps:$4 sm:$0xff]  }
 0x376   :  { %v3573_v26 = vsel %vm11404_vm10, %v3493_v0, %v3477_v36  ;;  %v3577_v12 = vsel %vm11408_vm11, %v3497_v41, %v3481_v18  ;;  %v3589_v47 = vsel %vm11404_vm10, %v3525_v43, %v3509_v11  ;;  %v3593_v39 = vsel %vm11408_vm11, %v3529_v24, %v3513_v27 }
 0x377   :  { %v3605_v20 = vsel %vm11412_vm12, %v3557_v33, %v3541_v15  ;;  %v3609_v17 = vsel %vm11416_vm13, %v3561_v58, %v3545_v32  ;;  %v3621_v19 = vsel %vm11412_vm12, %v3589_v47, %v3573_v26  ;;  %v3625_v48 = vsel %vm11416_vm13, %v3593_v39, %v3577_v12 }
 0x378   :  { %v3637_v31 = vsel %vm11420_vm14, %v3621_v19, %v3605_v20  ;;  %v3641_v62 = vsel %vm11439_vm15, %v3625_v48, %v3609_v17  ;;  %v3282_v51 = vand.u32 1, %v11389_v56  ;;  %v3286_v13 = vand.u32 1, %v11392_v57 }
 0x379   :  { %v3675_v10 = vmul.f32 %v10605_v8, %v3637_v31  ;;  %v3679_v28 = vmul.f32 %v10605_v8, %v3641_v62  ;;  %v3314_v53 = vand.u32 2, %v11389_v56  ;;  %v3318_v37 = vand.u32 2, %v11392_v57 }
 0x37a   :  { %vm11510_vm0 = vcmp.ne.s32.totalorder %v3282_v51, 0  ;;  %vm11514_vm1 = vcmp.ne.s32.totalorder %v3286_v13, 0  ;;  %v3346_v16 = vand.u32 4, %v11389_v56  ;;  %v3350_v45 = vand.u32 4, %v11392_v57 }
 0x37b   :  { %v3687_v63 = vpack.c.bf16 %v3679_v28, %v3675_v10  ;;  %vm11520_vm2 = vcmp.ne.s32.totalorder %v3314_v53, 0  ;;  %vm11524_vm3 = vcmp.ne.s32.totalorder %v3318_v37, 0  ;;  %v3378_v44 = vand.u32 8, %v11389_v56 }
 0x37c   :  { %vm11529_vm4 = vcmp.ne.s32.totalorder %v3346_v16, 0  ;;  %vm11533_vm5 = vcmp.ne.s32.totalorder %v3350_v45, 0  ;;  %v3382_v21 = vand.u32 8, %v11392_v57  ;;  %v3410_v4 = vsel %vm11510_vm0, -0.6961928, %v4137_v35 }
 0x37d   :  { %3889 = vmatprep.subr.bf16.mxu1 %v3687_v63  ;;  %vm11541_vm6 = vcmp.ne.s32.totalorder %v3378_v44, 0  ;;  %v3414_v56 = vsel %vm11514_vm1, -0.6961928, %v4137_v35  ;;  %v3426_v22 = vsel %vm11510_vm0, -0.3949175, %v4138_v38  ;;  %v3458_v57 = vsel %vm11510_vm0, 0.0, %v4140_v46 }
 0x37e   :  { %vm11554_vm7 = vcmp.ne.s32.totalorder %v3382_v21, 0  ;;  %v3430_v23 = vsel %vm11514_vm1, -0.3949175, %v4138_v38  ;;  %v3442_v9 = vsel %vm11510_vm0, -0.18477343, %v4139_v42  ;;  %v3462_v54 = vsel %vm11514_vm1, 0.0, %v4140_v46 }
 0x37f   :  { %v3446_v36 = vsel %vm11514_vm1, -0.18477343, %v4139_v42  ;;  %v3474_v18 = vsel %vm11510_vm0, 0.1609302, %v4141_v49  ;;  %v3478_v0 = vsel %vm11514_vm1, 0.1609302, %v4141_v49  ;;  %v3538_v15 = vsel %vm11520_vm2, %v3426_v22, %v3410_v4 }
 0x380   :  { %v3490_v41 = vsel %vm11510_vm0, 0.33791524, %v4142_v52  ;;  %v3494_v11 = vsel %vm11514_vm1, 0.33791524, %v4142_v52  ;;  %v3506_v27 = vsel %vm11510_vm0, 0.562617, %v4143_v55  ;;  %v3542_v32 = vsel %vm11524_vm3, %v3430_v23, %v3414_v56 }
 0x381   :  { %v3510_v43 = vsel %vm11514_vm1, 0.562617, %v4143_v55  ;;  %v3522_v24 = vsel %vm11510_vm0, 1.0, %v4144_v59  ;;  %v3526_v33 = vsel %vm11514_vm1, 1.0, %v4144_v59  ;;  %v3554_v58 = vsel %vm11520_vm2, %v3458_v57, %v3442_v9 }
 0x382   :  { %v3558_v26 = vsel %vm11524_vm3, %v3462_v54, %v3446_v36  ;;  %v3570_v12 = vsel %vm11520_vm2, %v3490_v41, %v3474_v18  ;;  %v3574_v47 = vsel %vm11524_vm3, %v3494_v11, %v3478_v0  ;;  %v3586_v39 = vsel %vm11520_vm2, %v3522_v24, %v3506_v27 }
 0x383   :  { %v3590_v20 = vsel %vm11524_vm3, %v3526_v33, %v3510_v43  ;;  %v3602_v17 = vsel %vm11529_vm4, %v3554_v58, %v3538_v15  ;;  %v3606_v19 = vsel %vm11533_vm5, %v3558_v26, %v3542_v32  ;;  %v3618_v48 = vsel %vm11529_vm4, %v3586_v39, %v3570_v12  ;;  %v3987_v39 = vld [vmem:[#allocation3 + $0x10] ss:$8 sps:$4 sm:$0xff]  }
 0x384   :  { %v3622_v31 = vsel %vm11533_vm5, %v3590_v20, %v3574_v47  ;;  %v3634_v62 = vsel %vm11541_vm6, %v3618_v48, %v3602_v17  ;;  %v3956_v51 = vshrl.u32 %v10560_v40, 28  ;;  %v3960_v13 = vshrl.u32 %v10563_v1, 28 }
 0x385   :  { %v3638_v10 = vsel %vm11554_vm7, %v3622_v31, %v3606_v19  ;;  %v3672_v28 = vmul.f32 %v10731_v30, %v3634_v62  ;;  %v3764_v62 = vld [vmem:[%s11761_s3] sm:$0xf]  ;;  %s4145_s3 = smov [#allocation9]  }
 0x386   :  { %v3676_v53 = vmul.f32 %v10731_v30, %v3638_v10  ;;  %v3284_v37 = vand.u32 1, %v3956_v51  ;;  %v3288_v6 = vand.u32 1, %v3960_v13  ;;  %v3316_v61 = vand.u32 2, %v3956_v51  ;;  %v3982_v30 = vld [vmem:[#allocation3] ss:$8 sps:$4 sm:$0xff]   ;;  %s3933_s30 = sshll.u32 %s4145_s3, 4  ;;  %s3934_s30 = int_to_ptr.vmem [resolvable:$true] %s3933_s30 }
 0x387   :  { %v3320_v16 = vand.u32 2, %v3960_v13  ;;  %v3348_v45 = vand.u32 4, %v3956_v51  ;;  %v3352_v63 = vand.u32 4, %v3960_v13  ;;  %v3380_v60 = vand.u32 8, %v3956_v51  ;;  %s4102_s5 = scalar_lea.vmem %s3934_s30, 2048  ;;  %p4107_p11 = scmp.lt.s32.totalorder %s3934_s30, %s3934_s30 }
 0x388   :  { %v3684_v8 = vpack.c.bf16 %v3676_v53, %v3672_v28  ;;  %vm11626_vm8 = vcmp.ne.s32.totalorder %v3284_v37, 0  ;;  %vm11630_vm9 = vcmp.ne.s32.totalorder %v3288_v6, 0  ;;  %vm11634_vm10 = vcmp.ne.s32.totalorder %v3316_v61, 0  ;;  %p4103_p10 = scmp.ne.s32.totalorder %s3934_s30, %s4102_s5  ;;  %p4108_p12 = scmp.lt.s32.totalorder %s4102_s5, %s4102_s5 }
 0x389   :  { %vm11638_vm11 = vcmp.ne.s32.totalorder %v3320_v16, 0  ;;  %vm11642_vm12 = vcmp.ne.s32.totalorder %v3348_v45, 0  ;;  %vm11646_vm13 = vcmp.ne.s32.totalorder %v3352_v63, 0  ;;  %v3384_v4 = vand.u32 8, %v3960_v13 }
 0x38a   :  { %3837 = vmatpush1.bf16.msra.mxu0 %v3684_v8  ;;  %vm11650_vm14 = vcmp.ne.s32.totalorder %v3380_v60, 0  ;;  %v3412_v22 = vsel %vm11626_vm8, -0.6961928, %v4137_v35  ;;  %v3416_v57 = vsel %vm11630_vm9, -0.6961928, %v4137_v35  ;;  %v3460_v5 = vsel %vm11626_vm8, 0.0, %v4140_v46  ;;  %p4109_p13 = por %p4108_p12, %p4107_p11 }
 0x38b   :  { %vm11663_vm15 = vcmp.ne.s32.totalorder %v3384_v4, 0  ;;  %v3428_v9 = vsel %vm11626_vm8, -0.3949175, %v4138_v38  ;;  %v3432_v54 = vsel %vm11630_vm9, -0.3949175, %v4138_v38  ;;  %v3464_v35 = vsel %vm11630_vm9, 0.0, %v4140_v46 }
 0x38c   :  { %v3444_v36 = vsel %vm11626_vm8, -0.18477343, %v4139_v42  ;;  %v3448_v18 = vsel %vm11630_vm9, -0.18477343, %v4139_v42  ;;  %v3476_v0 = vsel %vm11626_vm8, 0.1609302, %v4141_v49  ;;  %v3540_v15 = vsel %vm11634_vm10, %v3428_v9, %v3412_v22  ;;  %p4110_p0 = pnand %p4109_p13, %p4103_p10 }
 0x38d   :  { %v3480_v38 = vsel %vm11630_vm9, 0.1609302, %v4141_v49  ;;  %v3492_v46 = vsel %vm11626_vm8, 0.33791524, %v4142_v52  ;;  %v3496_v41 = vsel %vm11630_vm9, 0.33791524, %v4142_v52  ;;  %v3544_v42 = vsel %vm11638_vm11, %v3432_v54, %v3416_v57  ;;  %3839 = vmatmul.mubr.bf16.vlgmr.msra.gmra.mrb[0].mxu0 %v3982_v30 }
 0x38e   :  { %v3508_v11 = vsel %vm11626_vm8, 0.562617, %v4143_v55  ;;  %v3512_v49 = vsel %vm11630_vm9, 0.562617, %v4143_v55  ;;  %v3524_v27 = vsel %vm11626_vm8, 1.0, %v4144_v59  ;;  %v3528_v52 = vsel %vm11630_vm9, 1.0, %v4144_v59  ;;  %3848 = vmatprep.mubr.bf16.mxu0 %v3985_v34 }
 0x38f   :  { %v3556_v32 = vsel %vm11634_vm10, %v3460_v5, %v3444_v36  ;;  %v3560_v43 = vsel %vm11638_vm11, %v3464_v35, %v3448_v18  ;;  %v3572_v24 = vsel %vm11634_vm10, %v3492_v46, %v3476_v0  ;;  %v3576_v55 = vsel %vm11638_vm11, %v3496_v41, %v3480_v38 }
 0x390   :  { %v3588_v33 = vsel %vm11634_vm10, %v3524_v27, %v3508_v11  ;;  %v3592_v58 = vsel %vm11638_vm11, %v3528_v52, %v3512_v49  ;;  %v3604_v59 = vsel %vm11642_vm12, %v3556_v32, %v3540_v15  ;;  %v3608_v26 = vsel %vm11646_vm13, %v3560_v43, %v3544_v42 }
 0x391   :  { %v3620_v12 = vsel %vm11642_vm12, %v3588_v33, %v3572_v24  ;;  %v3624_v47 = vsel %vm11646_vm13, %v3592_v58, %v3576_v55  ;;  %v3769_v51 = vrot.slane %v3764_v62, %v4220_v7  ;;  %v3773_v13 = vrot.slane %v3764_v62, %v4210_v2 }
 0x392   :  { %v3636_v20 = vsel %vm11650_vm14, %v3620_v12, %v3604_v59  ;;  %v3640_v17 = vsel %vm11663_vm15, %v3624_v47, %v3608_v26  ;;  %v3777_v8 = vrot.slane %v3764_v62, %v4234_v14  ;;  %v3781_v2 = vrot.slane %v3764_v62, %v4212_v3 }
 0x393   :  { %v3674_v19 = vmul.f32 %v11204_v29, %v3636_v20  ;;  %v3678_v48 = vmul.f32 %v11204_v29, %v3640_v17 }
 0x395   :  { %v3686_v31 = vpack.c.bf16 %v3678_v48, %v3674_v19  ;;  %3849 = vmatmul.mubr.bf16.gmra.mrb[4].mxu0 %v3987_v39 }
 0x397   :  { %3890 = vmatpush1.bf16.msra.mxu1 %v3686_v31 }
 0x39a   :  { %3892 = vmatmul.mubr.bf16.vlgmr.msra.gmra.mrb[0].mxu1 %v3982_v30 }
 0x39b   :  { %3901 = vmatprep.mubr.bf16.mxu1 %v3985_v34 }
 0x3a2   :  { %3902 = vmatmul.mubr.bf16.gmra.mrb[4].mxu1 %v3987_v39 }
 0x460   :  { %v3840_v10 = vpop.f32.mrb[0].mxu0 }
 0x461   :  { %v3841_v28 = vadd.f32 %v3840_v10, %v3769_v51  ;;  %v3842_v53 = vpop.f32.mrb[1].mxu0 }
 0x462   :  { %v3843_v37 = vadd.f32 %v3842_v53, %v3773_v13  ;;  %v3844_v6 = vpop.f32.mrb[2].mxu0 }
 0x463   :  { %3912 = vst [vmem:[#allocation9] sm:$0xff] %v3841_v28  ;;  %v3845_v29 = vadd.f32 %v3844_v6, %v3769_v51  ;;  %v3846_v61 = vpop.f32.mrb[3].mxu0 }
 0x464   :  { %3913 = vst [vmem:[#allocation9 + $0x8] sm:$0xff] %v3843_v37  ;;  %v3847_v16 = vadd.f32 %v3846_v61, %v3773_v13 }
 0x465   :  { %3916 = vst [vmem:[#allocation9 + $0x20] sm:$0xff] %v3845_v29 }
 0x466   :  { %3917 = vst [vmem:[#allocation9 + $0x28] sm:$0xff] %v3847_v16 }
 0x468   :  { %v3850_v45 = vpop.f32.mrb[4].mxu0 }
 0x469   :  { %v3851_v63 = vadd.f32 %v3850_v45, %v3769_v51  ;;  %v3852_v60 = vpop.f32.mrb[5].mxu0 }
 0x46a   :  { %v3853_v7 = vadd.f32 %v3852_v60, %v3773_v13  ;;  %v3854_v44 = vpop.f32.mrb[6].mxu0 }
 0x46b   :  { %3920 = vst [vmem:[#allocation9 + $0x40] sm:$0xff] %v3851_v63  ;;  %v3855_v40 = vadd.f32 %v3854_v44, %v3769_v51  ;;  %v3856_v1 = vpop.f32.mrb[7].mxu0 }
 0x46c   :  { %3921 = vst [vmem:[#allocation9 + $0x48] sm:$0xff] %v3853_v7  ;;  %v3857_v30 = vadd.f32 %v3856_v1, %v3773_v13 }
 0x46d   :  { %v3893_v25 = vpop.f32.mrb[0].mxu1  ;;  %3924 = vst [vmem:[#allocation9 + $0x60] sm:$0xff] %v3855_v40 }
 0x46e   :  { %v3894_v50 = vadd.f32 %v3893_v25, %v3777_v8  ;;  %v3895_v21 = vpop.f32.mrb[1].mxu1  ;;  %3925 = vst [vmem:[#allocation9 + $0x68] sm:$0xff] %v3857_v30 }
 0x46f   :  { %v3896_v4 = vadd.f32 %v3895_v21, %v3781_v2  ;;  %v3897_v34 = vpop.f32.mrb[2].mxu1 }
 0x470   :  { %3914 = vst [vmem:[#allocation9 + $0x10] sm:$0xff] %v3894_v50  ;;  %v3898_v56 = vadd.f32 %v3897_v34, %v3777_v8  ;;  %v3899_v22 = vpop.f32.mrb[3].mxu1 }
 0x471   :  { %3915 = vst [vmem:[#allocation9 + $0x18] sm:$0xff] %v3896_v4  ;;  %v3900_v14 = vadd.f32 %v3899_v22, %v3781_v2 }
 0x472   :  { %3918 = vst [vmem:[#allocation9 + $0x30] sm:$0xff] %v3898_v56 }
 0x473   :  { %3919 = vst [vmem:[#allocation9 + $0x38] sm:$0xff] %v3900_v14 }
 0x475   :  { %v3903_v3 = vpop.f32.mrb[4].mxu1 }
 0x476   :  { %v3904_v57 = vadd.f32 %v3903_v3, %v3777_v8  ;;  %v3905_v5 = vpop.f32.mrb[5].mxu1 }
 0x477   :  { %v3906_v23 = vadd.f32 %v3905_v5, %v3781_v2  ;;  %v3907_v9 = vpop.f32.mrb[6].mxu1 }
 0x478   :  { %3922 = vst [vmem:[#allocation9 + $0x50] sm:$0xff] %v3904_v57  ;;  %v3908_v54 = vadd.f32 %v3907_v9, %v3777_v8  ;;  %v3909_v35 = vpop.f32.mrb[7].mxu1 }
 0x479   :  { %3923 = vst [vmem:[#allocation9 + $0x58] sm:$0xff] %v3906_v23  ;;  %v3910_v36 = vadd.f32 %v3909_v35, %v3781_v2 }
 0x47a   :  { %3926 = vst [vmem:[#allocation9 + $0x70] sm:$0xff] %v3908_v54 }
 0x47b   :  { %3927 = vst [vmem:[#allocation9 + $0x78] sm:$0xff] %v3910_v36 }
 0x47c   :  { %4113 = shalt.err (!%p4110_p0)
}
 0x47d   :  { %s4114_s8 = scalar_lea.hbm %s11762_s4, 2048 }
 0x47e   :  { %p4115_p1 = scmp.ne.s32.totalorder %s11762_s4, %s4114_s8  ;;  %p4118_p2 = scmp.lt.u32.totalorder %s4114_s8, %s11762_s4 }
 0x480   :  { %p4120_p3 = pnand %p4118_p2, %p4115_p1 }
 0x482   :  { %4123 = shalt.err (!%p4120_p3)
}
 0x483   :  { %3939 = dma.vmem_to_hbm [thread:$0]  %s3934_s30, 2048, %s11762_s4, [#allocation5], %s4131_s25, %s4131_s25, %s4132_s26  }
 0x484   :  { %4128 = dma.done.wait [#allocation5], 2048  }
 0x485   :  { %4129 = vsyncadd [#allocation5], 4294965248 }
 0x486   :  { %3943 = vsyncpa [#allocation4], 1 }
 0x487   :  { %3944 = vsyncpa [#allocation7], 1 }
 0x488   :  { %3945 = vsyncpa [#allocation5], 1 }

</bundles_post_ra>
